<compile_context>
chip_gen: v6e
topology: v6e:2x2x1
jax: 0.10.0
libtpu: 0.0.40
codegen_flags: <defaults>
</compile_context>

<pallas_src>
import jax
import jax.numpy as jnp
from jax import lax
from jax.experimental import pallas as pl
from jax.experimental.pallas import tpu as pltpu

# ----------------------------- configuration ------------------------------
BATCH = 2
CHANNELS = 3
HIDDEN = 32          # hidden_size
OUTPUT = 5           # output_size
LAYERS = 4
IMG = 84             # CNN4 assumes (3, 84, 84) inputs
BN_EPS = 1e-5

# per-layer conv-input spatial sizes: 84 -> 42 -> 21 -> 10 (-> 5 after pool 4)
LH = [84, 42, 21, 10]
WPAD = [88, 48, 24, 16]                    # padded row stride (W+2 rounded to x8)
HPAD = [h + 2 for h in LH]                 # padded height (zero top/bottom rows)
MP = [BATCH * HPAD[l] * WPAD[l] for l in range(LAYERS)]   # padded-flat rows/layer
EPAD = 8                                   # end padding (x8): shifted taps in-bounds
HC = [2, 3, 3, 5]                          # image-row chunk size per layer (divides H)
SLAB_C = 32                                # layer-1 im2col channels (27 taps, zero-padded)
FEAT = 5
FEAT_HW = FEAT * FEAT                      # 25 -> embedding = 25 * hidden


# ------------------------------ kernel helpers ------------------------------
def _bn_affine(s1, s2, g_ref, be_ref, count):
    """Training-mode BatchNorm2d (biased variance) folded into a per-channel affine.

    Single-pass E[x^2]-E[x]^2 in f32; adequate at init-scale activations (see
    review note about cancellation for large trained activations)."""
    mu = s1 / count
    var = s2 / count - mu * mu
    scale = g_ref[...] * lax.rsqrt(var + BN_EPS)       # (1, cout)
    shift = be_ref[...] - mu * scale
    return scale, shift


def _bn_relu_pool(y_ref, dst_ref, scale, shift, *, H, Wp, dst_padded, ep_dst, OWp):
    """Fused BN + ReLU + 2x2/2 max-pool.  Reads the four stride-2 operand sets
    directly from the conv-output buffer (no intermediate row-buffer bounce) and
    writes the pooled rows into the next layer's padded buffer (or fbuf)."""
    img = (H + 2) * Wp
    OH = OW = H // 2
    oimg = (OH + 2) * OWp if dst_padded else 0

    def pool_row(n, oi, carry):
        # base -> (i = 2*oi + 1, j = 1) in the padded-flat conv-output layout
        base = pl.multiple_of(n * img + (2 * oi + 1) * Wp, 8) + 1
        a0 = y_ref[pl.ds(base, OW, stride=2), :]              # row 2oi,   cols 1,3,...
        a1 = y_ref[pl.ds(base + 1, OW, stride=2), :]          # row 2oi,   cols 2,4,...
        b0 = y_ref[pl.ds(base + Wp, OW, stride=2), :]         # row 2oi+1, cols 1,3,...
        b1 = y_ref[pl.ds(base + Wp + 1, OW, stride=2), :]     # row 2oi+1, cols 2,4,...
        a0 = jnp.maximum(a0 * scale + shift, 0.0)
        a1 = jnp.maximum(a1 * scale + shift, 0.0)
        b0 = jnp.maximum(b0 * scale + shift, 0.0)
        b1 = jnp.maximum(b1 * scale + shift, 0.0)
        pooled = jnp.maximum(jnp.maximum(a0, a1), jnp.maximum(b0, b1))
        if dst_padded:   # interior of the next layer's zero-padded buffer
            d0 = pl.multiple_of(ep_dst + n * oimg + OWp + oi * OWp, 8) + 1
        else:            # last layer: dense (n, oi, oj) feature rows
            d0 = n * (OH * OW) + oi * OW
        dst_ref[pl.ds(d0, OW), :] = pooled
        return carry

    def pool_outer(n, carry):
        return lax.fori_loop(0, OH, lambda oi, cc: pool_row(n, oi, cc), carry)

    lax.fori_loop(0, BATCH, pool_outer, 0)


def _first_conv_block(slab_ref, w_ref, g_ref, be_ref, y_ref, dst_ref,
                      *, H, Wp, hc, ep_dst, OWp):
    """Layer 1: pre-im2col'd conv (one K=32 matmul per chunk) + BN + ReLU + pool.

    The im2col slab is zero at every padding position, so junk columns produce
    exact zeros and contribute nothing to the BN sums -> no masking needed."""
    W = H
    img = (H + 2) * Wp
    CH = H // hc
    rows = hc * Wp

    wmat = w_ref[...]                                   # (32, 32), hoisted

    def conv_chunk(n, c, carry):
        s1, s2 = carry
        out0 = pl.multiple_of(n * img + Wp + c * rows, 8)
        xs = slab_ref[pl.ds(out0, rows), :]             # (rows, 32) im2col rows
        acc = jnp.dot(xs, wmat, preferred_element_type=jnp.float32)
        s1 = s1 + jnp.sum(acc, axis=0, keepdims=True)
        s2 = s2 + jnp.sum(acc * acc, axis=0, keepdims=True)
        y_ref[pl.ds(out0, rows), :] = acc
        return s1, s2

    def conv_outer(n, carry):
        return lax.fori_loop(0, CH, lambda c, cc: conv_chunk(n, c, cc), carry)

    zero = jnp.zeros((1, HIDDEN), jnp.float32)
    s1, s2 = lax.fori_loop(0, BATCH, conv_outer, (zero, zero))

    scale, shift = _bn_affine(s1, s2, g_ref, be_ref, float(BATCH * H * W))
    _bn_relu_pool(y_ref, dst_ref, scale, shift, H=H, Wp=Wp,
                  dst_padded=True, ep_dst=ep_dst, OWp=OWp)


def _conv_block(xin_ref, w_ref, g_ref, be_ref, y_ref, dst_ref,
                *, H, Wp, cin, ep_in, hc, dst_padded, ep_dst, OWp):
    """Layers 2-4: conv3x3(s1,p1) as 9 shifted-slice matmuls + BN(train) + ReLU
    + maxpool2x2(s2), on padded-flat rows (row stride Wp, multiple of 8)."""
    W = H
    img = (H + 2) * Wp
    CH = H // hc
    rows = hc * Wp

    # 0/1 mask that removes the two junk columns per image row (j==0 and j==W+1)
    # from the BN sums; columns j in [W+2, Wp-1] are exact zeros already.
    r = lax.broadcasted_iota(jnp.int32, (rows, 1), 0)
    bad = (r == 0) | (r == W + 1)
    for k in range(1, hc):
        bad = bad | (r == k * Wp) | (r == k * Wp + W + 1)
    mask = jnp.where(bad, 0.0, 1.0)                     # (rows, 1) f32

    def conv_chunk(n, c, carry):
        s1, s2 = carry
        out0 = pl.multiple_of(n * img + Wp + c * rows, 8)
        base = out0 + ep_in                             # ep_in is a multiple of 8
        acc = None
        for t in range(9):
            dy, dx = divmod(t, 3)
            off = (dy - 1) * Wp + (dx - 1)              # dx==1 taps stay aligned
            xs = xin_ref[pl.ds(base + off, rows), :]    # (rows, cin)
            wt = w_ref[t * cin:(t + 1) * cin, :]        # (cin, 32)
            term = jnp.dot(xs, wt, preferred_element_type=jnp.float32)
            acc = term if acc is None else acc + term
        macc = acc * mask
        s1 = s1 + jnp.sum(macc, axis=0, keepdims=True)
        s2 = s2 + jnp.sum(macc * acc, axis=0, keepdims=True)
        y_ref[pl.ds(out0, rows), :] = acc
        return s1, s2

    def conv_outer(n, carry):
        return lax.fori_loop(0, CH, lambda c, cc: conv_chunk(n, c, cc), carry)

    zero = jnp.zeros((1, HIDDEN), jnp.float32)
    s1, s2 = lax.fori_loop(0, BATCH, conv_outer, (zero, zero))

    scale, shift = _bn_affine(s1, s2, g_ref, be_ref, float(BATCH * H * W))
    _bn_relu_pool(y_ref, dst_ref, scale, shift, H=H, Wp=Wp,
                  dst_padded=dst_padded, ep_dst=ep_dst, OWp=OWp)


# ------------------------------ kernel body --------------------------------
def _cnn4_kernel(slab, w1, g1, be1, w2, g2, be2, w3, g3, be3, w4, g4, be4,
                 wh, bh, o_ref,
                 x2, x3, x4, ybuf, fbuf):
    # Zero the padded activation buffers: their zero border rows/columns
    # implement the conv padding=1, and the end padding keeps shifted slices
    # in-bounds.  (Interiors are overwritten; full memset is cheap and simple.)
    x2[...] = jnp.zeros(x2.shape, jnp.float32)
    x3[...] = jnp.zeros(x3.shape, jnp.float32)
    x4[...] = jnp.zeros(x4.shape, jnp.float32)

    _first_conv_block(slab, w1, g1, be1, ybuf, x2,
                      H=LH[0], Wp=WPAD[0], hc=HC[0], ep_dst=EPAD, OWp=WPAD[1])
    _conv_block(x2, w2, g2, be2, ybuf, x3, H=LH[1], Wp=WPAD[1], cin=HIDDEN,
                ep_in=EPAD, hc=HC[1], dst_padded=True, ep_dst=EPAD, OWp=WPAD[2])
    _conv_block(x3, w3, g3, be3, ybuf, x4, H=LH[2], Wp=WPAD[2], cin=HIDDEN,
                ep_in=EPAD, hc=HC[2], dst_padded=True, ep_dst=EPAD, OWp=WPAD[3])
    _conv_block(x4, w4, g4, be4, ybuf, fbuf, H=LH[3], Wp=WPAD[3], cin=HIDDEN,
                ep_in=EPAD, hc=HC[3], dst_padded=False, ep_dst=0, OWp=0)

    # Classifier head: torch NCHW flatten of the (N, 5, 5, hidden) features,
    # done as 25 per-position (N, hidden) x (hidden, O) matmuls (tiny epilogue).
    logits = None
    for p in range(FEAT_HW):
        frow = fbuf[pl.ds(p, BATCH, stride=FEAT_HW), :]          # (N, hidden)
        blk = wh[p * HIDDEN:(p + 1) * HIDDEN, :]                 # (hidden, O)
        term = jnp.dot(frow, blk, preferred_element_type=jnp.float32)
        logits = term if logits is None else logits + term
    o_ref[...] = logits + bh[...]


# ------------------------------- wrapper ------------------------------------
@jax.jit
def cnn4_forward(x, conv_params, head_params):
    assert x.shape == (BATCH, CHANNELS, IMG, IMG)
    # Layer-1 im2col slab built with XLA: for every valid output position the
    # 27 tap-values (dy, dx, c) are laid out on lanes (zero-padded to 32), and
    # the spatial grid is embedded into the zero-padded flattened layout with
    # row stride WPAD[0] = 88 (multiple of 8).
    xh = jnp.transpose(x.astype(jnp.float32), (0, 2, 3, 1))        # NHWC
    xp = jnp.pad(xh, ((0, 0), (1, 1), (1, 1), (0, 0)))             # (B, 86, 86, 3)
    taps = [xp[:, dy:dy + IMG, dx:dx + IMG, :]
            for dy in range(3) for dx in range(3)]
    patches = jnp.concatenate(taps, axis=-1)                       # (B, 84, 84, 27)
    patches = jnp.pad(patches, ((0, 0), (1, 1), (1, WPAD[0] - 1 - IMG),
                                (0, SLAB_C - 9 * CHANNELS)))       # (B, 86, 88, 32)
    slab = patches.reshape(BATCH * HPAD[0] * WPAD[0], SLAB_C)

    (w1, g1, b1), (w2, g2, b2), (w3, g3, b3), (w4, g4, b4) = conv_params
    w1f = jnp.pad(w1.reshape(9 * CHANNELS, HIDDEN),
                  ((0, SLAB_C - 9 * CHANNELS), (0, 0)))            # (32, 32)
    args = [slab,
            w1f, g1.reshape(1, HIDDEN), b1.reshape(1, HIDDEN),
            w2.reshape(9 * HIDDEN, HIDDEN), g2.reshape(1, HIDDEN), b2.reshape(1, HIDDEN),
            w3.reshape(9 * HIDDEN, HIDDEN), g3.reshape(1, HIDDEN), b3.reshape(1, HIDDEN),
            w4.reshape(9 * HIDDEN, HIDDEN), g4.reshape(1, HIDDEN), b4.reshape(1, HIDDEN)]

    cls_w, cls_b = head_params              # cls_w: (25*hidden, O), row = c*25 + p
    # reorder to per-spatial-position blocks: row = p*hidden + c
    wh = jnp.transpose(cls_w.reshape(HIDDEN, FEAT_HW, OUTPUT), (1, 0, 2))
    wh = wh.reshape(FEAT_HW * HIDDEN, OUTPUT)
    args += [wh, cls_b.reshape(1, OUTPUT)]

    return pl.pallas_call(
        _cnn4_kernel,
        out_shape=jax.ShapeDtypeStruct((BATCH, OUTPUT), jnp.float32),
        scratch_shapes=[
            pltpu.VMEM((2 * EPAD + MP[1], HIDDEN), jnp.float32),   # layer-2 input
            pltpu.VMEM((2 * EPAD + MP[2], HIDDEN), jnp.float32),   # layer-3 input
            pltpu.VMEM((2 * EPAD + MP[3], HIDDEN), jnp.float32),   # layer-4 input
            pltpu.VMEM((MP[0], HIDDEN), jnp.float32),              # conv-out buffer
            pltpu.VMEM((BATCH * FEAT_HW, HIDDEN), jnp.float32),    # pooled features
        ],
        compiler_params=pltpu.CompilerParams(
            vmem_limit_bytes=32 * 1024 * 1024),
    )(*args)


# -------------------------- init + XLA reference ----------------------------
def init_params(key):
    """Mirror the torch module's __init__ (xavier_uniform conv/cls, BN weight
    ~U[0,1), all biases 0).  The conv bias is omitted: it is 0 and is exactly
    cancelled by training-mode BatchNorm."""
    conv = []
    cin = CHANNELS
    for _ in range(LAYERS):
        key, kw, kg = jax.random.split(key, 3)
        fan_in, fan_out = cin * 9, HIDDEN * 9
        bound = (6.0 / (fan_in + fan_out)) ** 0.5
        w = jax.random.uniform(kw, (3, 3, cin, HIDDEN), jnp.float32,
                               -bound, bound)                       # HWIO
        gamma = jax.random.uniform(kg, (HIDDEN,), jnp.float32, 0.0, 1.0)
        beta = jnp.zeros((HIDDEN,), jnp.float32)
        conv.append((w, gamma, beta))
        cin = HIDDEN
    key, kc = jax.random.split(key)
    emb = FEAT_HW * HIDDEN
    bound = (6.0 / (emb + OUTPUT)) ** 0.5
    cls_w = jax.random.uniform(kc, (emb, OUTPUT), jnp.float32, -bound, bound)
    cls_b = jnp.zeros((OUTPUT,), jnp.float32)                       # bias -> 0
    return conv, (cls_w, cls_b)


def reference_forward(x, conv_params, head_params):
    """Pure-JAX/XLA reference of the same forward pass (NCHW)."""
    h = x.astype(jnp.float32)
    for (w, g, b) in conv_params:
        y = lax.conv_general_dilated(
            h, w, window_strides=(1, 1), padding=((1, 1), (1, 1)),
            dimension_numbers=("NCHW", "HWIO", "NCHW"))
        mu = jnp.mean(y, axis=(0, 2, 3), keepdims=True)
        var = jnp.mean(jnp.square(y - mu), axis=(0, 2, 3), keepdims=True)
        y = (y - mu) * lax.rsqrt(var + BN_EPS)
        y = y * g.reshape(1, -1, 1, 1) + b.reshape(1, -1, 1, 1)
        y = jnp.maximum(y, 0.0)
        h = lax.reduce_window(y, -jnp.inf, lax.max,
                              (1, 1, 2, 2), (1, 1, 2, 2), "VALID")
    feat = h.reshape(h.shape[0], -1)                 # NCHW flatten (c, h, w)
    cls_w, cls_b = head_params
    return feat @ cls_w + cls_b


if __name__ == "__main__":
    key = jax.random.PRNGKey(0)
    key, kx = jax.random.split(key)
    x = jax.random.normal(kx, (BATCH, CHANNELS, IMG, IMG), jnp.float32)
    conv_params, head_params = init_params(key)

    out = jax.block_until_ready(cnn4_forward(x, conv_params, head_params))
    ref = jax.block_until_ready(reference_forward(x, conv_params, head_params))

    assert out.shape == (BATCH, OUTPUT), out.shape
    max_err = float(jnp.max(jnp.abs(out - ref)))
    assert jnp.allclose(out, ref, rtol=2e-2, atol=2e-2), (
        "mismatch vs reference", max_err)
    print("KERNEL_OK")
</pallas_src>

<mosaic_0001>
module attributes {stable_mosaic.version = 11 : i64} {
  func.func @_cnn4_kernel(%arg0: memref<15136x32xf32, #tpu.memory_space<vmem>>, %arg1: memref<32x32xf32, #tpu.memory_space<vmem>>, %arg2: memref<1x32xf32, #tpu.memory_space<vmem>>, %arg3: memref<1x32xf32, #tpu.memory_space<vmem>>, %arg4: memref<288x32xf32, #tpu.memory_space<vmem>>, %arg5: memref<1x32xf32, #tpu.memory_space<vmem>>, %arg6: memref<1x32xf32, #tpu.memory_space<vmem>>, %arg7: memref<288x32xf32, #tpu.memory_space<vmem>>, %arg8: memref<1x32xf32, #tpu.memory_space<vmem>>, %arg9: memref<1x32xf32, #tpu.memory_space<vmem>>, %arg10: memref<288x32xf32, #tpu.memory_space<vmem>>, %arg11: memref<1x32xf32, #tpu.memory_space<vmem>>, %arg12: memref<1x32xf32, #tpu.memory_space<vmem>>, %arg13: memref<800x5xf32, #tpu.memory_space<vmem>>, %arg14: memref<1x5xf32, #tpu.memory_space<vmem>>, %arg15: memref<2x5xf32, #tpu.memory_space<vmem>>, %arg16: memref<4240x32xf32, #tpu.memory_space<vmem>>, %arg17: memref<1120x32xf32, #tpu.memory_space<vmem>>, %arg18: memref<400x32xf32, #tpu.memory_space<vmem>>, %arg19: memref<15136x32xf32, #tpu.memory_space<vmem>>, %arg20: memref<50x32xf32, #tpu.memory_space<vmem>>) attributes {dimension_semantics = [], scalar_prefetch = 0 : i64, scratch_operands = 5 : i64, tpu.core_type = #tpu.core_type<tc>} {
    %cst = arith.constant 0.000000e+00 : f32
    %0 = vector.broadcast %cst : f32 to vector<4240x32xf32>
    %c0 = arith.constant 0 : index
    %c0_0 = arith.constant 0 : index
    %1 = vector.load %arg16[%c0, %c0_0] : memref<4240x32xf32, #tpu.memory_space<vmem>>, vector<4240x32xf32>
    tpu.vector_store %arg16[%c0, %c0_0], %0 {strides = array<i32>} : memref<4240x32xf32, #tpu.memory_space<vmem>>, vector<4240x32xf32>,
    %cst_1 = arith.constant 0.000000e+00 : f32
    %2 = vector.broadcast %cst_1 : f32 to vector<1120x32xf32>
    %c0_2 = arith.constant 0 : index
    %c0_3 = arith.constant 0 : index
    %3 = vector.load %arg17[%c0_2, %c0_3] : memref<1120x32xf32, #tpu.memory_space<vmem>>, vector<1120x32xf32>
    tpu.vector_store %arg17[%c0_2, %c0_3], %2 {strides = array<i32>} : memref<1120x32xf32, #tpu.memory_space<vmem>>, vector<1120x32xf32>,
    %cst_4 = arith.constant 0.000000e+00 : f32
    %4 = vector.broadcast %cst_4 : f32 to vector<400x32xf32>
    %c0_5 = arith.constant 0 : index
    %c0_6 = arith.constant 0 : index
    %5 = vector.load %arg18[%c0_5, %c0_6] : memref<400x32xf32, #tpu.memory_space<vmem>>, vector<400x32xf32>
    tpu.vector_store %arg18[%c0_5, %c0_6], %4 {strides = array<i32>} : memref<400x32xf32, #tpu.memory_space<vmem>>, vector<400x32xf32>,
    %c0_7 = arith.constant 0 : index
    %c0_8 = arith.constant 0 : index
    %6 = vector.load %arg1[%c0_7, %c0_8] : memref<32x32xf32, #tpu.memory_space<vmem>>, vector<32x32xf32>
    %cst_9 = arith.constant 0.000000e+00 : f32
    %7 = vector.broadcast %cst_9 : f32 to vector<1x32xf32>
    %c0_i32 = arith.constant 0 : i32
    %c2_i32 = arith.constant 2 : i32
    %8 = arith.addi %c0_i32, %c2_i32 : i32
    %c1_i32 = arith.constant 1 : i32
    %9:2 = scf.for %arg21 = %c0_i32 to %8 step %c1_i32 iter_args(%arg22 = %7, %arg23 = %7) -> (vector<1x32xf32>, vector<1x32xf32>)  : i32 {
      %c0_i32_163 = arith.constant 0 : i32
      %c42_i32 = arith.constant 42 : i32
      %257 = arith.addi %c0_i32_163, %c42_i32 : i32
      %c1_i32_164 = arith.constant 1 : i32
      %258:2 = scf.for %arg24 = %c0_i32_163 to %257 step %c1_i32_164 iter_args(%arg25 = %arg22, %arg26 = %arg23) -> (vector<1x32xf32>, vector<1x32xf32>)  : i32 {
        %c7568_i32 = arith.constant 7568 : i32
        %259 = arith.muli %arg21, %c7568_i32 : i32
        %c88_i32 = arith.constant 88 : i32
        %260 = arith.addi %259, %c88_i32 : i32
        %c176_i32 = arith.constant 176 : i32
        %261 = arith.muli %arg24, %c176_i32 : i32
        %262 = arith.addi %260, %261 : i32
        %263 = tpu.assume_multiple %262, 8 : i32
        %264 = arith.index_cast %263 : i32 to index
        %c0_166 = arith.constant 0 : index
        %265 = vector.load %arg0[%264, %c0_166] : memref<15136x32xf32, #tpu.memory_space<vmem>>, vector<176x32xf32>
        %cst_167 = arith.constant dense<0.000000e+00> : vector<176x32xf32>
        %266 = tpu.matmul %265, %6, %cst_167 {dimension_numbers = #tpu.dot_dimension_numbers<[1], [0], [0], [1], [0, 0, 1, 1], [], []>} : vector<176x32xf32>, vector<32x32xf32>, vector<176x32xf32> -> vector<176x32xf32>
        %cst_168 = arith.constant dense<0.000000e+00> : vector<32xf32>
        %267 = vector.multi_reduction <add>, %266, %cst_168 [0] : vector<176x32xf32> to vector<32xf32>
        %268 = vector.shape_cast %267 : vector<32xf32> to vector<1x32xf32>
        %269 = arith.addf %arg25, %268 : vector<1x32xf32>
        %270 = arith.mulf %266, %266 : vector<176x32xf32>
        %cst_169 = arith.constant dense<0.000000e+00> : vector<32xf32>
        %271 = vector.multi_reduction <add>, %270, %cst_169 [0] : vector<176x32xf32> to vector<32xf32>
        %272 = vector.shape_cast %271 : vector<32xf32> to vector<1x32xf32>
        %273 = arith.addf %arg26, %272 : vector<1x32xf32>
        %274 = arith.index_cast %263 : i32 to index
        %c0_170 = arith.constant 0 : index
        %275 = vector.load %arg19[%274, %c0_170] : memref<15136x32xf32, #tpu.memory_space<vmem>>, vector<176x32xf32>
        tpu.vector_store %arg19[%274, %c0_170], %266 {strides = array<i32>} : memref<15136x32xf32, #tpu.memory_space<vmem>>, vector<176x32xf32>,
        scf.yield %269, %273 : vector<1x32xf32>, vector<1x32xf32>
      }
      %c42_i32_165 = arith.constant 42 : i32
      scf.yield %258#0, %258#1 : vector<1x32xf32>, vector<1x32xf32>
    }
    %c2_i32_10 = arith.constant 2 : i32
    %cst_11 = arith.constant 1.411200e+04 : f32
    %10 = vector.broadcast %cst_11 : f32 to vector<1x32xf32>
    %11 = arith.divf %9#0, %10 : vector<1x32xf32>
    %cst_12 = arith.constant 1.411200e+04 : f32
    %12 = vector.broadcast %cst_12 : f32 to vector<1x32xf32>
    %13 = arith.divf %9#1, %12 : vector<1x32xf32>
    %14 = arith.mulf %11, %11 : vector<1x32xf32>
    %15 = arith.subf %13, %14 : vector<1x32xf32>
    %c0_13 = arith.constant 0 : index
    %c0_14 = arith.constant 0 : index
    %16 = vector.load %arg2[%c0_13, %c0_14] : memref<1x32xf32, #tpu.memory_space<vmem>>, vector<1x32xf32>
    %cst_15 = arith.constant 9.99999974E-6 : f32
    %17 = vector.broadcast %cst_15 : f32 to vector<1x32xf32>
    %18 = arith.addf %15, %17 : vector<1x32xf32>
    %19 = math.rsqrt %18 : vector<1x32xf32>
    %20 = arith.mulf %16, %19 : vector<1x32xf32>
    %c0_16 = arith.constant 0 : index
    %c0_17 = arith.constant 0 : index
    %21 = vector.load %arg3[%c0_16, %c0_17] : memref<1x32xf32, #tpu.memory_space<vmem>>, vector<1x32xf32>
    %22 = arith.mulf %11, %20 : vector<1x32xf32>
    %23 = arith.subf %21, %22 : vector<1x32xf32>
    %c0_i32_18 = arith.constant 0 : i32
    %c2_i32_19 = arith.constant 2 : i32
    %24 = arith.addi %c0_i32_18, %c2_i32_19 : i32
    %c1_i32_20 = arith.constant 1 : i32
    scf.for %arg21 = %c0_i32_18 to %24 step %c1_i32_20  : i32 {
      %c0_i32_163 = arith.constant 0 : i32
      %c42_i32 = arith.constant 42 : i32
      %257 = arith.addi %c0_i32_163, %c42_i32 : i32
      %c1_i32_164 = arith.constant 1 : i32
      scf.for %arg22 = %c0_i32_163 to %257 step %c1_i32_164  : i32 {
        %c7568_i32 = arith.constant 7568 : i32
        %258 = arith.muli %arg21, %c7568_i32 : i32
        %c2_i32_166 = arith.constant 2 : i32
        %259 = arith.muli %c2_i32_166, %arg22 : i32
        %c1_i32_167 = arith.constant 1 : i32
        %260 = arith.addi %259, %c1_i32_167 : i32
        %c88_i32 = arith.constant 88 : i32
        %261 = arith.muli %260, %c88_i32 : i32
        %262 = arith.addi %258, %261 : i32
        %263 = tpu.assume_multiple %262, 8 : i32
        %c1_i32_168 = arith.constant 1 : i32
        %264 = arith.addi %263, %c1_i32_168 : i32
        %265 = arith.index_cast %264 : i32 to index
        %c0_169 = arith.constant 0 : index
        %266 = tpu.strided_load %arg19[%265, %c0_169] {strides = array<i32: 2, 1>} : memref<15136x32xf32, #tpu.memory_space<vmem>>, vector<42x32xf32>
        %c1_i32_170 = arith.constant 1 : i32
        %267 = arith.addi %264, %c1_i32_170 : i32
        %268 = arith.index_cast %267 : i32 to index
        %c0_171 = arith.constant 0 : index
        %269 = tpu.strided_load %arg19[%268, %c0_171] {strides = array<i32: 2, 1>} : memref<15136x32xf32, #tpu.memory_space<vmem>>, vector<42x32xf32>
        %c88_i32_172 = arith.constant 88 : i32
        %270 = arith.addi %264, %c88_i32_172 : i32
        %271 = arith.index_cast %270 : i32 to index
        %c0_173 = arith.constant 0 : index
        %272 = tpu.strided_load %arg19[%271, %c0_173] {strides = array<i32: 2, 1>} : memref<15136x32xf32, #tpu.memory_space<vmem>>, vector<42x32xf32>
        %c88_i32_174 = arith.constant 88 : i32
        %273 = arith.addi %264, %c88_i32_174 : i32
        %c1_i32_175 = arith.constant 1 : i32
        %274 = arith.addi %273, %c1_i32_175 : i32
        %275 = arith.index_cast %274 : i32 to index
        %c0_176 = arith.constant 0 : index
        %276 = tpu.strided_load %arg19[%275, %c0_176] {strides = array<i32: 2, 1>} : memref<15136x32xf32, #tpu.memory_space<vmem>>, vector<42x32xf32>
        %277 = vector.broadcast %20 : vector<1x32xf32> to vector<42x32xf32>
        %278 = arith.mulf %266, %277 : vector<42x32xf32>
        %279 = vector.broadcast %23 : vector<1x32xf32> to vector<42x32xf32>
        %280 = arith.addf %278, %279 : vector<42x32xf32>
        %cst_177 = arith.constant 0.000000e+00 : f32
        %281 = vector.broadcast %cst_177 : f32 to vector<42x32xf32>
        %282 = arith.maximumf %280, %281 : vector<42x32xf32>
        %283 = vector.broadcast %20 : vector<1x32xf32> to vector<42x32xf32>
        %284 = arith.mulf %269, %283 : vector<42x32xf32>
        %285 = vector.broadcast %23 : vector<1x32xf32> to vector<42x32xf32>
        %286 = arith.addf %284, %285 : vector<42x32xf32>
        %cst_178 = arith.constant 0.000000e+00 : f32
        %287 = vector.broadcast %cst_178 : f32 to vector<42x32xf32>
        %288 = arith.maximumf %286, %287 : vector<42x32xf32>
        %289 = vector.broadcast %20 : vector<1x32xf32> to vector<42x32xf32>
        %290 = arith.mulf %272, %289 : vector<42x32xf32>
        %291 = vector.broadcast %23 : vector<1x32xf32> to vector<42x32xf32>
        %292 = arith.addf %290, %291 : vector<42x32xf32>
        %cst_179 = arith.constant 0.000000e+00 : f32
        %293 = vector.broadcast %cst_179 : f32 to vector<42x32xf32>
        %294 = arith.maximumf %292, %293 : vector<42x32xf32>
        %295 = vector.broadcast %20 : vector<1x32xf32> to vector<42x32xf32>
        %296 = arith.mulf %276, %295 : vector<42x32xf32>
        %297 = vector.broadcast %23 : vector<1x32xf32> to vector<42x32xf32>
        %298 = arith.addf %296, %297 : vector<42x32xf32>
        %cst_180 = arith.constant 0.000000e+00 : f32
        %299 = vector.broadcast %cst_180 : f32 to vector<42x32xf32>
        %300 = arith.maximumf %298, %299 : vector<42x32xf32>
        %301 = arith.maximumf %282, %288 : vector<42x32xf32>
        %302 = arith.maximumf %294, %300 : vector<42x32xf32>
        %303 = arith.maximumf %301, %302 : vector<42x32xf32>
        %c2112_i32 = arith.constant 2112 : i32
        %304 = arith.muli %arg21, %c2112_i32 : i32
        %c8_i32 = arith.constant 8 : i32
        %305 = arith.addi %c8_i32, %304 : i32
        %c48_i32_181 = arith.constant 48 : i32
        %306 = arith.addi %305, %c48_i32_181 : i32
        %c48_i32_182 = arith.constant 48 : i32
        %307 = arith.muli %arg22, %c48_i32_182 : i32
        %308 = arith.addi %306, %307 : i32
        %309 = tpu.assume_multiple %308, 8 : i32
        %c1_i32_183 = arith.constant 1 : i32
        %310 = arith.addi %309, %c1_i32_183 : i32
        %311 = arith.index_cast %310 : i32 to index
        %c0_184 = arith.constant 0 : index
        %312 = vector.load %arg16[%311, %c0_184] : memref<4240x32xf32, #tpu.memory_space<vmem>>, vector<42x32xf32>
        tpu.vector_store %arg16[%311, %c0_184], %303 {strides = array<i32>} : memref<4240x32xf32, #tpu.memory_space<vmem>>, vector<42x32xf32>,
      }
      %c42_i32_165 = arith.constant 42 : i32
    }
    %c2_i32_21 = arith.constant 2 : i32
    %25 = tpu.iota {dimensions = array<i32: 0>} : vector<144x1xi32>
    %c0_i32_22 = arith.constant 0 : i32
    %26 = vector.broadcast %c0_i32_22 : i32 to vector<144x1xi32>
    %27 = arith.cmpi eq, %25, %26 : vector<144x1xi32>
    %c43_i32 = arith.constant 43 : i32
    %28 = vector.broadcast %c43_i32 : i32 to vector<144x1xi32>
    %29 = arith.cmpi eq, %25, %28 : vector<144x1xi32>
    %30 = arith.ori %27, %29 : vector<144x1xi1>
    %c48_i32 = arith.constant 48 : i32
    %31 = vector.broadcast %c48_i32 : i32 to vector<144x1xi32>
    %32 = arith.cmpi eq, %25, %31 : vector<144x1xi32>
    %33 = arith.ori %30, %32 : vector<144x1xi1>
    %c91_i32 = arith.constant 91 : i32
    %34 = vector.broadcast %c91_i32 : i32 to vector<144x1xi32>
    %35 = arith.cmpi eq, %25, %34 : vector<144x1xi32>
    %36 = arith.ori %33, %35 : vector<144x1xi1>
    %c96_i32 = arith.constant 96 : i32
    %37 = vector.broadcast %c96_i32 : i32 to vector<144x1xi32>
    %38 = arith.cmpi eq, %25, %37 : vector<144x1xi32>
    %39 = arith.ori %36, %38 : vector<144x1xi1>
    %c139_i32 = arith.constant 139 : i32
    %40 = vector.broadcast %c139_i32 : i32 to vector<144x1xi32>
    %41 = arith.cmpi eq, %25, %40 : vector<144x1xi32>
    %42 = arith.ori %39, %41 : vector<144x1xi1>
    %cst_23 = arith.constant 0.000000e+00 : f32
    %cst_24 = arith.constant 1.000000e+00 : f32
    %43 = vector.broadcast %cst_23 : f32 to vector<144x1xf32>
    %44 = vector.broadcast %cst_24 : f32 to vector<144x1xf32>
    %45 = arith.select %42, %43, %44 : vector<144x1xi1>, vector<144x1xf32>
    %cst_25 = arith.constant 0.000000e+00 : f32
    %46 = vector.broadcast %cst_25 : f32 to vector<1x32xf32>
    %c0_i32_26 = arith.constant 0 : i32
    %c2_i32_27 = arith.constant 2 : i32
    %47 = arith.addi %c0_i32_26, %c2_i32_27 : i32
    %c1_i32_28 = arith.constant 1 : i32
    %48:2 = scf.for %arg21 = %c0_i32_26 to %47 step %c1_i32_28 iter_args(%arg22 = %46, %arg23 = %46) -> (vector<1x32xf32>, vector<1x32xf32>)  : i32 {
      %c0_i32_163 = arith.constant 0 : i32
      %c14_i32 = arith.constant 14 : i32
      %257 = arith.addi %c0_i32_163, %c14_i32 : i32
      %c1_i32_164 = arith.constant 1 : i32
      %258:2 = scf.for %arg24 = %c0_i32_163 to %257 step %c1_i32_164 iter_args(%arg25 = %arg22, %arg26 = %arg23) -> (vector<1x32xf32>, vector<1x32xf32>)  : i32 {
        %c2112_i32 = arith.constant 2112 : i32
        %259 = arith.muli %arg21, %c2112_i32 : i32
        %c48_i32_166 = arith.constant 48 : i32
        %260 = arith.addi %259, %c48_i32_166 : i32
        %c144_i32 = arith.constant 144 : i32
        %261 = arith.muli %arg24, %c144_i32 : i32
        %262 = arith.addi %260, %261 : i32
        %263 = tpu.assume_multiple %262, 8 : i32
        %c8_i32 = arith.constant 8 : i32
        %264 = arith.addi %263, %c8_i32 : i32
        %c-49_i32 = arith.constant -49 : i32
        %265 = arith.addi %264, %c-49_i32 : i32
        %266 = arith.index_cast %265 : i32 to index
        %c0_167 = arith.constant 0 : index
        %267 = vector.load %arg16[%266, %c0_167] : memref<4240x32xf32, #tpu.memory_space<vmem>>, vector<144x32xf32>
        %c0_168 = arith.constant 0 : index
        %c0_169 = arith.constant 0 : index
        %268 = vector.load %arg4[%c0_168, %c0_169] : memref<288x32xf32, #tpu.memory_space<vmem>>, vector<32x32xf32>
        %cst_170 = arith.constant dense<0.000000e+00> : vector<144x32xf32>
        %269 = tpu.matmul %267, %268, %cst_170 {dimension_numbers = #tpu.dot_dimension_numbers<[1], [0], [0], [1], [0, 0, 1, 1], [], []>} : vector<144x32xf32>, vector<32x32xf32>, vector<144x32xf32> -> vector<144x32xf32>
        %c-48_i32 = arith.constant -48 : i32
        %270 = arith.addi %264, %c-48_i32 : i32
        %271 = arith.index_cast %270 : i32 to index
        %c0_171 = arith.constant 0 : index
        %272 = vector.load %arg16[%271, %c0_171] : memref<4240x32xf32, #tpu.memory_space<vmem>>, vector<144x32xf32>
        %c32_172 = arith.constant 32 : index
        %c0_173 = arith.constant 0 : index
        %273 = vector.load %arg4[%c32_172, %c0_173] : memref<288x32xf32, #tpu.memory_space<vmem>>, vector<32x32xf32>
        %cst_174 = arith.constant dense<0.000000e+00> : vector<144x32xf32>
        %274 = tpu.matmul %272, %273, %cst_174 {dimension_numbers = #tpu.dot_dimension_numbers<[1], [0], [0], [1], [0, 0, 1, 1], [], []>} : vector<144x32xf32>, vector<32x32xf32>, vector<144x32xf32> -> vector<144x32xf32>
        %275 = arith.addf %269, %274 : vector<144x32xf32>
        %c-47_i32 = arith.constant -47 : i32
        %276 = arith.addi %264, %c-47_i32 : i32
        %277 = arith.index_cast %276 : i32 to index
        %c0_175 = arith.constant 0 : index
        %278 = vector.load %arg16[%277, %c0_175] : memref<4240x32xf32, #tpu.memory_space<vmem>>, vector<144x32xf32>
        %c64_176 = arith.constant 64 : index
        %c0_177 = arith.constant 0 : index
        %279 = vector.load %arg4[%c64_176, %c0_177] : memref<288x32xf32, #tpu.memory_space<vmem>>, vector<32x32xf32>
        %cst_178 = arith.constant dense<0.000000e+00> : vector<144x32xf32>
        %280 = tpu.matmul %278, %279, %cst_178 {dimension_numbers = #tpu.dot_dimension_numbers<[1], [0], [0], [1], [0, 0, 1, 1], [], []>} : vector<144x32xf32>, vector<32x32xf32>, vector<144x32xf32> -> vector<144x32xf32>
        %281 = arith.addf %275, %280 : vector<144x32xf32>
        %c-1_i32 = arith.constant -1 : i32
        %282 = arith.addi %264, %c-1_i32 : i32
        %283 = arith.index_cast %282 : i32 to index
        %c0_179 = arith.constant 0 : index
        %284 = vector.load %arg16[%283, %c0_179] : memref<4240x32xf32, #tpu.memory_space<vmem>>, vector<144x32xf32>
        %c96_180 = arith.constant 96 : index
        %c0_181 = arith.constant 0 : index
        %285 = vector.load %arg4[%c96_180, %c0_181] : memref<288x32xf32, #tpu.memory_space<vmem>>, vector<32x32xf32>
        %cst_182 = arith.constant dense<0.000000e+00> : vector<144x32xf32>
        %286 = tpu.matmul %284, %285, %cst_182 {dimension_numbers = #tpu.dot_dimension_numbers<[1], [0], [0], [1], [0, 0, 1, 1], [], []>} : vector<144x32xf32>, vector<32x32xf32>, vector<144x32xf32> -> vector<144x32xf32>
        %287 = arith.addf %281, %286 : vector<144x32xf32>
        %c0_i32_183 = arith.constant 0 : i32
        %288 = arith.addi %264, %c0_i32_183 : i32
        %289 = arith.index_cast %288 : i32 to index
        %c0_184 = arith.constant 0 : index
        %290 = vector.load %arg16[%289, %c0_184] : memref<4240x32xf32, #tpu.memory_space<vmem>>, vector<144x32xf32>
        %c128_185 = arith.constant 128 : index
        %c0_186 = arith.constant 0 : index
        %291 = vector.load %arg4[%c128_185, %c0_186] : memref<288x32xf32, #tpu.memory_space<vmem>>, vector<32x32xf32>
        %cst_187 = arith.constant dense<0.000000e+00> : vector<144x32xf32>
        %292 = tpu.matmul %290, %291, %cst_187 {dimension_numbers = #tpu.dot_dimension_numbers<[1], [0], [0], [1], [0, 0, 1, 1], [], []>} : vector<144x32xf32>, vector<32x32xf32>, vector<144x32xf32> -> vector<144x32xf32>
        %293 = arith.addf %287, %292 : vector<144x32xf32>
        %c1_i32_188 = arith.constant 1 : i32
        %294 = arith.addi %264, %c1_i32_188 : i32
        %295 = arith.index_cast %294 : i32 to index
        %c0_189 = arith.constant 0 : index
        %296 = vector.load %arg16[%295, %c0_189] : memref<4240x32xf32, #tpu.memory_space<vmem>>, vector<144x32xf32>
        %c160_190 = arith.constant 160 : index
        %c0_191 = arith.constant 0 : index
        %297 = vector.load %arg4[%c160_190, %c0_191] : memref<288x32xf32, #tpu.memory_space<vmem>>, vector<32x32xf32>
        %cst_192 = arith.constant dense<0.000000e+00> : vector<144x32xf32>
        %298 = tpu.matmul %296, %297, %cst_192 {dimension_numbers = #tpu.dot_dimension_numbers<[1], [0], [0], [1], [0, 0, 1, 1], [], []>} : vector<144x32xf32>, vector<32x32xf32>, vector<144x32xf32> -> vector<144x32xf32>
        %299 = arith.addf %293, %298 : vector<144x32xf32>
        %c47_i32 = arith.constant 47 : i32
        %300 = arith.addi %264, %c47_i32 : i32
        %301 = arith.index_cast %300 : i32 to index
        %c0_193 = arith.constant 0 : index
        %302 = vector.load %arg16[%301, %c0_193] : memref<4240x32xf32, #tpu.memory_space<vmem>>, vector<144x32xf32>
        %c192_194 = arith.constant 192 : index
        %c0_195 = arith.constant 0 : index
        %303 = vector.load %arg4[%c192_194, %c0_195] : memref<288x32xf32, #tpu.memory_space<vmem>>, vector<32x32xf32>
        %cst_196 = arith.constant dense<0.000000e+00> : vector<144x32xf32>
        %304 = tpu.matmul %302, %303, %cst_196 {dimension_numbers = #tpu.dot_dimension_numbers<[1], [0], [0], [1], [0, 0, 1, 1], [], []>} : vector<144x32xf32>, vector<32x32xf32>, vector<144x32xf32> -> vector<144x32xf32>
        %305 = arith.addf %299, %304 : vector<144x32xf32>
        %c48_i32_197 = arith.constant 48 : i32
        %306 = arith.addi %264, %c48_i32_197 : i32
        %307 = arith.index_cast %306 : i32 to index
        %c0_198 = arith.constant 0 : index
        %308 = vector.load %arg16[%307, %c0_198] : memref<4240x32xf32, #tpu.memory_space<vmem>>, vector<144x32xf32>
        %c224_199 = arith.constant 224 : index
        %c0_200 = arith.constant 0 : index
        %309 = vector.load %arg4[%c224_199, %c0_200] : memref<288x32xf32, #tpu.memory_space<vmem>>, vector<32x32xf32>
        %cst_201 = arith.constant dense<0.000000e+00> : vector<144x32xf32>
        %310 = tpu.matmul %308, %309, %cst_201 {dimension_numbers = #tpu.dot_dimension_numbers<[1], [0], [0], [1], [0, 0, 1, 1], [], []>} : vector<144x32xf32>, vector<32x32xf32>, vector<144x32xf32> -> vector<144x32xf32>
        %311 = arith.addf %305, %310 : vector<144x32xf32>
        %c49_i32 = arith.constant 49 : i32
        %312 = arith.addi %264, %c49_i32 : i32
        %313 = arith.index_cast %312 : i32 to index
        %c0_202 = arith.constant 0 : index
        %314 = vector.load %arg16[%313, %c0_202] : memref<4240x32xf32, #tpu.memory_space<vmem>>, vector<144x32xf32>
        %c256_203 = arith.constant 256 : index
        %c0_204 = arith.constant 0 : index
        %315 = vector.load %arg4[%c256_203, %c0_204] : memref<288x32xf32, #tpu.memory_space<vmem>>, vector<32x32xf32>
        %cst_205 = arith.constant dense<0.000000e+00> : vector<144x32xf32>
        %316 = tpu.matmul %314, %315, %cst_205 {dimension_numbers = #tpu.dot_dimension_numbers<[1], [0], [0], [1], [0, 0, 1, 1], [], []>} : vector<144x32xf32>, vector<32x32xf32>, vector<144x32xf32> -> vector<144x32xf32>
        %317 = arith.addf %311, %316 : vector<144x32xf32>
        %318 = vector.broadcast %45 : vector<144x1xf32> to vector<144x32xf32>
        %319 = arith.mulf %317, %318 : vector<144x32xf32>
        %cst_206 = arith.constant dense<0.000000e+00> : vector<32xf32>
        %320 = vector.multi_reduction <add>, %319, %cst_206 [0] : vector<144x32xf32> to vector<32xf32>
        %321 = vector.shape_cast %320 : vector<32xf32> to vector<1x32xf32>
        %322 = arith.addf %arg25, %321 : vector<1x32xf32>
        %323 = arith.mulf %319, %317 : vector<144x32xf32>
        %cst_207 = arith.constant dense<0.000000e+00> : vector<32xf32>
        %324 = vector.multi_reduction <add>, %323, %cst_207 [0] : vector<144x32xf32> to vector<32xf32>
        %325 = vector.shape_cast %324 : vector<32xf32> to vector<1x32xf32>
        %326 = arith.addf %arg26, %325 : vector<1x32xf32>
        %327 = arith.index_cast %263 : i32 to index
        %c0_208 = arith.constant 0 : index
        %328 = vector.load %arg19[%327, %c0_208] : memref<15136x32xf32, #tpu.memory_space<vmem>>, vector<144x32xf32>
        tpu.vector_store %arg19[%327, %c0_208], %317 {strides = array<i32>} : memref<15136x32xf32, #tpu.memory_space<vmem>>, vector<144x32xf32>,
        scf.yield %322, %326 : vector<1x32xf32>, vector<1x32xf32>
      }
      %c14_i32_165 = arith.constant 14 : i32
      scf.yield %258#0, %258#1 : vector<1x32xf32>, vector<1x32xf32>
    }
    %c2_i32_29 = arith.constant 2 : i32
    %cst_30 = arith.constant 3.528000e+03 : f32
    %49 = vector.broadcast %cst_30 : f32 to vector<1x32xf32>
    %50 = arith.divf %48#0, %49 : vector<1x32xf32>
    %cst_31 = arith.constant 3.528000e+03 : f32
    %51 = vector.broadcast %cst_31 : f32 to vector<1x32xf32>
    %52 = arith.divf %48#1, %51 : vector<1x32xf32>
    %53 = arith.mulf %50, %50 : vector<1x32xf32>
    %54 = arith.subf %52, %53 : vector<1x32xf32>
    %c0_32 = arith.constant 0 : index
    %c0_33 = arith.constant 0 : index
    %55 = vector.load %arg5[%c0_32, %c0_33] : memref<1x32xf32, #tpu.memory_space<vmem>>, vector<1x32xf32>
    %cst_34 = arith.constant 9.99999974E-6 : f32
    %56 = vector.broadcast %cst_34 : f32 to vector<1x32xf32>
    %57 = arith.addf %54, %56 : vector<1x32xf32>
    %58 = math.rsqrt %57 : vector<1x32xf32>
    %59 = arith.mulf %55, %58 : vector<1x32xf32>
    %c0_35 = arith.constant 0 : index
    %c0_36 = arith.constant 0 : index
    %60 = vector.load %arg6[%c0_35, %c0_36] : memref<1x32xf32, #tpu.memory_space<vmem>>, vector<1x32xf32>
    %61 = arith.mulf %50, %59 : vector<1x32xf32>
    %62 = arith.subf %60, %61 : vector<1x32xf32>
    %c0_i32_37 = arith.constant 0 : i32
    %c2_i32_38 = arith.constant 2 : i32
    %63 = arith.addi %c0_i32_37, %c2_i32_38 : i32
    %c1_i32_39 = arith.constant 1 : i32
    scf.for %arg21 = %c0_i32_37 to %63 step %c1_i32_39  : i32 {
      %c0_i32_163 = arith.constant 0 : i32
      %c21_i32 = arith.constant 21 : i32
      %257 = arith.addi %c0_i32_163, %c21_i32 : i32
      %c1_i32_164 = arith.constant 1 : i32
      scf.for %arg22 = %c0_i32_163 to %257 step %c1_i32_164  : i32 {
        %c2112_i32 = arith.constant 2112 : i32
        %258 = arith.muli %arg21, %c2112_i32 : i32
        %c2_i32_166 = arith.constant 2 : i32
        %259 = arith.muli %c2_i32_166, %arg22 : i32
        %c1_i32_167 = arith.constant 1 : i32
        %260 = arith.addi %259, %c1_i32_167 : i32
        %c48_i32_168 = arith.constant 48 : i32
        %261 = arith.muli %260, %c48_i32_168 : i32
        %262 = arith.addi %258, %261 : i32
        %263 = tpu.assume_multiple %262, 8 : i32
        %c1_i32_169 = arith.constant 1 : i32
        %264 = arith.addi %263, %c1_i32_169 : i32
        %265 = arith.index_cast %264 : i32 to index
        %c0_170 = arith.constant 0 : index
        %266 = tpu.strided_load %arg19[%265, %c0_170] {strides = array<i32: 2, 1>} : memref<15136x32xf32, #tpu.memory_space<vmem>>, vector<21x32xf32>
        %c1_i32_171 = arith.constant 1 : i32
        %267 = arith.addi %264, %c1_i32_171 : i32
        %268 = arith.index_cast %267 : i32 to index
        %c0_172 = arith.constant 0 : index
        %269 = tpu.strided_load %arg19[%268, %c0_172] {strides = array<i32: 2, 1>} : memref<15136x32xf32, #tpu.memory_space<vmem>>, vector<21x32xf32>
        %c48_i32_173 = arith.constant 48 : i32
        %270 = arith.addi %264, %c48_i32_173 : i32
        %271 = arith.index_cast %270 : i32 to index
        %c0_174 = arith.constant 0 : index
        %272 = tpu.strided_load %arg19[%271, %c0_174] {strides = array<i32: 2, 1>} : memref<15136x32xf32, #tpu.memory_space<vmem>>, vector<21x32xf32>
        %c48_i32_175 = arith.constant 48 : i32
        %273 = arith.addi %264, %c48_i32_175 : i32
        %c1_i32_176 = arith.constant 1 : i32
        %274 = arith.addi %273, %c1_i32_176 : i32
        %275 = arith.index_cast %274 : i32 to index
        %c0_177 = arith.constant 0 : index
        %276 = tpu.strided_load %arg19[%275, %c0_177] {strides = array<i32: 2, 1>} : memref<15136x32xf32, #tpu.memory_space<vmem>>, vector<21x32xf32>
        %277 = vector.broadcast %59 : vector<1x32xf32> to vector<21x32xf32>
        %278 = arith.mulf %266, %277 : vector<21x32xf32>
        %279 = vector.broadcast %62 : vector<1x32xf32> to vector<21x32xf32>
        %280 = arith.addf %278, %279 : vector<21x32xf32>
        %cst_178 = arith.constant 0.000000e+00 : f32
        %281 = vector.broadcast %cst_178 : f32 to vector<21x32xf32>
        %282 = arith.maximumf %280, %281 : vector<21x32xf32>
        %283 = vector.broadcast %59 : vector<1x32xf32> to vector<21x32xf32>
        %284 = arith.mulf %269, %283 : vector<21x32xf32>
        %285 = vector.broadcast %62 : vector<1x32xf32> to vector<21x32xf32>
        %286 = arith.addf %284, %285 : vector<21x32xf32>
        %cst_179 = arith.constant 0.000000e+00 : f32
        %287 = vector.broadcast %cst_179 : f32 to vector<21x32xf32>
        %288 = arith.maximumf %286, %287 : vector<21x32xf32>
        %289 = vector.broadcast %59 : vector<1x32xf32> to vector<21x32xf32>
        %290 = arith.mulf %272, %289 : vector<21x32xf32>
        %291 = vector.broadcast %62 : vector<1x32xf32> to vector<21x32xf32>
        %292 = arith.addf %290, %291 : vector<21x32xf32>
        %cst_180 = arith.constant 0.000000e+00 : f32
        %293 = vector.broadcast %cst_180 : f32 to vector<21x32xf32>
        %294 = arith.maximumf %292, %293 : vector<21x32xf32>
        %295 = vector.broadcast %59 : vector<1x32xf32> to vector<21x32xf32>
        %296 = arith.mulf %276, %295 : vector<21x32xf32>
        %297 = vector.broadcast %62 : vector<1x32xf32> to vector<21x32xf32>
        %298 = arith.addf %296, %297 : vector<21x32xf32>
        %cst_181 = arith.constant 0.000000e+00 : f32
        %299 = vector.broadcast %cst_181 : f32 to vector<21x32xf32>
        %300 = arith.maximumf %298, %299 : vector<21x32xf32>
        %301 = arith.maximumf %282, %288 : vector<21x32xf32>
        %302 = arith.maximumf %294, %300 : vector<21x32xf32>
        %303 = arith.maximumf %301, %302 : vector<21x32xf32>
        %c552_i32 = arith.constant 552 : i32
        %304 = arith.muli %arg21, %c552_i32 : i32
        %c8_i32 = arith.constant 8 : i32
        %305 = arith.addi %c8_i32, %304 : i32
        %c24_i32_182 = arith.constant 24 : i32
        %306 = arith.addi %305, %c24_i32_182 : i32
        %c24_i32_183 = arith.constant 24 : i32
        %307 = arith.muli %arg22, %c24_i32_183 : i32
        %308 = arith.addi %306, %307 : i32
        %309 = tpu.assume_multiple %308, 8 : i32
        %c1_i32_184 = arith.constant 1 : i32
        %310 = arith.addi %309, %c1_i32_184 : i32
        %311 = arith.index_cast %310 : i32 to index
        %c0_185 = arith.constant 0 : index
        %312 = vector.load %arg17[%311, %c0_185] : memref<1120x32xf32, #tpu.memory_space<vmem>>, vector<21x32xf32>
        tpu.vector_store %arg17[%311, %c0_185], %303 {strides = array<i32>} : memref<1120x32xf32, #tpu.memory_space<vmem>>, vector<21x32xf32>,
      }
      %c21_i32_165 = arith.constant 21 : i32
    }
    %c2_i32_40 = arith.constant 2 : i32
    %64 = tpu.iota {dimensions = array<i32: 0>} : vector<72x1xi32>
    %c0_i32_41 = arith.constant 0 : i32
    %65 = vector.broadcast %c0_i32_41 : i32 to vector<72x1xi32>
    %66 = arith.cmpi eq, %64, %65 : vector<72x1xi32>
    %c22_i32 = arith.constant 22 : i32
    %67 = vector.broadcast %c22_i32 : i32 to vector<72x1xi32>
    %68 = arith.cmpi eq, %64, %67 : vector<72x1xi32>
    %69 = arith.ori %66, %68 : vector<72x1xi1>
    %c24_i32 = arith.constant 24 : i32
    %70 = vector.broadcast %c24_i32 : i32 to vector<72x1xi32>
    %71 = arith.cmpi eq, %64, %70 : vector<72x1xi32>
    %72 = arith.ori %69, %71 : vector<72x1xi1>
    %c46_i32 = arith.constant 46 : i32
    %73 = vector.broadcast %c46_i32 : i32 to vector<72x1xi32>
    %74 = arith.cmpi eq, %64, %73 : vector<72x1xi32>
    %75 = arith.ori %72, %74 : vector<72x1xi1>
    %c48_i32_42 = arith.constant 48 : i32
    %76 = vector.broadcast %c48_i32_42 : i32 to vector<72x1xi32>
    %77 = arith.cmpi eq, %64, %76 : vector<72x1xi32>
    %78 = arith.ori %75, %77 : vector<72x1xi1>
    %c70_i32 = arith.constant 70 : i32
    %79 = vector.broadcast %c70_i32 : i32 to vector<72x1xi32>
    %80 = arith.cmpi eq, %64, %79 : vector<72x1xi32>
    %81 = arith.ori %78, %80 : vector<72x1xi1>
    %cst_43 = arith.constant 0.000000e+00 : f32
    %cst_44 = arith.constant 1.000000e+00 : f32
    %82 = vector.broadcast %cst_43 : f32 to vector<72x1xf32>
    %83 = vector.broadcast %cst_44 : f32 to vector<72x1xf32>
    %84 = arith.select %81, %82, %83 : vector<72x1xi1>, vector<72x1xf32>
    %cst_45 = arith.constant 0.000000e+00 : f32
    %85 = vector.broadcast %cst_45 : f32 to vector<1x32xf32>
    %c0_i32_46 = arith.constant 0 : i32
    %c2_i32_47 = arith.constant 2 : i32
    %86 = arith.addi %c0_i32_46, %c2_i32_47 : i32
    %c1_i32_48 = arith.constant 1 : i32
    %87:2 = scf.for %arg21 = %c0_i32_46 to %86 step %c1_i32_48 iter_args(%arg22 = %85, %arg23 = %85) -> (vector<1x32xf32>, vector<1x32xf32>)  : i32 {
      %c0_i32_163 = arith.constant 0 : i32
      %c7_i32 = arith.constant 7 : i32
      %257 = arith.addi %c0_i32_163, %c7_i32 : i32
      %c1_i32_164 = arith.constant 1 : i32
      %258:2 = scf.for %arg24 = %c0_i32_163 to %257 step %c1_i32_164 iter_args(%arg25 = %arg22, %arg26 = %arg23) -> (vector<1x32xf32>, vector<1x32xf32>)  : i32 {
        %c552_i32 = arith.constant 552 : i32
        %259 = arith.muli %arg21, %c552_i32 : i32
        %c24_i32_166 = arith.constant 24 : i32
        %260 = arith.addi %259, %c24_i32_166 : i32
        %c72_i32 = arith.constant 72 : i32
        %261 = arith.muli %arg24, %c72_i32 : i32
        %262 = arith.addi %260, %261 : i32
        %263 = tpu.assume_multiple %262, 8 : i32
        %c8_i32 = arith.constant 8 : i32
        %264 = arith.addi %263, %c8_i32 : i32
        %c-25_i32 = arith.constant -25 : i32
        %265 = arith.addi %264, %c-25_i32 : i32
        %266 = arith.index_cast %265 : i32 to index
        %c0_167 = arith.constant 0 : index
        %267 = vector.load %arg17[%266, %c0_167] : memref<1120x32xf32, #tpu.memory_space<vmem>>, vector<72x32xf32>
        %c0_168 = arith.constant 0 : index
        %c0_169 = arith.constant 0 : index
        %268 = vector.load %arg7[%c0_168, %c0_169] : memref<288x32xf32, #tpu.memory_space<vmem>>, vector<32x32xf32>
        %cst_170 = arith.constant dense<0.000000e+00> : vector<72x32xf32>
        %269 = tpu.matmul %267, %268, %cst_170 {dimension_numbers = #tpu.dot_dimension_numbers<[1], [0], [0], [1], [0, 0, 1, 1], [], []>} : vector<72x32xf32>, vector<32x32xf32>, vector<72x32xf32> -> vector<72x32xf32>
        %c-24_i32 = arith.constant -24 : i32
        %270 = arith.addi %264, %c-24_i32 : i32
        %271 = arith.index_cast %270 : i32 to index
        %c0_171 = arith.constant 0 : index
        %272 = vector.load %arg17[%271, %c0_171] : memref<1120x32xf32, #tpu.memory_space<vmem>>, vector<72x32xf32>
        %c32_172 = arith.constant 32 : index
        %c0_173 = arith.constant 0 : index
        %273 = vector.load %arg7[%c32_172, %c0_173] : memref<288x32xf32, #tpu.memory_space<vmem>>, vector<32x32xf32>
        %cst_174 = arith.constant dense<0.000000e+00> : vector<72x32xf32>
        %274 = tpu.matmul %272, %273, %cst_174 {dimension_numbers = #tpu.dot_dimension_numbers<[1], [0], [0], [1], [0, 0, 1, 1], [], []>} : vector<72x32xf32>, vector<32x32xf32>, vector<72x32xf32> -> vector<72x32xf32>
        %275 = arith.addf %269, %274 : vector<72x32xf32>
        %c-23_i32 = arith.constant -23 : i32
        %276 = arith.addi %264, %c-23_i32 : i32
        %277 = arith.index_cast %276 : i32 to index
        %c0_175 = arith.constant 0 : index
        %278 = vector.load %arg17[%277, %c0_175] : memref<1120x32xf32, #tpu.memory_space<vmem>>, vector<72x32xf32>
        %c64_176 = arith.constant 64 : index
        %c0_177 = arith.constant 0 : index
        %279 = vector.load %arg7[%c64_176, %c0_177] : memref<288x32xf32, #tpu.memory_space<vmem>>, vector<32x32xf32>
        %cst_178 = arith.constant dense<0.000000e+00> : vector<72x32xf32>
        %280 = tpu.matmul %278, %279, %cst_178 {dimension_numbers = #tpu.dot_dimension_numbers<[1], [0], [0], [1], [0, 0, 1, 1], [], []>} : vector<72x32xf32>, vector<32x32xf32>, vector<72x32xf32> -> vector<72x32xf32>
        %281 = arith.addf %275, %280 : vector<72x32xf32>
        %c-1_i32 = arith.constant -1 : i32
        %282 = arith.addi %264, %c-1_i32 : i32
        %283 = arith.index_cast %282 : i32 to index
        %c0_179 = arith.constant 0 : index
        %284 = vector.load %arg17[%283, %c0_179] : memref<1120x32xf32, #tpu.memory_space<vmem>>, vector<72x32xf32>
        %c96_180 = arith.constant 96 : index
        %c0_181 = arith.constant 0 : index
        %285 = vector.load %arg7[%c96_180, %c0_181] : memref<288x32xf32, #tpu.memory_space<vmem>>, vector<32x32xf32>
        %cst_182 = arith.constant dense<0.000000e+00> : vector<72x32xf32>
        %286 = tpu.matmul %284, %285, %cst_182 {dimension_numbers = #tpu.dot_dimension_numbers<[1], [0], [0], [1], [0, 0, 1, 1], [], []>} : vector<72x32xf32>, vector<32x32xf32>, vector<72x32xf32> -> vector<72x32xf32>
        %287 = arith.addf %281, %286 : vector<72x32xf32>
        %c0_i32_183 = arith.constant 0 : i32
        %288 = arith.addi %264, %c0_i32_183 : i32
        %289 = arith.index_cast %288 : i32 to index
        %c0_184 = arith.constant 0 : index
        %290 = vector.load %arg17[%289, %c0_184] : memref<1120x32xf32, #tpu.memory_space<vmem>>, vector<72x32xf32>
        %c128_185 = arith.constant 128 : index
        %c0_186 = arith.constant 0 : index
        %291 = vector.load %arg7[%c128_185, %c0_186] : memref<288x32xf32, #tpu.memory_space<vmem>>, vector<32x32xf32>
        %cst_187 = arith.constant dense<0.000000e+00> : vector<72x32xf32>
        %292 = tpu.matmul %290, %291, %cst_187 {dimension_numbers = #tpu.dot_dimension_numbers<[1], [0], [0], [1], [0, 0, 1, 1], [], []>} : vector<72x32xf32>, vector<32x32xf32>, vector<72x32xf32> -> vector<72x32xf32>
        %293 = arith.addf %287, %292 : vector<72x32xf32>
        %c1_i32_188 = arith.constant 1 : i32
        %294 = arith.addi %264, %c1_i32_188 : i32
        %295 = arith.index_cast %294 : i32 to index
        %c0_189 = arith.constant 0 : index
        %296 = vector.load %arg17[%295, %c0_189] : memref<1120x32xf32, #tpu.memory_space<vmem>>, vector<72x32xf32>
        %c160_190 = arith.constant 160 : index
        %c0_191 = arith.constant 0 : index
        %297 = vector.load %arg7[%c160_190, %c0_191] : memref<288x32xf32, #tpu.memory_space<vmem>>, vector<32x32xf32>
        %cst_192 = arith.constant dense<0.000000e+00> : vector<72x32xf32>
        %298 = tpu.matmul %296, %297, %cst_192 {dimension_numbers = #tpu.dot_dimension_numbers<[1], [0], [0], [1], [0, 0, 1, 1], [], []>} : vector<72x32xf32>, vector<32x32xf32>, vector<72x32xf32> -> vector<72x32xf32>
        %299 = arith.addf %293, %298 : vector<72x32xf32>
        %c23_i32 = arith.constant 23 : i32
        %300 = arith.addi %264, %c23_i32 : i32
        %301 = arith.index_cast %300 : i32 to index
        %c0_193 = arith.constant 0 : index
        %302 = vector.load %arg17[%301, %c0_193] : memref<1120x32xf32, #tpu.memory_space<vmem>>, vector<72x32xf32>
        %c192_194 = arith.constant 192 : index
        %c0_195 = arith.constant 0 : index
        %303 = vector.load %arg7[%c192_194, %c0_195] : memref<288x32xf32, #tpu.memory_space<vmem>>, vector<32x32xf32>
        %cst_196 = arith.constant dense<0.000000e+00> : vector<72x32xf32>
        %304 = tpu.matmul %302, %303, %cst_196 {dimension_numbers = #tpu.dot_dimension_numbers<[1], [0], [0], [1], [0, 0, 1, 1], [], []>} : vector<72x32xf32>, vector<32x32xf32>, vector<72x32xf32> -> vector<72x32xf32>
        %305 = arith.addf %299, %304 : vector<72x32xf32>
        %c24_i32_197 = arith.constant 24 : i32
        %306 = arith.addi %264, %c24_i32_197 : i32
        %307 = arith.index_cast %306 : i32 to index
        %c0_198 = arith.constant 0 : index
        %308 = vector.load %arg17[%307, %c0_198] : memref<1120x32xf32, #tpu.memory_space<vmem>>, vector<72x32xf32>
        %c224_199 = arith.constant 224 : index
        %c0_200 = arith.constant 0 : index
        %309 = vector.load %arg7[%c224_199, %c0_200] : memref<288x32xf32, #tpu.memory_space<vmem>>, vector<32x32xf32>
        %cst_201 = arith.constant dense<0.000000e+00> : vector<72x32xf32>
        %310 = tpu.matmul %308, %309, %cst_201 {dimension_numbers = #tpu.dot_dimension_numbers<[1], [0], [0], [1], [0, 0, 1, 1], [], []>} : vector<72x32xf32>, vector<32x32xf32>, vector<72x32xf32> -> vector<72x32xf32>
        %311 = arith.addf %305, %310 : vector<72x32xf32>
        %c25_i32 = arith.constant 25 : i32
        %312 = arith.addi %264, %c25_i32 : i32
        %313 = arith.index_cast %312 : i32 to index
        %c0_202 = arith.constant 0 : index
        %314 = vector.load %arg17[%313, %c0_202] : memref<1120x32xf32, #tpu.memory_space<vmem>>, vector<72x32xf32>
        %c256_203 = arith.constant 256 : index
        %c0_204 = arith.constant 0 : index
        %315 = vector.load %arg7[%c256_203, %c0_204] : memref<288x32xf32, #tpu.memory_space<vmem>>, vector<32x32xf32>
        %cst_205 = arith.constant dense<0.000000e+00> : vector<72x32xf32>
        %316 = tpu.matmul %314, %315, %cst_205 {dimension_numbers = #tpu.dot_dimension_numbers<[1], [0], [0], [1], [0, 0, 1, 1], [], []>} : vector<72x32xf32>, vector<32x32xf32>, vector<72x32xf32> -> vector<72x32xf32>
        %317 = arith.addf %311, %316 : vector<72x32xf32>
        %318 = vector.broadcast %84 : vector<72x1xf32> to vector<72x32xf32>
        %319 = arith.mulf %317, %318 : vector<72x32xf32>
        %cst_206 = arith.constant dense<0.000000e+00> : vector<32xf32>
        %320 = vector.multi_reduction <add>, %319, %cst_206 [0] : vector<72x32xf32> to vector<32xf32>
        %321 = vector.shape_cast %320 : vector<32xf32> to vector<1x32xf32>
        %322 = arith.addf %arg25, %321 : vector<1x32xf32>
        %323 = arith.mulf %319, %317 : vector<72x32xf32>
        %cst_207 = arith.constant dense<0.000000e+00> : vector<32xf32>
        %324 = vector.multi_reduction <add>, %323, %cst_207 [0] : vector<72x32xf32> to vector<32xf32>
        %325 = vector.shape_cast %324 : vector<32xf32> to vector<1x32xf32>
        %326 = arith.addf %arg26, %325 : vector<1x32xf32>
        %327 = arith.index_cast %263 : i32 to index
        %c0_208 = arith.constant 0 : index
        %328 = vector.load %arg19[%327, %c0_208] : memref<15136x32xf32, #tpu.memory_space<vmem>>, vector<72x32xf32>
        tpu.vector_store %arg19[%327, %c0_208], %317 {strides = array<i32>} : memref<15136x32xf32, #tpu.memory_space<vmem>>, vector<72x32xf32>,
        scf.yield %322, %326 : vector<1x32xf32>, vector<1x32xf32>
      }
      %c7_i32_165 = arith.constant 7 : i32
      scf.yield %258#0, %258#1 : vector<1x32xf32>, vector<1x32xf32>
    }
    %c2_i32_49 = arith.constant 2 : i32
    %cst_50 = arith.constant 8.820000e+02 : f32
    %88 = vector.broadcast %cst_50 : f32 to vector<1x32xf32>
    %89 = arith.divf %87#0, %88 : vector<1x32xf32>
    %cst_51 = arith.constant 8.820000e+02 : f32
    %90 = vector.broadcast %cst_51 : f32 to vector<1x32xf32>
    %91 = arith.divf %87#1, %90 : vector<1x32xf32>
    %92 = arith.mulf %89, %89 : vector<1x32xf32>
    %93 = arith.subf %91, %92 : vector<1x32xf32>
    %c0_52 = arith.constant 0 : index
    %c0_53 = arith.constant 0 : index
    %94 = vector.load %arg8[%c0_52, %c0_53] : memref<1x32xf32, #tpu.memory_space<vmem>>, vector<1x32xf32>
    %cst_54 = arith.constant 9.99999974E-6 : f32
    %95 = vector.broadcast %cst_54 : f32 to vector<1x32xf32>
    %96 = arith.addf %93, %95 : vector<1x32xf32>
    %97 = math.rsqrt %96 : vector<1x32xf32>
    %98 = arith.mulf %94, %97 : vector<1x32xf32>
    %c0_55 = arith.constant 0 : index
    %c0_56 = arith.constant 0 : index
    %99 = vector.load %arg9[%c0_55, %c0_56] : memref<1x32xf32, #tpu.memory_space<vmem>>, vector<1x32xf32>
    %100 = arith.mulf %89, %98 : vector<1x32xf32>
    %101 = arith.subf %99, %100 : vector<1x32xf32>
    %c0_i32_57 = arith.constant 0 : i32
    %c2_i32_58 = arith.constant 2 : i32
    %102 = arith.addi %c0_i32_57, %c2_i32_58 : i32
    %c1_i32_59 = arith.constant 1 : i32
    scf.for %arg21 = %c0_i32_57 to %102 step %c1_i32_59  : i32 {
      %c0_i32_163 = arith.constant 0 : i32
      %c10_i32 = arith.constant 10 : i32
      %257 = arith.addi %c0_i32_163, %c10_i32 : i32
      %c1_i32_164 = arith.constant 1 : i32
      scf.for %arg22 = %c0_i32_163 to %257 step %c1_i32_164  : i32 {
        %c552_i32 = arith.constant 552 : i32
        %258 = arith.muli %arg21, %c552_i32 : i32
        %c2_i32_166 = arith.constant 2 : i32
        %259 = arith.muli %c2_i32_166, %arg22 : i32
        %c1_i32_167 = arith.constant 1 : i32
        %260 = arith.addi %259, %c1_i32_167 : i32
        %c24_i32_168 = arith.constant 24 : i32
        %261 = arith.muli %260, %c24_i32_168 : i32
        %262 = arith.addi %258, %261 : i32
        %263 = tpu.assume_multiple %262, 8 : i32
        %c1_i32_169 = arith.constant 1 : i32
        %264 = arith.addi %263, %c1_i32_169 : i32
        %265 = arith.index_cast %264 : i32 to index
        %c0_170 = arith.constant 0 : index
        %266 = tpu.strided_load %arg19[%265, %c0_170] {strides = array<i32: 2, 1>} : memref<15136x32xf32, #tpu.memory_space<vmem>>, vector<10x32xf32>
        %c1_i32_171 = arith.constant 1 : i32
        %267 = arith.addi %264, %c1_i32_171 : i32
        %268 = arith.index_cast %267 : i32 to index
        %c0_172 = arith.constant 0 : index
        %269 = tpu.strided_load %arg19[%268, %c0_172] {strides = array<i32: 2, 1>} : memref<15136x32xf32, #tpu.memory_space<vmem>>, vector<10x32xf32>
        %c24_i32_173 = arith.constant 24 : i32
        %270 = arith.addi %264, %c24_i32_173 : i32
        %271 = arith.index_cast %270 : i32 to index
        %c0_174 = arith.constant 0 : index
        %272 = tpu.strided_load %arg19[%271, %c0_174] {strides = array<i32: 2, 1>} : memref<15136x32xf32, #tpu.memory_space<vmem>>, vector<10x32xf32>
        %c24_i32_175 = arith.constant 24 : i32
        %273 = arith.addi %264, %c24_i32_175 : i32
        %c1_i32_176 = arith.constant 1 : i32
        %274 = arith.addi %273, %c1_i32_176 : i32
        %275 = arith.index_cast %274 : i32 to index
        %c0_177 = arith.constant 0 : index
        %276 = tpu.strided_load %arg19[%275, %c0_177] {strides = array<i32: 2, 1>} : memref<15136x32xf32, #tpu.memory_space<vmem>>, vector<10x32xf32>
        %277 = vector.broadcast %98 : vector<1x32xf32> to vector<10x32xf32>
        %278 = arith.mulf %266, %277 : vector<10x32xf32>
        %279 = vector.broadcast %101 : vector<1x32xf32> to vector<10x32xf32>
        %280 = arith.addf %278, %279 : vector<10x32xf32>
        %cst_178 = arith.constant 0.000000e+00 : f32
        %281 = vector.broadcast %cst_178 : f32 to vector<10x32xf32>
        %282 = arith.maximumf %280, %281 : vector<10x32xf32>
        %283 = vector.broadcast %98 : vector<1x32xf32> to vector<10x32xf32>
        %284 = arith.mulf %269, %283 : vector<10x32xf32>
        %285 = vector.broadcast %101 : vector<1x32xf32> to vector<10x32xf32>
        %286 = arith.addf %284, %285 : vector<10x32xf32>
        %cst_179 = arith.constant 0.000000e+00 : f32
        %287 = vector.broadcast %cst_179 : f32 to vector<10x32xf32>
        %288 = arith.maximumf %286, %287 : vector<10x32xf32>
        %289 = vector.broadcast %98 : vector<1x32xf32> to vector<10x32xf32>
        %290 = arith.mulf %272, %289 : vector<10x32xf32>
        %291 = vector.broadcast %101 : vector<1x32xf32> to vector<10x32xf32>
        %292 = arith.addf %290, %291 : vector<10x32xf32>
        %cst_180 = arith.constant 0.000000e+00 : f32
        %293 = vector.broadcast %cst_180 : f32 to vector<10x32xf32>
        %294 = arith.maximumf %292, %293 : vector<10x32xf32>
        %295 = vector.broadcast %98 : vector<1x32xf32> to vector<10x32xf32>
        %296 = arith.mulf %276, %295 : vector<10x32xf32>
        %297 = vector.broadcast %101 : vector<1x32xf32> to vector<10x32xf32>
        %298 = arith.addf %296, %297 : vector<10x32xf32>
        %cst_181 = arith.constant 0.000000e+00 : f32
        %299 = vector.broadcast %cst_181 : f32 to vector<10x32xf32>
        %300 = arith.maximumf %298, %299 : vector<10x32xf32>
        %301 = arith.maximumf %282, %288 : vector<10x32xf32>
        %302 = arith.maximumf %294, %300 : vector<10x32xf32>
        %303 = arith.maximumf %301, %302 : vector<10x32xf32>
        %c192_i32 = arith.constant 192 : i32
        %304 = arith.muli %arg21, %c192_i32 : i32
        %c8_i32 = arith.constant 8 : i32
        %305 = arith.addi %c8_i32, %304 : i32
        %c16_i32_182 = arith.constant 16 : i32
        %306 = arith.addi %305, %c16_i32_182 : i32
        %c16_i32_183 = arith.constant 16 : i32
        %307 = arith.muli %arg22, %c16_i32_183 : i32
        %308 = arith.addi %306, %307 : i32
        %309 = tpu.assume_multiple %308, 8 : i32
        %c1_i32_184 = arith.constant 1 : i32
        %310 = arith.addi %309, %c1_i32_184 : i32
        %311 = arith.index_cast %310 : i32 to index
        %c0_185 = arith.constant 0 : index
        %312 = vector.load %arg18[%311, %c0_185] : memref<400x32xf32, #tpu.memory_space<vmem>>, vector<10x32xf32>
        tpu.vector_store %arg18[%311, %c0_185], %303 {strides = array<i32>} : memref<400x32xf32, #tpu.memory_space<vmem>>, vector<10x32xf32>,
      }
      %c10_i32_165 = arith.constant 10 : i32
    }
    %c2_i32_60 = arith.constant 2 : i32
    %103 = tpu.iota {dimensions = array<i32: 0>} : vector<80x1xi32>
    %c0_i32_61 = arith.constant 0 : i32
    %104 = vector.broadcast %c0_i32_61 : i32 to vector<80x1xi32>
    %105 = arith.cmpi eq, %103, %104 : vector<80x1xi32>
    %c11_i32 = arith.constant 11 : i32
    %106 = vector.broadcast %c11_i32 : i32 to vector<80x1xi32>
    %107 = arith.cmpi eq, %103, %106 : vector<80x1xi32>
    %108 = arith.ori %105, %107 : vector<80x1xi1>
    %c16_i32 = arith.constant 16 : i32
    %109 = vector.broadcast %c16_i32 : i32 to vector<80x1xi32>
    %110 = arith.cmpi eq, %103, %109 : vector<80x1xi32>
    %111 = arith.ori %108, %110 : vector<80x1xi1>
    %c27_i32 = arith.constant 27 : i32
    %112 = vector.broadcast %c27_i32 : i32 to vector<80x1xi32>
    %113 = arith.cmpi eq, %103, %112 : vector<80x1xi32>
    %114 = arith.ori %111, %113 : vector<80x1xi1>
    %c32_i32 = arith.constant 32 : i32
    %115 = vector.broadcast %c32_i32 : i32 to vector<80x1xi32>
    %116 = arith.cmpi eq, %103, %115 : vector<80x1xi32>
    %117 = arith.ori %114, %116 : vector<80x1xi1>
    %c43_i32_62 = arith.constant 43 : i32
    %118 = vector.broadcast %c43_i32_62 : i32 to vector<80x1xi32>
    %119 = arith.cmpi eq, %103, %118 : vector<80x1xi32>
    %120 = arith.ori %117, %119 : vector<80x1xi1>
    %c48_i32_63 = arith.constant 48 : i32
    %121 = vector.broadcast %c48_i32_63 : i32 to vector<80x1xi32>
    %122 = arith.cmpi eq, %103, %121 : vector<80x1xi32>
    %123 = arith.ori %120, %122 : vector<80x1xi1>
    %c59_i32 = arith.constant 59 : i32
    %124 = vector.broadcast %c59_i32 : i32 to vector<80x1xi32>
    %125 = arith.cmpi eq, %103, %124 : vector<80x1xi32>
    %126 = arith.ori %123, %125 : vector<80x1xi1>
    %c64_i32 = arith.constant 64 : i32
    %127 = vector.broadcast %c64_i32 : i32 to vector<80x1xi32>
    %128 = arith.cmpi eq, %103, %127 : vector<80x1xi32>
    %129 = arith.ori %126, %128 : vector<80x1xi1>
    %c75_i32 = arith.constant 75 : i32
    %130 = vector.broadcast %c75_i32 : i32 to vector<80x1xi32>
    %131 = arith.cmpi eq, %103, %130 : vector<80x1xi32>
    %132 = arith.ori %129, %131 : vector<80x1xi1>
    %cst_64 = arith.constant 0.000000e+00 : f32
    %cst_65 = arith.constant 1.000000e+00 : f32
    %133 = vector.broadcast %cst_64 : f32 to vector<80x1xf32>
    %134 = vector.broadcast %cst_65 : f32 to vector<80x1xf32>
    %135 = arith.select %132, %133, %134 : vector<80x1xi1>, vector<80x1xf32>
    %cst_66 = arith.constant 0.000000e+00 : f32
    %136 = vector.broadcast %cst_66 : f32 to vector<1x32xf32>
    %c0_i32_67 = arith.constant 0 : i32
    %c2_i32_68 = arith.constant 2 : i32
    %137 = arith.addi %c0_i32_67, %c2_i32_68 : i32
    %c1_i32_69 = arith.constant 1 : i32
    %138:2 = scf.for %arg21 = %c0_i32_67 to %137 step %c1_i32_69 iter_args(%arg22 = %136, %arg23 = %136) -> (vector<1x32xf32>, vector<1x32xf32>)  : i32 {
      %c0_i32_163 = arith.constant 0 : i32
      %c2_i32_164 = arith.constant 2 : i32
      %257 = arith.addi %c0_i32_163, %c2_i32_164 : i32
      %c1_i32_165 = arith.constant 1 : i32
      %258:2 = scf.for %arg24 = %c0_i32_163 to %257 step %c1_i32_165 iter_args(%arg25 = %arg22, %arg26 = %arg23) -> (vector<1x32xf32>, vector<1x32xf32>)  : i32 {
        %c192_i32 = arith.constant 192 : i32
        %259 = arith.muli %arg21, %c192_i32 : i32
        %c16_i32_167 = arith.constant 16 : i32
        %260 = arith.addi %259, %c16_i32_167 : i32
        %c80_i32 = arith.constant 80 : i32
        %261 = arith.muli %arg24, %c80_i32 : i32
        %262 = arith.addi %260, %261 : i32
        %263 = tpu.assume_multiple %262, 8 : i32
        %c8_i32 = arith.constant 8 : i32
        %264 = arith.addi %263, %c8_i32 : i32
        %c-17_i32 = arith.constant -17 : i32
        %265 = arith.addi %264, %c-17_i32 : i32
        %266 = arith.index_cast %265 : i32 to index
        %c0_168 = arith.constant 0 : index
        %267 = vector.load %arg18[%266, %c0_168] : memref<400x32xf32, #tpu.memory_space<vmem>>, vector<80x32xf32>
        %c0_169 = arith.constant 0 : index
        %c0_170 = arith.constant 0 : index
        %268 = vector.load %arg10[%c0_169, %c0_170] : memref<288x32xf32, #tpu.memory_space<vmem>>, vector<32x32xf32>
        %cst_171 = arith.constant dense<0.000000e+00> : vector<80x32xf32>
        %269 = tpu.matmul %267, %268, %cst_171 {dimension_numbers = #tpu.dot_dimension_numbers<[1], [0], [0], [1], [0, 0, 1, 1], [], []>} : vector<80x32xf32>, vector<32x32xf32>, vector<80x32xf32> -> vector<80x32xf32>
        %c-16_i32 = arith.constant -16 : i32
        %270 = arith.addi %264, %c-16_i32 : i32
        %271 = arith.index_cast %270 : i32 to index
        %c0_172 = arith.constant 0 : index
        %272 = vector.load %arg18[%271, %c0_172] : memref<400x32xf32, #tpu.memory_space<vmem>>, vector<80x32xf32>
        %c32_173 = arith.constant 32 : index
        %c0_174 = arith.constant 0 : index
        %273 = vector.load %arg10[%c32_173, %c0_174] : memref<288x32xf32, #tpu.memory_space<vmem>>, vector<32x32xf32>
        %cst_175 = arith.constant dense<0.000000e+00> : vector<80x32xf32>
        %274 = tpu.matmul %272, %273, %cst_175 {dimension_numbers = #tpu.dot_dimension_numbers<[1], [0], [0], [1], [0, 0, 1, 1], [], []>} : vector<80x32xf32>, vector<32x32xf32>, vector<80x32xf32> -> vector<80x32xf32>
        %275 = arith.addf %269, %274 : vector<80x32xf32>
        %c-15_i32 = arith.constant -15 : i32
        %276 = arith.addi %264, %c-15_i32 : i32
        %277 = arith.index_cast %276 : i32 to index
        %c0_176 = arith.constant 0 : index
        %278 = vector.load %arg18[%277, %c0_176] : memref<400x32xf32, #tpu.memory_space<vmem>>, vector<80x32xf32>
        %c64_177 = arith.constant 64 : index
        %c0_178 = arith.constant 0 : index
        %279 = vector.load %arg10[%c64_177, %c0_178] : memref<288x32xf32, #tpu.memory_space<vmem>>, vector<32x32xf32>
        %cst_179 = arith.constant dense<0.000000e+00> : vector<80x32xf32>
        %280 = tpu.matmul %278, %279, %cst_179 {dimension_numbers = #tpu.dot_dimension_numbers<[1], [0], [0], [1], [0, 0, 1, 1], [], []>} : vector<80x32xf32>, vector<32x32xf32>, vector<80x32xf32> -> vector<80x32xf32>
        %281 = arith.addf %275, %280 : vector<80x32xf32>
        %c-1_i32 = arith.constant -1 : i32
        %282 = arith.addi %264, %c-1_i32 : i32
        %283 = arith.index_cast %282 : i32 to index
        %c0_180 = arith.constant 0 : index
        %284 = vector.load %arg18[%283, %c0_180] : memref<400x32xf32, #tpu.memory_space<vmem>>, vector<80x32xf32>
        %c96_181 = arith.constant 96 : index
        %c0_182 = arith.constant 0 : index
        %285 = vector.load %arg10[%c96_181, %c0_182] : memref<288x32xf32, #tpu.memory_space<vmem>>, vector<32x32xf32>
        %cst_183 = arith.constant dense<0.000000e+00> : vector<80x32xf32>
        %286 = tpu.matmul %284, %285, %cst_183 {dimension_numbers = #tpu.dot_dimension_numbers<[1], [0], [0], [1], [0, 0, 1, 1], [], []>} : vector<80x32xf32>, vector<32x32xf32>, vector<80x32xf32> -> vector<80x32xf32>
        %287 = arith.addf %281, %286 : vector<80x32xf32>
        %c0_i32_184 = arith.constant 0 : i32
        %288 = arith.addi %264, %c0_i32_184 : i32
        %289 = arith.index_cast %288 : i32 to index
        %c0_185 = arith.constant 0 : index
        %290 = vector.load %arg18[%289, %c0_185] : memref<400x32xf32, #tpu.memory_space<vmem>>, vector<80x32xf32>
        %c128_186 = arith.constant 128 : index
        %c0_187 = arith.constant 0 : index
        %291 = vector.load %arg10[%c128_186, %c0_187] : memref<288x32xf32, #tpu.memory_space<vmem>>, vector<32x32xf32>
        %cst_188 = arith.constant dense<0.000000e+00> : vector<80x32xf32>
        %292 = tpu.matmul %290, %291, %cst_188 {dimension_numbers = #tpu.dot_dimension_numbers<[1], [0], [0], [1], [0, 0, 1, 1], [], []>} : vector<80x32xf32>, vector<32x32xf32>, vector<80x32xf32> -> vector<80x32xf32>
        %293 = arith.addf %287, %292 : vector<80x32xf32>
        %c1_i32_189 = arith.constant 1 : i32
        %294 = arith.addi %264, %c1_i32_189 : i32
        %295 = arith.index_cast %294 : i32 to index
        %c0_190 = arith.constant 0 : index
        %296 = vector.load %arg18[%295, %c0_190] : memref<400x32xf32, #tpu.memory_space<vmem>>, vector<80x32xf32>
        %c160_191 = arith.constant 160 : index
        %c0_192 = arith.constant 0 : index
        %297 = vector.load %arg10[%c160_191, %c0_192] : memref<288x32xf32, #tpu.memory_space<vmem>>, vector<32x32xf32>
        %cst_193 = arith.constant dense<0.000000e+00> : vector<80x32xf32>
        %298 = tpu.matmul %296, %297, %cst_193 {dimension_numbers = #tpu.dot_dimension_numbers<[1], [0], [0], [1], [0, 0, 1, 1], [], []>} : vector<80x32xf32>, vector<32x32xf32>, vector<80x32xf32> -> vector<80x32xf32>
        %299 = arith.addf %293, %298 : vector<80x32xf32>
        %c15_i32 = arith.constant 15 : i32
        %300 = arith.addi %264, %c15_i32 : i32
        %301 = arith.index_cast %300 : i32 to index
        %c0_194 = arith.constant 0 : index
        %302 = vector.load %arg18[%301, %c0_194] : memref<400x32xf32, #tpu.memory_space<vmem>>, vector<80x32xf32>
        %c192_195 = arith.constant 192 : index
        %c0_196 = arith.constant 0 : index
        %303 = vector.load %arg10[%c192_195, %c0_196] : memref<288x32xf32, #tpu.memory_space<vmem>>, vector<32x32xf32>
        %cst_197 = arith.constant dense<0.000000e+00> : vector<80x32xf32>
        %304 = tpu.matmul %302, %303, %cst_197 {dimension_numbers = #tpu.dot_dimension_numbers<[1], [0], [0], [1], [0, 0, 1, 1], [], []>} : vector<80x32xf32>, vector<32x32xf32>, vector<80x32xf32> -> vector<80x32xf32>
        %305 = arith.addf %299, %304 : vector<80x32xf32>
        %c16_i32_198 = arith.constant 16 : i32
        %306 = arith.addi %264, %c16_i32_198 : i32
        %307 = arith.index_cast %306 : i32 to index
        %c0_199 = arith.constant 0 : index
        %308 = vector.load %arg18[%307, %c0_199] : memref<400x32xf32, #tpu.memory_space<vmem>>, vector<80x32xf32>
        %c224_200 = arith.constant 224 : index
        %c0_201 = arith.constant 0 : index
        %309 = vector.load %arg10[%c224_200, %c0_201] : memref<288x32xf32, #tpu.memory_space<vmem>>, vector<32x32xf32>
        %cst_202 = arith.constant dense<0.000000e+00> : vector<80x32xf32>
        %310 = tpu.matmul %308, %309, %cst_202 {dimension_numbers = #tpu.dot_dimension_numbers<[1], [0], [0], [1], [0, 0, 1, 1], [], []>} : vector<80x32xf32>, vector<32x32xf32>, vector<80x32xf32> -> vector<80x32xf32>
        %311 = arith.addf %305, %310 : vector<80x32xf32>
        %c17_i32 = arith.constant 17 : i32
        %312 = arith.addi %264, %c17_i32 : i32
        %313 = arith.index_cast %312 : i32 to index
        %c0_203 = arith.constant 0 : index
        %314 = vector.load %arg18[%313, %c0_203] : memref<400x32xf32, #tpu.memory_space<vmem>>, vector<80x32xf32>
        %c256_204 = arith.constant 256 : index
        %c0_205 = arith.constant 0 : index
        %315 = vector.load %arg10[%c256_204, %c0_205] : memref<288x32xf32, #tpu.memory_space<vmem>>, vector<32x32xf32>
        %cst_206 = arith.constant dense<0.000000e+00> : vector<80x32xf32>
        %316 = tpu.matmul %314, %315, %cst_206 {dimension_numbers = #tpu.dot_dimension_numbers<[1], [0], [0], [1], [0, 0, 1, 1], [], []>} : vector<80x32xf32>, vector<32x32xf32>, vector<80x32xf32> -> vector<80x32xf32>
        %317 = arith.addf %311, %316 : vector<80x32xf32>
        %318 = vector.broadcast %135 : vector<80x1xf32> to vector<80x32xf32>
        %319 = arith.mulf %317, %318 : vector<80x32xf32>
        %cst_207 = arith.constant dense<0.000000e+00> : vector<32xf32>
        %320 = vector.multi_reduction <add>, %319, %cst_207 [0] : vector<80x32xf32> to vector<32xf32>
        %321 = vector.shape_cast %320 : vector<32xf32> to vector<1x32xf32>
        %322 = arith.addf %arg25, %321 : vector<1x32xf32>
        %323 = arith.mulf %319, %317 : vector<80x32xf32>
        %cst_208 = arith.constant dense<0.000000e+00> : vector<32xf32>
        %324 = vector.multi_reduction <add>, %323, %cst_208 [0] : vector<80x32xf32> to vector<32xf32>
        %325 = vector.shape_cast %324 : vector<32xf32> to vector<1x32xf32>
        %326 = arith.addf %arg26, %325 : vector<1x32xf32>
        %327 = arith.index_cast %263 : i32 to index
        %c0_209 = arith.constant 0 : index
        %328 = vector.load %arg19[%327, %c0_209] : memref<15136x32xf32, #tpu.memory_space<vmem>>, vector<80x32xf32>
        tpu.vector_store %arg19[%327, %c0_209], %317 {strides = array<i32>} : memref<15136x32xf32, #tpu.memory_space<vmem>>, vector<80x32xf32>,
        scf.yield %322, %326 : vector<1x32xf32>, vector<1x32xf32>
      }
      %c2_i32_166 = arith.constant 2 : i32
      scf.yield %258#0, %258#1 : vector<1x32xf32>, vector<1x32xf32>
    }
    %c2_i32_70 = arith.constant 2 : i32
    %cst_71 = arith.constant 2.000000e+02 : f32
    %139 = vector.broadcast %cst_71 : f32 to vector<1x32xf32>
    %140 = arith.divf %138#0, %139 : vector<1x32xf32>
    %cst_72 = arith.constant 2.000000e+02 : f32
    %141 = vector.broadcast %cst_72 : f32 to vector<1x32xf32>
    %142 = arith.divf %138#1, %141 : vector<1x32xf32>
    %143 = arith.mulf %140, %140 : vector<1x32xf32>
    %144 = arith.subf %142, %143 : vector<1x32xf32>
    %c0_73 = arith.constant 0 : index
    %c0_74 = arith.constant 0 : index
    %145 = vector.load %arg11[%c0_73, %c0_74] : memref<1x32xf32, #tpu.memory_space<vmem>>, vector<1x32xf32>
    %cst_75 = arith.constant 9.99999974E-6 : f32
    %146 = vector.broadcast %cst_75 : f32 to vector<1x32xf32>
    %147 = arith.addf %144, %146 : vector<1x32xf32>
    %148 = math.rsqrt %147 : vector<1x32xf32>
    %149 = arith.mulf %145, %148 : vector<1x32xf32>
    %c0_76 = arith.constant 0 : index
    %c0_77 = arith.constant 0 : index
    %150 = vector.load %arg12[%c0_76, %c0_77] : memref<1x32xf32, #tpu.memory_space<vmem>>, vector<1x32xf32>
    %151 = arith.mulf %140, %149 : vector<1x32xf32>
    %152 = arith.subf %150, %151 : vector<1x32xf32>
    %c0_i32_78 = arith.constant 0 : i32
    %c2_i32_79 = arith.constant 2 : i32
    %153 = arith.addi %c0_i32_78, %c2_i32_79 : i32
    %c1_i32_80 = arith.constant 1 : i32
    scf.for %arg21 = %c0_i32_78 to %153 step %c1_i32_80  : i32 {
      %c0_i32_163 = arith.constant 0 : i32
      %c5_i32 = arith.constant 5 : i32
      %257 = arith.addi %c0_i32_163, %c5_i32 : i32
      %c1_i32_164 = arith.constant 1 : i32
      scf.for %arg22 = %c0_i32_163 to %257 step %c1_i32_164  : i32 {
        %c192_i32 = arith.constant 192 : i32
        %258 = arith.muli %arg21, %c192_i32 : i32
        %c2_i32_166 = arith.constant 2 : i32
        %259 = arith.muli %c2_i32_166, %arg22 : i32
        %c1_i32_167 = arith.constant 1 : i32
        %260 = arith.addi %259, %c1_i32_167 : i32
        %c16_i32_168 = arith.constant 16 : i32
        %261 = arith.muli %260, %c16_i32_168 : i32
        %262 = arith.addi %258, %261 : i32
        %263 = tpu.assume_multiple %262, 8 : i32
        %c1_i32_169 = arith.constant 1 : i32
        %264 = arith.addi %263, %c1_i32_169 : i32
        %265 = arith.index_cast %264 : i32 to index
        %c0_170 = arith.constant 0 : index
        %266 = tpu.strided_load %arg19[%265, %c0_170] {strides = array<i32: 2, 1>} : memref<15136x32xf32, #tpu.memory_space<vmem>>, vector<5x32xf32>
        %c1_i32_171 = arith.constant 1 : i32
        %267 = arith.addi %264, %c1_i32_171 : i32
        %268 = arith.index_cast %267 : i32 to index
        %c0_172 = arith.constant 0 : index
        %269 = tpu.strided_load %arg19[%268, %c0_172] {strides = array<i32: 2, 1>} : memref<15136x32xf32, #tpu.memory_space<vmem>>, vector<5x32xf32>
        %c16_i32_173 = arith.constant 16 : i32
        %270 = arith.addi %264, %c16_i32_173 : i32
        %271 = arith.index_cast %270 : i32 to index
        %c0_174 = arith.constant 0 : index
        %272 = tpu.strided_load %arg19[%271, %c0_174] {strides = array<i32: 2, 1>} : memref<15136x32xf32, #tpu.memory_space<vmem>>, vector<5x32xf32>
        %c16_i32_175 = arith.constant 16 : i32
        %273 = arith.addi %264, %c16_i32_175 : i32
        %c1_i32_176 = arith.constant 1 : i32
        %274 = arith.addi %273, %c1_i32_176 : i32
        %275 = arith.index_cast %274 : i32 to index
        %c0_177 = arith.constant 0 : index
        %276 = tpu.strided_load %arg19[%275, %c0_177] {strides = array<i32: 2, 1>} : memref<15136x32xf32, #tpu.memory_space<vmem>>, vector<5x32xf32>
        %277 = vector.broadcast %149 : vector<1x32xf32> to vector<5x32xf32>
        %278 = arith.mulf %266, %277 : vector<5x32xf32>
        %279 = vector.broadcast %152 : vector<1x32xf32> to vector<5x32xf32>
        %280 = arith.addf %278, %279 : vector<5x32xf32>
        %cst_178 = arith.constant 0.000000e+00 : f32
        %281 = vector.broadcast %cst_178 : f32 to vector<5x32xf32>
        %282 = arith.maximumf %280, %281 : vector<5x32xf32>
        %283 = vector.broadcast %149 : vector<1x32xf32> to vector<5x32xf32>
        %284 = arith.mulf %269, %283 : vector<5x32xf32>
        %285 = vector.broadcast %152 : vector<1x32xf32> to vector<5x32xf32>
        %286 = arith.addf %284, %285 : vector<5x32xf32>
        %cst_179 = arith.constant 0.000000e+00 : f32
        %287 = vector.broadcast %cst_179 : f32 to vector<5x32xf32>
        %288 = arith.maximumf %286, %287 : vector<5x32xf32>
        %289 = vector.broadcast %149 : vector<1x32xf32> to vector<5x32xf32>
        %290 = arith.mulf %272, %289 : vector<5x32xf32>
        %291 = vector.broadcast %152 : vector<1x32xf32> to vector<5x32xf32>
        %292 = arith.addf %290, %291 : vector<5x32xf32>
        %cst_180 = arith.constant 0.000000e+00 : f32
        %293 = vector.broadcast %cst_180 : f32 to vector<5x32xf32>
        %294 = arith.maximumf %292, %293 : vector<5x32xf32>
        %295 = vector.broadcast %149 : vector<1x32xf32> to vector<5x32xf32>
        %296 = arith.mulf %276, %295 : vector<5x32xf32>
        %297 = vector.broadcast %152 : vector<1x32xf32> to vector<5x32xf32>
        %298 = arith.addf %296, %297 : vector<5x32xf32>
        %cst_181 = arith.constant 0.000000e+00 : f32
        %299 = vector.broadcast %cst_181 : f32 to vector<5x32xf32>
        %300 = arith.maximumf %298, %299 : vector<5x32xf32>
        %301 = arith.maximumf %282, %288 : vector<5x32xf32>
        %302 = arith.maximumf %294, %300 : vector<5x32xf32>
        %303 = arith.maximumf %301, %302 : vector<5x32xf32>
        %c25_i32 = arith.constant 25 : i32
        %304 = arith.muli %arg21, %c25_i32 : i32
        %c5_i32_182 = arith.constant 5 : i32
        %305 = arith.muli %arg22, %c5_i32_182 : i32
        %306 = arith.addi %304, %305 : i32
        %307 = arith.index_cast %306 : i32 to index
        %c0_183 = arith.constant 0 : index
        %308 = vector.load %arg20[%307, %c0_183] : memref<50x32xf32, #tpu.memory_space<vmem>>, vector<5x32xf32>
        tpu.vector_store %arg20[%307, %c0_183], %303 {strides = array<i32>} : memref<50x32xf32, #tpu.memory_space<vmem>>, vector<5x32xf32>,
      }
      %c5_i32_165 = arith.constant 5 : i32
    }
    %c2_i32_81 = arith.constant 2 : i32
    %c0_82 = arith.constant 0 : index
    %c0_83 = arith.constant 0 : index
    %154 = tpu.strided_load %arg20[%c0_82, %c0_83] {strides = array<i32: 25, 1>} : memref<50x32xf32, #tpu.memory_space<vmem>>, vector<2x32xf32>
    %c0_84 = arith.constant 0 : index
    %c0_85 = arith.constant 0 : index
    %155 = vector.load %arg13[%c0_84, %c0_85] : memref<800x5xf32, #tpu.memory_space<vmem>>, vector<32x5xf32>
    %cst_86 = arith.constant dense<0.000000e+00> : vector<2x5xf32>
    %156 = tpu.matmul %154, %155, %cst_86 {dimension_numbers = #tpu.dot_dimension_numbers<[1], [0], [0], [1], [0, 0, 1, 1], [], []>} : vector<2x32xf32>, vector<32x5xf32>, vector<2x5xf32> -> vector<2x5xf32>
    %c1 = arith.constant 1 : index
    %c0_87 = arith.constant 0 : index
    %157 = tpu.strided_load %arg20[%c1, %c0_87] {strides = array<i32: 25, 1>} : memref<50x32xf32, #tpu.memory_space<vmem>>, vector<2x32xf32>
    %c32 = arith.constant 32 : index
    %c0_88 = arith.constant 0 : index
    %158 = vector.load %arg13[%c32, %c0_88] : memref<800x5xf32, #tpu.memory_space<vmem>>, vector<32x5xf32>
    %cst_89 = arith.constant dense<0.000000e+00> : vector<2x5xf32>
    %159 = tpu.matmul %157, %158, %cst_89 {dimension_numbers = #tpu.dot_dimension_numbers<[1], [0], [0], [1], [0, 0, 1, 1], [], []>} : vector<2x32xf32>, vector<32x5xf32>, vector<2x5xf32> -> vector<2x5xf32>
    %160 = arith.addf %156, %159 : vector<2x5xf32>
    %c2 = arith.constant 2 : index
    %c0_90 = arith.constant 0 : index
    %161 = tpu.strided_load %arg20[%c2, %c0_90] {strides = array<i32: 25, 1>} : memref<50x32xf32, #tpu.memory_space<vmem>>, vector<2x32xf32>
    %c64 = arith.constant 64 : index
    %c0_91 = arith.constant 0 : index
    %162 = vector.load %arg13[%c64, %c0_91] : memref<800x5xf32, #tpu.memory_space<vmem>>, vector<32x5xf32>
    %cst_92 = arith.constant dense<0.000000e+00> : vector<2x5xf32>
    %163 = tpu.matmul %161, %162, %cst_92 {dimension_numbers = #tpu.dot_dimension_numbers<[1], [0], [0], [1], [0, 0, 1, 1], [], []>} : vector<2x32xf32>, vector<32x5xf32>, vector<2x5xf32> -> vector<2x5xf32>
    %164 = arith.addf %160, %163 : vector<2x5xf32>
    %c3 = arith.constant 3 : index
    %c0_93 = arith.constant 0 : index
    %165 = tpu.strided_load %arg20[%c3, %c0_93] {strides = array<i32: 25, 1>} : memref<50x32xf32, #tpu.memory_space<vmem>>, vector<2x32xf32>
    %c96 = arith.constant 96 : index
    %c0_94 = arith.constant 0 : index
    %166 = vector.load %arg13[%c96, %c0_94] : memref<800x5xf32, #tpu.memory_space<vmem>>, vector<32x5xf32>
    %cst_95 = arith.constant dense<0.000000e+00> : vector<2x5xf32>
    %167 = tpu.matmul %165, %166, %cst_95 {dimension_numbers = #tpu.dot_dimension_numbers<[1], [0], [0], [1], [0, 0, 1, 1], [], []>} : vector<2x32xf32>, vector<32x5xf32>, vector<2x5xf32> -> vector<2x5xf32>
    %168 = arith.addf %164, %167 : vector<2x5xf32>
    %c4 = arith.constant 4 : index
    %c0_96 = arith.constant 0 : index
    %169 = tpu.strided_load %arg20[%c4, %c0_96] {strides = array<i32: 25, 1>} : memref<50x32xf32, #tpu.memory_space<vmem>>, vector<2x32xf32>
    %c128 = arith.constant 128 : index
    %c0_97 = arith.constant 0 : index
    %170 = vector.load %arg13[%c128, %c0_97] : memref<800x5xf32, #tpu.memory_space<vmem>>, vector<32x5xf32>
    %cst_98 = arith.constant dense<0.000000e+00> : vector<2x5xf32>
    %171 = tpu.matmul %169, %170, %cst_98 {dimension_numbers = #tpu.dot_dimension_numbers<[1], [0], [0], [1], [0, 0, 1, 1], [], []>} : vector<2x32xf32>, vector<32x5xf32>, vector<2x5xf32> -> vector<2x5xf32>
    %172 = arith.addf %168, %171 : vector<2x5xf32>
    %c5 = arith.constant 5 : index
    %c0_99 = arith.constant 0 : index
    %173 = tpu.strided_load %arg20[%c5, %c0_99] {strides = array<i32: 25, 1>} : memref<50x32xf32, #tpu.memory_space<vmem>>, vector<2x32xf32>
    %c160 = arith.constant 160 : index
    %c0_100 = arith.constant 0 : index
    %174 = vector.load %arg13[%c160, %c0_100] : memref<800x5xf32, #tpu.memory_space<vmem>>, vector<32x5xf32>
    %cst_101 = arith.constant dense<0.000000e+00> : vector<2x5xf32>
    %175 = tpu.matmul %173, %174, %cst_101 {dimension_numbers = #tpu.dot_dimension_numbers<[1], [0], [0], [1], [0, 0, 1, 1], [], []>} : vector<2x32xf32>, vector<32x5xf32>, vector<2x5xf32> -> vector<2x5xf32>
    %176 = arith.addf %172, %175 : vector<2x5xf32>
    %c6 = arith.constant 6 : index
    %c0_102 = arith.constant 0 : index
    %177 = tpu.strided_load %arg20[%c6, %c0_102] {strides = array<i32: 25, 1>} : memref<50x32xf32, #tpu.memory_space<vmem>>, vector<2x32xf32>
    %c192 = arith.constant 192 : index
    %c0_103 = arith.constant 0 : index
    %178 = vector.load %arg13[%c192, %c0_103] : memref<800x5xf32, #tpu.memory_space<vmem>>, vector<32x5xf32>
    %cst_104 = arith.constant dense<0.000000e+00> : vector<2x5xf32>
    %179 = tpu.matmul %177, %178, %cst_104 {dimension_numbers = #tpu.dot_dimension_numbers<[1], [0], [0], [1], [0, 0, 1, 1], [], []>} : vector<2x32xf32>, vector<32x5xf32>, vector<2x5xf32> -> vector<2x5xf32>
    %180 = arith.addf %176, %179 : vector<2x5xf32>
    %c7 = arith.constant 7 : index
    %c0_105 = arith.constant 0 : index
    %181 = tpu.strided_load %arg20[%c7, %c0_105] {strides = array<i32: 25, 1>} : memref<50x32xf32, #tpu.memory_space<vmem>>, vector<2x32xf32>
    %c224 = arith.constant 224 : index
    %c0_106 = arith.constant 0 : index
    %182 = vector.load %arg13[%c224, %c0_106] : memref<800x5xf32, #tpu.memory_space<vmem>>, vector<32x5xf32>
    %cst_107 = arith.constant dense<0.000000e+00> : vector<2x5xf32>
    %183 = tpu.matmul %181, %182, %cst_107 {dimension_numbers = #tpu.dot_dimension_numbers<[1], [0], [0], [1], [0, 0, 1, 1], [], []>} : vector<2x32xf32>, vector<32x5xf32>, vector<2x5xf32> -> vector<2x5xf32>
    %184 = arith.addf %180, %183 : vector<2x5xf32>
    %c8 = arith.constant 8 : index
    %c0_108 = arith.constant 0 : index
    %185 = tpu.strided_load %arg20[%c8, %c0_108] {strides = array<i32: 25, 1>} : memref<50x32xf32, #tpu.memory_space<vmem>>, vector<2x32xf32>
    %c256 = arith.constant 256 : index
    %c0_109 = arith.constant 0 : index
    %186 = vector.load %arg13[%c256, %c0_109] : memref<800x5xf32, #tpu.memory_space<vmem>>, vector<32x5xf32>
    %cst_110 = arith.constant dense<0.000000e+00> : vector<2x5xf32>
    %187 = tpu.matmul %185, %186, %cst_110 {dimension_numbers = #tpu.dot_dimension_numbers<[1], [0], [0], [1], [0, 0, 1, 1], [], []>} : vector<2x32xf32>, vector<32x5xf32>, vector<2x5xf32> -> vector<2x5xf32>
    %188 = arith.addf %184, %187 : vector<2x5xf32>
    %c9 = arith.constant 9 : index
    %c0_111 = arith.constant 0 : index
    %189 = tpu.strided_load %arg20[%c9, %c0_111] {strides = array<i32: 25, 1>} : memref<50x32xf32, #tpu.memory_space<vmem>>, vector<2x32xf32>
    %c288 = arith.constant 288 : index
    %c0_112 = arith.constant 0 : index
    %190 = vector.load %arg13[%c288, %c0_112] : memref<800x5xf32, #tpu.memory_space<vmem>>, vector<32x5xf32>
    %cst_113 = arith.constant dense<0.000000e+00> : vector<2x5xf32>
    %191 = tpu.matmul %189, %190, %cst_113 {dimension_numbers = #tpu.dot_dimension_numbers<[1], [0], [0], [1], [0, 0, 1, 1], [], []>} : vector<2x32xf32>, vector<32x5xf32>, vector<2x5xf32> -> vector<2x5xf32>
    %192 = arith.addf %188, %191 : vector<2x5xf32>
    %c10 = arith.constant 10 : index
    %c0_114 = arith.constant 0 : index
    %193 = tpu.strided_load %arg20[%c10, %c0_114] {strides = array<i32: 25, 1>} : memref<50x32xf32, #tpu.memory_space<vmem>>, vector<2x32xf32>
    %c320 = arith.constant 320 : index
    %c0_115 = arith.constant 0 : index
    %194 = vector.load %arg13[%c320, %c0_115] : memref<800x5xf32, #tpu.memory_space<vmem>>, vector<32x5xf32>
    %cst_116 = arith.constant dense<0.000000e+00> : vector<2x5xf32>
    %195 = tpu.matmul %193, %194, %cst_116 {dimension_numbers = #tpu.dot_dimension_numbers<[1], [0], [0], [1], [0, 0, 1, 1], [], []>} : vector<2x32xf32>, vector<32x5xf32>, vector<2x5xf32> -> vector<2x5xf32>
    %196 = arith.addf %192, %195 : vector<2x5xf32>
    %c11 = arith.constant 11 : index
    %c0_117 = arith.constant 0 : index
    %197 = tpu.strided_load %arg20[%c11, %c0_117] {strides = array<i32: 25, 1>} : memref<50x32xf32, #tpu.memory_space<vmem>>, vector<2x32xf32>
    %c352 = arith.constant 352 : index
    %c0_118 = arith.constant 0 : index
    %198 = vector.load %arg13[%c352, %c0_118] : memref<800x5xf32, #tpu.memory_space<vmem>>, vector<32x5xf32>
    %cst_119 = arith.constant dense<0.000000e+00> : vector<2x5xf32>
    %199 = tpu.matmul %197, %198, %cst_119 {dimension_numbers = #tpu.dot_dimension_numbers<[1], [0], [0], [1], [0, 0, 1, 1], [], []>} : vector<2x32xf32>, vector<32x5xf32>, vector<2x5xf32> -> vector<2x5xf32>
    %200 = arith.addf %196, %199 : vector<2x5xf32>
    %c12 = arith.constant 12 : index
    %c0_120 = arith.constant 0 : index
    %201 = tpu.strided_load %arg20[%c12, %c0_120] {strides = array<i32: 25, 1>} : memref<50x32xf32, #tpu.memory_space<vmem>>, vector<2x32xf32>
    %c384 = arith.constant 384 : index
    %c0_121 = arith.constant 0 : index
    %202 = vector.load %arg13[%c384, %c0_121] : memref<800x5xf32, #tpu.memory_space<vmem>>, vector<32x5xf32>
    %cst_122 = arith.constant dense<0.000000e+00> : vector<2x5xf32>
    %203 = tpu.matmul %201, %202, %cst_122 {dimension_numbers = #tpu.dot_dimension_numbers<[1], [0], [0], [1], [0, 0, 1, 1], [], []>} : vector<2x32xf32>, vector<32x5xf32>, vector<2x5xf32> -> vector<2x5xf32>
    %204 = arith.addf %200, %203 : vector<2x5xf32>
    %c13 = arith.constant 13 : index
    %c0_123 = arith.constant 0 : index
    %205 = tpu.strided_load %arg20[%c13, %c0_123] {strides = array<i32: 25, 1>} : memref<50x32xf32, #tpu.memory_space<vmem>>, vector<2x32xf32>
    %c416 = arith.constant 416 : index
    %c0_124 = arith.constant 0 : index
    %206 = vector.load %arg13[%c416, %c0_124] : memref<800x5xf32, #tpu.memory_space<vmem>>, vector<32x5xf32>
    %cst_125 = arith.constant dense<0.000000e+00> : vector<2x5xf32>
    %207 = tpu.matmul %205, %206, %cst_125 {dimension_numbers = #tpu.dot_dimension_numbers<[1], [0], [0], [1], [0, 0, 1, 1], [], []>} : vector<2x32xf32>, vector<32x5xf32>, vector<2x5xf32> -> vector<2x5xf32>
    %208 = arith.addf %204, %207 : vector<2x5xf32>
    %c14 = arith.constant 14 : index
    %c0_126 = arith.constant 0 : index
    %209 = tpu.strided_load %arg20[%c14, %c0_126] {strides = array<i32: 25, 1>} : memref<50x32xf32, #tpu.memory_space<vmem>>, vector<2x32xf32>
    %c448 = arith.constant 448 : index
    %c0_127 = arith.constant 0 : index
    %210 = vector.load %arg13[%c448, %c0_127] : memref<800x5xf32, #tpu.memory_space<vmem>>, vector<32x5xf32>
    %cst_128 = arith.constant dense<0.000000e+00> : vector<2x5xf32>
    %211 = tpu.matmul %209, %210, %cst_128 {dimension_numbers = #tpu.dot_dimension_numbers<[1], [0], [0], [1], [0, 0, 1, 1], [], []>} : vector<2x32xf32>, vector<32x5xf32>, vector<2x5xf32> -> vector<2x5xf32>
    %212 = arith.addf %208, %211 : vector<2x5xf32>
    %c15 = arith.constant 15 : index
    %c0_129 = arith.constant 0 : index
    %213 = tpu.strided_load %arg20[%c15, %c0_129] {strides = array<i32: 25, 1>} : memref<50x32xf32, #tpu.memory_space<vmem>>, vector<2x32xf32>
    %c480 = arith.constant 480 : index
    %c0_130 = arith.constant 0 : index
    %214 = vector.load %arg13[%c480, %c0_130] : memref<800x5xf32, #tpu.memory_space<vmem>>, vector<32x5xf32>
    %cst_131 = arith.constant dense<0.000000e+00> : vector<2x5xf32>
    %215 = tpu.matmul %213, %214, %cst_131 {dimension_numbers = #tpu.dot_dimension_numbers<[1], [0], [0], [1], [0, 0, 1, 1], [], []>} : vector<2x32xf32>, vector<32x5xf32>, vector<2x5xf32> -> vector<2x5xf32>
    %216 = arith.addf %212, %215 : vector<2x5xf32>
    %c16 = arith.constant 16 : index
    %c0_132 = arith.constant 0 : index
    %217 = tpu.strided_load %arg20[%c16, %c0_132] {strides = array<i32: 25, 1>} : memref<50x32xf32, #tpu.memory_space<vmem>>, vector<2x32xf32>
    %c512 = arith.constant 512 : index
    %c0_133 = arith.constant 0 : index
    %218 = vector.load %arg13[%c512, %c0_133] : memref<800x5xf32, #tpu.memory_space<vmem>>, vector<32x5xf32>
    %cst_134 = arith.constant dense<0.000000e+00> : vector<2x5xf32>
    %219 = tpu.matmul %217, %218, %cst_134 {dimension_numbers = #tpu.dot_dimension_numbers<[1], [0], [0], [1], [0, 0, 1, 1], [], []>} : vector<2x32xf32>, vector<32x5xf32>, vector<2x5xf32> -> vector<2x5xf32>
    %220 = arith.addf %216, %219 : vector<2x5xf32>
    %c17 = arith.constant 17 : index
    %c0_135 = arith.constant 0 : index
    %221 = tpu.strided_load %arg20[%c17, %c0_135] {strides = array<i32: 25, 1>} : memref<50x32xf32, #tpu.memory_space<vmem>>, vector<2x32xf32>
    %c544 = arith.constant 544 : index
    %c0_136 = arith.constant 0 : index
    %222 = vector.load %arg13[%c544, %c0_136] : memref<800x5xf32, #tpu.memory_space<vmem>>, vector<32x5xf32>
    %cst_137 = arith.constant dense<0.000000e+00> : vector<2x5xf32>
    %223 = tpu.matmul %221, %222, %cst_137 {dimension_numbers = #tpu.dot_dimension_numbers<[1], [0], [0], [1], [0, 0, 1, 1], [], []>} : vector<2x32xf32>, vector<32x5xf32>, vector<2x5xf32> -> vector<2x5xf32>
    %224 = arith.addf %220, %223 : vector<2x5xf32>
    %c18 = arith.constant 18 : index
    %c0_138 = arith.constant 0 : index
    %225 = tpu.strided_load %arg20[%c18, %c0_138] {strides = array<i32: 25, 1>} : memref<50x32xf32, #tpu.memory_space<vmem>>, vector<2x32xf32>
    %c576 = arith.constant 576 : index
    %c0_139 = arith.constant 0 : index
    %226 = vector.load %arg13[%c576, %c0_139] : memref<800x5xf32, #tpu.memory_space<vmem>>, vector<32x5xf32>
    %cst_140 = arith.constant dense<0.000000e+00> : vector<2x5xf32>
    %227 = tpu.matmul %225, %226, %cst_140 {dimension_numbers = #tpu.dot_dimension_numbers<[1], [0], [0], [1], [0, 0, 1, 1], [], []>} : vector<2x32xf32>, vector<32x5xf32>, vector<2x5xf32> -> vector<2x5xf32>
    %228 = arith.addf %224, %227 : vector<2x5xf32>
    %c19 = arith.constant 19 : index
    %c0_141 = arith.constant 0 : index
    %229 = tpu.strided_load %arg20[%c19, %c0_141] {strides = array<i32: 25, 1>} : memref<50x32xf32, #tpu.memory_space<vmem>>, vector<2x32xf32>
    %c608 = arith.constant 608 : index
    %c0_142 = arith.constant 0 : index
    %230 = vector.load %arg13[%c608, %c0_142] : memref<800x5xf32, #tpu.memory_space<vmem>>, vector<32x5xf32>
    %cst_143 = arith.constant dense<0.000000e+00> : vector<2x5xf32>
    %231 = tpu.matmul %229, %230, %cst_143 {dimension_numbers = #tpu.dot_dimension_numbers<[1], [0], [0], [1], [0, 0, 1, 1], [], []>} : vector<2x32xf32>, vector<32x5xf32>, vector<2x5xf32> -> vector<2x5xf32>
    %232 = arith.addf %228, %231 : vector<2x5xf32>
    %c20 = arith.constant 20 : index
    %c0_144 = arith.constant 0 : index
    %233 = tpu.strided_load %arg20[%c20, %c0_144] {strides = array<i32: 25, 1>} : memref<50x32xf32, #tpu.memory_space<vmem>>, vector<2x32xf32>
    %c640 = arith.constant 640 : index
    %c0_145 = arith.constant 0 : index
    %234 = vector.load %arg13[%c640, %c0_145] : memref<800x5xf32, #tpu.memory_space<vmem>>, vector<32x5xf32>
    %cst_146 = arith.constant dense<0.000000e+00> : vector<2x5xf32>
    %235 = tpu.matmul %233, %234, %cst_146 {dimension_numbers = #tpu.dot_dimension_numbers<[1], [0], [0], [1], [0, 0, 1, 1], [], []>} : vector<2x32xf32>, vector<32x5xf32>, vector<2x5xf32> -> vector<2x5xf32>
    %236 = arith.addf %232, %235 : vector<2x5xf32>
    %c21 = arith.constant 21 : index
    %c0_147 = arith.constant 0 : index
    %237 = tpu.strided_load %arg20[%c21, %c0_147] {strides = array<i32: 25, 1>} : memref<50x32xf32, #tpu.memory_space<vmem>>, vector<2x32xf32>
    %c672 = arith.constant 672 : index
    %c0_148 = arith.constant 0 : index
    %238 = vector.load %arg13[%c672, %c0_148] : memref<800x5xf32, #tpu.memory_space<vmem>>, vector<32x5xf32>
    %cst_149 = arith.constant dense<0.000000e+00> : vector<2x5xf32>
    %239 = tpu.matmul %237, %238, %cst_149 {dimension_numbers = #tpu.dot_dimension_numbers<[1], [0], [0], [1], [0, 0, 1, 1], [], []>} : vector<2x32xf32>, vector<32x5xf32>, vector<2x5xf32> -> vector<2x5xf32>
    %240 = arith.addf %236, %239 : vector<2x5xf32>
    %c22 = arith.constant 22 : index
    %c0_150 = arith.constant 0 : index
    %241 = tpu.strided_load %arg20[%c22, %c0_150] {strides = array<i32: 25, 1>} : memref<50x32xf32, #tpu.memory_space<vmem>>, vector<2x32xf32>
    %c704 = arith.constant 704 : index
    %c0_151 = arith.constant 0 : index
    %242 = vector.load %arg13[%c704, %c0_151] : memref<800x5xf32, #tpu.memory_space<vmem>>, vector<32x5xf32>
    %cst_152 = arith.constant dense<0.000000e+00> : vector<2x5xf32>
    %243 = tpu.matmul %241, %242, %cst_152 {dimension_numbers = #tpu.dot_dimension_numbers<[1], [0], [0], [1], [0, 0, 1, 1], [], []>} : vector<2x32xf32>, vector<32x5xf32>, vector<2x5xf32> -> vector<2x5xf32>
    %244 = arith.addf %240, %243 : vector<2x5xf32>
    %c23 = arith.constant 23 : index
    %c0_153 = arith.constant 0 : index
    %245 = tpu.strided_load %arg20[%c23, %c0_153] {strides = array<i32: 25, 1>} : memref<50x32xf32, #tpu.memory_space<vmem>>, vector<2x32xf32>
    %c736 = arith.constant 736 : index
    %c0_154 = arith.constant 0 : index
    %246 = vector.load %arg13[%c736, %c0_154] : memref<800x5xf32, #tpu.memory_space<vmem>>, vector<32x5xf32>
    %cst_155 = arith.constant dense<0.000000e+00> : vector<2x5xf32>
    %247 = tpu.matmul %245, %246, %cst_155 {dimension_numbers = #tpu.dot_dimension_numbers<[1], [0], [0], [1], [0, 0, 1, 1], [], []>} : vector<2x32xf32>, vector<32x5xf32>, vector<2x5xf32> -> vector<2x5xf32>
    %248 = arith.addf %244, %247 : vector<2x5xf32>
    %c24 = arith.constant 24 : index
    %c0_156 = arith.constant 0 : index
    %249 = tpu.strided_load %arg20[%c24, %c0_156] {strides = array<i32: 25, 1>} : memref<50x32xf32, #tpu.memory_space<vmem>>, vector<2x32xf32>
    %c768 = arith.constant 768 : index
    %c0_157 = arith.constant 0 : index
    %250 = vector.load %arg13[%c768, %c0_157] : memref<800x5xf32, #tpu.memory_space<vmem>>, vector<32x5xf32>
    %cst_158 = arith.constant dense<0.000000e+00> : vector<2x5xf32>
    %251 = tpu.matmul %249, %250, %cst_158 {dimension_numbers = #tpu.dot_dimension_numbers<[1], [0], [0], [1], [0, 0, 1, 1], [], []>} : vector<2x32xf32>, vector<32x5xf32>, vector<2x5xf32> -> vector<2x5xf32>
    %252 = arith.addf %248, %251 : vector<2x5xf32>
    %c0_159 = arith.constant 0 : index
    %c0_160 = arith.constant 0 : index
    %253 = vector.load %arg14[%c0_159, %c0_160] : memref<1x5xf32, #tpu.memory_space<vmem>>, vector<1x5xf32>
    %254 = vector.broadcast %253 : vector<1x5xf32> to vector<2x5xf32>
    %255 = arith.addf %252, %254 : vector<2x5xf32>
    %c0_161 = arith.constant 0 : index
    %c0_162 = arith.constant 0 : index
    %256 = vector.load %arg15[%c0_161, %c0_162] : memref<2x5xf32, #tpu.memory_space<vmem>>, vector<2x5xf32>
    tpu.vector_store %arg15[%c0_161, %c0_162], %255 {strides = array<i32>} : memref<2x5xf32, #tpu.memory_space<vmem>>, vector<2x5xf32>,
    return
  }
}

</mosaic_0001>

<bundles_post_ra>
// kernel: cnn4_forward.1
= control target key start
LH: loop header
LB: loop body
LE: loop exit
PB: predicated region body
PF: predicated region fallthrough
CT: control target
= control target key end

     0   :  { %20 = vsyncpa [#allocation8], 0  ;;  %vm51_vm0 = vcmask 261120   ;;  %v18084_v2 = vmov 0.0   ;;  %v14943_v5 = vmov 0.0   ;;  %v14945_v6 = vmov 0.0   ;;  %s18068_s0 = inlined_call_operand.vmem [shape: f32[15136,32], index: 0, kind: input, shape index: {}]   ;;  %s18069_s1 = inlined_call_operand.vmem [shape: f32[32,32], index: 1, kind: input, shape index: {}]   ;;  %s18070_s2 = inlined_call_operand.vmem [shape: f32[1,32], index: 2, kind: input, shape index: {}]   ;;  %s18071_s3 = inlined_call_operand.vmem [shape: f32[1,32], index: 3, kind: input, shape index: {}]   ;;  %s18072_s4 = inlined_call_operand.vmem [shape: f32[288,32], index: 4, kind: input, shape index: {}]   ;;  %s18073_s5 = inlined_call_operand.vmem [shape: f32[1,32], index: 5, kind: input, shape index: {}]   ;;  %s18074_s6 = inlined_call_operand.vmem [shape: f32[1,32], index: 6, kind: input, shape index: {}]   ;;  %s18075_s7 = inlined_call_operand.vmem [shape: f32[288,32], index: 7, kind: input, shape index: {}]   ;;  %s18076_s8 = inlined_call_operand.vmem [shape: f32[1,32], index: 8, kind: input, shape index: {}]   ;;  %s18077_s9 = inlined_call_operand.vmem [shape: f32[1,32], index: 9, kind: input, shape index: {}]   ;;  %s18078_s10 = inlined_call_operand.vmem [shape: f32[288,32], index: 10, kind: input, shape index: {}]   ;;  %s18079_s11 = inlined_call_operand.vmem [shape: f32[1,32], index: 11, kind: input, shape index: {}]   ;;  %s18080_s12 = inlined_call_operand.vmem [shape: f32[1,32], index: 12, kind: input, shape index: {}]   ;;  %s18081_s13 = inlined_call_operand.vmem [shape: f32[800,5], index: 13, kind: input, shape index: {}]   ;;  %s18082_s14 = inlined_call_operand.vmem [shape: f32[1,5], index: 14, kind: input, shape index: {}]   ;;  %s18083_s15 = inlined_call_operand.hbm [shape: f32[2,5], index: 15, kind: output, shape index: {}]  }
   0x1   :  { %v13486_v0 = vld [vmem:[%s18069_s1] sm:$0xff]  ;;  %v13491_v1 = vld [vmem:[%s18069_s1 + $0x8] sm:$0xff]  ;;  %52 = vst.msk [vmem:[#allocation2] sm:$0xff] %vm51_vm0, %v18084_v2  ;;  %53 = vst.msk [vmem:[#allocation2 + $0x8] sm:$0xff] %vm51_vm0, %v18084_v2  ;;  %s14947_s26 = smov 0  }
   0x2   :  { %54 = vst.msk [vmem:[#allocation2 + $0x10] sm:$0xff] %vm51_vm0, %v18084_v2  ;;  %55 = vst.msk [vmem:[#allocation2 + $0x18] sm:$0xff] %vm51_vm0, %v18084_v2  ;;  %v14936_v3 = vld [vmem:[%s18069_s1 + $0x10] sm:$0xff]  ;;  %v14941_v4 = vld [vmem:[%s18069_s1 + $0x18] sm:$0xff] }
   0x3   :  { %56 = vst.msk [vmem:[#allocation2 + $0x20] sm:$0xff] %vm51_vm0, %v18084_v2  ;;  %57 = vst.msk [vmem:[#allocation2 + $0x28] sm:$0xff] %vm51_vm0, %v18084_v2 }
   0x4   :  { %58 = vst.msk [vmem:[#allocation2 + $0x30] sm:$0xff] %vm51_vm0, %v18084_v2  ;;  %59 = vst.msk [vmem:[#allocation2 + $0x38] sm:$0xff] %vm51_vm0, %v18084_v2 }
   0x5   :  { %60 = vst.msk [vmem:[#allocation2 + $0x40] sm:$0xff] %vm51_vm0, %v18084_v2  ;;  %61 = vst.msk [vmem:[#allocation2 + $0x48] sm:$0xff] %vm51_vm0, %v18084_v2 }
   0x6   :  { %62 = vst.msk [vmem:[#allocation2 + $0x50] sm:$0xff] %vm51_vm0, %v18084_v2  ;;  %63 = vst.msk [vmem:[#allocation2 + $0x58] sm:$0xff] %vm51_vm0, %v18084_v2 }
   0x7   :  { %64 = vst.msk [vmem:[#allocation2 + $0x60] sm:$0xff] %vm51_vm0, %v18084_v2  ;;  %65 = vst.msk [vmem:[#allocation2 + $0x68] sm:$0xff] %vm51_vm0, %v18084_v2 }
   0x8   :  { %66 = vst.msk [vmem:[#allocation2 + $0x70] sm:$0xff] %vm51_vm0, %v18084_v2  ;;  %67 = vst.msk [vmem:[#allocation2 + $0x78] sm:$0xff] %vm51_vm0, %v18084_v2 }
   0x9   :  { %68 = vst.msk [vmem:[#allocation2 + $0x80] sm:$0xff] %vm51_vm0, %v18084_v2  ;;  %69 = vst.msk [vmem:[#allocation2 + $0x88] sm:$0xff] %vm51_vm0, %v18084_v2 }
   0xa   :  { %70 = vst.msk [vmem:[#allocation2 + $0x90] sm:$0xff] %vm51_vm0, %v18084_v2  ;;  %71 = vst.msk [vmem:[#allocation2 + $0x98] sm:$0xff] %vm51_vm0, %v18084_v2 }
   0xb   :  { %72 = vst.msk [vmem:[#allocation2 + $0xa0] sm:$0xff] %vm51_vm0, %v18084_v2  ;;  %73 = vst.msk [vmem:[#allocation2 + $0xa8] sm:$0xff] %vm51_vm0, %v18084_v2 }
   0xc   :  { %74 = vst.msk [vmem:[#allocation2 + $0xb0] sm:$0xff] %vm51_vm0, %v18084_v2  ;;  %75 = vst.msk [vmem:[#allocation2 + $0xb8] sm:$0xff] %vm51_vm0, %v18084_v2 }
   0xd   :  { %76 = vst.msk [vmem:[#allocation2 + $0xc0] sm:$0xff] %vm51_vm0, %v18084_v2  ;;  %77 = vst.msk [vmem:[#allocation2 + $0xc8] sm:$0xff] %vm51_vm0, %v18084_v2 }
   0xe   :  { %78 = vst.msk [vmem:[#allocation2 + $0xd0] sm:$0xff] %vm51_vm0, %v18084_v2  ;;  %79 = vst.msk [vmem:[#allocation2 + $0xd8] sm:$0xff] %vm51_vm0, %v18084_v2 }
   0xf   :  { %80 = vst.msk [vmem:[#allocation2 + $0xe0] sm:$0xff] %vm51_vm0, %v18084_v2  ;;  %81 = vst.msk [vmem:[#allocation2 + $0xe8] sm:$0xff] %vm51_vm0, %v18084_v2 }
  0x10   :  { %82 = vst.msk [vmem:[#allocation2 + $0xf0] sm:$0xff] %vm51_vm0, %v18084_v2  ;;  %83 = vst.msk [vmem:[#allocation2 + $0xf8] sm:$0xff] %vm51_vm0, %v18084_v2 }
  0x11   :  { %84 = vst.msk [vmem:[#allocation2 + $0x100] sm:$0xff] %vm51_vm0, %v18084_v2  ;;  %85 = vst.msk [vmem:[#allocation2 + $0x108] sm:$0xff] %vm51_vm0, %v18084_v2 }
  0x12   :  { %86 = vst.msk [vmem:[#allocation2 + $0x110] sm:$0xff] %vm51_vm0, %v18084_v2  ;;  %87 = vst.msk [vmem:[#allocation2 + $0x118] sm:$0xff] %vm51_vm0, %v18084_v2 }
  0x13   :  { %88 = vst.msk [vmem:[#allocation2 + $0x120] sm:$0xff] %vm51_vm0, %v18084_v2  ;;  %89 = vst.msk [vmem:[#allocation2 + $0x128] sm:$0xff] %vm51_vm0, %v18084_v2 }
  0x14   :  { %90 = vst.msk [vmem:[#allocation2 + $0x130] sm:$0xff] %vm51_vm0, %v18084_v2  ;;  %91 = vst.msk [vmem:[#allocation2 + $0x138] sm:$0xff] %vm51_vm0, %v18084_v2 }
  0x15   :  { %92 = vst.msk [vmem:[#allocation2 + $0x140] sm:$0xff] %vm51_vm0, %v18084_v2  ;;  %93 = vst.msk [vmem:[#allocation2 + $0x148] sm:$0xff] %vm51_vm0, %v18084_v2 }
  0x16   :  { %94 = vst.msk [vmem:[#allocation2 + $0x150] sm:$0xff] %vm51_vm0, %v18084_v2  ;;  %95 = vst.msk [vmem:[#allocation2 + $0x158] sm:$0xff] %vm51_vm0, %v18084_v2 }
  0x17   :  { %96 = vst.msk [vmem:[#allocation2 + $0x160] sm:$0xff] %vm51_vm0, %v18084_v2  ;;  %97 = vst.msk [vmem:[#allocation2 + $0x168] sm:$0xff] %vm51_vm0, %v18084_v2 }
  0x18   :  { %98 = vst.msk [vmem:[#allocation2 + $0x170] sm:$0xff] %vm51_vm0, %v18084_v2  ;;  %99 = vst.msk [vmem:[#allocation2 + $0x178] sm:$0xff] %vm51_vm0, %v18084_v2 }
  0x19   :  { %100 = vst.msk [vmem:[#allocation2 + $0x180] sm:$0xff] %vm51_vm0, %v18084_v2  ;;  %101 = vst.msk [vmem:[#allocation2 + $0x188] sm:$0xff] %vm51_vm0, %v18084_v2 }
  0x1a   :  { %102 = vst.msk [vmem:[#allocation2 + $0x190] sm:$0xff] %vm51_vm0, %v18084_v2  ;;  %103 = vst.msk [vmem:[#allocation2 + $0x198] sm:$0xff] %vm51_vm0, %v18084_v2 }
  0x1b   :  { %104 = vst.msk [vmem:[#allocation2 + $0x1a0] sm:$0xff] %vm51_vm0, %v18084_v2  ;;  %105 = vst.msk [vmem:[#allocation2 + $0x1a8] sm:$0xff] %vm51_vm0, %v18084_v2 }
  0x1c   :  { %106 = vst.msk [vmem:[#allocation2 + $0x1b0] sm:$0xff] %vm51_vm0, %v18084_v2  ;;  %107 = vst.msk [vmem:[#allocation2 + $0x1b8] sm:$0xff] %vm51_vm0, %v18084_v2 }
  0x1d   :  { %108 = vst.msk [vmem:[#allocation2 + $0x1c0] sm:$0xff] %vm51_vm0, %v18084_v2  ;;  %109 = vst.msk [vmem:[#allocation2 + $0x1c8] sm:$0xff] %vm51_vm0, %v18084_v2 }
  0x1e   :  { %110 = vst.msk [vmem:[#allocation2 + $0x1d0] sm:$0xff] %vm51_vm0, %v18084_v2  ;;  %111 = vst.msk [vmem:[#allocation2 + $0x1d8] sm:$0xff] %vm51_vm0, %v18084_v2 }
  0x1f   :  { %112 = vst.msk [vmem:[#allocation2 + $0x1e0] sm:$0xff] %vm51_vm0, %v18084_v2  ;;  %113 = vst.msk [vmem:[#allocation2 + $0x1e8] sm:$0xff] %vm51_vm0, %v18084_v2 }
  0x20   :  { %114 = vst.msk [vmem:[#allocation2 + $0x1f0] sm:$0xff] %vm51_vm0, %v18084_v2  ;;  %115 = vst.msk [vmem:[#allocation2 + $0x1f8] sm:$0xff] %vm51_vm0, %v18084_v2 }
  0x21   :  { %116 = vst.msk [vmem:[#allocation2 + $0x200] sm:$0xff] %vm51_vm0, %v18084_v2  ;;  %117 = vst.msk [vmem:[#allocation2 + $0x208] sm:$0xff] %vm51_vm0, %v18084_v2 }
  0x22   :  { %118 = vst.msk [vmem:[#allocation2 + $0x210] sm:$0xff] %vm51_vm0, %v18084_v2  ;;  %119 = vst.msk [vmem:[#allocation2 + $0x218] sm:$0xff] %vm51_vm0, %v18084_v2 }
  0x23   :  { %120 = vst.msk [vmem:[#allocation2 + $0x220] sm:$0xff] %vm51_vm0, %v18084_v2  ;;  %121 = vst.msk [vmem:[#allocation2 + $0x228] sm:$0xff] %vm51_vm0, %v18084_v2 }
  0x24   :  { %122 = vst.msk [vmem:[#allocation2 + $0x230] sm:$0xff] %vm51_vm0, %v18084_v2  ;;  %123 = vst.msk [vmem:[#allocation2 + $0x238] sm:$0xff] %vm51_vm0, %v18084_v2 }
  0x25   :  { %124 = vst.msk [vmem:[#allocation2 + $0x240] sm:$0xff] %vm51_vm0, %v18084_v2  ;;  %125 = vst.msk [vmem:[#allocation2 + $0x248] sm:$0xff] %vm51_vm0, %v18084_v2 }
  0x26   :  { %126 = vst.msk [vmem:[#allocation2 + $0x250] sm:$0xff] %vm51_vm0, %v18084_v2  ;;  %127 = vst.msk [vmem:[#allocation2 + $0x258] sm:$0xff] %vm51_vm0, %v18084_v2 }
  0x27   :  { %128 = vst.msk [vmem:[#allocation2 + $0x260] sm:$0xff] %vm51_vm0, %v18084_v2  ;;  %129 = vst.msk [vmem:[#allocation2 + $0x268] sm:$0xff] %vm51_vm0, %v18084_v2 }
  0x28   :  { %130 = vst.msk [vmem:[#allocation2 + $0x270] sm:$0xff] %vm51_vm0, %v18084_v2  ;;  %131 = vst.msk [vmem:[#allocation2 + $0x278] sm:$0xff] %vm51_vm0, %v18084_v2 }
  0x29   :  { %132 = vst.msk [vmem:[#allocation2 + $0x280] sm:$0xff] %vm51_vm0, %v18084_v2  ;;  %133 = vst.msk [vmem:[#allocation2 + $0x288] sm:$0xff] %vm51_vm0, %v18084_v2 }
  0x2a   :  { %134 = vst.msk [vmem:[#allocation2 + $0x290] sm:$0xff] %vm51_vm0, %v18084_v2  ;;  %135 = vst.msk [vmem:[#allocation2 + $0x298] sm:$0xff] %vm51_vm0, %v18084_v2 }
  0x2b   :  { %136 = vst.msk [vmem:[#allocation2 + $0x2a0] sm:$0xff] %vm51_vm0, %v18084_v2  ;;  %137 = vst.msk [vmem:[#allocation2 + $0x2a8] sm:$0xff] %vm51_vm0, %v18084_v2 }
  0x2c   :  { %138 = vst.msk [vmem:[#allocation2 + $0x2b0] sm:$0xff] %vm51_vm0, %v18084_v2  ;;  %139 = vst.msk [vmem:[#allocation2 + $0x2b8] sm:$0xff] %vm51_vm0, %v18084_v2 }
  0x2d   :  { %140 = vst.msk [vmem:[#allocation2 + $0x2c0] sm:$0xff] %vm51_vm0, %v18084_v2  ;;  %141 = vst.msk [vmem:[#allocation2 + $0x2c8] sm:$0xff] %vm51_vm0, %v18084_v2 }
  0x2e   :  { %142 = vst.msk [vmem:[#allocation2 + $0x2d0] sm:$0xff] %vm51_vm0, %v18084_v2  ;;  %143 = vst.msk [vmem:[#allocation2 + $0x2d8] sm:$0xff] %vm51_vm0, %v18084_v2 }
  0x2f   :  { %144 = vst.msk [vmem:[#allocation2 + $0x2e0] sm:$0xff] %vm51_vm0, %v18084_v2  ;;  %145 = vst.msk [vmem:[#allocation2 + $0x2e8] sm:$0xff] %vm51_vm0, %v18084_v2 }
  0x30   :  { %146 = vst.msk [vmem:[#allocation2 + $0x2f0] sm:$0xff] %vm51_vm0, %v18084_v2  ;;  %147 = vst.msk [vmem:[#allocation2 + $0x2f8] sm:$0xff] %vm51_vm0, %v18084_v2 }
  0x31   :  { %148 = vst.msk [vmem:[#allocation2 + $0x300] sm:$0xff] %vm51_vm0, %v18084_v2  ;;  %149 = vst.msk [vmem:[#allocation2 + $0x308] sm:$0xff] %vm51_vm0, %v18084_v2 }
  0x32   :  { %150 = vst.msk [vmem:[#allocation2 + $0x310] sm:$0xff] %vm51_vm0, %v18084_v2  ;;  %151 = vst.msk [vmem:[#allocation2 + $0x318] sm:$0xff] %vm51_vm0, %v18084_v2 }
  0x33   :  { %152 = vst.msk [vmem:[#allocation2 + $0x320] sm:$0xff] %vm51_vm0, %v18084_v2  ;;  %153 = vst.msk [vmem:[#allocation2 + $0x328] sm:$0xff] %vm51_vm0, %v18084_v2 }
  0x34   :  { %154 = vst.msk [vmem:[#allocation2 + $0x330] sm:$0xff] %vm51_vm0, %v18084_v2  ;;  %155 = vst.msk [vmem:[#allocation2 + $0x338] sm:$0xff] %vm51_vm0, %v18084_v2 }
  0x35   :  { %156 = vst.msk [vmem:[#allocation2 + $0x340] sm:$0xff] %vm51_vm0, %v18084_v2  ;;  %157 = vst.msk [vmem:[#allocation2 + $0x348] sm:$0xff] %vm51_vm0, %v18084_v2 }
  0x36   :  { %158 = vst.msk [vmem:[#allocation2 + $0x350] sm:$0xff] %vm51_vm0, %v18084_v2  ;;  %159 = vst.msk [vmem:[#allocation2 + $0x358] sm:$0xff] %vm51_vm0, %v18084_v2 }
  0x37   :  { %160 = vst.msk [vmem:[#allocation2 + $0x360] sm:$0xff] %vm51_vm0, %v18084_v2  ;;  %161 = vst.msk [vmem:[#allocation2 + $0x368] sm:$0xff] %vm51_vm0, %v18084_v2 }
  0x38   :  { %162 = vst.msk [vmem:[#allocation2 + $0x370] sm:$0xff] %vm51_vm0, %v18084_v2  ;;  %163 = vst.msk [vmem:[#allocation2 + $0x378] sm:$0xff] %vm51_vm0, %v18084_v2 }
  0x39   :  { %164 = vst.msk [vmem:[#allocation2 + $0x380] sm:$0xff] %vm51_vm0, %v18084_v2  ;;  %165 = vst.msk [vmem:[#allocation2 + $0x388] sm:$0xff] %vm51_vm0, %v18084_v2 }
  0x3a   :  { %166 = vst.msk [vmem:[#allocation2 + $0x390] sm:$0xff] %vm51_vm0, %v18084_v2  ;;  %167 = vst.msk [vmem:[#allocation2 + $0x398] sm:$0xff] %vm51_vm0, %v18084_v2 }
  0x3b   :  { %168 = vst.msk [vmem:[#allocation2 + $0x3a0] sm:$0xff] %vm51_vm0, %v18084_v2  ;;  %169 = vst.msk [vmem:[#allocation2 + $0x3a8] sm:$0xff] %vm51_vm0, %v18084_v2 }
  0x3c   :  { %170 = vst.msk [vmem:[#allocation2 + $0x3b0] sm:$0xff] %vm51_vm0, %v18084_v2  ;;  %171 = vst.msk [vmem:[#allocation2 + $0x3b8] sm:$0xff] %vm51_vm0, %v18084_v2 }
  0x3d   :  { %172 = vst.msk [vmem:[#allocation2 + $0x3c0] sm:$0xff] %vm51_vm0, %v18084_v2  ;;  %173 = vst.msk [vmem:[#allocation2 + $0x3c8] sm:$0xff] %vm51_vm0, %v18084_v2 }
  0x3e   :  { %174 = vst.msk [vmem:[#allocation2 + $0x3d0] sm:$0xff] %vm51_vm0, %v18084_v2  ;;  %175 = vst.msk [vmem:[#allocation2 + $0x3d8] sm:$0xff] %vm51_vm0, %v18084_v2 }
  0x3f   :  { %176 = vst.msk [vmem:[#allocation2 + $0x3e0] sm:$0xff] %vm51_vm0, %v18084_v2  ;;  %177 = vst.msk [vmem:[#allocation2 + $0x3e8] sm:$0xff] %vm51_vm0, %v18084_v2 }
  0x40   :  { %178 = vst.msk [vmem:[#allocation2 + $0x3f0] sm:$0xff] %vm51_vm0, %v18084_v2  ;;  %179 = vst.msk [vmem:[#allocation2 + $0x3f8] sm:$0xff] %vm51_vm0, %v18084_v2 }
  0x41   :  { %180 = vst.msk [vmem:[#allocation2 + $0x400] sm:$0xff] %vm51_vm0, %v18084_v2  ;;  %181 = vst.msk [vmem:[#allocation2 + $0x408] sm:$0xff] %vm51_vm0, %v18084_v2 }
  0x42   :  { %182 = vst.msk [vmem:[#allocation2 + $0x410] sm:$0xff] %vm51_vm0, %v18084_v2  ;;  %183 = vst.msk [vmem:[#allocation2 + $0x418] sm:$0xff] %vm51_vm0, %v18084_v2 }
  0x43   :  { %184 = vst.msk [vmem:[#allocation2 + $0x420] sm:$0xff] %vm51_vm0, %v18084_v2  ;;  %185 = vst.msk [vmem:[#allocation2 + $0x428] sm:$0xff] %vm51_vm0, %v18084_v2 }
  0x44   :  { %186 = vst.msk [vmem:[#allocation2 + $0x430] sm:$0xff] %vm51_vm0, %v18084_v2  ;;  %187 = vst.msk [vmem:[#allocation2 + $0x438] sm:$0xff] %vm51_vm0, %v18084_v2 }
  0x45   :  { %188 = vst.msk [vmem:[#allocation2 + $0x440] sm:$0xff] %vm51_vm0, %v18084_v2  ;;  %189 = vst.msk [vmem:[#allocation2 + $0x448] sm:$0xff] %vm51_vm0, %v18084_v2 }
  0x46   :  { %190 = vst.msk [vmem:[#allocation2 + $0x450] sm:$0xff] %vm51_vm0, %v18084_v2  ;;  %191 = vst.msk [vmem:[#allocation2 + $0x458] sm:$0xff] %vm51_vm0, %v18084_v2 }
  0x47   :  { %192 = vst.msk [vmem:[#allocation2 + $0x460] sm:$0xff] %vm51_vm0, %v18084_v2  ;;  %193 = vst.msk [vmem:[#allocation2 + $0x468] sm:$0xff] %vm51_vm0, %v18084_v2 }
  0x48   :  { %194 = vst.msk [vmem:[#allocation2 + $0x470] sm:$0xff] %vm51_vm0, %v18084_v2  ;;  %195 = vst.msk [vmem:[#allocation2 + $0x478] sm:$0xff] %vm51_vm0, %v18084_v2 }
  0x49   :  { %196 = vst.msk [vmem:[#allocation2 + $0x480] sm:$0xff] %vm51_vm0, %v18084_v2  ;;  %197 = vst.msk [vmem:[#allocation2 + $0x488] sm:$0xff] %vm51_vm0, %v18084_v2 }
  0x4a   :  { %198 = vst.msk [vmem:[#allocation2 + $0x490] sm:$0xff] %vm51_vm0, %v18084_v2  ;;  %199 = vst.msk [vmem:[#allocation2 + $0x498] sm:$0xff] %vm51_vm0, %v18084_v2 }
  0x4b   :  { %200 = vst.msk [vmem:[#allocation2 + $0x4a0] sm:$0xff] %vm51_vm0, %v18084_v2  ;;  %201 = vst.msk [vmem:[#allocation2 + $0x4a8] sm:$0xff] %vm51_vm0, %v18084_v2 }
  0x4c   :  { %202 = vst.msk [vmem:[#allocation2 + $0x4b0] sm:$0xff] %vm51_vm0, %v18084_v2  ;;  %203 = vst.msk [vmem:[#allocation2 + $0x4b8] sm:$0xff] %vm51_vm0, %v18084_v2 }
  0x4d   :  { %204 = vst.msk [vmem:[#allocation2 + $0x4c0] sm:$0xff] %vm51_vm0, %v18084_v2  ;;  %205 = vst.msk [vmem:[#allocation2 + $0x4c8] sm:$0xff] %vm51_vm0, %v18084_v2 }
  0x4e   :  { %206 = vst.msk [vmem:[#allocation2 + $0x4d0] sm:$0xff] %vm51_vm0, %v18084_v2  ;;  %207 = vst.msk [vmem:[#allocation2 + $0x4d8] sm:$0xff] %vm51_vm0, %v18084_v2 }
  0x4f   :  { %208 = vst.msk [vmem:[#allocation2 + $0x4e0] sm:$0xff] %vm51_vm0, %v18084_v2  ;;  %209 = vst.msk [vmem:[#allocation2 + $0x4e8] sm:$0xff] %vm51_vm0, %v18084_v2 }
  0x50   :  { %210 = vst.msk [vmem:[#allocation2 + $0x4f0] sm:$0xff] %vm51_vm0, %v18084_v2  ;;  %211 = vst.msk [vmem:[#allocation2 + $0x4f8] sm:$0xff] %vm51_vm0, %v18084_v2 }
  0x51   :  { %212 = vst.msk [vmem:[#allocation2 + $0x500] sm:$0xff] %vm51_vm0, %v18084_v2  ;;  %213 = vst.msk [vmem:[#allocation2 + $0x508] sm:$0xff] %vm51_vm0, %v18084_v2 }
  0x52   :  { %214 = vst.msk [vmem:[#allocation2 + $0x510] sm:$0xff] %vm51_vm0, %v18084_v2  ;;  %215 = vst.msk [vmem:[#allocation2 + $0x518] sm:$0xff] %vm51_vm0, %v18084_v2 }
  0x53   :  { %216 = vst.msk [vmem:[#allocation2 + $0x520] sm:$0xff] %vm51_vm0, %v18084_v2  ;;  %217 = vst.msk [vmem:[#allocation2 + $0x528] sm:$0xff] %vm51_vm0, %v18084_v2 }
  0x54   :  { %218 = vst.msk [vmem:[#allocation2 + $0x530] sm:$0xff] %vm51_vm0, %v18084_v2  ;;  %219 = vst.msk [vmem:[#allocation2 + $0x538] sm:$0xff] %vm51_vm0, %v18084_v2 }
  0x55   :  { %220 = vst.msk [vmem:[#allocation2 + $0x540] sm:$0xff] %vm51_vm0, %v18084_v2  ;;  %221 = vst.msk [vmem:[#allocation2 + $0x548] sm:$0xff] %vm51_vm0, %v18084_v2 }
  0x56   :  { %222 = vst.msk [vmem:[#allocation2 + $0x550] sm:$0xff] %vm51_vm0, %v18084_v2  ;;  %223 = vst.msk [vmem:[#allocation2 + $0x558] sm:$0xff] %vm51_vm0, %v18084_v2 }
  0x57   :  { %224 = vst.msk [vmem:[#allocation2 + $0x560] sm:$0xff] %vm51_vm0, %v18084_v2  ;;  %225 = vst.msk [vmem:[#allocation2 + $0x568] sm:$0xff] %vm51_vm0, %v18084_v2 }
  0x58   :  { %226 = vst.msk [vmem:[#allocation2 + $0x570] sm:$0xff] %vm51_vm0, %v18084_v2  ;;  %227 = vst.msk [vmem:[#allocation2 + $0x578] sm:$0xff] %vm51_vm0, %v18084_v2 }
  0x59   :  { %228 = vst.msk [vmem:[#allocation2 + $0x580] sm:$0xff] %vm51_vm0, %v18084_v2  ;;  %229 = vst.msk [vmem:[#allocation2 + $0x588] sm:$0xff] %vm51_vm0, %v18084_v2 }
  0x5a   :  { %230 = vst.msk [vmem:[#allocation2 + $0x590] sm:$0xff] %vm51_vm0, %v18084_v2  ;;  %231 = vst.msk [vmem:[#allocation2 + $0x598] sm:$0xff] %vm51_vm0, %v18084_v2 }
  0x5b   :  { %232 = vst.msk [vmem:[#allocation2 + $0x5a0] sm:$0xff] %vm51_vm0, %v18084_v2  ;;  %233 = vst.msk [vmem:[#allocation2 + $0x5a8] sm:$0xff] %vm51_vm0, %v18084_v2 }
  0x5c   :  { %234 = vst.msk [vmem:[#allocation2 + $0x5b0] sm:$0xff] %vm51_vm0, %v18084_v2  ;;  %235 = vst.msk [vmem:[#allocation2 + $0x5b8] sm:$0xff] %vm51_vm0, %v18084_v2 }
  0x5d   :  { %236 = vst.msk [vmem:[#allocation2 + $0x5c0] sm:$0xff] %vm51_vm0, %v18084_v2  ;;  %237 = vst.msk [vmem:[#allocation2 + $0x5c8] sm:$0xff] %vm51_vm0, %v18084_v2 }
  0x5e   :  { %238 = vst.msk [vmem:[#allocation2 + $0x5d0] sm:$0xff] %vm51_vm0, %v18084_v2  ;;  %239 = vst.msk [vmem:[#allocation2 + $0x5d8] sm:$0xff] %vm51_vm0, %v18084_v2 }
  0x5f   :  { %240 = vst.msk [vmem:[#allocation2 + $0x5e0] sm:$0xff] %vm51_vm0, %v18084_v2  ;;  %241 = vst.msk [vmem:[#allocation2 + $0x5e8] sm:$0xff] %vm51_vm0, %v18084_v2 }
  0x60   :  { %242 = vst.msk [vmem:[#allocation2 + $0x5f0] sm:$0xff] %vm51_vm0, %v18084_v2  ;;  %243 = vst.msk [vmem:[#allocation2 + $0x5f8] sm:$0xff] %vm51_vm0, %v18084_v2 }
  0x61   :  { %244 = vst.msk [vmem:[#allocation2 + $0x600] sm:$0xff] %vm51_vm0, %v18084_v2  ;;  %245 = vst.msk [vmem:[#allocation2 + $0x608] sm:$0xff] %vm51_vm0, %v18084_v2 }
  0x62   :  { %246 = vst.msk [vmem:[#allocation2 + $0x610] sm:$0xff] %vm51_vm0, %v18084_v2  ;;  %247 = vst.msk [vmem:[#allocation2 + $0x618] sm:$0xff] %vm51_vm0, %v18084_v2 }
  0x63   :  { %248 = vst.msk [vmem:[#allocation2 + $0x620] sm:$0xff] %vm51_vm0, %v18084_v2  ;;  %249 = vst.msk [vmem:[#allocation2 + $0x628] sm:$0xff] %vm51_vm0, %v18084_v2 }
  0x64   :  { %250 = vst.msk [vmem:[#allocation2 + $0x630] sm:$0xff] %vm51_vm0, %v18084_v2  ;;  %251 = vst.msk [vmem:[#allocation2 + $0x638] sm:$0xff] %vm51_vm0, %v18084_v2 }
  0x65   :  { %252 = vst.msk [vmem:[#allocation2 + $0x640] sm:$0xff] %vm51_vm0, %v18084_v2  ;;  %253 = vst.msk [vmem:[#allocation2 + $0x648] sm:$0xff] %vm51_vm0, %v18084_v2 }
  0x66   :  { %254 = vst.msk [vmem:[#allocation2 + $0x650] sm:$0xff] %vm51_vm0, %v18084_v2  ;;  %255 = vst.msk [vmem:[#allocation2 + $0x658] sm:$0xff] %vm51_vm0, %v18084_v2 }
  0x67   :  { %256 = vst.msk [vmem:[#allocation2 + $0x660] sm:$0xff] %vm51_vm0, %v18084_v2  ;;  %257 = vst.msk [vmem:[#allocation2 + $0x668] sm:$0xff] %vm51_vm0, %v18084_v2 }
  0x68   :  { %258 = vst.msk [vmem:[#allocation2 + $0x670] sm:$0xff] %vm51_vm0, %v18084_v2  ;;  %259 = vst.msk [vmem:[#allocation2 + $0x678] sm:$0xff] %vm51_vm0, %v18084_v2 }
  0x69   :  { %260 = vst.msk [vmem:[#allocation2 + $0x680] sm:$0xff] %vm51_vm0, %v18084_v2  ;;  %261 = vst.msk [vmem:[#allocation2 + $0x688] sm:$0xff] %vm51_vm0, %v18084_v2 }
  0x6a   :  { %262 = vst.msk [vmem:[#allocation2 + $0x690] sm:$0xff] %vm51_vm0, %v18084_v2  ;;  %263 = vst.msk [vmem:[#allocation2 + $0x698] sm:$0xff] %vm51_vm0, %v18084_v2 }
  0x6b   :  { %264 = vst.msk [vmem:[#allocation2 + $0x6a0] sm:$0xff] %vm51_vm0, %v18084_v2  ;;  %265 = vst.msk [vmem:[#allocation2 + $0x6a8] sm:$0xff] %vm51_vm0, %v18084_v2 }
  0x6c   :  { %266 = vst.msk [vmem:[#allocation2 + $0x6b0] sm:$0xff] %vm51_vm0, %v18084_v2  ;;  %267 = vst.msk [vmem:[#allocation2 + $0x6b8] sm:$0xff] %vm51_vm0, %v18084_v2 }
  0x6d   :  { %268 = vst.msk [vmem:[#allocation2 + $0x6c0] sm:$0xff] %vm51_vm0, %v18084_v2  ;;  %269 = vst.msk [vmem:[#allocation2 + $0x6c8] sm:$0xff] %vm51_vm0, %v18084_v2 }
  0x6e   :  { %270 = vst.msk [vmem:[#allocation2 + $0x6d0] sm:$0xff] %vm51_vm0, %v18084_v2  ;;  %271 = vst.msk [vmem:[#allocation2 + $0x6d8] sm:$0xff] %vm51_vm0, %v18084_v2 }
  0x6f   :  { %272 = vst.msk [vmem:[#allocation2 + $0x6e0] sm:$0xff] %vm51_vm0, %v18084_v2  ;;  %273 = vst.msk [vmem:[#allocation2 + $0x6e8] sm:$0xff] %vm51_vm0, %v18084_v2 }
  0x70   :  { %274 = vst.msk [vmem:[#allocation2 + $0x6f0] sm:$0xff] %vm51_vm0, %v18084_v2  ;;  %275 = vst.msk [vmem:[#allocation2 + $0x6f8] sm:$0xff] %vm51_vm0, %v18084_v2 }
  0x71   :  { %276 = vst.msk [vmem:[#allocation2 + $0x700] sm:$0xff] %vm51_vm0, %v18084_v2  ;;  %277 = vst.msk [vmem:[#allocation2 + $0x708] sm:$0xff] %vm51_vm0, %v18084_v2 }
  0x72   :  { %278 = vst.msk [vmem:[#allocation2 + $0x710] sm:$0xff] %vm51_vm0, %v18084_v2  ;;  %279 = vst.msk [vmem:[#allocation2 + $0x718] sm:$0xff] %vm51_vm0, %v18084_v2 }
  0x73   :  { %280 = vst.msk [vmem:[#allocation2 + $0x720] sm:$0xff] %vm51_vm0, %v18084_v2  ;;  %281 = vst.msk [vmem:[#allocation2 + $0x728] sm:$0xff] %vm51_vm0, %v18084_v2 }
  0x74   :  { %282 = vst.msk [vmem:[#allocation2 + $0x730] sm:$0xff] %vm51_vm0, %v18084_v2  ;;  %283 = vst.msk [vmem:[#allocation2 + $0x738] sm:$0xff] %vm51_vm0, %v18084_v2 }
  0x75   :  { %284 = vst.msk [vmem:[#allocation2 + $0x740] sm:$0xff] %vm51_vm0, %v18084_v2  ;;  %285 = vst.msk [vmem:[#allocation2 + $0x748] sm:$0xff] %vm51_vm0, %v18084_v2 }
  0x76   :  { %286 = vst.msk [vmem:[#allocation2 + $0x750] sm:$0xff] %vm51_vm0, %v18084_v2  ;;  %287 = vst.msk [vmem:[#allocation2 + $0x758] sm:$0xff] %vm51_vm0, %v18084_v2 }
  0x77   :  { %288 = vst.msk [vmem:[#allocation2 + $0x760] sm:$0xff] %vm51_vm0, %v18084_v2  ;;  %289 = vst.msk [vmem:[#allocation2 + $0x768] sm:$0xff] %vm51_vm0, %v18084_v2 }
  0x78   :  { %290 = vst.msk [vmem:[#allocation2 + $0x770] sm:$0xff] %vm51_vm0, %v18084_v2  ;;  %291 = vst.msk [vmem:[#allocation2 + $0x778] sm:$0xff] %vm51_vm0, %v18084_v2 }
  0x79   :  { %292 = vst.msk [vmem:[#allocation2 + $0x780] sm:$0xff] %vm51_vm0, %v18084_v2  ;;  %293 = vst.msk [vmem:[#allocation2 + $0x788] sm:$0xff] %vm51_vm0, %v18084_v2 }
  0x7a   :  { %294 = vst.msk [vmem:[#allocation2 + $0x790] sm:$0xff] %vm51_vm0, %v18084_v2  ;;  %295 = vst.msk [vmem:[#allocation2 + $0x798] sm:$0xff] %vm51_vm0, %v18084_v2 }
  0x7b   :  { %296 = vst.msk [vmem:[#allocation2 + $0x7a0] sm:$0xff] %vm51_vm0, %v18084_v2  ;;  %297 = vst.msk [vmem:[#allocation2 + $0x7a8] sm:$0xff] %vm51_vm0, %v18084_v2 }
  0x7c   :  { %298 = vst.msk [vmem:[#allocation2 + $0x7b0] sm:$0xff] %vm51_vm0, %v18084_v2  ;;  %299 = vst.msk [vmem:[#allocation2 + $0x7b8] sm:$0xff] %vm51_vm0, %v18084_v2 }
  0x7d   :  { %300 = vst.msk [vmem:[#allocation2 + $0x7c0] sm:$0xff] %vm51_vm0, %v18084_v2  ;;  %301 = vst.msk [vmem:[#allocation2 + $0x7c8] sm:$0xff] %vm51_vm0, %v18084_v2 }
  0x7e   :  { %302 = vst.msk [vmem:[#allocation2 + $0x7d0] sm:$0xff] %vm51_vm0, %v18084_v2  ;;  %303 = vst.msk [vmem:[#allocation2 + $0x7d8] sm:$0xff] %vm51_vm0, %v18084_v2 }
  0x7f   :  { %304 = vst.msk [vmem:[#allocation2 + $0x7e0] sm:$0xff] %vm51_vm0, %v18084_v2  ;;  %305 = vst.msk [vmem:[#allocation2 + $0x7e8] sm:$0xff] %vm51_vm0, %v18084_v2 }
  0x80   :  { %306 = vst.msk [vmem:[#allocation2 + $0x7f0] sm:$0xff] %vm51_vm0, %v18084_v2  ;;  %307 = vst.msk [vmem:[#allocation2 + $0x7f8] sm:$0xff] %vm51_vm0, %v18084_v2 }
  0x81   :  { %308 = vst.msk [vmem:[#allocation2 + $0x800] sm:$0xff] %vm51_vm0, %v18084_v2  ;;  %309 = vst.msk [vmem:[#allocation2 + $0x808] sm:$0xff] %vm51_vm0, %v18084_v2 }
  0x82   :  { %310 = vst.msk [vmem:[#allocation2 + $0x810] sm:$0xff] %vm51_vm0, %v18084_v2  ;;  %311 = vst.msk [vmem:[#allocation2 + $0x818] sm:$0xff] %vm51_vm0, %v18084_v2 }
  0x83   :  { %312 = vst.msk [vmem:[#allocation2 + $0x820] sm:$0xff] %vm51_vm0, %v18084_v2  ;;  %313 = vst.msk [vmem:[#allocation2 + $0x828] sm:$0xff] %vm51_vm0, %v18084_v2 }
  0x84   :  { %314 = vst.msk [vmem:[#allocation2 + $0x830] sm:$0xff] %vm51_vm0, %v18084_v2  ;;  %315 = vst.msk [vmem:[#allocation2 + $0x838] sm:$0xff] %vm51_vm0, %v18084_v2 }
  0x85   :  { %316 = vst.msk [vmem:[#allocation2 + $0x840] sm:$0xff] %vm51_vm0, %v18084_v2  ;;  %317 = vst.msk [vmem:[#allocation2 + $0x848] sm:$0xff] %vm51_vm0, %v18084_v2 }
  0x86   :  { %318 = vst.msk [vmem:[#allocation2 + $0x850] sm:$0xff] %vm51_vm0, %v18084_v2  ;;  %319 = vst.msk [vmem:[#allocation2 + $0x858] sm:$0xff] %vm51_vm0, %v18084_v2 }
  0x87   :  { %320 = vst.msk [vmem:[#allocation2 + $0x860] sm:$0xff] %vm51_vm0, %v18084_v2  ;;  %321 = vst.msk [vmem:[#allocation2 + $0x868] sm:$0xff] %vm51_vm0, %v18084_v2 }
  0x88   :  { %322 = vst.msk [vmem:[#allocation2 + $0x870] sm:$0xff] %vm51_vm0, %v18084_v2  ;;  %323 = vst.msk [vmem:[#allocation2 + $0x878] sm:$0xff] %vm51_vm0, %v18084_v2 }
  0x89   :  { %324 = vst.msk [vmem:[#allocation2 + $0x880] sm:$0xff] %vm51_vm0, %v18084_v2  ;;  %325 = vst.msk [vmem:[#allocation2 + $0x888] sm:$0xff] %vm51_vm0, %v18084_v2 }
  0x8a   :  { %326 = vst.msk [vmem:[#allocation2 + $0x890] sm:$0xff] %vm51_vm0, %v18084_v2  ;;  %327 = vst.msk [vmem:[#allocation2 + $0x898] sm:$0xff] %vm51_vm0, %v18084_v2 }
  0x8b   :  { %328 = vst.msk [vmem:[#allocation2 + $0x8a0] sm:$0xff] %vm51_vm0, %v18084_v2  ;;  %329 = vst.msk [vmem:[#allocation2 + $0x8a8] sm:$0xff] %vm51_vm0, %v18084_v2 }
  0x8c   :  { %330 = vst.msk [vmem:[#allocation2 + $0x8b0] sm:$0xff] %vm51_vm0, %v18084_v2  ;;  %331 = vst.msk [vmem:[#allocation2 + $0x8b8] sm:$0xff] %vm51_vm0, %v18084_v2 }
  0x8d   :  { %332 = vst.msk [vmem:[#allocation2 + $0x8c0] sm:$0xff] %vm51_vm0, %v18084_v2  ;;  %333 = vst.msk [vmem:[#allocation2 + $0x8c8] sm:$0xff] %vm51_vm0, %v18084_v2 }
  0x8e   :  { %334 = vst.msk [vmem:[#allocation2 + $0x8d0] sm:$0xff] %vm51_vm0, %v18084_v2  ;;  %335 = vst.msk [vmem:[#allocation2 + $0x8d8] sm:$0xff] %vm51_vm0, %v18084_v2 }
  0x8f   :  { %336 = vst.msk [vmem:[#allocation2 + $0x8e0] sm:$0xff] %vm51_vm0, %v18084_v2  ;;  %337 = vst.msk [vmem:[#allocation2 + $0x8e8] sm:$0xff] %vm51_vm0, %v18084_v2 }
  0x90   :  { %338 = vst.msk [vmem:[#allocation2 + $0x8f0] sm:$0xff] %vm51_vm0, %v18084_v2  ;;  %339 = vst.msk [vmem:[#allocation2 + $0x8f8] sm:$0xff] %vm51_vm0, %v18084_v2 }
  0x91   :  { %340 = vst.msk [vmem:[#allocation2 + $0x900] sm:$0xff] %vm51_vm0, %v18084_v2  ;;  %341 = vst.msk [vmem:[#allocation2 + $0x908] sm:$0xff] %vm51_vm0, %v18084_v2 }
  0x92   :  { %342 = vst.msk [vmem:[#allocation2 + $0x910] sm:$0xff] %vm51_vm0, %v18084_v2  ;;  %343 = vst.msk [vmem:[#allocation2 + $0x918] sm:$0xff] %vm51_vm0, %v18084_v2 }
  0x93   :  { %344 = vst.msk [vmem:[#allocation2 + $0x920] sm:$0xff] %vm51_vm0, %v18084_v2  ;;  %345 = vst.msk [vmem:[#allocation2 + $0x928] sm:$0xff] %vm51_vm0, %v18084_v2 }
  0x94   :  { %346 = vst.msk [vmem:[#allocation2 + $0x930] sm:$0xff] %vm51_vm0, %v18084_v2  ;;  %347 = vst.msk [vmem:[#allocation2 + $0x938] sm:$0xff] %vm51_vm0, %v18084_v2 }
  0x95   :  { %348 = vst.msk [vmem:[#allocation2 + $0x940] sm:$0xff] %vm51_vm0, %v18084_v2  ;;  %349 = vst.msk [vmem:[#allocation2 + $0x948] sm:$0xff] %vm51_vm0, %v18084_v2 }
  0x96   :  { %350 = vst.msk [vmem:[#allocation2 + $0x950] sm:$0xff] %vm51_vm0, %v18084_v2  ;;  %351 = vst.msk [vmem:[#allocation2 + $0x958] sm:$0xff] %vm51_vm0, %v18084_v2 }
  0x97   :  { %352 = vst.msk [vmem:[#allocation2 + $0x960] sm:$0xff] %vm51_vm0, %v18084_v2  ;;  %353 = vst.msk [vmem:[#allocation2 + $0x968] sm:$0xff] %vm51_vm0, %v18084_v2 }
  0x98   :  { %354 = vst.msk [vmem:[#allocation2 + $0x970] sm:$0xff] %vm51_vm0, %v18084_v2  ;;  %355 = vst.msk [vmem:[#allocation2 + $0x978] sm:$0xff] %vm51_vm0, %v18084_v2 }
  0x99   :  { %356 = vst.msk [vmem:[#allocation2 + $0x980] sm:$0xff] %vm51_vm0, %v18084_v2  ;;  %357 = vst.msk [vmem:[#allocation2 + $0x988] sm:$0xff] %vm51_vm0, %v18084_v2 }
  0x9a   :  { %358 = vst.msk [vmem:[#allocation2 + $0x990] sm:$0xff] %vm51_vm0, %v18084_v2  ;;  %359 = vst.msk [vmem:[#allocation2 + $0x998] sm:$0xff] %vm51_vm0, %v18084_v2 }
  0x9b   :  { %360 = vst.msk [vmem:[#allocation2 + $0x9a0] sm:$0xff] %vm51_vm0, %v18084_v2  ;;  %361 = vst.msk [vmem:[#allocation2 + $0x9a8] sm:$0xff] %vm51_vm0, %v18084_v2 }
  0x9c   :  { %362 = vst.msk [vmem:[#allocation2 + $0x9b0] sm:$0xff] %vm51_vm0, %v18084_v2  ;;  %363 = vst.msk [vmem:[#allocation2 + $0x9b8] sm:$0xff] %vm51_vm0, %v18084_v2 }
  0x9d   :  { %364 = vst.msk [vmem:[#allocation2 + $0x9c0] sm:$0xff] %vm51_vm0, %v18084_v2  ;;  %365 = vst.msk [vmem:[#allocation2 + $0x9c8] sm:$0xff] %vm51_vm0, %v18084_v2 }
  0x9e   :  { %366 = vst.msk [vmem:[#allocation2 + $0x9d0] sm:$0xff] %vm51_vm0, %v18084_v2  ;;  %367 = vst.msk [vmem:[#allocation2 + $0x9d8] sm:$0xff] %vm51_vm0, %v18084_v2 }
  0x9f   :  { %368 = vst.msk [vmem:[#allocation2 + $0x9e0] sm:$0xff] %vm51_vm0, %v18084_v2  ;;  %369 = vst.msk [vmem:[#allocation2 + $0x9e8] sm:$0xff] %vm51_vm0, %v18084_v2 }
  0xa0   :  { %370 = vst.msk [vmem:[#allocation2 + $0x9f0] sm:$0xff] %vm51_vm0, %v18084_v2  ;;  %371 = vst.msk [vmem:[#allocation2 + $0x9f8] sm:$0xff] %vm51_vm0, %v18084_v2 }
  0xa1   :  { %372 = vst.msk [vmem:[#allocation2 + $0xa00] sm:$0xff] %vm51_vm0, %v18084_v2  ;;  %373 = vst.msk [vmem:[#allocation2 + $0xa08] sm:$0xff] %vm51_vm0, %v18084_v2 }
  0xa2   :  { %374 = vst.msk [vmem:[#allocation2 + $0xa10] sm:$0xff] %vm51_vm0, %v18084_v2  ;;  %375 = vst.msk [vmem:[#allocation2 + $0xa18] sm:$0xff] %vm51_vm0, %v18084_v2 }
  0xa3   :  { %376 = vst.msk [vmem:[#allocation2 + $0xa20] sm:$0xff] %vm51_vm0, %v18084_v2  ;;  %377 = vst.msk [vmem:[#allocation2 + $0xa28] sm:$0xff] %vm51_vm0, %v18084_v2 }
  0xa4   :  { %378 = vst.msk [vmem:[#allocation2 + $0xa30] sm:$0xff] %vm51_vm0, %v18084_v2  ;;  %379 = vst.msk [vmem:[#allocation2 + $0xa38] sm:$0xff] %vm51_vm0, %v18084_v2 }
  0xa5   :  { %380 = vst.msk [vmem:[#allocation2 + $0xa40] sm:$0xff] %vm51_vm0, %v18084_v2  ;;  %381 = vst.msk [vmem:[#allocation2 + $0xa48] sm:$0xff] %vm51_vm0, %v18084_v2 }
  0xa6   :  { %382 = vst.msk [vmem:[#allocation2 + $0xa50] sm:$0xff] %vm51_vm0, %v18084_v2  ;;  %383 = vst.msk [vmem:[#allocation2 + $0xa58] sm:$0xff] %vm51_vm0, %v18084_v2 }
  0xa7   :  { %384 = vst.msk [vmem:[#allocation2 + $0xa60] sm:$0xff] %vm51_vm0, %v18084_v2  ;;  %385 = vst.msk [vmem:[#allocation2 + $0xa68] sm:$0xff] %vm51_vm0, %v18084_v2 }
  0xa8   :  { %386 = vst.msk [vmem:[#allocation2 + $0xa70] sm:$0xff] %vm51_vm0, %v18084_v2  ;;  %387 = vst.msk [vmem:[#allocation2 + $0xa78] sm:$0xff] %vm51_vm0, %v18084_v2 }
  0xa9   :  { %388 = vst.msk [vmem:[#allocation2 + $0xa80] sm:$0xff] %vm51_vm0, %v18084_v2  ;;  %389 = vst.msk [vmem:[#allocation2 + $0xa88] sm:$0xff] %vm51_vm0, %v18084_v2 }
  0xaa   :  { %390 = vst.msk [vmem:[#allocation2 + $0xa90] sm:$0xff] %vm51_vm0, %v18084_v2  ;;  %391 = vst.msk [vmem:[#allocation2 + $0xa98] sm:$0xff] %vm51_vm0, %v18084_v2 }
  0xab   :  { %392 = vst.msk [vmem:[#allocation2 + $0xaa0] sm:$0xff] %vm51_vm0, %v18084_v2  ;;  %393 = vst.msk [vmem:[#allocation2 + $0xaa8] sm:$0xff] %vm51_vm0, %v18084_v2 }
  0xac   :  { %394 = vst.msk [vmem:[#allocation2 + $0xab0] sm:$0xff] %vm51_vm0, %v18084_v2  ;;  %395 = vst.msk [vmem:[#allocation2 + $0xab8] sm:$0xff] %vm51_vm0, %v18084_v2 }
  0xad   :  { %396 = vst.msk [vmem:[#allocation2 + $0xac0] sm:$0xff] %vm51_vm0, %v18084_v2  ;;  %397 = vst.msk [vmem:[#allocation2 + $0xac8] sm:$0xff] %vm51_vm0, %v18084_v2 }
  0xae   :  { %398 = vst.msk [vmem:[#allocation2 + $0xad0] sm:$0xff] %vm51_vm0, %v18084_v2  ;;  %399 = vst.msk [vmem:[#allocation2 + $0xad8] sm:$0xff] %vm51_vm0, %v18084_v2 }
  0xaf   :  { %400 = vst.msk [vmem:[#allocation2 + $0xae0] sm:$0xff] %vm51_vm0, %v18084_v2  ;;  %401 = vst.msk [vmem:[#allocation2 + $0xae8] sm:$0xff] %vm51_vm0, %v18084_v2 }
  0xb0   :  { %402 = vst.msk [vmem:[#allocation2 + $0xaf0] sm:$0xff] %vm51_vm0, %v18084_v2  ;;  %403 = vst.msk [vmem:[#allocation2 + $0xaf8] sm:$0xff] %vm51_vm0, %v18084_v2 }
  0xb1   :  { %404 = vst.msk [vmem:[#allocation2 + $0xb00] sm:$0xff] %vm51_vm0, %v18084_v2  ;;  %405 = vst.msk [vmem:[#allocation2 + $0xb08] sm:$0xff] %vm51_vm0, %v18084_v2 }
  0xb2   :  { %406 = vst.msk [vmem:[#allocation2 + $0xb10] sm:$0xff] %vm51_vm0, %v18084_v2  ;;  %407 = vst.msk [vmem:[#allocation2 + $0xb18] sm:$0xff] %vm51_vm0, %v18084_v2 }
  0xb3   :  { %408 = vst.msk [vmem:[#allocation2 + $0xb20] sm:$0xff] %vm51_vm0, %v18084_v2  ;;  %409 = vst.msk [vmem:[#allocation2 + $0xb28] sm:$0xff] %vm51_vm0, %v18084_v2 }
  0xb4   :  { %410 = vst.msk [vmem:[#allocation2 + $0xb30] sm:$0xff] %vm51_vm0, %v18084_v2  ;;  %411 = vst.msk [vmem:[#allocation2 + $0xb38] sm:$0xff] %vm51_vm0, %v18084_v2 }
  0xb5   :  { %412 = vst.msk [vmem:[#allocation2 + $0xb40] sm:$0xff] %vm51_vm0, %v18084_v2  ;;  %413 = vst.msk [vmem:[#allocation2 + $0xb48] sm:$0xff] %vm51_vm0, %v18084_v2 }
  0xb6   :  { %414 = vst.msk [vmem:[#allocation2 + $0xb50] sm:$0xff] %vm51_vm0, %v18084_v2  ;;  %415 = vst.msk [vmem:[#allocation2 + $0xb58] sm:$0xff] %vm51_vm0, %v18084_v2 }
  0xb7   :  { %416 = vst.msk [vmem:[#allocation2 + $0xb60] sm:$0xff] %vm51_vm0, %v18084_v2  ;;  %417 = vst.msk [vmem:[#allocation2 + $0xb68] sm:$0xff] %vm51_vm0, %v18084_v2 }
  0xb8   :  { %418 = vst.msk [vmem:[#allocation2 + $0xb70] sm:$0xff] %vm51_vm0, %v18084_v2  ;;  %419 = vst.msk [vmem:[#allocation2 + $0xb78] sm:$0xff] %vm51_vm0, %v18084_v2 }
  0xb9   :  { %420 = vst.msk [vmem:[#allocation2 + $0xb80] sm:$0xff] %vm51_vm0, %v18084_v2  ;;  %421 = vst.msk [vmem:[#allocation2 + $0xb88] sm:$0xff] %vm51_vm0, %v18084_v2 }
  0xba   :  { %422 = vst.msk [vmem:[#allocation2 + $0xb90] sm:$0xff] %vm51_vm0, %v18084_v2  ;;  %423 = vst.msk [vmem:[#allocation2 + $0xb98] sm:$0xff] %vm51_vm0, %v18084_v2 }
  0xbb   :  { %424 = vst.msk [vmem:[#allocation2 + $0xba0] sm:$0xff] %vm51_vm0, %v18084_v2  ;;  %425 = vst.msk [vmem:[#allocation2 + $0xba8] sm:$0xff] %vm51_vm0, %v18084_v2 }
  0xbc   :  { %426 = vst.msk [vmem:[#allocation2 + $0xbb0] sm:$0xff] %vm51_vm0, %v18084_v2  ;;  %427 = vst.msk [vmem:[#allocation2 + $0xbb8] sm:$0xff] %vm51_vm0, %v18084_v2 }
  0xbd   :  { %428 = vst.msk [vmem:[#allocation2 + $0xbc0] sm:$0xff] %vm51_vm0, %v18084_v2  ;;  %429 = vst.msk [vmem:[#allocation2 + $0xbc8] sm:$0xff] %vm51_vm0, %v18084_v2 }
  0xbe   :  { %430 = vst.msk [vmem:[#allocation2 + $0xbd0] sm:$0xff] %vm51_vm0, %v18084_v2  ;;  %431 = vst.msk [vmem:[#allocation2 + $0xbd8] sm:$0xff] %vm51_vm0, %v18084_v2 }
  0xbf   :  { %432 = vst.msk [vmem:[#allocation2 + $0xbe0] sm:$0xff] %vm51_vm0, %v18084_v2  ;;  %433 = vst.msk [vmem:[#allocation2 + $0xbe8] sm:$0xff] %vm51_vm0, %v18084_v2 }
  0xc0   :  { %434 = vst.msk [vmem:[#allocation2 + $0xbf0] sm:$0xff] %vm51_vm0, %v18084_v2  ;;  %435 = vst.msk [vmem:[#allocation2 + $0xbf8] sm:$0xff] %vm51_vm0, %v18084_v2 }
  0xc1   :  { %436 = vst.msk [vmem:[#allocation2 + $0xc00] sm:$0xff] %vm51_vm0, %v18084_v2  ;;  %437 = vst.msk [vmem:[#allocation2 + $0xc08] sm:$0xff] %vm51_vm0, %v18084_v2 }
  0xc2   :  { %438 = vst.msk [vmem:[#allocation2 + $0xc10] sm:$0xff] %vm51_vm0, %v18084_v2  ;;  %439 = vst.msk [vmem:[#allocation2 + $0xc18] sm:$0xff] %vm51_vm0, %v18084_v2 }
  0xc3   :  { %440 = vst.msk [vmem:[#allocation2 + $0xc20] sm:$0xff] %vm51_vm0, %v18084_v2  ;;  %441 = vst.msk [vmem:[#allocation2 + $0xc28] sm:$0xff] %vm51_vm0, %v18084_v2 }
  0xc4   :  { %442 = vst.msk [vmem:[#allocation2 + $0xc30] sm:$0xff] %vm51_vm0, %v18084_v2  ;;  %443 = vst.msk [vmem:[#allocation2 + $0xc38] sm:$0xff] %vm51_vm0, %v18084_v2 }
  0xc5   :  { %444 = vst.msk [vmem:[#allocation2 + $0xc40] sm:$0xff] %vm51_vm0, %v18084_v2  ;;  %445 = vst.msk [vmem:[#allocation2 + $0xc48] sm:$0xff] %vm51_vm0, %v18084_v2 }
  0xc6   :  { %446 = vst.msk [vmem:[#allocation2 + $0xc50] sm:$0xff] %vm51_vm0, %v18084_v2  ;;  %447 = vst.msk [vmem:[#allocation2 + $0xc58] sm:$0xff] %vm51_vm0, %v18084_v2 }
  0xc7   :  { %448 = vst.msk [vmem:[#allocation2 + $0xc60] sm:$0xff] %vm51_vm0, %v18084_v2  ;;  %449 = vst.msk [vmem:[#allocation2 + $0xc68] sm:$0xff] %vm51_vm0, %v18084_v2 }
  0xc8   :  { %450 = vst.msk [vmem:[#allocation2 + $0xc70] sm:$0xff] %vm51_vm0, %v18084_v2  ;;  %451 = vst.msk [vmem:[#allocation2 + $0xc78] sm:$0xff] %vm51_vm0, %v18084_v2 }
  0xc9   :  { %452 = vst.msk [vmem:[#allocation2 + $0xc80] sm:$0xff] %vm51_vm0, %v18084_v2  ;;  %453 = vst.msk [vmem:[#allocation2 + $0xc88] sm:$0xff] %vm51_vm0, %v18084_v2 }
  0xca   :  { %454 = vst.msk [vmem:[#allocation2 + $0xc90] sm:$0xff] %vm51_vm0, %v18084_v2  ;;  %455 = vst.msk [vmem:[#allocation2 + $0xc98] sm:$0xff] %vm51_vm0, %v18084_v2 }
  0xcb   :  { %456 = vst.msk [vmem:[#allocation2 + $0xca0] sm:$0xff] %vm51_vm0, %v18084_v2  ;;  %457 = vst.msk [vmem:[#allocation2 + $0xca8] sm:$0xff] %vm51_vm0, %v18084_v2 }
  0xcc   :  { %458 = vst.msk [vmem:[#allocation2 + $0xcb0] sm:$0xff] %vm51_vm0, %v18084_v2  ;;  %459 = vst.msk [vmem:[#allocation2 + $0xcb8] sm:$0xff] %vm51_vm0, %v18084_v2 }
  0xcd   :  { %460 = vst.msk [vmem:[#allocation2 + $0xcc0] sm:$0xff] %vm51_vm0, %v18084_v2  ;;  %461 = vst.msk [vmem:[#allocation2 + $0xcc8] sm:$0xff] %vm51_vm0, %v18084_v2 }
  0xce   :  { %462 = vst.msk [vmem:[#allocation2 + $0xcd0] sm:$0xff] %vm51_vm0, %v18084_v2  ;;  %463 = vst.msk [vmem:[#allocation2 + $0xcd8] sm:$0xff] %vm51_vm0, %v18084_v2 }
  0xcf   :  { %464 = vst.msk [vmem:[#allocation2 + $0xce0] sm:$0xff] %vm51_vm0, %v18084_v2  ;;  %465 = vst.msk [vmem:[#allocation2 + $0xce8] sm:$0xff] %vm51_vm0, %v18084_v2 }
  0xd0   :  { %466 = vst.msk [vmem:[#allocation2 + $0xcf0] sm:$0xff] %vm51_vm0, %v18084_v2  ;;  %467 = vst.msk [vmem:[#allocation2 + $0xcf8] sm:$0xff] %vm51_vm0, %v18084_v2 }
  0xd1   :  { %468 = vst.msk [vmem:[#allocation2 + $0xd00] sm:$0xff] %vm51_vm0, %v18084_v2  ;;  %469 = vst.msk [vmem:[#allocation2 + $0xd08] sm:$0xff] %vm51_vm0, %v18084_v2 }
  0xd2   :  { %470 = vst.msk [vmem:[#allocation2 + $0xd10] sm:$0xff] %vm51_vm0, %v18084_v2  ;;  %471 = vst.msk [vmem:[#allocation2 + $0xd18] sm:$0xff] %vm51_vm0, %v18084_v2 }
  0xd3   :  { %472 = vst.msk [vmem:[#allocation2 + $0xd20] sm:$0xff] %vm51_vm0, %v18084_v2  ;;  %473 = vst.msk [vmem:[#allocation2 + $0xd28] sm:$0xff] %vm51_vm0, %v18084_v2 }
  0xd4   :  { %474 = vst.msk [vmem:[#allocation2 + $0xd30] sm:$0xff] %vm51_vm0, %v18084_v2  ;;  %475 = vst.msk [vmem:[#allocation2 + $0xd38] sm:$0xff] %vm51_vm0, %v18084_v2 }
  0xd5   :  { %476 = vst.msk [vmem:[#allocation2 + $0xd40] sm:$0xff] %vm51_vm0, %v18084_v2  ;;  %477 = vst.msk [vmem:[#allocation2 + $0xd48] sm:$0xff] %vm51_vm0, %v18084_v2 }
  0xd6   :  { %478 = vst.msk [vmem:[#allocation2 + $0xd50] sm:$0xff] %vm51_vm0, %v18084_v2  ;;  %479 = vst.msk [vmem:[#allocation2 + $0xd58] sm:$0xff] %vm51_vm0, %v18084_v2 }
  0xd7   :  { %480 = vst.msk [vmem:[#allocation2 + $0xd60] sm:$0xff] %vm51_vm0, %v18084_v2  ;;  %481 = vst.msk [vmem:[#allocation2 + $0xd68] sm:$0xff] %vm51_vm0, %v18084_v2 }
  0xd8   :  { %482 = vst.msk [vmem:[#allocation2 + $0xd70] sm:$0xff] %vm51_vm0, %v18084_v2  ;;  %483 = vst.msk [vmem:[#allocation2 + $0xd78] sm:$0xff] %vm51_vm0, %v18084_v2 }
  0xd9   :  { %484 = vst.msk [vmem:[#allocation2 + $0xd80] sm:$0xff] %vm51_vm0, %v18084_v2  ;;  %485 = vst.msk [vmem:[#allocation2 + $0xd88] sm:$0xff] %vm51_vm0, %v18084_v2 }
  0xda   :  { %486 = vst.msk [vmem:[#allocation2 + $0xd90] sm:$0xff] %vm51_vm0, %v18084_v2  ;;  %487 = vst.msk [vmem:[#allocation2 + $0xd98] sm:$0xff] %vm51_vm0, %v18084_v2 }
  0xdb   :  { %488 = vst.msk [vmem:[#allocation2 + $0xda0] sm:$0xff] %vm51_vm0, %v18084_v2  ;;  %489 = vst.msk [vmem:[#allocation2 + $0xda8] sm:$0xff] %vm51_vm0, %v18084_v2 }
  0xdc   :  { %490 = vst.msk [vmem:[#allocation2 + $0xdb0] sm:$0xff] %vm51_vm0, %v18084_v2  ;;  %491 = vst.msk [vmem:[#allocation2 + $0xdb8] sm:$0xff] %vm51_vm0, %v18084_v2 }
  0xdd   :  { %492 = vst.msk [vmem:[#allocation2 + $0xdc0] sm:$0xff] %vm51_vm0, %v18084_v2  ;;  %493 = vst.msk [vmem:[#allocation2 + $0xdc8] sm:$0xff] %vm51_vm0, %v18084_v2 }
  0xde   :  { %494 = vst.msk [vmem:[#allocation2 + $0xdd0] sm:$0xff] %vm51_vm0, %v18084_v2  ;;  %495 = vst.msk [vmem:[#allocation2 + $0xdd8] sm:$0xff] %vm51_vm0, %v18084_v2 }
  0xdf   :  { %496 = vst.msk [vmem:[#allocation2 + $0xde0] sm:$0xff] %vm51_vm0, %v18084_v2  ;;  %497 = vst.msk [vmem:[#allocation2 + $0xde8] sm:$0xff] %vm51_vm0, %v18084_v2 }
  0xe0   :  { %498 = vst.msk [vmem:[#allocation2 + $0xdf0] sm:$0xff] %vm51_vm0, %v18084_v2  ;;  %499 = vst.msk [vmem:[#allocation2 + $0xdf8] sm:$0xff] %vm51_vm0, %v18084_v2 }
  0xe1   :  { %500 = vst.msk [vmem:[#allocation2 + $0xe00] sm:$0xff] %vm51_vm0, %v18084_v2  ;;  %501 = vst.msk [vmem:[#allocation2 + $0xe08] sm:$0xff] %vm51_vm0, %v18084_v2 }
  0xe2   :  { %502 = vst.msk [vmem:[#allocation2 + $0xe10] sm:$0xff] %vm51_vm0, %v18084_v2  ;;  %503 = vst.msk [vmem:[#allocation2 + $0xe18] sm:$0xff] %vm51_vm0, %v18084_v2 }
  0xe3   :  { %504 = vst.msk [vmem:[#allocation2 + $0xe20] sm:$0xff] %vm51_vm0, %v18084_v2  ;;  %505 = vst.msk [vmem:[#allocation2 + $0xe28] sm:$0xff] %vm51_vm0, %v18084_v2 }
  0xe4   :  { %506 = vst.msk [vmem:[#allocation2 + $0xe30] sm:$0xff] %vm51_vm0, %v18084_v2  ;;  %507 = vst.msk [vmem:[#allocation2 + $0xe38] sm:$0xff] %vm51_vm0, %v18084_v2 }
  0xe5   :  { %508 = vst.msk [vmem:[#allocation2 + $0xe40] sm:$0xff] %vm51_vm0, %v18084_v2  ;;  %509 = vst.msk [vmem:[#allocation2 + $0xe48] sm:$0xff] %vm51_vm0, %v18084_v2 }
  0xe6   :  { %510 = vst.msk [vmem:[#allocation2 + $0xe50] sm:$0xff] %vm51_vm0, %v18084_v2  ;;  %511 = vst.msk [vmem:[#allocation2 + $0xe58] sm:$0xff] %vm51_vm0, %v18084_v2 }
  0xe7   :  { %512 = vst.msk [vmem:[#allocation2 + $0xe60] sm:$0xff] %vm51_vm0, %v18084_v2  ;;  %513 = vst.msk [vmem:[#allocation2 + $0xe68] sm:$0xff] %vm51_vm0, %v18084_v2 }
  0xe8   :  { %514 = vst.msk [vmem:[#allocation2 + $0xe70] sm:$0xff] %vm51_vm0, %v18084_v2  ;;  %515 = vst.msk [vmem:[#allocation2 + $0xe78] sm:$0xff] %vm51_vm0, %v18084_v2 }
  0xe9   :  { %516 = vst.msk [vmem:[#allocation2 + $0xe80] sm:$0xff] %vm51_vm0, %v18084_v2  ;;  %517 = vst.msk [vmem:[#allocation2 + $0xe88] sm:$0xff] %vm51_vm0, %v18084_v2 }
  0xea   :  { %518 = vst.msk [vmem:[#allocation2 + $0xe90] sm:$0xff] %vm51_vm0, %v18084_v2  ;;  %519 = vst.msk [vmem:[#allocation2 + $0xe98] sm:$0xff] %vm51_vm0, %v18084_v2 }
  0xeb   :  { %520 = vst.msk [vmem:[#allocation2 + $0xea0] sm:$0xff] %vm51_vm0, %v18084_v2  ;;  %521 = vst.msk [vmem:[#allocation2 + $0xea8] sm:$0xff] %vm51_vm0, %v18084_v2 }
  0xec   :  { %522 = vst.msk [vmem:[#allocation2 + $0xeb0] sm:$0xff] %vm51_vm0, %v18084_v2  ;;  %523 = vst.msk [vmem:[#allocation2 + $0xeb8] sm:$0xff] %vm51_vm0, %v18084_v2 }
  0xed   :  { %524 = vst.msk [vmem:[#allocation2 + $0xec0] sm:$0xff] %vm51_vm0, %v18084_v2  ;;  %525 = vst.msk [vmem:[#allocation2 + $0xec8] sm:$0xff] %vm51_vm0, %v18084_v2 }
  0xee   :  { %526 = vst.msk [vmem:[#allocation2 + $0xed0] sm:$0xff] %vm51_vm0, %v18084_v2  ;;  %527 = vst.msk [vmem:[#allocation2 + $0xed8] sm:$0xff] %vm51_vm0, %v18084_v2 }
  0xef   :  { %528 = vst.msk [vmem:[#allocation2 + $0xee0] sm:$0xff] %vm51_vm0, %v18084_v2  ;;  %529 = vst.msk [vmem:[#allocation2 + $0xee8] sm:$0xff] %vm51_vm0, %v18084_v2 }
  0xf0   :  { %530 = vst.msk [vmem:[#allocation2 + $0xef0] sm:$0xff] %vm51_vm0, %v18084_v2  ;;  %531 = vst.msk [vmem:[#allocation2 + $0xef8] sm:$0xff] %vm51_vm0, %v18084_v2 }
  0xf1   :  { %532 = vst.msk [vmem:[#allocation2 + $0xf00] sm:$0xff] %vm51_vm0, %v18084_v2  ;;  %533 = vst.msk [vmem:[#allocation2 + $0xf08] sm:$0xff] %vm51_vm0, %v18084_v2 }
  0xf2   :  { %534 = vst.msk [vmem:[#allocation2 + $0xf10] sm:$0xff] %vm51_vm0, %v18084_v2  ;;  %535 = vst.msk [vmem:[#allocation2 + $0xf18] sm:$0xff] %vm51_vm0, %v18084_v2 }
  0xf3   :  { %536 = vst.msk [vmem:[#allocation2 + $0xf20] sm:$0xff] %vm51_vm0, %v18084_v2  ;;  %537 = vst.msk [vmem:[#allocation2 + $0xf28] sm:$0xff] %vm51_vm0, %v18084_v2 }
  0xf4   :  { %538 = vst.msk [vmem:[#allocation2 + $0xf30] sm:$0xff] %vm51_vm0, %v18084_v2  ;;  %539 = vst.msk [vmem:[#allocation2 + $0xf38] sm:$0xff] %vm51_vm0, %v18084_v2 }
  0xf5   :  { %540 = vst.msk [vmem:[#allocation2 + $0xf40] sm:$0xff] %vm51_vm0, %v18084_v2  ;;  %541 = vst.msk [vmem:[#allocation2 + $0xf48] sm:$0xff] %vm51_vm0, %v18084_v2 }
  0xf6   :  { %542 = vst.msk [vmem:[#allocation2 + $0xf50] sm:$0xff] %vm51_vm0, %v18084_v2  ;;  %543 = vst.msk [vmem:[#allocation2 + $0xf58] sm:$0xff] %vm51_vm0, %v18084_v2 }
  0xf7   :  { %544 = vst.msk [vmem:[#allocation2 + $0xf60] sm:$0xff] %vm51_vm0, %v18084_v2  ;;  %545 = vst.msk [vmem:[#allocation2 + $0xf68] sm:$0xff] %vm51_vm0, %v18084_v2 }
  0xf8   :  { %546 = vst.msk [vmem:[#allocation2 + $0xf70] sm:$0xff] %vm51_vm0, %v18084_v2  ;;  %547 = vst.msk [vmem:[#allocation2 + $0xf78] sm:$0xff] %vm51_vm0, %v18084_v2 }
  0xf9   :  { %548 = vst.msk [vmem:[#allocation2 + $0xf80] sm:$0xff] %vm51_vm0, %v18084_v2  ;;  %549 = vst.msk [vmem:[#allocation2 + $0xf88] sm:$0xff] %vm51_vm0, %v18084_v2 }
  0xfa   :  { %550 = vst.msk [vmem:[#allocation2 + $0xf90] sm:$0xff] %vm51_vm0, %v18084_v2  ;;  %551 = vst.msk [vmem:[#allocation2 + $0xf98] sm:$0xff] %vm51_vm0, %v18084_v2 }
  0xfb   :  { %552 = vst.msk [vmem:[#allocation2 + $0xfa0] sm:$0xff] %vm51_vm0, %v18084_v2  ;;  %553 = vst.msk [vmem:[#allocation2 + $0xfa8] sm:$0xff] %vm51_vm0, %v18084_v2 }
  0xfc   :  { %554 = vst.msk [vmem:[#allocation2 + $0xfb0] sm:$0xff] %vm51_vm0, %v18084_v2  ;;  %555 = vst.msk [vmem:[#allocation2 + $0xfb8] sm:$0xff] %vm51_vm0, %v18084_v2 }
  0xfd   :  { %556 = vst.msk [vmem:[#allocation2 + $0xfc0] sm:$0xff] %vm51_vm0, %v18084_v2  ;;  %557 = vst.msk [vmem:[#allocation2 + $0xfc8] sm:$0xff] %vm51_vm0, %v18084_v2 }
  0xfe   :  { %558 = vst.msk [vmem:[#allocation2 + $0xfd0] sm:$0xff] %vm51_vm0, %v18084_v2  ;;  %559 = vst.msk [vmem:[#allocation2 + $0xfd8] sm:$0xff] %vm51_vm0, %v18084_v2 }
  0xff   :  { %560 = vst.msk [vmem:[#allocation2 + $0xfe0] sm:$0xff] %vm51_vm0, %v18084_v2  ;;  %561 = vst.msk [vmem:[#allocation2 + $0xfe8] sm:$0xff] %vm51_vm0, %v18084_v2 }
 0x100   :  { %562 = vst.msk [vmem:[#allocation2 + $0xff0] sm:$0xff] %vm51_vm0, %v18084_v2  ;;  %563 = vst.msk [vmem:[#allocation2 + $0xff8] sm:$0xff] %vm51_vm0, %v18084_v2 }
 0x101   :  { %564 = vst.msk [vmem:[#allocation2 + $0x1000] sm:$0xff] %vm51_vm0, %v18084_v2  ;;  %565 = vst.msk [vmem:[#allocation2 + $0x1008] sm:$0xff] %vm51_vm0, %v18084_v2 }
 0x102   :  { %566 = vst.msk [vmem:[#allocation2 + $0x1010] sm:$0xff] %vm51_vm0, %v18084_v2  ;;  %567 = vst.msk [vmem:[#allocation2 + $0x1018] sm:$0xff] %vm51_vm0, %v18084_v2 }
 0x103   :  { %568 = vst.msk [vmem:[#allocation2 + $0x1020] sm:$0xff] %vm51_vm0, %v18084_v2  ;;  %569 = vst.msk [vmem:[#allocation2 + $0x1028] sm:$0xff] %vm51_vm0, %v18084_v2 }
 0x104   :  { %570 = vst.msk [vmem:[#allocation2 + $0x1030] sm:$0xff] %vm51_vm0, %v18084_v2  ;;  %571 = vst.msk [vmem:[#allocation2 + $0x1038] sm:$0xff] %vm51_vm0, %v18084_v2 }
 0x105   :  { %572 = vst.msk [vmem:[#allocation2 + $0x1040] sm:$0xff] %vm51_vm0, %v18084_v2  ;;  %573 = vst.msk [vmem:[#allocation2 + $0x1048] sm:$0xff] %vm51_vm0, %v18084_v2 }
 0x106   :  { %574 = vst.msk [vmem:[#allocation2 + $0x1050] sm:$0xff] %vm51_vm0, %v18084_v2  ;;  %575 = vst.msk [vmem:[#allocation2 + $0x1058] sm:$0xff] %vm51_vm0, %v18084_v2 }
 0x107   :  { %576 = vst.msk [vmem:[#allocation2 + $0x1060] sm:$0xff] %vm51_vm0, %v18084_v2  ;;  %577 = vst.msk [vmem:[#allocation2 + $0x1068] sm:$0xff] %vm51_vm0, %v18084_v2 }
 0x108   :  { %578 = vst.msk [vmem:[#allocation2 + $0x1070] sm:$0xff] %vm51_vm0, %v18084_v2  ;;  %579 = vst.msk [vmem:[#allocation2 + $0x1078] sm:$0xff] %vm51_vm0, %v18084_v2 }
 0x109   :  { %580 = vst.msk [vmem:[#allocation2 + $0x1080] sm:$0xff] %vm51_vm0, %v18084_v2  ;;  %581 = vst.msk [vmem:[#allocation2 + $0x1088] sm:$0xff] %vm51_vm0, %v18084_v2 }
 0x10a   :  { %582 = vst.msk [vmem:[#allocation3] sm:$0xff] %vm51_vm0, %v18084_v2  ;;  %583 = vst.msk [vmem:[#allocation3 + $0x8] sm:$0xff] %vm51_vm0, %v18084_v2 }
 0x10b   :  { %584 = vst.msk [vmem:[#allocation3 + $0x10] sm:$0xff] %vm51_vm0, %v18084_v2  ;;  %585 = vst.msk [vmem:[#allocation3 + $0x18] sm:$0xff] %vm51_vm0, %v18084_v2 }
 0x10c   :  { %586 = vst.msk [vmem:[#allocation3 + $0x20] sm:$0xff] %vm51_vm0, %v18084_v2  ;;  %587 = vst.msk [vmem:[#allocation3 + $0x28] sm:$0xff] %vm51_vm0, %v18084_v2 }
 0x10d   :  { %588 = vst.msk [vmem:[#allocation3 + $0x30] sm:$0xff] %vm51_vm0, %v18084_v2  ;;  %589 = vst.msk [vmem:[#allocation3 + $0x38] sm:$0xff] %vm51_vm0, %v18084_v2 }
 0x10e   :  { %590 = vst.msk [vmem:[#allocation3 + $0x40] sm:$0xff] %vm51_vm0, %v18084_v2  ;;  %591 = vst.msk [vmem:[#allocation3 + $0x48] sm:$0xff] %vm51_vm0, %v18084_v2 }
 0x10f   :  { %592 = vst.msk [vmem:[#allocation3 + $0x50] sm:$0xff] %vm51_vm0, %v18084_v2  ;;  %593 = vst.msk [vmem:[#allocation3 + $0x58] sm:$0xff] %vm51_vm0, %v18084_v2 }
 0x110   :  { %594 = vst.msk [vmem:[#allocation3 + $0x60] sm:$0xff] %vm51_vm0, %v18084_v2  ;;  %595 = vst.msk [vmem:[#allocation3 + $0x68] sm:$0xff] %vm51_vm0, %v18084_v2 }
 0x111   :  { %596 = vst.msk [vmem:[#allocation3 + $0x70] sm:$0xff] %vm51_vm0, %v18084_v2  ;;  %597 = vst.msk [vmem:[#allocation3 + $0x78] sm:$0xff] %vm51_vm0, %v18084_v2 }
 0x112   :  { %598 = vst.msk [vmem:[#allocation3 + $0x80] sm:$0xff] %vm51_vm0, %v18084_v2  ;;  %599 = vst.msk [vmem:[#allocation3 + $0x88] sm:$0xff] %vm51_vm0, %v18084_v2 }
 0x113   :  { %600 = vst.msk [vmem:[#allocation3 + $0x90] sm:$0xff] %vm51_vm0, %v18084_v2  ;;  %601 = vst.msk [vmem:[#allocation3 + $0x98] sm:$0xff] %vm51_vm0, %v18084_v2 }
 0x114   :  { %602 = vst.msk [vmem:[#allocation3 + $0xa0] sm:$0xff] %vm51_vm0, %v18084_v2  ;;  %603 = vst.msk [vmem:[#allocation3 + $0xa8] sm:$0xff] %vm51_vm0, %v18084_v2 }
 0x115   :  { %604 = vst.msk [vmem:[#allocation3 + $0xb0] sm:$0xff] %vm51_vm0, %v18084_v2  ;;  %605 = vst.msk [vmem:[#allocation3 + $0xb8] sm:$0xff] %vm51_vm0, %v18084_v2 }
 0x116   :  { %606 = vst.msk [vmem:[#allocation3 + $0xc0] sm:$0xff] %vm51_vm0, %v18084_v2  ;;  %607 = vst.msk [vmem:[#allocation3 + $0xc8] sm:$0xff] %vm51_vm0, %v18084_v2 }
 0x117   :  { %608 = vst.msk [vmem:[#allocation3 + $0xd0] sm:$0xff] %vm51_vm0, %v18084_v2  ;;  %609 = vst.msk [vmem:[#allocation3 + $0xd8] sm:$0xff] %vm51_vm0, %v18084_v2 }
 0x118   :  { %610 = vst.msk [vmem:[#allocation3 + $0xe0] sm:$0xff] %vm51_vm0, %v18084_v2  ;;  %611 = vst.msk [vmem:[#allocation3 + $0xe8] sm:$0xff] %vm51_vm0, %v18084_v2 }
 0x119   :  { %612 = vst.msk [vmem:[#allocation3 + $0xf0] sm:$0xff] %vm51_vm0, %v18084_v2  ;;  %613 = vst.msk [vmem:[#allocation3 + $0xf8] sm:$0xff] %vm51_vm0, %v18084_v2 }
 0x11a   :  { %614 = vst.msk [vmem:[#allocation3 + $0x100] sm:$0xff] %vm51_vm0, %v18084_v2  ;;  %615 = vst.msk [vmem:[#allocation3 + $0x108] sm:$0xff] %vm51_vm0, %v18084_v2 }
 0x11b   :  { %616 = vst.msk [vmem:[#allocation3 + $0x110] sm:$0xff] %vm51_vm0, %v18084_v2  ;;  %617 = vst.msk [vmem:[#allocation3 + $0x118] sm:$0xff] %vm51_vm0, %v18084_v2 }
 0x11c   :  { %618 = vst.msk [vmem:[#allocation3 + $0x120] sm:$0xff] %vm51_vm0, %v18084_v2  ;;  %619 = vst.msk [vmem:[#allocation3 + $0x128] sm:$0xff] %vm51_vm0, %v18084_v2 }
 0x11d   :  { %620 = vst.msk [vmem:[#allocation3 + $0x130] sm:$0xff] %vm51_vm0, %v18084_v2  ;;  %621 = vst.msk [vmem:[#allocation3 + $0x138] sm:$0xff] %vm51_vm0, %v18084_v2 }
 0x11e   :  { %622 = vst.msk [vmem:[#allocation3 + $0x140] sm:$0xff] %vm51_vm0, %v18084_v2  ;;  %623 = vst.msk [vmem:[#allocation3 + $0x148] sm:$0xff] %vm51_vm0, %v18084_v2 }
 0x11f   :  { %624 = vst.msk [vmem:[#allocation3 + $0x150] sm:$0xff] %vm51_vm0, %v18084_v2  ;;  %625 = vst.msk [vmem:[#allocation3 + $0x158] sm:$0xff] %vm51_vm0, %v18084_v2 }
 0x120   :  { %626 = vst.msk [vmem:[#allocation3 + $0x160] sm:$0xff] %vm51_vm0, %v18084_v2  ;;  %627 = vst.msk [vmem:[#allocation3 + $0x168] sm:$0xff] %vm51_vm0, %v18084_v2 }
 0x121   :  { %628 = vst.msk [vmem:[#allocation3 + $0x170] sm:$0xff] %vm51_vm0, %v18084_v2  ;;  %629 = vst.msk [vmem:[#allocation3 + $0x178] sm:$0xff] %vm51_vm0, %v18084_v2 }
 0x122   :  { %630 = vst.msk [vmem:[#allocation3 + $0x180] sm:$0xff] %vm51_vm0, %v18084_v2  ;;  %631 = vst.msk [vmem:[#allocation3 + $0x188] sm:$0xff] %vm51_vm0, %v18084_v2 }
 0x123   :  { %632 = vst.msk [vmem:[#allocation3 + $0x190] sm:$0xff] %vm51_vm0, %v18084_v2  ;;  %633 = vst.msk [vmem:[#allocation3 + $0x198] sm:$0xff] %vm51_vm0, %v18084_v2 }
 0x124   :  { %634 = vst.msk [vmem:[#allocation3 + $0x1a0] sm:$0xff] %vm51_vm0, %v18084_v2  ;;  %635 = vst.msk [vmem:[#allocation3 + $0x1a8] sm:$0xff] %vm51_vm0, %v18084_v2 }
 0x125   :  { %636 = vst.msk [vmem:[#allocation3 + $0x1b0] sm:$0xff] %vm51_vm0, %v18084_v2  ;;  %637 = vst.msk [vmem:[#allocation3 + $0x1b8] sm:$0xff] %vm51_vm0, %v18084_v2 }
 0x126   :  { %638 = vst.msk [vmem:[#allocation3 + $0x1c0] sm:$0xff] %vm51_vm0, %v18084_v2  ;;  %639 = vst.msk [vmem:[#allocation3 + $0x1c8] sm:$0xff] %vm51_vm0, %v18084_v2 }
 0x127   :  { %640 = vst.msk [vmem:[#allocation3 + $0x1d0] sm:$0xff] %vm51_vm0, %v18084_v2  ;;  %641 = vst.msk [vmem:[#allocation3 + $0x1d8] sm:$0xff] %vm51_vm0, %v18084_v2 }
 0x128   :  { %642 = vst.msk [vmem:[#allocation3 + $0x1e0] sm:$0xff] %vm51_vm0, %v18084_v2  ;;  %643 = vst.msk [vmem:[#allocation3 + $0x1e8] sm:$0xff] %vm51_vm0, %v18084_v2 }
 0x129   :  { %644 = vst.msk [vmem:[#allocation3 + $0x1f0] sm:$0xff] %vm51_vm0, %v18084_v2  ;;  %645 = vst.msk [vmem:[#allocation3 + $0x1f8] sm:$0xff] %vm51_vm0, %v18084_v2 }
 0x12a   :  { %646 = vst.msk [vmem:[#allocation3 + $0x200] sm:$0xff] %vm51_vm0, %v18084_v2  ;;  %647 = vst.msk [vmem:[#allocation3 + $0x208] sm:$0xff] %vm51_vm0, %v18084_v2 }
 0x12b   :  { %648 = vst.msk [vmem:[#allocation3 + $0x210] sm:$0xff] %vm51_vm0, %v18084_v2  ;;  %649 = vst.msk [vmem:[#allocation3 + $0x218] sm:$0xff] %vm51_vm0, %v18084_v2 }
 0x12c   :  { %650 = vst.msk [vmem:[#allocation3 + $0x220] sm:$0xff] %vm51_vm0, %v18084_v2  ;;  %651 = vst.msk [vmem:[#allocation3 + $0x228] sm:$0xff] %vm51_vm0, %v18084_v2 }
 0x12d   :  { %652 = vst.msk [vmem:[#allocation3 + $0x230] sm:$0xff] %vm51_vm0, %v18084_v2  ;;  %653 = vst.msk [vmem:[#allocation3 + $0x238] sm:$0xff] %vm51_vm0, %v18084_v2 }
 0x12e   :  { %654 = vst.msk [vmem:[#allocation3 + $0x240] sm:$0xff] %vm51_vm0, %v18084_v2  ;;  %655 = vst.msk [vmem:[#allocation3 + $0x248] sm:$0xff] %vm51_vm0, %v18084_v2 }
 0x12f   :  { %656 = vst.msk [vmem:[#allocation3 + $0x250] sm:$0xff] %vm51_vm0, %v18084_v2  ;;  %657 = vst.msk [vmem:[#allocation3 + $0x258] sm:$0xff] %vm51_vm0, %v18084_v2 }
 0x130   :  { %658 = vst.msk [vmem:[#allocation3 + $0x260] sm:$0xff] %vm51_vm0, %v18084_v2  ;;  %659 = vst.msk [vmem:[#allocation3 + $0x268] sm:$0xff] %vm51_vm0, %v18084_v2 }
 0x131   :  { %660 = vst.msk [vmem:[#allocation3 + $0x270] sm:$0xff] %vm51_vm0, %v18084_v2  ;;  %661 = vst.msk [vmem:[#allocation3 + $0x278] sm:$0xff] %vm51_vm0, %v18084_v2 }
 0x132   :  { %662 = vst.msk [vmem:[#allocation3 + $0x280] sm:$0xff] %vm51_vm0, %v18084_v2  ;;  %663 = vst.msk [vmem:[#allocation3 + $0x288] sm:$0xff] %vm51_vm0, %v18084_v2 }
 0x133   :  { %664 = vst.msk [vmem:[#allocation3 + $0x290] sm:$0xff] %vm51_vm0, %v18084_v2  ;;  %665 = vst.msk [vmem:[#allocation3 + $0x298] sm:$0xff] %vm51_vm0, %v18084_v2 }
 0x134   :  { %666 = vst.msk [vmem:[#allocation3 + $0x2a0] sm:$0xff] %vm51_vm0, %v18084_v2  ;;  %667 = vst.msk [vmem:[#allocation3 + $0x2a8] sm:$0xff] %vm51_vm0, %v18084_v2 }
 0x135   :  { %668 = vst.msk [vmem:[#allocation3 + $0x2b0] sm:$0xff] %vm51_vm0, %v18084_v2  ;;  %669 = vst.msk [vmem:[#allocation3 + $0x2b8] sm:$0xff] %vm51_vm0, %v18084_v2 }
 0x136   :  { %670 = vst.msk [vmem:[#allocation3 + $0x2c0] sm:$0xff] %vm51_vm0, %v18084_v2  ;;  %671 = vst.msk [vmem:[#allocation3 + $0x2c8] sm:$0xff] %vm51_vm0, %v18084_v2 }
 0x137   :  { %672 = vst.msk [vmem:[#allocation3 + $0x2d0] sm:$0xff] %vm51_vm0, %v18084_v2  ;;  %673 = vst.msk [vmem:[#allocation3 + $0x2d8] sm:$0xff] %vm51_vm0, %v18084_v2 }
 0x138   :  { %674 = vst.msk [vmem:[#allocation3 + $0x2e0] sm:$0xff] %vm51_vm0, %v18084_v2  ;;  %675 = vst.msk [vmem:[#allocation3 + $0x2e8] sm:$0xff] %vm51_vm0, %v18084_v2 }
 0x139   :  { %676 = vst.msk [vmem:[#allocation3 + $0x2f0] sm:$0xff] %vm51_vm0, %v18084_v2  ;;  %677 = vst.msk [vmem:[#allocation3 + $0x2f8] sm:$0xff] %vm51_vm0, %v18084_v2 }
 0x13a   :  { %678 = vst.msk [vmem:[#allocation3 + $0x300] sm:$0xff] %vm51_vm0, %v18084_v2  ;;  %679 = vst.msk [vmem:[#allocation3 + $0x308] sm:$0xff] %vm51_vm0, %v18084_v2 }
 0x13b   :  { %680 = vst.msk [vmem:[#allocation3 + $0x310] sm:$0xff] %vm51_vm0, %v18084_v2  ;;  %681 = vst.msk [vmem:[#allocation3 + $0x318] sm:$0xff] %vm51_vm0, %v18084_v2 }
 0x13c   :  { %682 = vst.msk [vmem:[#allocation3 + $0x320] sm:$0xff] %vm51_vm0, %v18084_v2  ;;  %683 = vst.msk [vmem:[#allocation3 + $0x328] sm:$0xff] %vm51_vm0, %v18084_v2 }
 0x13d   :  { %684 = vst.msk [vmem:[#allocation3 + $0x330] sm:$0xff] %vm51_vm0, %v18084_v2  ;;  %685 = vst.msk [vmem:[#allocation3 + $0x338] sm:$0xff] %vm51_vm0, %v18084_v2 }
 0x13e   :  { %686 = vst.msk [vmem:[#allocation3 + $0x340] sm:$0xff] %vm51_vm0, %v18084_v2  ;;  %687 = vst.msk [vmem:[#allocation3 + $0x348] sm:$0xff] %vm51_vm0, %v18084_v2 }
 0x13f   :  { %688 = vst.msk [vmem:[#allocation3 + $0x350] sm:$0xff] %vm51_vm0, %v18084_v2  ;;  %689 = vst.msk [vmem:[#allocation3 + $0x358] sm:$0xff] %vm51_vm0, %v18084_v2 }
 0x140   :  { %690 = vst.msk [vmem:[#allocation3 + $0x360] sm:$0xff] %vm51_vm0, %v18084_v2  ;;  %691 = vst.msk [vmem:[#allocation3 + $0x368] sm:$0xff] %vm51_vm0, %v18084_v2 }
 0x141   :  { %692 = vst.msk [vmem:[#allocation3 + $0x370] sm:$0xff] %vm51_vm0, %v18084_v2  ;;  %693 = vst.msk [vmem:[#allocation3 + $0x378] sm:$0xff] %vm51_vm0, %v18084_v2 }
 0x142   :  { %694 = vst.msk [vmem:[#allocation3 + $0x380] sm:$0xff] %vm51_vm0, %v18084_v2  ;;  %695 = vst.msk [vmem:[#allocation3 + $0x388] sm:$0xff] %vm51_vm0, %v18084_v2 }
 0x143   :  { %696 = vst.msk [vmem:[#allocation3 + $0x390] sm:$0xff] %vm51_vm0, %v18084_v2  ;;  %697 = vst.msk [vmem:[#allocation3 + $0x398] sm:$0xff] %vm51_vm0, %v18084_v2 }
 0x144   :  { %698 = vst.msk [vmem:[#allocation3 + $0x3a0] sm:$0xff] %vm51_vm0, %v18084_v2  ;;  %699 = vst.msk [vmem:[#allocation3 + $0x3a8] sm:$0xff] %vm51_vm0, %v18084_v2 }
 0x145   :  { %700 = vst.msk [vmem:[#allocation3 + $0x3b0] sm:$0xff] %vm51_vm0, %v18084_v2  ;;  %701 = vst.msk [vmem:[#allocation3 + $0x3b8] sm:$0xff] %vm51_vm0, %v18084_v2 }
 0x146   :  { %702 = vst.msk [vmem:[#allocation3 + $0x3c0] sm:$0xff] %vm51_vm0, %v18084_v2  ;;  %703 = vst.msk [vmem:[#allocation3 + $0x3c8] sm:$0xff] %vm51_vm0, %v18084_v2 }
 0x147   :  { %704 = vst.msk [vmem:[#allocation3 + $0x3d0] sm:$0xff] %vm51_vm0, %v18084_v2  ;;  %705 = vst.msk [vmem:[#allocation3 + $0x3d8] sm:$0xff] %vm51_vm0, %v18084_v2 }
 0x148   :  { %706 = vst.msk [vmem:[#allocation3 + $0x3e0] sm:$0xff] %vm51_vm0, %v18084_v2  ;;  %707 = vst.msk [vmem:[#allocation3 + $0x3e8] sm:$0xff] %vm51_vm0, %v18084_v2 }
 0x149   :  { %708 = vst.msk [vmem:[#allocation3 + $0x3f0] sm:$0xff] %vm51_vm0, %v18084_v2  ;;  %709 = vst.msk [vmem:[#allocation3 + $0x3f8] sm:$0xff] %vm51_vm0, %v18084_v2 }
 0x14a   :  { %710 = vst.msk [vmem:[#allocation3 + $0x400] sm:$0xff] %vm51_vm0, %v18084_v2  ;;  %711 = vst.msk [vmem:[#allocation3 + $0x408] sm:$0xff] %vm51_vm0, %v18084_v2 }
 0x14b   :  { %712 = vst.msk [vmem:[#allocation3 + $0x410] sm:$0xff] %vm51_vm0, %v18084_v2  ;;  %713 = vst.msk [vmem:[#allocation3 + $0x418] sm:$0xff] %vm51_vm0, %v18084_v2 }
 0x14c   :  { %714 = vst.msk [vmem:[#allocation3 + $0x420] sm:$0xff] %vm51_vm0, %v18084_v2  ;;  %715 = vst.msk [vmem:[#allocation3 + $0x428] sm:$0xff] %vm51_vm0, %v18084_v2 }
 0x14d   :  { %716 = vst.msk [vmem:[#allocation3 + $0x430] sm:$0xff] %vm51_vm0, %v18084_v2  ;;  %717 = vst.msk [vmem:[#allocation3 + $0x438] sm:$0xff] %vm51_vm0, %v18084_v2 }
 0x14e   :  { %718 = vst.msk [vmem:[#allocation3 + $0x440] sm:$0xff] %vm51_vm0, %v18084_v2  ;;  %719 = vst.msk [vmem:[#allocation3 + $0x448] sm:$0xff] %vm51_vm0, %v18084_v2 }
 0x14f   :  { %720 = vst.msk [vmem:[#allocation3 + $0x450] sm:$0xff] %vm51_vm0, %v18084_v2  ;;  %721 = vst.msk [vmem:[#allocation3 + $0x458] sm:$0xff] %vm51_vm0, %v18084_v2 }
 0x150   :  { %722 = vst.msk [vmem:[#allocation4] sm:$0xff] %vm51_vm0, %v18084_v2  ;;  %723 = vst.msk [vmem:[#allocation4 + $0x8] sm:$0xff] %vm51_vm0, %v18084_v2 }
 0x151   :  { %724 = vst.msk [vmem:[#allocation4 + $0x10] sm:$0xff] %vm51_vm0, %v18084_v2  ;;  %725 = vst.msk [vmem:[#allocation4 + $0x18] sm:$0xff] %vm51_vm0, %v18084_v2 }
 0x152   :  { %726 = vst.msk [vmem:[#allocation4 + $0x20] sm:$0xff] %vm51_vm0, %v18084_v2  ;;  %727 = vst.msk [vmem:[#allocation4 + $0x28] sm:$0xff] %vm51_vm0, %v18084_v2 }
 0x153   :  { %728 = vst.msk [vmem:[#allocation4 + $0x30] sm:$0xff] %vm51_vm0, %v18084_v2  ;;  %729 = vst.msk [vmem:[#allocation4 + $0x38] sm:$0xff] %vm51_vm0, %v18084_v2 }
 0x154   :  { %730 = vst.msk [vmem:[#allocation4 + $0x40] sm:$0xff] %vm51_vm0, %v18084_v2  ;;  %731 = vst.msk [vmem:[#allocation4 + $0x48] sm:$0xff] %vm51_vm0, %v18084_v2 }
 0x155   :  { %732 = vst.msk [vmem:[#allocation4 + $0x50] sm:$0xff] %vm51_vm0, %v18084_v2  ;;  %733 = vst.msk [vmem:[#allocation4 + $0x58] sm:$0xff] %vm51_vm0, %v18084_v2 }
 0x156   :  { %734 = vst.msk [vmem:[#allocation4 + $0x60] sm:$0xff] %vm51_vm0, %v18084_v2  ;;  %735 = vst.msk [vmem:[#allocation4 + $0x68] sm:$0xff] %vm51_vm0, %v18084_v2 }
 0x157   :  { %736 = vst.msk [vmem:[#allocation4 + $0x70] sm:$0xff] %vm51_vm0, %v18084_v2  ;;  %737 = vst.msk [vmem:[#allocation4 + $0x78] sm:$0xff] %vm51_vm0, %v18084_v2 }
 0x158   :  { %738 = vst.msk [vmem:[#allocation4 + $0x80] sm:$0xff] %vm51_vm0, %v18084_v2  ;;  %739 = vst.msk [vmem:[#allocation4 + $0x88] sm:$0xff] %vm51_vm0, %v18084_v2 }
 0x159   :  { %740 = vst.msk [vmem:[#allocation4 + $0x90] sm:$0xff] %vm51_vm0, %v18084_v2  ;;  %741 = vst.msk [vmem:[#allocation4 + $0x98] sm:$0xff] %vm51_vm0, %v18084_v2 }
 0x15a   :  { %742 = vst.msk [vmem:[#allocation4 + $0xa0] sm:$0xff] %vm51_vm0, %v18084_v2  ;;  %743 = vst.msk [vmem:[#allocation4 + $0xa8] sm:$0xff] %vm51_vm0, %v18084_v2 }
 0x15b   :  { %744 = vst.msk [vmem:[#allocation4 + $0xb0] sm:$0xff] %vm51_vm0, %v18084_v2  ;;  %745 = vst.msk [vmem:[#allocation4 + $0xb8] sm:$0xff] %vm51_vm0, %v18084_v2 }
 0x15c   :  { %746 = vst.msk [vmem:[#allocation4 + $0xc0] sm:$0xff] %vm51_vm0, %v18084_v2  ;;  %747 = vst.msk [vmem:[#allocation4 + $0xc8] sm:$0xff] %vm51_vm0, %v18084_v2 }
 0x15d   :  { %748 = vst.msk [vmem:[#allocation4 + $0xd0] sm:$0xff] %vm51_vm0, %v18084_v2  ;;  %749 = vst.msk [vmem:[#allocation4 + $0xd8] sm:$0xff] %vm51_vm0, %v18084_v2 }
 0x15e   :  { %750 = vst.msk [vmem:[#allocation4 + $0xe0] sm:$0xff] %vm51_vm0, %v18084_v2  ;;  %751 = vst.msk [vmem:[#allocation4 + $0xe8] sm:$0xff] %vm51_vm0, %v18084_v2 }
 0x15f   :  { %752 = vst.msk [vmem:[#allocation4 + $0xf0] sm:$0xff] %vm51_vm0, %v18084_v2  ;;  %753 = vst.msk [vmem:[#allocation4 + $0xf8] sm:$0xff] %vm51_vm0, %v18084_v2 }
 0x160   :  { %754 = vst.msk [vmem:[#allocation4 + $0x100] sm:$0xff] %vm51_vm0, %v18084_v2  ;;  %755 = vst.msk [vmem:[#allocation4 + $0x108] sm:$0xff] %vm51_vm0, %v18084_v2 }
 0x161   :  { %756 = vst.msk [vmem:[#allocation4 + $0x110] sm:$0xff] %vm51_vm0, %v18084_v2  ;;  %757 = vst.msk [vmem:[#allocation4 + $0x118] sm:$0xff] %vm51_vm0, %v18084_v2 }
 0x162   :  { %758 = vst.msk [vmem:[#allocation4 + $0x120] sm:$0xff] %vm51_vm0, %v18084_v2  ;;  %759 = vst.msk [vmem:[#allocation4 + $0x128] sm:$0xff] %vm51_vm0, %v18084_v2 }
 0x163   :  { %760 = vst.msk [vmem:[#allocation4 + $0x130] sm:$0xff] %vm51_vm0, %v18084_v2  ;;  %761 = vst.msk [vmem:[#allocation4 + $0x138] sm:$0xff] %vm51_vm0, %v18084_v2 }
 0x164   :  { %762 = vst.msk [vmem:[#allocation4 + $0x140] sm:$0xff] %vm51_vm0, %v18084_v2  ;;  %763 = vst.msk [vmem:[#allocation4 + $0x148] sm:$0xff] %vm51_vm0, %v18084_v2 }
 0x165   :  { %764 = vst.msk [vmem:[#allocation4 + $0x150] sm:$0xff] %vm51_vm0, %v18084_v2  ;;  %765 = vst.msk [vmem:[#allocation4 + $0x158] sm:$0xff] %vm51_vm0, %v18084_v2 }
 0x166   :  { %766 = vst.msk [vmem:[#allocation4 + $0x160] sm:$0xff] %vm51_vm0, %v18084_v2  ;;  %767 = vst.msk [vmem:[#allocation4 + $0x168] sm:$0xff] %vm51_vm0, %v18084_v2 }
 0x167   :  { %768 = vst.msk [vmem:[#allocation4 + $0x170] sm:$0xff] %vm51_vm0, %v18084_v2  ;;  %769 = vst.msk [vmem:[#allocation4 + $0x178] sm:$0xff] %vm51_vm0, %v18084_v2 }
 0x168   :  { %770 = vst.msk [vmem:[#allocation4 + $0x180] sm:$0xff] %vm51_vm0, %v18084_v2  ;;  %771 = vst.msk [vmem:[#allocation4 + $0x188] sm:$0xff] %vm51_vm0, %v18084_v2 }
 0x169 LB: > { %s14958_s1 = smov 0   ;;  %s13279_s26 = sphi %s14947_s26, %s781_s26   ;;  %v13275_v6 = vphi %v14945_v6, %v18100_v6   ;;  %v13271_v5 = vphi %v14943_v5, %v18099_v5  }
 0x16a LB: >> { %11664 = vmatprep.subr.mxu0 %v14941_v4  ;;  %s9746_s27 = smul.u32 7568, %s13279_s26  ;;  %12817 = vmatprep.subr.mxu1 %v14941_v4  ;;  %s13291_s1 = sphi %s14958_s1, %s789_s1   ;;  %v13287_v6 = vphi %v13275_v6, %v18098_v6   ;;  %v13283_v5 = vphi %v13271_v5, %v18097_v5  }
 0x16b   : >> { %11665 = vmatpush3.msra.mxu0 %v14941_v4  ;;  %12821 = vmatpush3.msra.mxu1 %v14941_v4  ;;  %s9747_s28 = smul.u32 176, %s13291_s1  ;;  %s789_s1 = sadd.s32 1, %s13291_s1  }
 0x16c   : >> { %11666 = vmatprep.subr.mxu0 %v14936_v3  ;;  %12818 = vmatprep.subr.mxu1 %v14936_v3  ;;  %p786_p0 = scmp.ge.s32.totalorder %s789_s1, 42  }
 0x16d   : >> { %11667 = vmatpush3.msra.mxu0 %v14936_v3  ;;  %12822 = vmatpush3.msra.mxu1 %v14936_v3  ;;  %s14980_s29 = sadd.s32 %s9747_s28, %s9746_s27  ;;  %s781_s26 = sadd.s32 (%p786_p0), 1, %s13279_s26  }
 0x16e   : >> { %11668 = vmatprep.subr.mxu0 %v13491_v1  ;;  %12819 = vmatprep.subr.mxu1 %v13491_v1  ;;  %s14988_s17 = scalar_lea.vmem %s18068_s0, %s14980_s29  ;;  %s15040_s18 = scalar_lea.vmem [#allocation5], %s14980_s29 }
 0x16f   : >> { %11669 = vmatpush3.msra.mxu0 %v13491_v1  ;;  %12823 = vmatpush3.msra.mxu1 %v13491_v1  ;;  %v10181_v7 = vld [vmem:[%s14988_s17 + $0x58] sm:$0xff]  ;;  %v10182_v8 = vld [vmem:[%s14988_s17 + $0x60] sm:$0xff]  ;;  %v10183_v9 = vld [vmem:[%s14988_s17 + $0x68] sm:$0xff]  ;;  %p778_p1 = scmp.ge.s32.totalorder (%p786_p0), %s781_s26, 2  }
 0x170   : >> { %11670 = vmatprep.subr.mxu0 %v13486_v0  ;;  %12820 = vmatprep.subr.mxu1 %v13486_v0  ;;  %v10184_v10 = vld [vmem:[%s14988_s17 + $0x70] sm:$0xff]  ;;  %v10185_v11 = vld [vmem:[%s14988_s17 + $0x78] sm:$0xff]  ;;  %v10194_v13 = vld [vmem:[%s14988_s17 + $0xc0] sm:$0xff] }
 0x171   : >> { %11671 = vmatpush3.msra.mxu0 %v13486_v0  ;;  %11672 = vmatprep.mubr.msk.f32.mxu0 %vm51_vm0, %v10181_v7  ;;  %v10193_v12 = vld [vmem:[%s14988_s17 + $0xb8] sm:$0xff]  ;;  %v10195_v14 = vld [vmem:[%s14988_s17 + $0xc8] sm:$0xff]  ;;  %v10186_v15 = vld [vmem:[%s14988_s17 + $0x80] sm:$0xff] }
 0x172   : >> { %11673 = vmatmul.mubr.msk.f32.vlgmr.msra.gmra.mxu0 %vm51_vm0, %v10182_v8  ;;  %12824 = vmatpush3.msra.mxu1 %v13486_v0  ;;  %v10196_v16 = vld [vmem:[%s14988_s17 + $0xd0] sm:$0xff]  ;;  %v10187_v17 = vld [vmem:[%s14988_s17 + $0x88] sm:$0xff]  ;;  %v10197_v18 = vld [vmem:[%s14988_s17 + $0xd8] sm:$0xff] }
 0x173   : >> { %11675 = vmatprep.mubr.msk.f32.mxu0 %vm51_vm0, %v10183_v9  ;;  %11690 = vmatprep.mubr.msk.f32.mxu1 %vm51_vm0, %v10193_v12  ;;  %v10188_v19 = vld [vmem:[%s14988_s17 + $0x90] sm:$0xff]  ;;  %v10198_v20 = vld [vmem:[%s14988_s17 + $0xe0] sm:$0xff]  ;;  %v10189_v21 = vld [vmem:[%s14988_s17 + $0x98] sm:$0xff] }
 0x174   : >> { %11691 = vmatmul.mubr.msk.f32.vlgmr.msra.gmra.mxu1 %vm51_vm0, %v10194_v13  ;;  %v10199_v22 = vld [vmem:[%s14988_s17 + $0xe8] sm:$0xff]  ;;  %v10190_v23 = vld [vmem:[%s14988_s17 + $0xa0] sm:$0xff]  ;;  %v10200_v24 = vld [vmem:[%s14988_s17 + $0xf0] sm:$0xff] }
 0x175   : >> { %11693 = vmatprep.mubr.msk.f32.mxu1 %vm51_vm0, %v10195_v14  ;;  %v10191_v25 = vld [vmem:[%s14988_s17 + $0xa8] sm:$0xff]  ;;  %v10201_v26 = vld [vmem:[%s14988_s17 + $0xf8] sm:$0xff]  ;;  %v10192_v27 = vld [vmem:[%s14988_s17 + $0xb0] sm:$0xff] }
 0x176   : >> { %11676 = vmatmul.mubr.msk.f32.gmra.mxu0 %vm51_vm0, %v10184_v10  ;;  %v10202_v28 = vld [vmem:[%s14988_s17 + $0x100] sm:$0xff] }
 0x177   : >> { %11678 = vmatprep.mubr.msk.f32.mxu0 %vm51_vm0, %v10185_v11 }
 0x178   : >> { %11694 = vmatmul.mubr.msk.f32.gmra.mxu1 %vm51_vm0, %v10196_v16 }
 0x179   : >> { %11696 = vmatprep.mubr.msk.f32.mxu1 %vm51_vm0, %v10197_v18 }
 0x17a   : >> { %11679 = vmatmul.mubr.msk.f32.gmra.mxu0 %vm51_vm0, %v10186_v15 }
 0x17b   : >> { %11681 = vmatprep.mubr.msk.f32.mxu0 %vm51_vm0, %v10187_v17 }
 0x17c   : >> { %11697 = vmatmul.mubr.msk.f32.gmra.mxu1 %vm51_vm0, %v10198_v20 }
 0x17d   : >> { %11699 = vmatprep.mubr.msk.f32.mxu1 %vm51_vm0, %v10199_v22 }
 0x17e   : >> { %11682 = vmatmul.mubr.msk.f32.gmra.mxu0 %vm51_vm0, %v10188_v19 }
 0x17f   : >> { %11684 = vmatprep.mubr.msk.f32.mxu0 %vm51_vm0, %v10189_v21 }
 0x180   : >> { %11700 = vmatmul.mubr.msk.f32.gmra.mxu1 %vm51_vm0, %v10200_v24 }
 0x181   : >> { %11702 = vmatprep.mubr.msk.f32.mxu1 %vm51_vm0, %v10201_v26 }
 0x182   : >> { %11685 = vmatmul.mubr.msk.f32.gmra.mxu0 %vm51_vm0, %v10190_v23 }
 0x183   : >> { %11687 = vmatprep.mubr.msk.f32.mxu0 %vm51_vm0, %v10191_v25 }
 0x184   : >> { %11703 = vmatmul.mubr.msk.f32.gmra.mxu1 %vm51_vm0, %v10202_v28 }
 0x186   : >> { %11688 = vmatmul.mubr.msk.f32.gmra.mxu0 %vm51_vm0, %v10192_v27 }
 0x232   : >> { %v11674_v29 = vpop.f32.mrf.mxu0 }
 0x233   : >> { %10226 = vst.msk [vmem:[%s15040_s18 + $0x60] sm:$0xff] %vm51_vm0, %v11674_v29  ;;  %v1111_v31 = vmul.f32 %v11674_v29, %v11674_v29  ;;  %v1061_v36 = vsel %vm51_vm0, %v11674_v29, 0.0 }
 0x234   : >> { %v951_v30 = vpop.f32.mrf.mxu0  ;;  %v15047_v35 = vpop.f32.mrf.mxu1 }
 0x235   : >> { %v1060_v32 = vsel %vm51_vm0, %v951_v30, 0.0  ;;  %v1110_v33 = vmul.f32 %v951_v30, %v951_v30  ;;  %10225 = vst.msk [vmem:[%s15040_s18 + $0x58] sm:$0xff] %vm51_vm0, %v951_v30  ;;  %10238 = vst.msk [vmem:[%s15040_s18 + $0xc0] sm:$0xff] %vm51_vm0, %v15047_v35  ;;  %v1133_v41 = vsel %vm51_vm0, %v1111_v31, 0.0 }
 0x236   : >> { %v11677_v34 = vpop.f32.mrf.mxu0  ;;  %v1062_v38 = vadd.f32 %v1061_v36, %v1060_v32  ;;  %v15056_v40 = vpop.f32.mrf.mxu1 }
 0x237   : >> { %v1132_v37 = vsel %vm51_vm0, %v1110_v33, 0.0  ;;  %10228 = vst.msk [vmem:[%s15040_s18 + $0x70] sm:$0xff] %vm51_vm0, %v11677_v34  ;;  %v1113_v42 = vmul.f32 %v11677_v34, %v11677_v34  ;;  %10237 = vst.msk [vmem:[%s15040_s18 + $0xb8] sm:$0xff] %vm51_vm0, %v15056_v40  ;;  %v1065_v49 = vsel %vm51_vm0, %v11677_v34, 0.0 }
 0x238   : >> { %v961_v39 = vpop.f32.mrf.mxu0  ;;  %v1134_v45 = vadd.f32 %v1133_v41, %v1132_v37  ;;  %v15065_v48 = vpop.f32.mrf.mxu1 }
 0x239   : >> { %v1063_v43 = vsel %vm51_vm0, %v961_v39, 0.0  ;;  %v1112_v44 = vmul.f32 %v961_v39, %v961_v39  ;;  %10227 = vst.msk [vmem:[%s15040_s18 + $0x68] sm:$0xff] %vm51_vm0, %v961_v39  ;;  %10240 = vst.msk [vmem:[%s15040_s18 + $0xd0] sm:$0xff] %vm51_vm0, %v15065_v48  ;;  %v1137_v55 = vsel %vm51_vm0, %v1113_v42, 0.0 }
 0x23a   : >> { %v1064_v46 = vadd.f32 %v1063_v43, %v1062_v38  ;;  %v11680_v47 = vpop.f32.mrf.mxu0  ;;  %v15074_v54 = vpop.f32.mrf.mxu1 }
 0x23b   : >> { %v1135_v50 = vsel %vm51_vm0, %v1112_v44, 0.0  ;;  %10230 = vst.msk [vmem:[%s15040_s18 + $0x80] sm:$0xff] %vm51_vm0, %v11680_v47  ;;  %v1115_v56 = vmul.f32 %v11680_v47, %v11680_v47  ;;  %10239 = vst.msk [vmem:[%s15040_s18 + $0xc8] sm:$0xff] %vm51_vm0, %v15074_v54  ;;  %v1069_v63 = vsel %vm51_vm0, %v11680_v47, 0.0 }
 0x23c   : >> { %v1136_v51 = vadd.f32 %v1135_v50, %v1134_v45  ;;  %v971_v52 = vpop.f32.mrf.mxu0  ;;  %v1066_v53 = vadd.f32 %v1065_v49, %v1064_v46  ;;  %v15083_v62 = vpop.f32.mrf.mxu1 }
 0x23d   : >> { %v1067_v57 = vsel %vm51_vm0, %v971_v52, 0.0  ;;  %v1114_v58 = vmul.f32 %v971_v52, %v971_v52  ;;  %10229 = vst.msk [vmem:[%s15040_s18 + $0x78] sm:$0xff] %vm51_vm0, %v971_v52  ;;  %10242 = vst.msk [vmem:[%s15040_s18 + $0xe0] sm:$0xff] %vm51_vm0, %v15083_v62  ;;  %v1141_v12 = vsel %vm51_vm0, %v1115_v56, 0.0  ;;  %v1123_v56 = vmul.f32 %v15047_v35, %v15047_v35 }
 0x23e   : >> { %v1068_v59 = vadd.f32 %v1067_v57, %v1066_v53  ;;  %v1138_v60 = vadd.f32 %v1137_v55, %v1136_v51  ;;  %v11683_v61 = vpop.f32.mrf.mxu0  ;;  %v15092_v11 = vpop.f32.mrf.mxu1  ;;  %v1122_v51 = vmul.f32 %v15056_v40, %v15056_v40  ;;  %v1083_v57 = vsel %vm51_vm0, %v15056_v40, 0.0 }
 0x23f   : >> { %v1139_v7 = vsel %vm51_vm0, %v1114_v58, 0.0  ;;  %10232 = vst.msk [vmem:[%s15040_s18 + $0x90] sm:$0xff] %vm51_vm0, %v11683_v61  ;;  %v1117_v13 = vmul.f32 %v11683_v61, %v11683_v61  ;;  %10241 = vst.msk [vmem:[%s15040_s18 + $0xd8] sm:$0xff] %vm51_vm0, %v15092_v11  ;;  %v1073_v20 = vsel %vm51_vm0, %v11683_v61, 0.0  ;;  %v1087_v40 = vsel %vm51_vm0, %v15074_v54, 0.0 }
 0x240   : >> { %v1140_v8 = vadd.f32 %v1139_v7, %v1138_v60  ;;  %v981_v9 = vpop.f32.mrf.mxu0  ;;  %v1070_v10 = vadd.f32 %v1069_v63, %v1068_v59  ;;  %v15101_v19 = vpop.f32.mrf.mxu1  ;;  %v1085_v60 = vsel %vm51_vm0, %v15047_v35, 0.0  ;;  %v1155_v61 = vsel %vm51_vm0, %v1122_v51, 0.0 }
 0x241   : >> { %v1071_v14 = vsel %vm51_vm0, %v981_v9, 0.0  ;;  %v1116_v15 = vmul.f32 %v981_v9, %v981_v9  ;;  %10231 = vst.msk [vmem:[%s15040_s18 + $0x88] sm:$0xff] %vm51_vm0, %v981_v9  ;;  %10244 = vst.msk [vmem:[%s15040_s18 + $0xf0] sm:$0xff] %vm51_vm0, %v15101_v19  ;;  %v1145_v26 = vsel %vm51_vm0, %v1117_v13, 0.0  ;;  %v1124_v63 = vmul.f32 %v15074_v54, %v15074_v54 }
 0x242   : >> { %v1072_v16 = vadd.f32 %v1071_v14, %v1070_v10  ;;  %v1142_v17 = vadd.f32 %v1141_v12, %v1140_v8  ;;  %v11686_v18 = vpop.f32.mrf.mxu0  ;;  %v15110_v25 = vpop.f32.mrf.mxu1  ;;  %v1157_v9 = vsel %vm51_vm0, %v1123_v56, 0.0  ;;  %v1125_v10 = vmul.f32 %v15065_v48, %v15065_v48 }
 0x243   : >> { %v1143_v21 = vsel %vm51_vm0, %v1116_v15, 0.0  ;;  %10234 = vst.msk [vmem:[%s15040_s18 + $0xa0] sm:$0xff] %vm51_vm0, %v11686_v18  ;;  %v1119_v27 = vmul.f32 %v11686_v18, %v11686_v18  ;;  %10243 = vst.msk [vmem:[%s15040_s18 + $0xe8] sm:$0xff] %vm51_vm0, %v15110_v25  ;;  %v1077_v34 = vsel %vm51_vm0, %v11686_v18, 0.0  ;;  %v1089_v35 = vsel %vm51_vm0, %v15065_v48, 0.0 }
 0x244   : >> { %v1144_v22 = vadd.f32 %v1143_v21, %v1142_v17  ;;  %v991_v23 = vpop.f32.mrf.mxu0  ;;  %v1074_v24 = vadd.f32 %v1073_v20, %v1072_v16  ;;  %v15119_v33 = vpop.f32.mrf.mxu1  ;;  %v1159_v14 = vsel %vm51_vm0, %v1124_v63, 0.0  ;;  %v1126_v15 = vmul.f32 %v15092_v11, %v15092_v11 }
 0x245   : >> { %v1075_v28 = vsel %vm51_vm0, %v991_v23, 0.0  ;;  %v1118_v29 = vmul.f32 %v991_v23, %v991_v23  ;;  %10233 = vst.msk [vmem:[%s15040_s18 + $0x98] sm:$0xff] %vm51_vm0, %v991_v23  ;;  %10246 = vst.msk [vmem:[%s15040_s18 + $0x100] sm:$0xff] %vm51_vm0, %v15119_v33  ;;  %v1149_v42 = vsel %vm51_vm0, %v1119_v27, 0.0  ;;  %v1161_v18 = vsel %vm51_vm0, %v1125_v10, 0.0 }
 0x246   : >> { %v1076_v30 = vadd.f32 %v1075_v28, %v1074_v24  ;;  %v1146_v31 = vadd.f32 %v1145_v26, %v1144_v22  ;;  %v11689_v32 = vpop.f32.mrf.mxu0  ;;  %v1051_v41 = vpop.f32.mrf.mxu1  ;;  %v1127_v20 = vmul.f32 %v15083_v62, %v15083_v62  ;;  %v1091_v54 = vsel %vm51_vm0, %v15092_v11, 0.0 }
 0x247   : >> { %v1147_v36 = vsel %vm51_vm0, %v1118_v29, 0.0  ;;  %10236 = vst.msk [vmem:[%s15040_s18 + $0xb0] sm:$0xff] %vm51_vm0, %v11689_v32  ;;  %v1121_v43 = vmul.f32 %v11689_v32, %v11689_v32  ;;  %10245 = vst.msk [vmem:[%s15040_s18 + $0xf8] sm:$0xff] %vm51_vm0, %v1051_v41  ;;  %v1081_v49 = vsel %vm51_vm0, %v11689_v32, 0.0  ;;  %v1093_v48 = vsel %vm51_vm0, %v15083_v62, 0.0 }
 0x248   : >> { %v1148_v37 = vadd.f32 %v1147_v36, %v1146_v31  ;;  %v1001_v38 = vpop.f32.mrf.mxu0  ;;  %v1078_v39 = vadd.f32 %v1077_v34, %v1076_v30  ;;  %v1163_v23 = vsel %vm51_vm0, %v1126_v15, 0.0  ;;  %v1128_v24 = vmul.f32 %v15110_v25, %v15110_v25 }
 0x249   : >> { %v1079_v44 = vsel %vm51_vm0, %v1001_v38, 0.0  ;;  %v1120_v45 = vmul.f32 %v1001_v38, %v1001_v38  ;;  %10235 = vst.msk [vmem:[%s15040_s18 + $0xa8] sm:$0xff] %vm51_vm0, %v1001_v38  ;;  %v1153_v55 = vsel %vm51_vm0, %v1121_v43, 0.0  ;;  %v1165_v28 = vsel %vm51_vm0, %v1127_v20, 0.0 }
 0x24a   : >> { %v1080_v46 = vadd.f32 %v1079_v44, %v1078_v39  ;;  %v1150_v47 = vadd.f32 %v1149_v42, %v1148_v37  ;;  %v1129_v29 = vmul.f32 %v15101_v19, %v15101_v19  ;;  %v1095_v11 = vsel %vm51_vm0, %v15110_v25, 0.0 }
 0x24b   : >> { %v1151_v50 = vsel %vm51_vm0, %v1120_v45, 0.0  ;;  %v1097_v62 = vsel %vm51_vm0, %v15101_v19, 0.0  ;;  %v1167_v32 = vsel %vm51_vm0, %v1128_v24, 0.0  ;;  %v1130_v34 = vmul.f32 %v1051_v41, %v1051_v41 }
 0x24c   : >> { %v1082_v52 = vadd.f32 %v1081_v49, %v1080_v46  ;;  %v1152_v53 = vadd.f32 %v1151_v50, %v1150_v47  ;;  %v1169_v38 = vsel %vm51_vm0, %v1129_v29, 0.0  ;;  %v1131_v39 = vmul.f32 %v15119_v33, %v15119_v33 }
 0x24d   : >> { %v1099_v42 = vsel %vm51_vm0, %v1051_v41, 0.0  ;;  %v1101_v25 = vsel %vm51_vm0, %v15119_v33, 0.0  ;;  %v1171_v45 = vsel %vm51_vm0, %v1130_v34, 0.0 }
 0x24e   : >> { %v1154_v58 = vadd.f32 %v1153_v55, %v1152_v53  ;;  %v1084_v59 = vadd.f32 %v1083_v57, %v1082_v52  ;;  %v1173_v47 = vsel %vm51_vm0, %v1131_v39, 0.0 }
 0x250   : >> { %v1156_v7 = vadd.f32 %v1155_v61, %v1154_v58  ;;  %v1086_v8 = vadd.f32 %v1085_v60, %v1084_v59 }
 0x252   : >> { %v1088_v12 = vadd.f32 %v1087_v40, %v1086_v8  ;;  %v1158_v13 = vadd.f32 %v1157_v9, %v1156_v7 }
 0x254   : >> { %v1160_v16 = vadd.f32 %v1159_v14, %v1158_v13  ;;  %v1090_v17 = vadd.f32 %v1089_v35, %v1088_v12 }
 0x256   : >> { %v1092_v21 = vadd.f32 %v1091_v54, %v1090_v17  ;;  %v1162_v22 = vadd.f32 %v1161_v18, %v1160_v16 }
 0x258   : >> { %v1164_v26 = vadd.f32 %v1163_v23, %v1162_v22  ;;  %v1094_v27 = vadd.f32 %v1093_v48, %v1092_v21 }
 0x25a   : >> { %v1096_v30 = vadd.f32 %v1095_v11, %v1094_v27  ;;  %v1166_v31 = vadd.f32 %v1165_v28, %v1164_v26 }
 0x25c   : >> { %v1168_v36 = vadd.f32 %v1167_v32, %v1166_v31  ;;  %v1098_v37 = vadd.f32 %v1097_v62, %v1096_v30 }
 0x25e   : >> { %v1100_v43 = vadd.f32 %v1099_v42, %v1098_v37  ;;  %v1170_v44 = vadd.f32 %v1169_v38, %v1168_v36 }
 0x260   : >> { %v1102_v19 = vadd.f32 %v1101_v25, %v1100_v43  ;;  %v1172_v46 = vadd.f32 %v1171_v45, %v1170_v44 }
 0x262   : >> { %v1103_v49 = vrot.slane %v1102_v19, 4  ;;  %v1174_v50 = vadd.f32 %v1173_v47, %v1172_v46 }
 0x264   : >> { %v1104_v51 = vadd.f32 %v1103_v49, %v1102_v19  ;;  %v1175_v52 = vrot.slane %v1174_v50, 4 }
 0x266   : >> { %v1105_v53 = vrot.slane %v1104_v51, 2  ;;  %v1176_v55 = vadd.f32 %v1175_v52, %v1174_v50 }
 0x268   : >> { %v1106_v56 = vadd.f32 %v1105_v53, %v1104_v51  ;;  %v1177_v57 = vrot.slane %v1176_v55, 2 }
 0x26a   : >> { %v1107_v41 = vrot.slane %v1106_v56, 1  ;;  %v1178_v58 = vadd.f32 %v1177_v57, %v1176_v55 }
 0x26c   : >> { %v1108_v59 = vadd.f32 %v1107_v41, %v1106_v56  ;;  %v1179_v60 = vrot.slane %v1178_v58, 1 }
 0x26e   : >> { %v1109_v33 = vadd.f32 %v13287_v6, %v1108_v59   ;;  %v1180_v61 = vadd.f32 %v1179_v60, %v1178_v58  ;;  %788 = sbr.rel (!%p786_p0) target bundleno = 362 (0x16a), region = 300 }
 0x270   : >> { %v1181_v63 = vadd.f32 %v13283_v5, %v1180_v61   ;;  %v18098_v6 = vmov %v1109_v33 }
 0x271   : > { %v18100_v6 = vmov (%p786_p0), %v1109_v33 }
 0x272   : >> { %v18097_v5 = vmov %v1181_v63 }
 0x273   : > { %v18099_v5 = vmov %v1181_v63  ;;  %780 = sbr.rel (!%p778_p1) target bundleno = 361 (0x169), region = 311  ;;  %v1206_v6 = vmul.f32 (%p778_p1), 7.086168e-05, %v1109_v33  ;;  %v1207_v7 = vmul.f32 (%p778_p1), 7.086168e-05, %v1181_v63  ;;  %s15215_s0 = smov (%p778_p1), 0  }
 0x274   :  { %v1210_v40 = vld [vmem:[%s18070_s2] sm:$0x1] (%p778_p1) }
 0x275   :  { %v1208_v8 = vmul.f32 (%p778_p1), %v1206_v6, %v1206_v6  ;;  %v15208_v35 = vld [vmem:[%s18071_s3] sm:$0x1] (%p778_p1) }
 0x277   :  { %v1209_v9 = vsub.f32 (%p778_p1), %v1207_v7, %v1208_v8 }
 0x279   :  { %v1211_v10 = vadd.f32 1e-05, %v1209_v9 }
 0x27b   :  { %13111 = vrsqrt.f32 %v1211_v10 }
 0x288   :  { %v13112_v12 = vpop.eup %13111 }
 0x289   :  { %v15203_v13 = vmul.f32 %v13112_v12, %v1210_v40 }
 0x28b   :  { %v15211_v14 = vmul.f32 %v15203_v13, %v1206_v6 }
 0x28d   :  { %v1216_v0 = vsub.f32 %v15208_v35, %v15211_v14 }
 0x28e LB: > { %s15220_s2 = smov 0   ;;  %s13295_s0 = sphi %s15215_s0, %s1222_s0  }
 0x28f LB: >> { %s9756_s3 = smul.u32 7568, %s13295_s0  ;;  %v1287_v1 = vlaneseq  ;;  %vm1399_vm1 = vcmask 254976   ;;  %s13299_s2 = sphi %s15220_s2, %s1228_s2  }
 0x290   : >> { %s10248_s23 = smul.u32 176, %s13299_s2 }
 0x291   : >> { %v15227_v3 = vshrl.u32 %v1287_v1, 7  ;;  %s9800_s25 = smul.u32 2112, %s13295_s0 }
 0x292   : >> { %s9759_s24 = sadd.s32 %s10248_s23, %s9756_s3  ;;  %s9801_s1 = smul.u32 48, %s13299_s2 }
 0x293   : >> { %v15230_v4 = vsub.s32 0, %v15227_v3  ;;  %s15233_s26 = scalar_lea.vmem [#allocation5], %s9759_s24  ;;  %s1228_s2 = sadd.s32 1, %s13299_s2  }
 0x294   : >> { %v10249_v5 = vld [vmem:[%s15233_s26 + $0x59] ss:$2 sm:$0xff]  ;;  %v10257_v15 = vld [vmem:[%s15233_s26 + $0x5a] ss:$2 sm:$0xff]  ;;  %v10250_v54 = vld [vmem:[%s15233_s26 + $0x69] ss:$2 sm:$0xff]  ;;  %s9802_s27 = sadd.s32 %s9801_s1, %s9800_s25 }
 0x295   : >> { %18101 = vst [vmem:[#allocation10_spill] sm:$0xff] %v15230_v4  ;;  %v10265_v16 = vld [vmem:[%s15233_s26 + $0xb1] ss:$2 sm:$0xff]  ;;  %v15240_v17 = vrot.slane %v15203_v13, %v15230_v4  ;;  %v15246_v18 = vrot.slane %v1216_v0, %v15230_v4  ;;  %v10273_v20 = vld [vmem:[%s15233_s26 + $0xb2] ss:$2 sm:$0xff]  ;;  %s15291_s28 = scalar_lea.vmem [#allocation2], %s9802_s27 }
 0x296   : >> { %v10258_v24 = vld [vmem:[%s15233_s26 + $0x6a] ss:$2 sm:$0xff]  ;;  %v10266_v26 = vld [vmem:[%s15233_s26 + $0xc1] ss:$2 sm:$0xff]  ;;  %v10259_v43 = vld [vmem:[%s15233_s26 + $0x7a] ss:$2 sm:$0xff] }
 0x297   : >> { %v1292_v21 = vmul.f32 %v10249_v5, %v15240_v17  ;;  %v1316_v22 = vmul.f32 %v10257_v15, %v15240_v17  ;;  %v1334_v48 = vmul.f32 %v10265_v16, %v15240_v17  ;;  %v1352_v23 = vmul.f32 %v10273_v20, %v15240_v17  ;;  %v10274_v27 = vld [vmem:[%s15233_s26 + $0xc2] ss:$2 sm:$0xff]  ;;  %v10251_v42 = vld [vmem:[%s15233_s26 + $0x79] ss:$2 sm:$0xff]  ;;  %v10275_v47 = vld [vmem:[%s15233_s26 + $0xd2] ss:$2 sm:$0xff] }
 0x298   : >> { %v1293_v28 = vmul.f32 %v10250_v54, %v15240_v17  ;;  %v1317_v29 = vmul.f32 %v10258_v24, %v15240_v17  ;;  %v1335_v11 = vmul.f32 %v10266_v26, %v15240_v17  ;;  %v1353_v30 = vmul.f32 %v10274_v27, %v15240_v17  ;;  %v10267_v44 = vld [vmem:[%s15233_s26 + $0xd1] ss:$2 sm:$0xff]  ;;  %v10260_v58 = vld [vmem:[%s15233_s26 + $0x8a] ss:$2 sm:$0xff]  ;;  %v10268_v63 = vld [vmem:[%s15233_s26 + $0xe1] ss:$2 sm:$0xff] }
 0x299   : >> { %v1304_v31 = vadd.f32 %v15246_v18, %v1292_v21  ;;  %v1322_v62 = vadd.f32 %v1316_v22, %v15246_v18  ;;  %v1340_v32 = vadd.f32 %v1334_v48, %v15246_v18  ;;  %v1358_v34 = vadd.f32 %v1352_v23, %v15246_v18  ;;  %v10252_v53 = vld [vmem:[%s15233_s26 + $0x89] ss:$2 sm:$0xff]  ;;  %v10276_v9 = vld [vmem:[%s15233_s26 + $0xe2] ss:$2 sm:$0xff]  ;;  %v10253_v15 = vld [vmem:[%s15233_s26 + $0x99] ss:$2 sm:$0xff] }
 0x29a   : >> { %v1305_v36 = vadd.f32 %v15246_v18, %v1293_v28  ;;  %v1323_v37 = vadd.f32 %v1317_v29, %v15246_v18  ;;  %v1341_v38 = vadd.f32 %v1335_v11, %v15246_v18  ;;  %v1359_v39 = vadd.f32 %v1353_v30, %v15246_v18  ;;  %v10261_v22 = vld [vmem:[%s15233_s26 + $0x9a] ss:$2 sm:$0xff]  ;;  %v10269_v27 = vld [vmem:[%s15233_s26 + $0xf1] ss:$2 sm:$0xff]  ;;  %p1225_p2 = scmp.ge.s32.totalorder %s1228_s2, 42  }
 0x29b   : >> { %v1310_v25 = vmax.f32 %v1304_v31, 0.0  ;;  %v1328_v45 = vmax.f32 %v1322_v62, 0.0  ;;  %v1346_v19 = vmax.f32 %v1340_v32, 0.0  ;;  %v1364_v46 = vmax.f32 %v1358_v34, 0.0  ;;  %v10277_v28 = vld [vmem:[%s15233_s26 + $0xf2] ss:$2 sm:$0xff] }
 0x29c   : >> { %v1311_v49 = vmax.f32 %v1305_v36, 0.0  ;;  %v1329_v50 = vmax.f32 %v1323_v37, 0.0  ;;  %v1347_v51 = vmax.f32 %v1341_v38, 0.0  ;;  %v1365_v52 = vmax.f32 %v1359_v39, 0.0  ;;  %s1222_s0 = sadd.s32 (%p1225_p2), 1, %s13295_s0  }
 0x29d   : >> { %v1370_v55 = vmax.f32 %v1310_v25, %v1328_v45  ;;  %v1376_v56 = vmax.f32 %v1346_v19, %v1364_v46  ;;  %v1294_v57 = vmul.f32 %v10251_v42, %v15240_v17  ;;  %v1318_v41 = vmul.f32 %v10259_v43, %v15240_v17  ;;  %v10254_v62 = vld [vmem:[%s15233_s26 + $0xa9] ss:$2 sm:$0x3]  ;;  %v10262_v38 = vld [vmem:[%s15233_s26 + $0xaa] ss:$2 sm:$0x3] }
 0x29e   : >> { %v1371_v59 = vmax.f32 %v1311_v49, %v1329_v50  ;;  %v1377_v60 = vmax.f32 %v1347_v51, %v1365_v52  ;;  %v1336_v33 = vmul.f32 %v10267_v44, %v15240_v17  ;;  %v1354_v61 = vmul.f32 %v10275_v47, %v15240_v17  ;;  %v10270_v25 = vld [vmem:[%s15233_s26 + $0x101] ss:$2 sm:$0x3]  ;;  %v10278_v49 = vld [vmem:[%s15233_s26 + $0x102] ss:$2 sm:$0x3] }
 0x29f   : >> { %v1382_v6 = vmax.f32 %v1370_v55, %v1376_v56  ;;  %v1306_v7 = vadd.f32 %v15246_v18, %v1294_v57  ;;  %v1324_v8 = vadd.f32 %v1318_v41, %v15246_v18  ;;  %v1295_v10 = vmul.f32 %v10252_v53, %v15240_v17  ;;  %p1219_p3 = scmp.ge.s32.totalorder (%p1225_p2), %s1222_s0, 2  }
 0x2a0   : >> { %v1383_v40 = vmax.f32 %v1371_v59, %v1377_v60  ;;  %v1342_v12 = vadd.f32 %v1336_v33, %v15246_v18  ;;  %v1360_v1 = vadd.f32 %v1354_v61, %v15246_v18  ;;  %v1319_v5 = vmul.f32 %v10260_v58, %v15240_v17 }
 0x2a1   : >> { %10279 = vst.msk [vmem:[%s15291_s28 + $0x39] sm:$0xff] %vm51_vm0, %v1382_v6  ;;  %v1312_v16 = vmax.f32 %v1306_v7, 0.0  ;;  %v1330_v20 = vmax.f32 %v1324_v8, 0.0  ;;  %v1307_v54 = vadd.f32 %v15246_v18, %v1295_v10  ;;  %v1337_v21 = vmul.f32 %v10268_v63, %v15240_v17 }
 0x2a2   : >> { %10280 = vst.msk [vmem:[%s15291_s28 + $0x41] sm:$0xff] %vm51_vm0, %v1383_v40  ;;  %v1348_v48 = vmax.f32 %v1342_v12, 0.0  ;;  %v1366_v23 = vmax.f32 %v1360_v1, 0.0  ;;  %v1325_v24 = vadd.f32 %v1319_v5, %v15246_v18  ;;  %v1355_v26 = vmul.f32 %v10276_v9, %v15240_v17 }
 0x2a3   : >> { %v1372_v29 = vmax.f32 %v1312_v16, %v1330_v20  ;;  %v1313_v11 = vmax.f32 %v1307_v54, 0.0  ;;  %v1343_v30 = vadd.f32 %v1337_v21, %v15246_v18  ;;  %v1296_v31 = vmul.f32 %v10253_v15, %v15240_v17 }
 0x2a4   : >> { %v1378_v32 = vmax.f32 %v1348_v48, %v1366_v23  ;;  %v1331_v34 = vmax.f32 %v1325_v24, 0.0  ;;  %v1361_v36 = vadd.f32 %v1355_v26, %v15246_v18  ;;  %v1320_v37 = vmul.f32 %v10261_v22, %v15240_v17 }
 0x2a5   : >> { %v1349_v39 = vmax.f32 %v1343_v30, 0.0  ;;  %v1308_v42 = vadd.f32 %v15246_v18, %v1296_v31  ;;  %v1338_v43 = vmul.f32 %v10269_v27, %v15240_v17  ;;  %v1356_v44 = vmul.f32 %v10277_v28, %v15240_v17 }
 0x2a6   : >> { %v1384_v45 = vmax.f32 %v1372_v29, %v1378_v32  ;;  %v1367_v19 = vmax.f32 %v1361_v36, 0.0  ;;  %v1373_v46 = vmax.f32 %v1313_v11, %v1331_v34  ;;  %v1326_v47 = vadd.f32 %v1320_v37, %v15246_v18 }
 0x2a7   : >> { %v1314_v50 = vmax.f32 %v1308_v42, 0.0  ;;  %v1344_v51 = vadd.f32 %v1338_v43, %v15246_v18  ;;  %v1362_v52 = vadd.f32 %v1356_v44, %v15246_v18  ;;  %v1297_v53 = vmul.f32 %v10254_v62, %v15240_v17 }
 0x2a8   : >> { %10281 = vst.msk [vmem:[%s15291_s28 + $0x49] sm:$0xff] %vm51_vm0, %v1384_v45  ;;  %v1379_v55 = vmax.f32 %v1349_v39, %v1367_v19  ;;  %v1332_v56 = vmax.f32 %v1326_v47, 0.0  ;;  %v1321_v57 = vmul.f32 %v10262_v38, %v15240_v17  ;;  %v1339_v41 = vmul.f32 %v10270_v25, %v15240_v17 }
 0x2a9   : >> { %v1350_v58 = vmax.f32 %v1344_v51, 0.0  ;;  %v1368_v59 = vmax.f32 %v1362_v52, 0.0  ;;  %v1309_v60 = vadd.f32 %v15246_v18, %v1297_v53  ;;  %v1357_v33 = vmul.f32 %v10278_v49, %v15240_v17 }
 0x2aa   : >> { %v1385_v61 = vmax.f32 %v1373_v46, %v1379_v55  ;;  %v1374_v63 = vmax.f32 %v1314_v50, %v1332_v56  ;;  %v1327_v6 = vadd.f32 %v1321_v57, %v15246_v18  ;;  %v1345_v7 = vadd.f32 %v1339_v41, %v15246_v18 }
 0x2ab   : >> { %v1380_v8 = vmax.f32 %v1350_v58, %v1368_v59  ;;  %v1315_v9 = vmax.f32 %v1309_v60, 0.0  ;;  %v1363_v10 = vadd.f32 %v1357_v33, %v15246_v18 }
 0x2ac   : >> { %10282 = vst.msk [vmem:[%s15291_s28 + $0x51] sm:$0xff] %vm51_vm0, %v1385_v61  ;;  %v1333_v40 = vmax.f32 %v1327_v6, 0.0  ;;  %v1351_v12 = vmax.f32 %v1345_v7, 0.0 }
 0x2ad   : >> { %v1386_v1 = vmax.f32 %v1374_v63, %v1380_v8  ;;  %v1369_v5 = vmax.f32 %v1363_v10, 0.0 }
 0x2ae   : >> { %v1375_v15 = vmax.f32 %v1315_v9, %v1333_v40 }
 0x2af   : >> { %10283 = vst.msk [vmem:[%s15291_s28 + $0x59] sm:$0xff] %vm51_vm0, %v1386_v1  ;;  %v1381_v17 = vmax.f32 %v1351_v12, %v1369_v5  ;;  %1227 = sbr.rel (!%p1225_p2) target bundleno = 655 (0x28f), region = 322 }
 0x2b1   : >> { %v1387_v16 = vmax.f32 %v1375_v15, %v1381_v17 }
 0x2b3   : >> { %10284 = vst.msk [vmem:[%s15291_s28 + $0x61] sm:$0x3] %vm1399_vm1, %v1387_v16 }
 0x2b4   :  { %1221 = sbr.rel (!%p1219_p3) target bundleno = 654 (0x28e), region = 333  ;;  %v15341_v18 = vadd.s32 (%p1219_p3), 8, %v15227_v3  ;;  %v15344_v20 = vadd.s32 (%p1219_p3), 16, %v15227_v3  ;;  %v15347_v54 = vadd.s32 (%p1219_p3), 24, %v15227_v3  ;;  %v15350_v21 = vadd.s32 (%p1219_p3), 32, %v15227_v3  ;;  %s15392_s29 = smov (%p1219_p3), 0  }
 0x2b5   :  { %v15353_v22 = vadd.s32 (%p1219_p3), 40, %v15227_v3  ;;  %v1408_v48 = vadd.s32 (%p1219_p3), 48, %v15227_v3  ;;  %v15357_v23 = vadd.s32 (%p1219_p3), 56, %v15227_v3  ;;  %v15360_v13 = vadd.s32 (%p1219_p3), 64, %v15227_v3 }
 0x2b6   :  { %18102 = vst [vmem:[#allocation11_spill] sm:$0xff] (%p1219_p3), %v15341_v18  ;;  %18103 = vst [vmem:[#allocation12_spill] sm:$0xff] (%p1219_p3), %v15344_v20  ;;  %v15363_v35 = vadd.s32 (%p1219_p3), 72, %v15227_v3  ;;  %v1413_v14 = vadd.s32 (%p1219_p3), 88, %v15227_v3  ;;  %v1414_v0 = vadd.s32 (%p1219_p3), 96, %v15227_v3  ;;  %v1419_v24 = vadd.s32 (%p1219_p3), 136, %v15227_v3 }
 0x2b7   :  { %18104 = vst [vmem:[#allocation13_spill] sm:$0xff] (%p1219_p3), %v15347_v54  ;;  %18105 = vst [vmem:[#allocation14_spill] sm:$0xff] (%p1219_p3), %v15350_v21  ;;  %vm1420_vm2 = vcmp.eq.s32.totalorder (%p1219_p3), %v15227_v3, 0  ;;  %vm1443_vm3 = vcmp.eq.s32.totalorder (%p1219_p3), %v15353_v22, 43  ;;  %vm1480_vm4 = vcmp.eq.s32.totalorder (%p1219_p3), %v1408_v48, 48  ;;  %v18086_v26 = vmov (%p1219_p3), 1.0  }
 0x2b8   :  { %18106 = vst [vmem:[#allocation15_spill] sm:$0xff] (%p1219_p3), %v15353_v22  ;;  %18107 = vst [vmem:[#allocation16_spill] sm:$0xff] (%p1219_p3), %v15357_v23  ;;  %vm1521_vm5 = vcmp.eq.s32.totalorder (%p1219_p3), %v1413_v14, 91  ;;  %vm1558_vm6 = vcmp.eq.s32.totalorder (%p1219_p3), %v1414_v0, 96  ;;  %vm1599_vm7 = vcmp.eq.s32.totalorder (%p1219_p3), %v1419_v24, 139  ;;  %v15371_v27 = vsel (%p1219_p3), %vm1420_vm2, 0.0, %v18086_v26 }
 0x2b9   :  { %18108 = vst [vmem:[#allocation17_spill] sm:$0xff] %v15360_v13  ;;  %18109 = vst [vmem:[#allocation18_spill] sm:$0xff] %v15363_v35  ;;  %v15374_v28 = vsel %vm1443_vm3, 0.0, %v18086_v26  ;;  %v15377_v29 = vsel %vm1480_vm4, 0.0, %v18086_v26  ;;  %v15380_v11 = vsel %vm1521_vm5, 0.0, %v18086_v26  ;;  %v15383_v3 = vsel %vm1558_vm6, 0.0, %v18086_v26 }
 0x2ba   :  { %18110 = vst [vmem:[#allocation19_spill] sm:$0xff] %v15371_v27  ;;  %18111 = vst [vmem:[#allocation20_spill] sm:$0xff] %v15374_v28  ;;  %v15386_v30 = vsel %vm1599_vm7, 0.0, %v18086_v26  ;;  %v15388_v31 = vmov 0.0   ;;  %v15390_v62 = vmov 0.0  }
 0x2bb   :  { %18112 = vst [vmem:[#allocation21_spill] sm:$0xff] %v15377_v29  ;;  %18113 = vst [vmem:[#allocation22_spill] sm:$0xff] %v15380_v11 }
 0x2bc   :  { %18114 = vst [vmem:[#allocation23_spill] sm:$0xff] %v15383_v3  ;;  %18115 = vst [vmem:[#allocation24_spill] sm:$0xff] %v15386_v30 }
 0x2bd LB: > { %s15403_s30 = smov 0   ;;  %s13311_s29 = sphi %s15392_s29, %s1641_s29   ;;  %v13307_v62 = vphi %v15390_v62, %v18140_v62   ;;  %v13303_v31 = vphi %v15388_v31, %v18139_v31  }
 0x2be LB: >> { %18116 = vst [vmem:[#allocation25_spill] sm:$0xff] %v13315_v31  ;;  %18117 = vst [vmem:[#allocation26_spill] sm:$0xff] %v13319_v62  ;;  %v1704_v32 = vld [vmem:[%s18072_s4 + $0x38] sm:$0xff]  ;;  %v1703_v34 = vld [vmem:[%s18072_s4 + $0x30] sm:$0xff]  ;;  %s9805_s20 = smul.u32 2112, %s13311_s29  ;;  %s13323_s30 = sphi %s15403_s30, %s1649_s30   ;;  %v13319_v62 = vphi %v13307_v62, %v18138_v62   ;;  %v13315_v31 = vphi %v13303_v31, %v18137_v31  }
 0x2bf   : >> { %11705 = vmatprep.subr.mxu0 %v1704_v32  ;;  %12825 = vmatprep.subr.mxu1 %v1704_v32  ;;  %v1702_v36 = vld [vmem:[%s18072_s4 + $0x28] sm:$0xff]  ;;  %s9806_s0 = smul.u32 144, %s13323_s30  ;;  %v1701_v37 = vld [vmem:[%s18072_s4 + $0x20] sm:$0xff]  ;;  %v2146_v44 = vld [vmem:[%s18072_s4 + $0x58] sm:$0xff]  ;;  %s1649_s30 = sadd.s32 1, %s13323_s30  }
 0x2c0   : >> { %11706 = vmatpush3.msra.mxu0 %v1704_v32  ;;  %12829 = vmatpush3.msra.mxu1 %v1704_v32  ;;  %v1680_v25 = vld [vmem:[%s18072_s4 + $0x18] sm:$0xff]  ;;  %v2145_v49 = vld [vmem:[%s18072_s4 + $0x50] sm:$0xff]  ;;  %v1678_v56 = vld [vmem:[%s18072_s4 + $0x8] sm:$0xff]  ;;  %p1646_p4 = scmp.ge.s32.totalorder %s1649_s30, 14  }
 0x2c1   : >> { %11707 = vmatprep.subr.mxu0 %v1703_v34  ;;  %12826 = vmatprep.subr.mxu1 %v1703_v34  ;;  %s15428_s23 = sadd.s32 %s9806_s0, %s9805_s20  ;;  %v1679_v50 = vld [vmem:[%s18072_s4 + $0x10] sm:$0xff]  ;;  %v2144_v57 = vld [vmem:[%s18072_s4 + $0x48] sm:$0xff]  ;;  %v1677_v33 = vld [vmem:[%s18072_s4] sm:$0xff]  ;;  %s1641_s29 = sadd.s32 (%p1646_p4), 1, %s13311_s29  }
 0x2c2   : >> { %11708 = vmatpush3.msra.mxu0 %v1703_v34  ;;  %12830 = vmatpush3.msra.mxu1 %v1703_v34  ;;  %s15431_s24 = scalar_lea.vmem [#allocation2], %s15428_s23  ;;  %v2143_v6 = vld [vmem:[%s18072_s4 + $0x40] sm:$0xff]  ;;  %v2397_v7 = vld [vmem:[%s18072_s4 + $0x78] sm:$0xff]  ;;  %v2396_v1 = vld [vmem:[%s18072_s4 + $0x70] sm:$0xff]  ;;  %p1638_p5 = scmp.ge.s32.totalorder (%p1646_p4), %s1641_s29, 2  }
 0x2c3   : >> { %11709 = vmatprep.subr.mxu0 %v1702_v36  ;;  %12827 = vmatprep.subr.mxu1 %v1702_v36  ;;  %v10303_v38 = vld [vmem:[%s15431_s24 + $0x8] sm:$0xff]  ;;  %v15435_v39 = vld [vmem:[%s15431_s24 + $0x58] sm:$0xff]  ;;  %v10304_v42 = vld [vmem:[%s15431_s24 + $0x10] sm:$0xff] }
 0x2c4   : >> { %11710 = vmatpush3.msra.mxu0 %v1702_v36  ;;  %12831 = vmatpush3.msra.mxu1 %v1702_v36  ;;  %v15439_v43 = vld [vmem:[%s15431_s24 + $0x60] sm:$0xff]  ;;  %v10305_v45 = vld [vmem:[%s15431_s24 + $0x18] sm:$0xff]  ;;  %v15455_v19 = vld [vmem:[%s15431_s24 + $0x68] sm:$0xff] }
 0x2c5   : >> { %11711 = vmatprep.subr.mxu0 %v1701_v37  ;;  %12828 = vmatprep.subr.mxu1 %v1701_v37  ;;  %v10306_v46 = vld [vmem:[%s15431_s24 + $0x20] sm:$0xff]  ;;  %v15459_v47 = vld [vmem:[%s15431_s24 + $0x70] sm:$0xff]  ;;  %v10307_v51 = vld [vmem:[%s15431_s24 + $0x28] sm:$0xff] }
 0x2c6   : >> { %11712 = vmatpush3.msra.mxu0 %v1701_v37  ;;  %12832 = vmatpush3.msra.mxu1 %v1701_v37  ;;  %v15475_v52 = vld [vmem:[%s15431_s24 + $0x78] sm:$0xff]  ;;  %v10308_v53 = vld [vmem:[%s15431_s24 + $0x30] sm:$0xff]  ;;  %v15479_v55 = vld [vmem:[%s15431_s24 + $0x80] sm:$0xff] }
 0x2c7   : >> { %11713 = vmatprep.mubr.msk.f32.mxu0 %vm51_vm0, %v10303_v38  ;;  %11728 = vmatprep.mubr.msk.f32.mxu1 %vm51_vm0, %v15435_v39  ;;  %v15491_v41 = vld [vmem:[%s15431_s24 + $0x38] sm:$0xff]  ;;  %v15494_v58 = vld [vmem:[%s15431_s24 + $0x88] sm:$0xff]  ;;  %v15500_v59 = vld [vmem:[%s15431_s24 + $0x40] sm:$0xff] }
 0x2c8   : >> { %11714 = vmatmul.mubr.msk.f32.vlgmr.msra.gmra.mxu0 %vm51_vm0, %v10304_v42  ;;  %11729 = vmatmul.mubr.msk.f32.vlgmr.msra.gmra.mxu1 %vm51_vm0, %v15439_v43  ;;  %v15503_v60 = vld [vmem:[%s15431_s24 + $0x90] sm:$0xff]  ;;  %v15513_v61 = vld [vmem:[%s15431_s24 + $0x48] sm:$0xff]  ;;  %v2647_v12 = vld [vmem:[%s18072_s4 + $0x98] sm:$0xff] }
 0x2c9   : >> { %11775 = vmatprep.subr.mxu0 %v2146_v44  ;;  %11740 = vmatprep.subr.mxu1 %v1680_v25  ;;  %v10285_v63 = vld [vmem:[%s15431_s24 + $0x7] sm:$0xff]  ;;  %v15529_v8 = vld [vmem:[%s15431_s24 + $0x50] sm:$0xff]  ;;  %v10288_v5 = vld [vmem:[%s15431_s24 + $0x1f] sm:$0xff] }
 0x2ca   : >> { %11776 = vmatpush3.msra.mxu0 %v2146_v44  ;;  %11716 = vmatprep.mubr.msk.f32.mxu0 %vm51_vm0, %v10305_v45  ;;  %v10286_v9 = vld [vmem:[%s15431_s24 + $0xf] sm:$0xff]  ;;  %v10287_v10 = vld [vmem:[%s15431_s24 + $0x17] sm:$0xff]  ;;  %v10289_v17 = vld [vmem:[%s15431_s24 + $0x27] sm:$0xff] }
 0x2cb   : >> { %11731 = vmatprep.mubr.msk.f32.mxu1 %vm51_vm0, %v15455_v19  ;;  %11741 = vmatpush3.msra.mxu1 %v1680_v25  ;;  %v10357_v40 = vld [vmem:[%s15431_s24 + $0x9] sm:$0xff]  ;;  %v10358_v15 = vld [vmem:[%s15431_s24 + $0x11] sm:$0xff]  ;;  %v10359_v16 = vld [vmem:[%s15431_s24 + $0x19] sm:$0xff] }
 0x2cc   : >> { %11717 = vmatmul.mubr.msk.f32.gmra.mxu0 %vm51_vm0, %v10306_v46  ;;  %11732 = vmatmul.mubr.msk.f32.gmra.mxu1 %vm51_vm0, %v15459_v47  ;;  %v2646_v48 = vld [vmem:[%s18072_s4 + $0x90] sm:$0xff]  ;;  %v2395_v14 = vld [vmem:[%s18072_s4 + $0x68] sm:$0xff]  ;;  %v2394_v37 = vld [vmem:[%s18072_s4 + $0x60] sm:$0xff] }
 0x2cd   : >> { %11777 = vmatprep.subr.mxu0 %v2145_v49  ;;  %11742 = vmatprep.subr.mxu1 %v1679_v50  ;;  %v10290_v0 = vld [vmem:[%s15431_s24 + $0x2f] sm:$0xff]  ;;  %v10360_v24 = vld [vmem:[%s15431_s24 + $0x21] sm:$0xff]  ;;  %v15563_v32 = vld [vmem:[%s15431_s24 + $0x37] sm:$0xff] }
 0x2ce   : >> { %11778 = vmatpush3.msra.mxu0 %v2145_v49  ;;  %11719 = vmatprep.mubr.msk.f32.mxu0 %vm51_vm0, %v10307_v51  ;;  %v10361_v34 = vld [vmem:[%s15431_s24 + $0x29] sm:$0xff]  ;;  %v10292_v38 = vld [vmem:[%s15431_s24 + $0x3f] sm:$0xff]  ;;  %v10362_v42 = vld [vmem:[%s15431_s24 + $0x31] sm:$0xff] }
 0x2cf   : >> { %11734 = vmatprep.mubr.msk.f32.mxu1 %vm51_vm0, %v15475_v52  ;;  %11743 = vmatpush3.msra.mxu1 %v1679_v50  ;;  %v2645_v36 = vld [vmem:[%s18072_s4 + $0x88] sm:$0xff]  ;;  %v15581_v25 = vld [vmem:[%s15431_s24 + $0x39] sm:$0xff] }
 0x2d0   : >> { %11720 = vmatmul.mubr.msk.f32.gmra.mxu0 %vm51_vm0, %v10308_v53  ;;  %11735 = vmatmul.mubr.msk.f32.gmra.mxu1 %vm51_vm0, %v15479_v55  ;;  %v10293_v44 = vld [vmem:[%s15431_s24 + $0x47] sm:$0xff]  ;;  %v2898_v46 = vld [vmem:[%s18072_s4 + $0xb8] sm:$0xff]  ;;  %v10294_v49 = vld [vmem:[%s15431_s24 + $0x4f] sm:$0xff] }
 0x2d1   : >> { %11744 = vmatprep.subr.mxu1 %v1678_v56  ;;  %11779 = vmatprep.subr.mxu0 %v2144_v57  ;;  %v2644_v45 = vld [vmem:[%s18072_s4 + $0x80] sm:$0xff]  ;;  %v10295_v51 = vld [vmem:[%s15431_s24 + $0x57] sm:$0xff]  ;;  %v15600_v53 = vld [vmem:[%s15431_s24 + $0x49] sm:$0xff] }
 0x2d2   : >> { %11722 = vmatprep.mubr.msk.f32.mxu0 %vm51_vm0, %v15491_v41  ;;  %11737 = vmatprep.mubr.msk.f32.mxu1 %vm51_vm0, %v15494_v58  ;;  %v15596_v50 = vld [vmem:[%s15431_s24 + $0x41] sm:$0xff] }
 0x2d3   : >> { %11745 = vmatpush3.msra.mxu1 %v1678_v56  ;;  %11780 = vmatpush3.msra.mxu0 %v2144_v57  ;;  %v3149_v56 = vld [vmem:[%s18072_s4 + $0xd8] sm:$0xff] }
 0x2d4   : >> { %11723 = vmatmul.mubr.msk.f32.gmra.mxu0 %vm51_vm0, %v15500_v59  ;;  %11738 = vmatmul.mubr.msk.f32.gmra.mxu1 %vm51_vm0, %v15503_v60  ;;  %v10296_v57 = vld [vmem:[%s15431_s24 + $0x5f] sm:$0xff] }
 0x2d5   : >> { %11746 = vmatprep.subr.mxu1 %v1677_v33  ;;  %11725 = vmatprep.mubr.msk.f32.mxu0 %vm51_vm0, %v15513_v61 }
 0x2d6   : >> { %11747 = vmatpush3.msra.mxu1 %v1677_v33  ;;  %11748 = vmatprep.mubr.msk.f32.mxu1 %vm51_vm0, %v10285_v63  ;;  %v15613_v33 = vld [vmem:[%s15431_s24 + $0x51] sm:$0xff]  ;;  %v15616_v63 = vld [vmem:[%s15431_s24 + $0x67] sm:$0xff] }
 0x2d7   : >> { %11781 = vmatprep.subr.mxu0 %v2143_v6  ;;  %11810 = vmatprep.subr.mxu1 %v2397_v7 }
 0x2d8   : >> { %11726 = vmatmul.mubr.msk.f32.gmra.mxu0 %vm51_vm0, %v15529_v8  ;;  %11749 = vmatmul.mubr.msk.f32.vlgmr.msra.gmra.mxu1 %vm51_vm0, %v10286_v9  ;;  %v15632_v9 = vld [vmem:[%s15431_s24 + $0x61] sm:$0xff] }
 0x2d9   : >> { %11782 = vmatpush3.msra.mxu0 %v2143_v6  ;;  %11751 = vmatprep.mubr.msk.f32.mxu1 %vm51_vm0, %v10287_v10  ;;  %v15619_v6 = vld [vmem:[%s15431_s24 + $0x59] sm:$0xff] }
 0x2da   : >> { %11783 = vmatprep.mubr.msk.f32.mxu0 %vm51_vm0, %v10357_v40  ;;  %11811 = vmatpush3.msra.mxu1 %v2397_v7  ;;  %v15629_v7 = vld [vmem:[%s15431_s24 + $0x6f] sm:$0xff]  ;;  %v15635_v10 = vld [vmem:[%s15431_s24 + $0x77] sm:$0xff] }
 0x2db   : >> { %11845 = vmatprep.subr.mxu0 %v2647_v12  ;;  %11812 = vmatprep.subr.mxu1 %v2396_v1  ;;  %v15638_v40 = vld [vmem:[%s15431_s24 + $0x69] sm:$0xff] }
 0x2dc   : >> { %11752 = vmatmul.mubr.msk.f32.gmra.mxu1 %vm51_vm0, %v10288_v5  ;;  %11784 = vmatmul.mubr.msk.f32.vlgmr.msra.gmra.mxu0 %vm51_vm0, %v10358_v15  ;;  %v15655_v5 = vld [vmem:[%s15431_s24 + $0x87] sm:$0xff]  ;;  %v15658_v15 = vld [vmem:[%s15431_s24 + $0x79] sm:$0xff] }
 0x2dd   : >> { %11846 = vmatpush3.msra.mxu0 %v2647_v12  ;;  %11754 = vmatprep.mubr.msk.f32.mxu1 %vm51_vm0, %v10289_v17  ;;  %v15649_v12 = vld [vmem:[%s15431_s24 + $0x7f] sm:$0xff]  ;;  %v15669_v17 = vld [vmem:[%s15431_s24 + $0x8f] sm:$0xff] }
 0x2de   : >> { %11786 = vmatprep.mubr.msk.f32.mxu0 %vm51_vm0, %v10359_v16  ;;  %11813 = vmatpush3.msra.mxu1 %v2396_v1  ;;  %v15652_v1 = vld [vmem:[%s15431_s24 + $0x71] sm:$0xff]  ;;  %v15672_v16 = vld [vmem:[%s15431_s24 + $0x81] sm:$0xff] }
 0x2df   : >> { %11847 = vmatprep.subr.mxu0 %v2646_v48  ;;  %11814 = vmatprep.subr.mxu1 %v2395_v14 }
 0x2e0   : >> { %11755 = vmatmul.mubr.msk.f32.gmra.mxu1 %vm51_vm0, %v10290_v0  ;;  %11787 = vmatmul.mubr.msk.f32.gmra.mxu0 %vm51_vm0, %v10360_v24  ;;  %v2897_v0 = vld [vmem:[%s18072_s4 + $0xb0] sm:$0xff] }
 0x2e1   : >> { %11757 = vmatprep.mubr.msk.f32.mxu1 %vm51_vm0, %v15563_v32  ;;  %11789 = vmatprep.mubr.msk.f32.mxu0 %vm51_vm0, %v10361_v34  ;;  %v3148_v24 = vld [vmem:[%s18072_s4 + $0xd0] sm:$0xff]  ;;  %v10406_v34 = vld [vmem:[%s15431_s24 + $0x9f] sm:$0xff] }
 0x2e2   : >> { %11848 = vmatpush3.msra.mxu0 %v2646_v48  ;;  %11815 = vmatpush3.msra.mxu1 %v2395_v14  ;;  %v15675_v48 = vld [vmem:[%s15431_s24 + $0x89] sm:$0xff]  ;;  %v15686_v14 = vld [vmem:[%s15431_s24 + $0x91] sm:$0xff] }
 0x2e3   : >> { %11849 = vmatprep.subr.mxu0 %v2645_v36  ;;  %11816 = vmatprep.subr.mxu1 %v2394_v37 }
 0x2e4   : >> { %11758 = vmatmul.mubr.msk.f32.gmra.mxu1 %vm51_vm0, %v10292_v38  ;;  %11790 = vmatmul.mubr.msk.f32.gmra.mxu0 %vm51_vm0, %v10362_v42  ;;  %v15768_v42 = vld [vmem:[%s15431_s24 + $0xa0] sm:$0xff] }
 0x2e5   : >> { %11760 = vmatprep.mubr.msk.f32.mxu1 %vm51_vm0, %v10293_v44  ;;  %11792 = vmatprep.mubr.msk.f32.mxu0 %vm51_vm0, %v15581_v25 }
 0x2e6   : >> { %11850 = vmatpush3.msra.mxu0 %v2645_v36  ;;  %11817 = vmatpush3.msra.mxu1 %v2394_v37  ;;  %v10407_v36 = vld [vmem:[%s15431_s24 + $0xa7] sm:$0xff]  ;;  %v15758_v37 = vld [vmem:[%s15431_s24 + $0x98] sm:$0xff] }
 0x2e7   : >> { %11851 = vmatprep.subr.mxu0 %v2644_v45  ;;  %11880 = vmatprep.subr.mxu1 %v2898_v46 }
 0x2e8   : >> { %11761 = vmatmul.mubr.msk.f32.gmra.mxu1 %vm51_vm0, %v10294_v49  ;;  %11793 = vmatmul.mubr.msk.f32.gmra.mxu0 %vm51_vm0, %v15596_v50 }
 0x2e9   : >> { %11763 = vmatprep.mubr.msk.f32.mxu1 %vm51_vm0, %v10295_v51  ;;  %11795 = vmatprep.mubr.msk.f32.mxu0 %vm51_vm0, %v15600_v53 }
 0x2ea   : >> { %11852 = vmatpush3.msra.mxu0 %v2644_v45  ;;  %v15772_v45 = vld [vmem:[%s15431_s24 + $0xa8] sm:$0xff] }
 0x2eb   : >> { %11915 = vmatprep.subr.mxu0 %v3149_v56 }
 0x2ec   : >> { %11764 = vmatmul.mubr.msk.f32.gmra.mxu1 %vm51_vm0, %v10296_v57  ;;  %11796 = vmatmul.mubr.msk.f32.gmra.mxu0 %vm51_vm0, %v15613_v33 }
 0x2ed   : >> { %11766 = vmatprep.mubr.msk.f32.mxu1 %vm51_vm0, %v15616_v63  ;;  %11798 = vmatprep.mubr.msk.f32.mxu0 %vm51_vm0, %v15619_v6 }
 0x2f0   : >> { %11767 = vmatmul.mubr.msk.f32.gmra.mxu1 %vm51_vm0, %v15629_v7  ;;  %11799 = vmatmul.mubr.msk.f32.gmra.mxu0 %vm51_vm0, %v15632_v9 }
 0x2f1   : >> { %11769 = vmatprep.mubr.msk.f32.mxu1 %vm51_vm0, %v15635_v10  ;;  %11801 = vmatprep.mubr.msk.f32.mxu0 %vm51_vm0, %v15638_v40 }
 0x2f4   : >> { %11770 = vmatmul.mubr.msk.f32.gmra.mxu1 %vm51_vm0, %v15649_v12  ;;  %11802 = vmatmul.mubr.msk.f32.gmra.mxu0 %vm51_vm0, %v15652_v1 }
 0x2f5   : >> { %11772 = vmatprep.mubr.msk.f32.mxu1 %vm51_vm0, %v15655_v5  ;;  %11804 = vmatprep.mubr.msk.f32.mxu0 %vm51_vm0, %v15658_v15 }
 0x2f8   : >> { %11773 = vmatmul.mubr.msk.f32.gmra.mxu1 %vm51_vm0, %v15669_v17  ;;  %11805 = vmatmul.mubr.msk.f32.gmra.mxu0 %vm51_vm0, %v15672_v16 }
 0x2f9   : >> { %11807 = vmatprep.mubr.msk.f32.mxu0 %vm51_vm0, %v15675_v48  ;;  %11818 = vmatprep.mubr.msk.f32.mxu1 %vm51_vm0, %v15563_v32  ;;  %v2896_v32 = vld [vmem:[%s18072_s4 + $0xa8] sm:$0xff] }
 0x2fc   : >> { %11808 = vmatmul.mubr.msk.f32.gmra.mxu0 %vm51_vm0, %v15686_v14  ;;  %11819 = vmatmul.mubr.msk.f32.vlgmr.msra.gmra.mxu1 %vm51_vm0, %v10292_v38  ;;  %v10408_v38 = vld [vmem:[%s15431_s24 + $0xaf] sm:$0xff] }
 0x2fd   : >> { %11821 = vmatprep.mubr.msk.f32.mxu1 %vm51_vm0, %v10293_v44  ;;  %11853 = vmatprep.mubr.msk.f32.mxu0 %vm51_vm0, %v15491_v41  ;;  %v3147_v41 = vld [vmem:[%s18072_s4 + $0xc8] sm:$0xff]  ;;  %v10409_v44 = vld [vmem:[%s15431_s24 + $0xb7] sm:$0xff] }
 0x2fe   : >> { %11881 = vmatpush3.msra.mxu1 %v2898_v46  ;;  %v10410_v46 = vld [vmem:[%s15431_s24 + $0xbf] sm:$0xff] }
 0x2ff   : >> { %11882 = vmatprep.subr.mxu1 %v2897_v0 }
 0x300   : >> { %11822 = vmatmul.mubr.msk.f32.gmra.mxu1 %vm51_vm0, %v10294_v49  ;;  %11854 = vmatmul.mubr.msk.f32.vlgmr.msra.gmra.mxu0 %vm51_vm0, %v15500_v59  ;;  %v2895_v59 = vld [vmem:[%s18072_s4 + $0xa0] sm:$0xff]  ;;  %v15782_v49 = vld [vmem:[%s15431_s24 + $0xb0] sm:$0xff] }
 0x301   : >> { %11916 = vmatpush3.msra.mxu0 %v3149_v56  ;;  %11824 = vmatprep.mubr.msk.f32.mxu1 %vm51_vm0, %v10295_v51  ;;  %v15785_v51 = vld [vmem:[%s15431_s24 + $0xb8] sm:$0xff]  ;;  %v15795_v56 = vld [vmem:[%s15431_s24 + $0xc0] sm:$0xff] }
 0x302   : >> { %11856 = vmatprep.mubr.msk.f32.mxu0 %vm51_vm0, %v15513_v61  ;;  %11883 = vmatpush3.msra.mxu1 %v2897_v0  ;;  %v3146_v61 = vld [vmem:[%s18072_s4 + $0xc0] sm:$0xff]  ;;  %v10515_v0 = vld [vmem:[%s15431_s24 + $0xd7] sm:$0xff] }
 0x303   : >> { %11917 = vmatprep.subr.mxu0 %v3148_v24  ;;  %11884 = vmatprep.subr.mxu1 %v2896_v32 }
 0x304   : >> { %11825 = vmatmul.mubr.msk.f32.gmra.mxu1 %vm51_vm0, %v10296_v57  ;;  %11857 = vmatmul.mubr.msk.f32.gmra.mxu0 %vm51_vm0, %v15529_v8  ;;  %v3400_v8 = vld [vmem:[%s18072_s4 + $0xf8] sm:$0xff]  ;;  %v3399_v57 = vld [vmem:[%s18072_s4 + $0xf0] sm:$0xff] }
 0x305   : >> { %11827 = vmatprep.mubr.msk.f32.mxu1 %vm51_vm0, %v15616_v63  ;;  %11859 = vmatprep.mubr.msk.f32.mxu0 %vm51_vm0, %v15435_v39  ;;  %v3651_v39 = vld [vmem:[%s18072_s4 + $0x118] sm:$0xff] }
 0x306   : >> { %11918 = vmatpush3.msra.mxu0 %v3148_v24  ;;  %11885 = vmatpush3.msra.mxu1 %v2896_v32  ;;  %v10482_v24 = vld [vmem:[%s15431_s24 + $0xc1] sm:$0xff] }
 0x307   : >> { %11919 = vmatprep.subr.mxu0 %v3147_v41  ;;  %11886 = vmatprep.subr.mxu1 %v2895_v59  ;;  %v10516_v32 = vld [vmem:[%s15431_s24 + $0xdf] sm:$0xff] }
 0x308   : >> { %11828 = vmatmul.mubr.msk.f32.gmra.mxu1 %vm51_vm0, %v15629_v7  ;;  %11860 = vmatmul.mubr.msk.f32.gmra.mxu0 %vm51_vm0, %v15439_v43  ;;  %v10405_v43 = vld [vmem:[%s15431_s24 + $0x97] sm:$0xff] }
 0x309   : >> { %11830 = vmatprep.mubr.msk.f32.mxu1 %vm51_vm0, %v15635_v10  ;;  %11862 = vmatprep.mubr.msk.f32.mxu0 %vm51_vm0, %v15455_v19 }
 0x30a   : >> { %11920 = vmatpush3.msra.mxu0 %v3147_v41  ;;  %11887 = vmatpush3.msra.mxu1 %v2895_v59  ;;  %v10517_v41 = vld [vmem:[%s15431_s24 + $0xe7] sm:$0xff]  ;;  %v10518_v59 = vld [vmem:[%s15431_s24 + $0xef] sm:$0xff] }
 0x30b   : >> { %11921 = vmatprep.subr.mxu0 %v3146_v61  ;;  %11950 = vmatprep.subr.mxu1 %v3400_v8 }
 0x30c   : >> { %11831 = vmatmul.mubr.msk.f32.gmra.mxu1 %vm51_vm0, %v15649_v12  ;;  %11863 = vmatmul.mubr.msk.f32.gmra.mxu0 %vm51_vm0, %v15459_v47 }
 0x30d   : >> { %11833 = vmatprep.mubr.msk.f32.mxu1 %vm51_vm0, %v15655_v5  ;;  %11865 = vmatprep.mubr.msk.f32.mxu0 %vm51_vm0, %v15475_v52 }
 0x30e   : >> { %11922 = vmatpush3.msra.mxu0 %v3146_v61 }
 0x30f   : >> { %11985 = vmatprep.subr.mxu0 %v3651_v39 }
 0x310   : >> { %11834 = vmatmul.mubr.msk.f32.gmra.mxu1 %vm51_vm0, %v15669_v17  ;;  %11866 = vmatmul.mubr.msk.f32.gmra.mxu0 %vm51_vm0, %v15479_v55 }
 0x311   : >> { %11836 = vmatprep.mubr.msk.f32.mxu1 %vm51_vm0, %v10405_v43  ;;  %11868 = vmatprep.mubr.msk.f32.mxu0 %vm51_vm0, %v15494_v58 }
 0x314   : >> { %11837 = vmatmul.mubr.msk.f32.gmra.mxu1 %vm51_vm0, %v10406_v34  ;;  %11869 = vmatmul.mubr.msk.f32.gmra.mxu0 %vm51_vm0, %v15503_v60 }
 0x315   : >> { %11839 = vmatprep.mubr.msk.f32.mxu1 %vm51_vm0, %v10407_v36  ;;  %11871 = vmatprep.mubr.msk.f32.mxu0 %vm51_vm0, %v15758_v37 }
 0x318   : >> { %11840 = vmatmul.mubr.msk.f32.gmra.mxu1 %vm51_vm0, %v10408_v38  ;;  %11872 = vmatmul.mubr.msk.f32.gmra.mxu0 %vm51_vm0, %v15768_v42 }
 0x319   : >> { %11842 = vmatprep.mubr.msk.f32.mxu1 %vm51_vm0, %v10409_v44  ;;  %11874 = vmatprep.mubr.msk.f32.mxu0 %vm51_vm0, %v15772_v45 }
 0x31c   : >> { %11843 = vmatmul.mubr.msk.f32.gmra.mxu1 %vm51_vm0, %v10410_v46  ;;  %11875 = vmatmul.mubr.msk.f32.gmra.mxu0 %vm51_vm0, %v15782_v49 }
 0x31d   : >> { %11877 = vmatprep.mubr.msk.f32.mxu0 %vm51_vm0, %v15785_v51  ;;  %11888 = vmatprep.mubr.msk.f32.mxu1 %vm51_vm0, %v15581_v25  ;;  %v3650_v25 = vld [vmem:[%s18072_s4 + $0x110] sm:$0xff] }
 0x320   : >> { %11878 = vmatmul.mubr.msk.f32.gmra.mxu0 %vm51_vm0, %v15795_v56  ;;  %11889 = vmatmul.mubr.msk.f32.vlgmr.msra.gmra.mxu1 %vm51_vm0, %v15596_v50  ;;  %v3398_v50 = vld [vmem:[%s18072_s4 + $0xe8] sm:$0xff] }
 0x321   : >> { %11891 = vmatprep.mubr.msk.f32.mxu1 %vm51_vm0, %v15600_v53  ;;  %11923 = vmatprep.mubr.msk.f32.mxu0 %vm51_vm0, %v15616_v63  ;;  %v3649_v53 = vld [vmem:[%s18072_s4 + $0x108] sm:$0xff]  ;;  %v3648_v63 = vld [vmem:[%s18072_s4 + $0x100] sm:$0xff] }
 0x322   : >> { %11951 = vmatpush3.msra.mxu1 %v3400_v8 }
 0x323   : >> { %11952 = vmatprep.subr.mxu1 %v3399_v57 }
 0x324   : >> { %11892 = vmatmul.mubr.msk.f32.gmra.mxu1 %vm51_vm0, %v15613_v33  ;;  %11924 = vmatmul.mubr.msk.f32.vlgmr.msra.gmra.mxu0 %vm51_vm0, %v15629_v7  ;;  %v3397_v33 = vld [vmem:[%s18072_s4 + $0xe0] sm:$0xff] }
 0x325   : >> { %11986 = vmatpush3.msra.mxu0 %v3651_v39  ;;  %11894 = vmatprep.mubr.msk.f32.mxu1 %vm51_vm0, %v15619_v6  ;;  %v10477_v6 = vld [vmem:[%s15431_s24 + $0x99] sm:$0xff]  ;;  %v10478_v7 = vld [vmem:[%s15431_s24 + $0xa1] sm:$0xff] }
 0x326   : >> { %11926 = vmatprep.mubr.msk.f32.mxu0 %vm51_vm0, %v15635_v10  ;;  %11953 = vmatpush3.msra.mxu1 %v3399_v57  ;;  %v10513_v10 = vld [vmem:[%s15431_s24 + $0xc7] sm:$0xff] }
 0x327   : >> { %11987 = vmatprep.subr.mxu0 %v3650_v25  ;;  %11954 = vmatprep.subr.mxu1 %v3398_v50 }
 0x328   : >> { %11895 = vmatmul.mubr.msk.f32.gmra.mxu1 %vm51_vm0, %v15632_v9  ;;  %11927 = vmatmul.mubr.msk.f32.gmra.mxu0 %vm51_vm0, %v15649_v12  ;;  %v10479_v9 = vld [vmem:[%s15431_s24 + $0xa9] sm:$0xff]  ;;  %v10480_v12 = vld [vmem:[%s15431_s24 + $0xb1] sm:$0xff] }
 0x329   : >> { %11897 = vmatprep.mubr.msk.f32.mxu1 %vm51_vm0, %v15638_v40  ;;  %11929 = vmatprep.mubr.msk.f32.mxu0 %vm51_vm0, %v15655_v5  ;;  %v10514_v5 = vld [vmem:[%s15431_s24 + $0xcf] sm:$0xff] }
 0x32a   : >> { %11988 = vmatpush3.msra.mxu0 %v3650_v25  ;;  %11955 = vmatpush3.msra.mxu1 %v3398_v50 }
 0x32b   : >> { %11989 = vmatprep.subr.mxu0 %v3649_v53  ;;  %11956 = vmatprep.subr.mxu1 %v3397_v33 }
 0x32c   : >> { %11898 = vmatmul.mubr.msk.f32.gmra.mxu1 %vm51_vm0, %v15652_v1  ;;  %11930 = vmatmul.mubr.msk.f32.gmra.mxu0 %vm51_vm0, %v15669_v17  ;;  %v10481_v17 = vld [vmem:[%s15431_s24 + $0xb9] sm:$0xff] }
 0x32d   : >> { %11900 = vmatprep.mubr.msk.f32.mxu1 %vm51_vm0, %v15658_v15  ;;  %11932 = vmatprep.mubr.msk.f32.mxu0 %vm51_vm0, %v10405_v43 }
 0x32e   : >> { %11990 = vmatpush3.msra.mxu0 %v3649_v53  ;;  %11957 = vmatpush3.msra.mxu1 %v3397_v33 }
 0x32f   : >> { %11991 = vmatprep.subr.mxu0 %v3648_v63 }
 0x330   : >> { %11901 = vmatmul.mubr.msk.f32.gmra.mxu1 %vm51_vm0, %v15672_v16  ;;  %11933 = vmatmul.mubr.msk.f32.gmra.mxu0 %vm51_vm0, %v10406_v34 }
 0x331   : >> { %11903 = vmatprep.mubr.msk.f32.mxu1 %vm51_vm0, %v15675_v48  ;;  %11935 = vmatprep.mubr.msk.f32.mxu0 %vm51_vm0, %v10407_v36 }
 0x332   : >> { %11992 = vmatpush3.msra.mxu0 %v3648_v63 }
 0x334   : >> { %11904 = vmatmul.mubr.msk.f32.gmra.mxu1 %vm51_vm0, %v15686_v14  ;;  %11936 = vmatmul.mubr.msk.f32.gmra.mxu0 %vm51_vm0, %v10408_v38 }
 0x335   : >> { %11906 = vmatprep.mubr.msk.f32.mxu1 %vm51_vm0, %v10477_v6  ;;  %11938 = vmatprep.mubr.msk.f32.mxu0 %vm51_vm0, %v10409_v44 }
 0x338   : >> { %11907 = vmatmul.mubr.msk.f32.gmra.mxu1 %vm51_vm0, %v10478_v7  ;;  %11939 = vmatmul.mubr.msk.f32.gmra.mxu0 %vm51_vm0, %v10410_v46 }
 0x339   : >> { %11909 = vmatprep.mubr.msk.f32.mxu1 %vm51_vm0, %v10479_v9  ;;  %11941 = vmatprep.mubr.msk.f32.mxu0 %vm51_vm0, %v10513_v10 }
 0x33c   : >> { %11910 = vmatmul.mubr.msk.f32.gmra.mxu1 %vm51_vm0, %v10480_v12  ;;  %11942 = vmatmul.mubr.msk.f32.gmra.mxu0 %vm51_vm0, %v10514_v5 }
 0x33d   : >> { %11912 = vmatprep.mubr.msk.f32.mxu1 %vm51_vm0, %v10481_v17  ;;  %11944 = vmatprep.mubr.msk.f32.mxu0 %vm51_vm0, %v10515_v0 }
 0x340   : >> { %11913 = vmatmul.mubr.msk.f32.gmra.mxu1 %vm51_vm0, %v10482_v24  ;;  %11945 = vmatmul.mubr.msk.f32.gmra.mxu0 %vm51_vm0, %v10516_v32 }
 0x341   : >> { %11947 = vmatprep.mubr.msk.f32.mxu0 %vm51_vm0, %v10517_v41  ;;  %11958 = vmatprep.mubr.msk.f32.mxu1 %vm51_vm0, %v15455_v19  ;;  %v10549_v19 = vld [vmem:[%s15431_s24 + $0xc8] sm:$0xff] }
 0x344   : >> { %11948 = vmatmul.mubr.msk.f32.gmra.mxu0 %vm51_vm0, %v10518_v59  ;;  %11959 = vmatmul.mubr.msk.f32.vlgmr.msra.gmra.mxu1 %vm51_vm0, %v15459_v47  ;;  %v10550_v47 = vld [vmem:[%s15431_s24 + $0xd0] sm:$0xff] }
 0x345   : >> { %11961 = vmatprep.mubr.msk.f32.mxu1 %vm51_vm0, %v15475_v52  ;;  %11993 = vmatprep.mubr.msk.f32.mxu0 %vm51_vm0, %v15638_v40  ;;  %v10551_v52 = vld [vmem:[%s15431_s24 + $0xd8] sm:$0xff]  ;;  %v10553_v40 = vld [vmem:[%s15431_s24 + $0xe8] sm:$0xff] }
 0x348   : >> { %11962 = vmatmul.mubr.msk.f32.gmra.mxu1 %vm51_vm0, %v15479_v55  ;;  %11994 = vmatmul.mubr.msk.f32.vlgmr.msra.gmra.mxu0 %vm51_vm0, %v15652_v1  ;;  %v10585_v55 = vld [vmem:[%s15431_s24 + $0xc9] sm:$0xff]  ;;  %v10587_v1 = vld [vmem:[%s15431_s24 + $0xd9] sm:$0xff] }
 0x349   : >> { %11964 = vmatprep.mubr.msk.f32.mxu1 %vm51_vm0, %v15494_v58  ;;  %11996 = vmatprep.mubr.msk.f32.mxu0 %vm51_vm0, %v15658_v15  ;;  %v10552_v58 = vld [vmem:[%s15431_s24 + $0xe0] sm:$0xff]  ;;  %v10554_v15 = vld [vmem:[%s15431_s24 + $0xf0] sm:$0xff] }
 0x34c   : >> { %11965 = vmatmul.mubr.msk.f32.gmra.mxu1 %vm51_vm0, %v15503_v60  ;;  %11997 = vmatmul.mubr.msk.f32.gmra.mxu0 %vm51_vm0, %v15672_v16  ;;  %v10586_v60 = vld [vmem:[%s15431_s24 + $0xd1] sm:$0xff]  ;;  %v10588_v16 = vld [vmem:[%s15431_s24 + $0xe1] sm:$0xff] }
 0x34d   : >> { %11967 = vmatprep.mubr.msk.f32.mxu1 %vm51_vm0, %v15758_v37  ;;  %11999 = vmatprep.mubr.msk.f32.mxu0 %vm51_vm0, %v15675_v48  ;;  %v10589_v48 = vld [vmem:[%s15431_s24 + $0xe9] sm:$0xff] }
 0x350   : >> { %11968 = vmatmul.mubr.msk.f32.gmra.mxu1 %vm51_vm0, %v15768_v42  ;;  %12000 = vmatmul.mubr.msk.f32.gmra.mxu0 %vm51_vm0, %v15686_v14  ;;  %v10590_v14 = vld [vmem:[%s15431_s24 + $0xf1] sm:$0xff]  ;;  %s16088_s24 = scalar_lea.vmem [#allocation5], %s15428_s23 }
 0x351   : >> { %11970 = vmatprep.mubr.msk.f32.mxu1 %vm51_vm0, %v15772_v45  ;;  %12002 = vmatprep.mubr.msk.f32.mxu0 %vm51_vm0, %v10477_v6 }
 0x354   : >> { %11971 = vmatmul.mubr.msk.f32.gmra.mxu1 %vm51_vm0, %v15782_v49  ;;  %12003 = vmatmul.mubr.msk.f32.gmra.mxu0 %vm51_vm0, %v10478_v7 }
 0x355   : >> { %11973 = vmatprep.mubr.msk.f32.mxu1 %vm51_vm0, %v15785_v51  ;;  %12005 = vmatprep.mubr.msk.f32.mxu0 %vm51_vm0, %v10479_v9 }
 0x358   : >> { %11974 = vmatmul.mubr.msk.f32.gmra.mxu1 %vm51_vm0, %v15795_v56  ;;  %12006 = vmatmul.mubr.msk.f32.gmra.mxu0 %vm51_vm0, %v10480_v12 }
 0x359   : >> { %11976 = vmatprep.mubr.msk.f32.mxu1 %vm51_vm0, %v10549_v19  ;;  %12008 = vmatprep.mubr.msk.f32.mxu0 %vm51_vm0, %v10481_v17 }
 0x35c   : >> { %11977 = vmatmul.mubr.msk.f32.gmra.mxu1 %vm51_vm0, %v10550_v47  ;;  %12009 = vmatmul.mubr.msk.f32.gmra.mxu0 %vm51_vm0, %v10482_v24 }
 0x35d   : >> { %11979 = vmatprep.mubr.msk.f32.mxu1 %vm51_vm0, %v10551_v52  ;;  %12011 = vmatprep.mubr.msk.f32.mxu0 %vm51_vm0, %v10585_v55 }
 0x360   : >> { %11980 = vmatmul.mubr.msk.f32.gmra.mxu1 %vm51_vm0, %v10552_v58  ;;  %12012 = vmatmul.mubr.msk.f32.gmra.mxu0 %vm51_vm0, %v10586_v60 }
 0x361   : >> { %11982 = vmatprep.mubr.msk.f32.mxu1 %vm51_vm0, %v10553_v40  ;;  %12014 = vmatprep.mubr.msk.f32.mxu0 %vm51_vm0, %v10587_v1 }
 0x364   : >> { %11983 = vmatmul.mubr.msk.f32.gmra.mxu1 %vm51_vm0, %v10554_v15  ;;  %12015 = vmatmul.mubr.msk.f32.gmra.mxu0 %vm51_vm0, %v10588_v16 }
 0x365   : >> { %12017 = vmatprep.mubr.msk.f32.mxu0 %vm51_vm0, %v10589_v48 }
 0x368   : >> { %12018 = vmatmul.mubr.msk.f32.gmra.mxu0 %vm51_vm0, %v10590_v14 }
 0x388   : >> { %v11715_v61 = vpop.f32.mrf.mxu0  ;;  %v11730_v8 = vpop.f32.mrf.mxu1 }
 0x38a   : >> { %v1825_v39 = vpop.f32.mrf.mxu0  ;;  %v1875_v43 = vpop.f32.mrf.mxu1 }
 0x38c   : >> { %v11718_v34 = vpop.f32.mrf.mxu0  ;;  %v11733_v36 = vpop.f32.mrf.mxu1 }
 0x38e   : >> { %v1835_v37 = vpop.f32.mrf.mxu0  ;;  %v1885_v38 = vpop.f32.mrf.mxu1 }
 0x390   : >> { %v11721_v42 = vpop.f32.mrf.mxu0  ;;  %v15947_v44 = vpop.f32.mrf.mxu1 }
 0x392   : >> { %v1845_v45 = vpop.f32.mrf.mxu0  ;;  %v15949_v46 = vpop.f32.mrf.mxu1 }
 0x394   : >> { %v11724_v49 = vpop.f32.mrf.mxu0  ;;  %v15951_v51 = vpop.f32.mrf.mxu1 }
 0x396   : >> { %v1855_v56 = vpop.f32.mrf.mxu0  ;;  %v15953_v57 = vpop.f32.mrf.mxu1 }
 0x398   : >> { %v11727_v25 = vpop.f32.mrf.mxu0  ;;  %v11750_v50 = vpop.f32.mrf.mxu1 }
 0x399   : >> { %v2040_v53 = vadd.f32 %v11750_v50, %v11715_v61 }
 0x39a   : >> { %v1865_v33 = vpop.f32.mrf.mxu0  ;;  %v2034_v63 = vpop.f32.mrf.mxu1 }
 0x39b   : >> { %v2035_v6 = vadd.f32 %v2034_v63, %v1825_v39 }
 0x39c   : >> { %v11753_v7 = vpop.f32.mrf.mxu1  ;;  %v11785_v9 = vpop.f32.mrf.mxu0 }
 0x39d   : >> { %v2050_v10 = vadd.f32 %v11753_v7, %v11718_v34  ;;  %v15955_v12 = vadd.f32 %v11785_v9, %v2040_v53 }
 0x39e   : >> { %v2044_v5 = vpop.f32.mrf.mxu1  ;;  %v2267_v17 = vpop.f32.mrf.mxu0 }
 0x39f   : >> { %v2045_v0 = vadd.f32 %v2044_v5, %v1835_v37  ;;  %v15957_v24 = vadd.f32 %v2267_v17, %v2035_v6 }
 0x3a0   : >> { %v11756_v32 = vpop.f32.mrf.mxu1  ;;  %v11788_v41 = vpop.f32.mrf.mxu0 }
 0x3a1   : >> { %v2060_v59 = vadd.f32 %v11756_v32, %v11721_v42  ;;  %v15959_v19 = vadd.f32 %v11788_v41, %v2050_v10 }
 0x3a2   : >> { %v2054_v47 = vpop.f32.mrf.mxu1  ;;  %v2277_v52 = vpop.f32.mrf.mxu0 }
 0x3a3   : >> { %v2055_v55 = vadd.f32 %v2054_v47, %v1845_v45  ;;  %v15961_v58 = vadd.f32 %v2277_v52, %v2045_v0 }
 0x3a4   : >> { %v11759_v60 = vpop.f32.mrf.mxu1  ;;  %v11791_v40 = vpop.f32.mrf.mxu0 }
 0x3a5   : >> { %v2070_v1 = vadd.f32 %v11759_v60, %v11724_v49  ;;  %v15963_v15 = vadd.f32 %v11791_v40, %v2060_v59 }
 0x3a6   : >> { %v2064_v16 = vpop.f32.mrf.mxu1  ;;  %v2287_v48 = vpop.f32.mrf.mxu0 }
 0x3a7   : >> { %v2065_v14 = vadd.f32 %v2064_v16, %v1855_v56  ;;  %v15965_v61 = vadd.f32 %v2287_v48, %v2055_v55 }
 0x3a8   : >> { %v11762_v39 = vpop.f32.mrf.mxu1  ;;  %v11794_v34 = vpop.f32.mrf.mxu0 }
 0x3a9   : >> { %v2080_v37 = vadd.f32 %v11762_v39, %v11727_v25  ;;  %v15967_v42 = vadd.f32 %v11794_v34, %v2070_v1 }
 0x3aa   : >> { %v2074_v50 = vpop.f32.mrf.mxu1  ;;  %v2297_v53 = vpop.f32.mrf.mxu0 }
 0x3ab   : >> { %v2075_v45 = vadd.f32 %v2074_v50, %v1865_v33  ;;  %v15969_v63 = vadd.f32 %v2297_v53, %v2065_v14 }
 0x3ac   : >> { %v11765_v6 = vpop.f32.mrf.mxu1  ;;  %v11797_v7 = vpop.f32.mrf.mxu0 }
 0x3ad   : >> { %v2090_v49 = vadd.f32 %v11765_v6, %v11730_v8  ;;  %v15971_v9 = vadd.f32 %v11797_v7, %v2080_v37 }
 0x3ae   : >> { %v2084_v10 = vpop.f32.mrf.mxu1  ;;  %v2307_v5 = vpop.f32.mrf.mxu0 }
 0x3af   : >> { %v2085_v56 = vadd.f32 %v2084_v10, %v1875_v43  ;;  %v15973_v17 = vadd.f32 %v2307_v5, %v2075_v45 }
 0x3b0   : >> { %v11768_v0 = vpop.f32.mrf.mxu1  ;;  %v11800_v32 = vpop.f32.mrf.mxu0 }
 0x3b1   : >> { %v2100_v25 = vadd.f32 %v11768_v0, %v11733_v36  ;;  %v15975_v41 = vadd.f32 %v11800_v32, %v2090_v49 }
 0x3b2   : >> { %v2094_v59 = vpop.f32.mrf.mxu1  ;;  %v2317_v47 = vpop.f32.mrf.mxu0 }
 0x3b3   : >> { %v2095_v33 = vadd.f32 %v2094_v59, %v1885_v38  ;;  %v15977_v52 = vadd.f32 %v2317_v47, %v2085_v56 }
 0x3b4   : >> { %v11771_v55 = vpop.f32.mrf.mxu1  ;;  %v11803_v60 = vpop.f32.mrf.mxu0 }
 0x3b5   : >> { %v2110_v8 = vadd.f32 %v11771_v55, %v15947_v44  ;;  %v15980_v40 = vadd.f32 %v11803_v60, %v2100_v25 }
 0x3b6   : >> { %v2104_v1 = vpop.f32.mrf.mxu1  ;;  %v2327_v43 = vpop.f32.mrf.mxu0 }
 0x3b7   : >> { %v2105_v16 = vadd.f32 %v2104_v1, %v15949_v46  ;;  %v15983_v48 = vadd.f32 %v2327_v43, %v2095_v33 }
 0x3b8   : >> { %v11774_v36 = vpop.f32.mrf.mxu1  ;;  %v11806_v14 = vpop.f32.mrf.mxu0 }
 0x3b9   : >> { %v2120_v39 = vadd.f32 %v11774_v36, %v15951_v51  ;;  %v15986_v34 = vadd.f32 %v11806_v14, %v2110_v8 }
 0x3ba   : >> { %v2114_v38 = vpop.f32.mrf.mxu1  ;;  %v2337_v37 = vpop.f32.mrf.mxu0 }
 0x3bb   : >> { %v2115_v50 = vadd.f32 %v2114_v38, %v15953_v57  ;;  %v15989_v53 = vadd.f32 %v2337_v37, %v2105_v16 }
 0x3bc   : >> { %v11809_v44 = vpop.f32.mrf.mxu0  ;;  %v11820_v45 = vpop.f32.mrf.mxu1 }
 0x3bd   : >> { %v15991_v6 = vadd.f32 %v11809_v44, %v2120_v39  ;;  %v2608_v46 = vadd.f32 %v11820_v45, %v15955_v12 }
 0x3be   : >> { %v2347_v7 = vpop.f32.mrf.mxu0  ;;  %v2518_v49 = vpop.f32.mrf.mxu1 }
 0x3bf   : >> { %v15994_v10 = vadd.f32 %v2347_v7, %v2115_v50  ;;  %v2607_v51 = vadd.f32 %v2518_v49, %v15957_v24 }
 0x3c0   : >> { %v11823_v5 = vpop.f32.mrf.mxu1  ;;  %v11855_v56 = vpop.f32.mrf.mxu0 }
 0x3c1   : >> { %v2610_v0 = vadd.f32 %v11823_v5, %v15959_v19  ;;  %v15998_v32 = vadd.f32 %v11855_v56, %v2608_v46 }
 0x3c2   : >> { %v2528_v57 = vpop.f32.mrf.mxu1  ;;  %v2768_v25 = vpop.f32.mrf.mxu0 }
 0x3c3   : >> { %v2609_v59 = vadd.f32 %v2528_v57, %v15961_v58  ;;  %v16001_v47 = vadd.f32 %v2768_v25, %v2607_v51 }
 0x3c4   : >> { %v11826_v33 = vpop.f32.mrf.mxu1  ;;  %v11858_v12 = vpop.f32.mrf.mxu0 }
 0x3c5   : >> { %v2612_v55 = vadd.f32 %v11826_v33, %v15963_v15  ;;  %v16004_v60 = vadd.f32 %v11858_v12, %v2610_v0 }
 0x3c6   : >> { %v2538_v8 = vpop.f32.mrf.mxu1  ;;  %v2778_v24 = vpop.f32.mrf.mxu0 }
 0x3c7   : >> { %v2611_v1 = vadd.f32 %v2538_v8, %v15965_v61  ;;  %v16007_v43 = vadd.f32 %v2778_v24, %v2609_v59 }
 0x3c8   : >> { %v11829_v19 = vpop.f32.mrf.mxu1  ;;  %v11861_v16 = vpop.f32.mrf.mxu0 }
 0x3c9   : >> { %v2614_v36 = vadd.f32 %v11829_v19, %v15967_v42  ;;  %v16010_v14 = vadd.f32 %v11861_v16, %v2612_v55 }
 0x3ca   : >> { %v2548_v58 = vpop.f32.mrf.mxu1  ;;  %v2788_v39 = vpop.f32.mrf.mxu0 }
 0x3cb   : >> { %v2613_v38 = vadd.f32 %v2548_v58, %v15969_v63  ;;  %v16013_v37 = vadd.f32 %v2788_v39, %v2611_v1 }
 0x3cc   : >> { %v11832_v15 = vpop.f32.mrf.mxu1  ;;  %v11864_v50 = vpop.f32.mrf.mxu0 }
 0x3cd   : >> { %v2616_v44 = vadd.f32 %v11832_v15, %v15971_v9  ;;  %v16016_v45 = vadd.f32 %v11864_v50, %v2614_v36 }
 0x3ce   : >> { %v2558_v61 = vpop.f32.mrf.mxu1  ;;  %v2798_v46 = vpop.f32.mrf.mxu0 }
 0x3cf   : >> { %v2615_v7 = vadd.f32 %v2558_v61, %v15973_v17  ;;  %v16019_v49 = vadd.f32 %v2798_v46, %v2613_v38 }
 0x3d0   : >> { %v11835_v42 = vpop.f32.mrf.mxu1  ;;  %v11867_v51 = vpop.f32.mrf.mxu0 }
 0x3d1   : >> { %v2618_v5 = vadd.f32 %v11835_v42, %v15975_v41  ;;  %v16022_v56 = vadd.f32 %v11867_v51, %v2616_v44 }
 0x3d2   : >> { %v2568_v63 = vpop.f32.mrf.mxu1  ;;  %v2808_v0 = vpop.f32.mrf.mxu0 }
 0x3d3   : >> { %v2617_v57 = vadd.f32 %v2568_v63, %v15977_v52  ;;  %v16025_v25 = vadd.f32 %v2808_v0, %v2615_v7 }
 0x3d4   : >> { %v11838_v9 = vpop.f32.mrf.mxu1  ;;  %v11870_v59 = vpop.f32.mrf.mxu0 }
 0x3d5   : >> { %v2620_v33 = vadd.f32 %v11838_v9, %v15980_v40  ;;  %v16028_v12 = vadd.f32 %v11870_v59, %v2618_v5 }
 0x3d6   : >> { %v2578_v17 = vpop.f32.mrf.mxu1  ;;  %v2818_v55 = vpop.f32.mrf.mxu0 }
 0x3d7   : >> { %v2619_v8 = vadd.f32 %v2578_v17, %v15983_v48  ;;  %v16031_v24 = vadd.f32 %v2818_v55, %v2617_v57 }
 0x3d8   : >> { %v11841_v41 = vpop.f32.mrf.mxu1  ;;  %v11873_v1 = vpop.f32.mrf.mxu0 }
 0x3d9   : >> { %v2622_v19 = vadd.f32 %v11841_v41, %v15986_v34  ;;  %v16034_v16 = vadd.f32 %v11873_v1, %v2620_v33 }
 0x3da   : >> { %v2588_v52 = vpop.f32.mrf.mxu1  ;;  %v2828_v36 = vpop.f32.mrf.mxu0 }
 0x3db   : >> { %v2621_v58 = vadd.f32 %v2588_v52, %v15989_v53  ;;  %v16037_v39 = vadd.f32 %v2828_v36, %v2619_v8 }
 0x3dc   : >> { %v11844_v40 = vpop.f32.mrf.mxu1  ;;  %v11876_v38 = vpop.f32.mrf.mxu0 }
 0x3dd   : >> { %v2624_v15 = vadd.f32 %v11844_v40, %v15991_v6  ;;  %v16040_v50 = vadd.f32 %v11876_v38, %v2622_v19 }
 0x3de   : >> { %v2598_v48 = vpop.f32.mrf.mxu1  ;;  %v2838_v44 = vpop.f32.mrf.mxu0 }
 0x3df   : >> { %v2623_v61 = vadd.f32 %v2598_v48, %v15994_v10  ;;  %v16043_v46 = vadd.f32 %v2838_v44, %v2621_v58 }
 0x3e0   : >> { %v11879_v34 = vpop.f32.mrf.mxu0  ;;  %v11890_v7 = vpop.f32.mrf.mxu1 }
 0x3e1   : >> { %v16045_v42 = vadd.f32 %v11879_v34, %v2624_v15  ;;  %v3109_v22 = vadd.f32 %v11890_v7, %v15998_v32 }
 0x3e2   : >> { %v2848_v51 = vpop.f32.mrf.mxu0  ;;  %v3019_v53 = vpop.f32.mrf.mxu1 }
 0x3e3   : >> { %v16047_v5 = vadd.f32 %v2848_v51, %v2623_v61  ;;  %v3108_v4 = vadd.f32 %v3019_v53, %v16001_v47 }
 0x3e4   : >> { %v11893_v63 = vpop.f32.mrf.mxu1  ;;  %v11925_v0 = vpop.f32.mrf.mxu0 }
 0x3e5   : >> { %18118 = vst [vmem:[#allocation27_spill] sm:$0xff] %v16047_v5  ;;  %v3360_v31 = vadd.f32 %v11925_v0, %v3109_v22  ;;  %v3111_v3 = vadd.f32 %v11893_v63, %v16004_v60 }
 0x3e6   : >> { %v3029_v57 = vpop.f32.mrf.mxu1  ;;  %v3270_v6 = vpop.f32.mrf.mxu0 }
 0x3e7   : >> { %v3359_v11 = vadd.f32 %v3270_v6, %v3108_v4 }
 0x3e8   : >> { %v11896_v9 = vpop.f32.mrf.mxu1  ;;  %v11928_v59 = vpop.f32.mrf.mxu0 }
 0x3e9   : >> { %v3113_v32 = vadd.f32 %v11896_v9, %v16010_v14  ;;  %v3362_v7 = vadd.f32 %v11928_v59, %v3111_v3 }
 0x3ea   : >> { %v3039_v33 = vpop.f32.mrf.mxu1  ;;  %v3280_v17 = vpop.f32.mrf.mxu0 }
 0x3eb   : >> { %v3112_v47 = vadd.f32 %v3039_v33, %v16013_v37 }
 0x3ec   : >> { %v11899_v55 = vpop.f32.mrf.mxu1  ;;  %v11931_v10 = vpop.f32.mrf.mxu0 }
 0x3ed   : >> { %v3115_v53 = vadd.f32 %v11899_v55, %v16016_v45  ;;  %v3364_v60 = vadd.f32 %v11931_v10, %v3113_v32 }
 0x3ee   : >> { %v3049_v8 = vpop.f32.mrf.mxu1  ;;  %v3290_v41 = vpop.f32.mrf.mxu0 }
 0x3ef   : >> { %v3114_v4 = vadd.f32 %v3049_v8, %v16019_v49 }
 0x3f0   : >> { %v11902_v1 = vpop.f32.mrf.mxu1  ;;  %v11934_v19 = vpop.f32.mrf.mxu0 }
 0x3f2   : >> { %v3059_v52 = vpop.f32.mrf.mxu1  ;;  %v3300_v36 = vpop.f32.mrf.mxu0 }
 0x3f3   : >> { %v3116_v14 = vadd.f32 %v3059_v52, %v16025_v25  ;;  %v3365_v37 = vadd.f32 %v3300_v36, %v3114_v4 }
 0x3f4   : >> { %v11905_v58 = vpop.f32.mrf.mxu1  ;;  %v11937_v40 = vpop.f32.mrf.mxu0 }
 0x3f5   : >> { %v3119_v49 = vadd.f32 %v11905_v58, %v16028_v12 }
 0x3f6   : >> { %v3069_v38 = vpop.f32.mrf.mxu1  ;;  %v16049_v15 = vpop.f32.mrf.mxu0 }
 0x3f7   : >> { %v3367_v59 = vadd.f32 %v16049_v15, %v3116_v14 }
 0x3f8   : >> { %v16051_v48 = vpop.f32.mrf.mxu1  ;;  %v16053_v44 = vpop.f32.mrf.mxu0 }
 0x3fa   : >> { %v16055_v61 = vpop.f32.mrf.mxu1  ;;  %v16057_v34 = vpop.f32.mrf.mxu0 }
 0x3fc   : >> { %v16059_v51 = vpop.f32.mrf.mxu1  ;;  %v16061_v2 = vpop.f32.mrf.mxu0 }
 0x3fe   : >> { %v16063_v26 = vpop.f32.mrf.mxu1  ;;  %v16065_v35 = vpop.f32.mrf.mxu0 }
 0x400   : >> { %v16067_v23 = vpop.f32.mrf.mxu1  ;;  %v16069_v21 = vpop.f32.mrf.mxu0 }
 0x401   : >> { %18119 = vst [vmem:[#allocation28_spill] sm:$0xff] %v16067_v23  ;;  %18120 = vst [vmem:[#allocation29_spill] sm:$0xff] %v16069_v21 }
 0x402   : >> { %v16071_v18 = vpop.f32.mrf.mxu1  ;;  %v16073_v13 = vpop.f32.mrf.mxu0 }
 0x403   : >> { %18121 = vst [vmem:[#allocation30_spill] sm:$0xff] %v16071_v18  ;;  %18122 = vst [vmem:[#allocation31_spill] sm:$0xff] %v16073_v13  ;;  %v3110_v18 = vadd.f32 %v3029_v57, %v16007_v43 }
 0x404   : >> { %v16076_v54 = vpop.f32.mrf.mxu0  ;;  %v11960_v20 = vpop.f32.mrf.mxu1 }
 0x405   : >> { %18123 = vst [vmem:[#allocation32_spill] sm:$0xff] %v16076_v54  ;;  %v3611_v5 = vadd.f32 %v11960_v20, %v3360_v31  ;;  %v3361_v22 = vadd.f32 %v3280_v17, %v3110_v18 }
 0x406   : >> { %v16079_v62 = vpop.f32.mrf.mxu0  ;;  %v3521_v30 = vpop.f32.mrf.mxu1 }
 0x407   : >> { %18124 = vst [vmem:[#allocation33_spill] sm:$0xff] %v16079_v62  ;;  %v3610_v54 = vadd.f32 %v3521_v30, %v3359_v11  ;;  %v3363_v11 = vadd.f32 %v3290_v41, %v3112_v47  ;;  %v3366_v30 = vadd.f32 %v11934_v19, %v3115_v53 }
 0x408   : >> { %v11963_v21 = vpop.f32.mrf.mxu1  ;;  %v11995_v13 = vpop.f32.mrf.mxu0 }
 0x409   : >> { %v3862_v23 = vadd.f32 %v11995_v13, %v3611_v5  ;;  %v3613_v20 = vadd.f32 %v11963_v21, %v3362_v7  ;;  %v3117_v13 = vadd.f32 %v11902_v1, %v16022_v56  ;;  %v3121_v1 = vadd.f32 %v16051_v48, %v16034_v16 }
 0x40a   : >> { %v3531_v0 = vpop.f32.mrf.mxu1  ;;  %v3772_v62 = vpop.f32.mrf.mxu0  ;;  %v3120_v16 = vadd.f32 %v16055_v61, %v16037_v39 }
 0x40b   : >> { %10610 = vst.msk [vmem:[%s16088_s24 + $0x38] sm:$0xff] %vm51_vm0, %v3862_v23  ;;  %v3861_v3 = vadd.f32 %v3772_v62, %v3610_v54  ;;  %v3940_v18 = vmul.f32 %v3862_v23, %v3862_v23  ;;  %v3368_v5 = vadd.f32 %v11937_v40, %v3117_v13  ;;  %v3118_v54 = vadd.f32 %v3069_v38, %v16031_v24 }
 0x40c   : >> { %v11966_v31 = vpop.f32.mrf.mxu1  ;;  %v11998_v43 = vpop.f32.mrf.mxu0  ;;  %v3612_v62 = vadd.f32 %v3531_v0, %v3361_v22  ;;  %v3898_v57 = vsel %vm51_vm0, %v3862_v23, 0.0  ;;  %v3370_v38 = vadd.f32 %v16053_v44, %v3119_v49 }
 0x40d   : >> { %v3879_v21 = vmul.f32 %v3861_v3, %v15371_v27  ;;  %10609 = vst.msk [vmem:[%s16088_s24 + $0x30] sm:$0xff] %vm51_vm0, %v3861_v3  ;;  %v3864_v45 = vadd.f32 %v11998_v43, %v3613_v20  ;;  %v3615_v25 = vadd.f32 %v11966_v31, %v3364_v60  ;;  %v3958_v33 = vsel %vm51_vm0, %v3940_v18, 0.0 }
 0x40e   : >> { %v3541_v56 = vpop.f32.mrf.mxu1  ;;  %v3782_v63 = vpop.f32.mrf.mxu0  ;;  %v3369_v31 = vadd.f32 %v16057_v34, %v3118_v54 }
 0x40f   : >> { %v3897_v6 = vsel %vm51_vm0, %v3879_v21, 0.0  ;;  %v3939_v9 = vmul.f32 %v3879_v21, %v3861_v3  ;;  %10612 = vst.msk [vmem:[%s16088_s24 + $0x48] sm:$0xff] %vm51_vm0, %v3864_v45  ;;  %v3863_v12 = vadd.f32 %v3782_v63, %v3612_v62  ;;  %v3942_v8 = vmul.f32 %v3864_v45, %v3864_v45 }
 0x410   : >> { %v3899_v17 = vadd.f32 %v3898_v57, %v3897_v6  ;;  %v11969_v55 = vpop.f32.mrf.mxu1  ;;  %v12001_v24 = vpop.f32.mrf.mxu0  ;;  %v3614_v23 = vadd.f32 %v3541_v56, %v3363_v11  ;;  %v3902_v48 = vsel %vm51_vm0, %v3864_v45, 0.0  ;;  %v3372_v63 = vadd.f32 %v16061_v2, %v3121_v1  ;;  %v18127_v1 = vld [vmem:[#allocation27_spill] sm:$0xff] }
 0x411   : >> { %v3957_v10 = vsel %vm51_vm0, %v3939_v9, 0.0  ;;  %v3866_v41 = vadd.f32 %v12001_v24, %v3615_v25  ;;  %v3900_v52 = vsel %vm51_vm0, %v3863_v12, 0.0  ;;  %v3941_v36 = vmul.f32 %v3863_v12, %v3863_v12  ;;  %10611 = vst.msk [vmem:[%s16088_s24 + $0x40] sm:$0xff] %vm51_vm0, %v3863_v12 }
 0x412   : >> { %v3959_v19 = vadd.f32 %v3958_v33, %v3957_v10  ;;  %v3551_v58 = vpop.f32.mrf.mxu1  ;;  %v3792_v40 = vpop.f32.mrf.mxu0  ;;  %v3901_v15 = vadd.f32 %v3900_v52, %v3899_v17  ;;  %v3617_v22 = vadd.f32 %v11969_v55, %v3366_v30  ;;  %v3962_v60 = vsel %vm51_vm0, %v3942_v8, 0.0  ;;  %v18125_v55 = vld [vmem:[#allocation28_spill] sm:$0xff] }
 0x413   : >> { %v3884_v32 = vmul.f32 %v3866_v41, %v15374_v28  ;;  %10614 = vst.msk [vmem:[%s16088_s24 + $0x58] sm:$0xff] %vm51_vm0, %v3866_v41  ;;  %v3865_v7 = vadd.f32 %v3792_v40, %v3614_v23  ;;  %v3960_v47 = vsel %vm51_vm0, %v3941_v36, 0.0  ;;  %v3616_v44 = vadd.f32 %v3551_v58, %v3365_v37  ;;  %v18126_v23 = vld [vmem:[#allocation29_spill] sm:$0xff] }
 0x414   : >> { %v11972_v53 = vpop.f32.mrf.mxu1  ;;  %v12004_v0 = vpop.f32.mrf.mxu0  ;;  %v3961_v4 = vadd.f32 %v3960_v47, %v3959_v19  ;;  %v3903_v20 = vadd.f32 %v3902_v48, %v3901_v15  ;;  %v3123_v37 = vadd.f32 %v16059_v51, %v16040_v50  ;;  %v3371_v33 = vadd.f32 %v16065_v35, %v3120_v16  ;;  %v18128_v35 = vld [vmem:[#allocation30_spill] sm:$0xff] }
 0x415   : >> { %10613 = vst.msk [vmem:[%s16088_s24 + $0x50] sm:$0xff] %vm51_vm0, %v3865_v7  ;;  %v3944_v3 = vmul.f32 %v3884_v32, %v3866_v41  ;;  %v3904_v11 = vsel %vm51_vm0, %v3865_v7, 0.0  ;;  %v3943_v13 = vmul.f32 %v3865_v7, %v3865_v7  ;;  %v3868_v39 = vadd.f32 %v12004_v0, %v3617_v22  ;;  %v18129_v47 = vld [vmem:[#allocation22_spill] sm:$0xff] }
 0x416   : >> { %v3561_v61 = vpop.f32.mrf.mxu1  ;;  %v3802_v18 = vpop.f32.mrf.mxu0  ;;  %v3905_v30 = vadd.f32 %v3904_v11, %v3903_v20  ;;  %v3963_v43 = vadd.f32 %v3962_v60, %v3961_v4  ;;  %v3619_v14 = vadd.f32 %v11972_v53, %v3368_v5  ;;  %v3906_v21 = vsel %vm51_vm0, %v3884_v32, 0.0 }
 0x417   : >> { %v3964_v45 = vsel %vm51_vm0, %v3943_v13, 0.0  ;;  %10616 = vst.msk [vmem:[%s16088_s24 + $0x68] sm:$0xff] %vm51_vm0, %v3868_v39  ;;  %v3867_v49 = vadd.f32 %v3802_v18, %v3616_v44  ;;  %v3122_v5 = vadd.f32 %v16063_v26, %v16043_v46  ;;  %v3966_v50 = vsel %vm51_vm0, %v3944_v3, 0.0  ;;  %v18130_v3 = vld [vmem:[#allocation31_spill] sm:$0xff] }
 0x418   : >> { %v11975_v62 = vpop.f32.mrf.mxu1  ;;  %v12007_v56 = vpop.f32.mrf.mxu0  ;;  %v3907_v34 = vadd.f32 %v3906_v21, %v3905_v30  ;;  %v3965_v54 = vadd.f32 %v3964_v45, %v3963_v43  ;;  %v3618_v51 = vadd.f32 %v3561_v61, %v3367_v59  ;;  %v3946_v12 = vmul.f32 %v3868_v39, %v3868_v39 }
 0x419   : >> { %v3870_v57 = vadd.f32 %v12007_v56, %v3619_v14  ;;  %v3885_v6 = vmul.f32 %v3867_v49, %v15377_v29  ;;  %10615 = vst.msk [vmem:[%s16088_s24 + $0x60] sm:$0xff] %vm51_vm0, %v3867_v49  ;;  %v3621_v2 = vadd.f32 %v11975_v62, %v3370_v38  ;;  %v3125_v26 = vadd.f32 %v18125_v55, %v16045_v42  ;;  %v18131_v56 = vld [vmem:[#allocation32_spill] sm:$0xff]  ;;  %v18133_v55 = vld [vmem:[#allocation23_spill] sm:$0xff] }
 0x41a   : >> { %v3571_v9 = vpop.f32.mrf.mxu1  ;;  %v3812_v25 = vpop.f32.mrf.mxu0  ;;  %v3967_v17 = vadd.f32 %v3966_v50, %v3965_v54  ;;  %v3374_v41 = vadd.f32 %v18126_v23, %v3123_v37  ;;  %v3124_v19 = vadd.f32 %v18128_v35, %v18127_v1  ;;  %v3910_v58 = vsel %vm51_vm0, %v3868_v39, 0.0 }
 0x41b   : >> { %10618 = vst.msk [vmem:[%s16088_s24 + $0x78] sm:$0xff] %vm51_vm0, %v3870_v57  ;;  %v3908_v46 = vsel %vm51_vm0, %v3885_v6, 0.0  ;;  %v3945_v59 = vmul.f32 %v3885_v6, %v3867_v49  ;;  %v3869_v24 = vadd.f32 %v3812_v25, %v3618_v51  ;;  %v3620_v38 = vadd.f32 %v3571_v9, %v3369_v31  ;;  %v18132_v51 = vld [vmem:[#allocation33_spill] sm:$0xff] }
 0x41c   : >> { %v11978_v10 = vpop.f32.mrf.mxu1  ;;  %v12010_v8 = vpop.f32.mrf.mxu0  ;;  %v3909_v52 = vadd.f32 %v3908_v46, %v3907_v34  ;;  %v3970_v7 = vsel %vm51_vm0, %v3946_v12, 0.0  ;;  %v3948_v53 = vmul.f32 %v3870_v57, %v3870_v57  ;;  %v3373_v11 = vadd.f32 %v18130_v3, %v3122_v5 }
 0x41d   : >> { %v3872_v36 = vadd.f32 %v12010_v8, %v3621_v2  ;;  %v3968_v40 = vsel %vm51_vm0, %v3945_v59, 0.0  ;;  %v3947_v42 = vmul.f32 %v3869_v24, %v3869_v24  ;;  %10617 = vst.msk [vmem:[%s16088_s24 + $0x70] sm:$0xff] %vm51_vm0, %v3869_v24  ;;  %v3912_v0 = vsel %vm51_vm0, %v3869_v24, 0.0 }
 0x41e   : >> { %v3581_v15 = vpop.f32.mrf.mxu1  ;;  %v3822_v32 = vpop.f32.mrf.mxu0  ;;  %v3969_v16 = vadd.f32 %v3968_v40, %v3967_v17  ;;  %v3911_v48 = vadd.f32 %v3910_v58, %v3909_v52  ;;  %v3623_v60 = vadd.f32 %v11978_v10, %v3372_v63  ;;  %v3914_v13 = vsel %vm51_vm0, %v3870_v57, 0.0 }
 0x41f   : >> { %v3890_v22 = vmul.f32 %v3872_v36, %v18129_v47  ;;  %10620 = vst.msk [vmem:[%s16088_s24 + $0x88] sm:$0xff] %vm51_vm0, %v3872_v36  ;;  %v3871_v4 = vadd.f32 %v3822_v32, %v3620_v38  ;;  %v3972_v18 = vsel %vm51_vm0, %v3947_v42, 0.0  ;;  %v3622_v31 = vadd.f32 %v3581_v15, %v3371_v33 }
 0x420   : >> { %v11981_v44 = vpop.f32.mrf.mxu1  ;;  %v12013_v20 = vpop.f32.mrf.mxu0  ;;  %v3913_v39 = vadd.f32 %v3912_v0, %v3911_v48  ;;  %v3971_v61 = vadd.f32 %v3970_v7, %v3969_v16  ;;  %v3376_v63 = vadd.f32 %v18131_v56, %v3125_v26  ;;  %v3974_v34 = vsel %vm51_vm0, %v3948_v53, 0.0 }
 0x421   : >> { %v3949_v30 = vmul.f32 %v3871_v4, %v3871_v4  ;;  %10619 = vst.msk [vmem:[%s16088_s24 + $0x80] sm:$0xff] %vm51_vm0, %v3871_v4  ;;  %v3874_v43 = vadd.f32 %v12013_v20, %v3623_v60  ;;  %v3950_v45 = vmul.f32 %v3890_v22, %v3872_v36  ;;  %v3625_v62 = vadd.f32 %v11981_v44, %v3374_v41  ;;  %v18134_v60 = vld [vmem:[#allocation24_spill] sm:$0xff] }
 0x422   : >> { %v3591_v14 = vpop.f32.mrf.mxu1  ;;  %v3832_v37 = vpop.f32.mrf.mxu0  ;;  %v3973_v21 = vadd.f32 %v3972_v18, %v3971_v61  ;;  %v3915_v49 = vadd.f32 %v3914_v13, %v3913_v39  ;;  %v3916_v54 = vsel %vm51_vm0, %v3871_v4, 0.0  ;;  %v3375_v6 = vadd.f32 %v18132_v51, %v3124_v19 }
 0x423   : >> { %10622 = vst.msk [vmem:[%s16088_s24 + $0x98] sm:$0xff] %vm51_vm0, %v3874_v43  ;;  %v3873_v57 = vadd.f32 %v3832_v37, %v3622_v31  ;;  %v3918_v12 = vsel %vm51_vm0, %v3890_v22, 0.0  ;;  %v3976_v17 = vsel %vm51_vm0, %v3949_v30, 0.0  ;;  %v3624_v2 = vadd.f32 %v3591_v14, %v3373_v11 }
 0x424   : >> { %v11984_v5 = vpop.f32.mrf.mxu1  ;;  %v12016_v50 = vpop.f32.mrf.mxu0  ;;  %v3917_v9 = vadd.f32 %v3916_v54, %v3915_v49  ;;  %v3975_v25 = vadd.f32 %v3974_v34, %v3973_v21  ;;  %v3978_v24 = vsel %vm51_vm0, %v3950_v45, 0.0  ;;  %v3952_v41 = vmul.f32 %v3874_v43, %v3874_v43 }
 0x425   : >> { %v3876_v33 = vadd.f32 %v12016_v50, %v3625_v62  ;;  %v3891_v26 = vmul.f32 %v3873_v57, %v18133_v55  ;;  %10621 = vst.msk [vmem:[%s16088_s24 + $0x90] sm:$0xff] %vm51_vm0, %v3873_v57  ;;  %v3627_v23 = vadd.f32 %v11984_v5, %v3376_v63  ;;  %v3922_v42 = vsel %vm51_vm0, %v3874_v43, 0.0  ;;  %v18136_v55 = vld [vmem:[#allocation25_spill] sm:$0xff] }
 0x426   : >> { %v3601_v46 = vpop.f32.mrf.mxu1  ;;  %v3842_v59 = vpop.f32.mrf.mxu0  ;;  %v3919_v10 = vadd.f32 %v3918_v12, %v3917_v9  ;;  %v3977_v8 = vadd.f32 %v3976_v17, %v3975_v25  ;;  %v3982_v22 = vsel %vm51_vm0, %v3952_v41, 0.0  ;;  %v18135_v12 = vld [vmem:[#allocation26_spill] sm:$0xff] }
 0x427   : >> { %10624 = vst.msk [vmem:[%s16088_s24 + $0xa8] sm:$0xff] %vm51_vm0, %v3876_v33  ;;  %v3920_v1 = vsel %vm51_vm0, %v3891_v26, 0.0  ;;  %v3951_v35 = vmul.f32 %v3891_v26, %v3873_v57  ;;  %v3875_v19 = vadd.f32 %v3842_v59, %v3624_v2  ;;  %v3626_v40 = vadd.f32 %v3601_v46, %v3375_v6 }
 0x428   : >> { %v12019_v52 = vpop.f32.mrf.mxu0  ;;  %v3921_v36 = vadd.f32 %v3920_v1, %v3919_v10  ;;  %v3979_v58 = vadd.f32 %v3978_v24, %v3977_v8  ;;  %v3954_v53 = vmul.f32 %v3876_v33, %v3876_v33  ;;  %v3926_v3 = vsel %vm51_vm0, %v3876_v33, 0.0 }
 0x429   : >> { %v3878_v38 = vadd.f32 %v12019_v52, %v3627_v23  ;;  %v3980_v15 = vsel %vm51_vm0, %v3951_v35, 0.0  ;;  %v3953_v32 = vmul.f32 %v3875_v19, %v3875_v19  ;;  %10623 = vst.msk [vmem:[%s16088_s24 + $0xa0] sm:$0xff] %vm51_vm0, %v3875_v19  ;;  %v3924_v0 = vsel %vm51_vm0, %v3875_v19, 0.0 }
 0x42a   : >> { %v3852_v7 = vpop.f32.mrf.mxu0  ;;  %v3981_v16 = vadd.f32 %v3980_v15, %v3979_v58  ;;  %v3923_v48 = vadd.f32 %v3922_v42, %v3921_v36  ;;  %v3986_v18 = vsel %vm51_vm0, %v3954_v53, 0.0 }
 0x42b   : >> { %10626 = vst.msk [vmem:[%s16088_s24 + $0xb8] sm:$0xff] %vm51_vm0, %v3878_v38  ;;  %v3877_v47 = vadd.f32 %v3852_v7, %v3626_v40  ;;  %v3896_v4 = vmul.f32 %v3878_v38, %v18134_v60  ;;  %v3984_v11 = vsel %vm51_vm0, %v3953_v32, 0.0 }
 0x42c   : >> { %v3925_v44 = vadd.f32 %v3924_v0, %v3923_v48  ;;  %v3983_v20 = vadd.f32 %v3982_v22, %v3981_v16 }
 0x42d   : >> { %10625 = vst.msk [vmem:[%s16088_s24 + $0xb0] sm:$0xff] %vm51_vm0, %v3877_v47  ;;  %v3955_v13 = vmul.f32 %v3877_v47, %v3877_v47  ;;  %v3956_v31 = vmul.f32 %v3896_v4, %v3878_v38  ;;  %v3928_v30 = vsel %vm51_vm0, %v3877_v47, 0.0  ;;  %v3930_v37 = vsel %vm51_vm0, %v3896_v4, 0.0 }
 0x42e   : >> { %v3985_v39 = vadd.f32 %v3984_v11, %v3983_v20  ;;  %v3927_v61 = vadd.f32 %v3926_v3, %v3925_v44 }
 0x42f   : >> { %v3988_v21 = vsel %vm51_vm0, %v3955_v13, 0.0  ;;  %v3990_v62 = vsel %vm51_vm0, %v3956_v31, 0.0 }
 0x430   : >> { %v3929_v43 = vadd.f32 %v3928_v30, %v3927_v61  ;;  %v3987_v14 = vadd.f32 %v3986_v18, %v3985_v39 }
 0x432   : >> { %v3931_v45 = vadd.f32 %v3930_v37, %v3929_v43  ;;  %v3989_v49 = vadd.f32 %v3988_v21, %v3987_v14 }
 0x434   : >> { %v3932_v56 = vrot.slane %v3931_v45, 4  ;;  %v3991_v63 = vadd.f32 %v3990_v62, %v3989_v49 }
 0x436   : >> { %v3933_v34 = vadd.f32 %v3932_v56, %v3931_v45  ;;  %v3992_v54 = vrot.slane %v3991_v63, 4 }
 0x438   : >> { %v3934_v57 = vrot.slane %v3933_v34, 2  ;;  %v3993_v5 = vadd.f32 %v3992_v54, %v3991_v63 }
 0x43a   : >> { %v3935_v50 = vadd.f32 %v3934_v57, %v3933_v34  ;;  %v3994_v51 = vrot.slane %v3993_v5, 2 }
 0x43c   : >> { %v3936_v6 = vrot.slane %v3935_v50, 1  ;;  %v3995_v9 = vadd.f32 %v3994_v51, %v3993_v5 }
 0x43e   : >> { %v3937_v25 = vadd.f32 %v3936_v6, %v3935_v50  ;;  %v3996_v33 = vrot.slane %v3995_v9, 1 }
 0x440   : >> { %v3938_v17 = vadd.f32 %v18135_v12, %v3937_v25   ;;  %v3997_v2 = vadd.f32 %v3996_v33, %v3995_v9  ;;  %1648 = sbr.rel (!%p1646_p4) target bundleno = 702 (0x2be), region = 344 }
 0x442   : >> { %v3998_v26 = vadd.f32 %v18136_v55, %v3997_v2   ;;  %v18138_v62 = vmov %v3938_v17 }
 0x443   : > { %v18140_v62 = vmov (%p1646_p4), %v3938_v17 }
 0x444   : >> { %v18137_v31 = vmov %v3998_v26 }
 0x445   : > { %v18139_v31 = vmov %v3998_v26  ;;  %1640 = sbr.rel (!%p1638_p5) target bundleno = 701 (0x2bd), region = 355  ;;  %v4019_v46 = vmul.f32 (%p1638_p5), 0.00028344672, %v3938_v17  ;;  %v4020_v59 = vmul.f32 (%p1638_p5), 0.00028344672, %v3998_v26  ;;  %s16224_s4 = smov (%p1638_p5), 0  }
 0x446   :  { %v4023_v23 = vld [vmem:[%s18073_s5] sm:$0x1] (%p1638_p5) }
 0x447   :  { %v4021_v24 = vmul.f32 (%p1638_p5), %v4019_v46, %v4019_v46  ;;  %v16217_v35 = vld [vmem:[%s18074_s6] sm:$0x1] (%p1638_p5) }
 0x449   :  { %v4022_v10 = vsub.f32 (%p1638_p5), %v4020_v59, %v4021_v24 }
 0x44b   :  { %v4024_v8 = vadd.f32 1e-05, %v4022_v10 }
 0x44d   :  { %13113 = vrsqrt.f32 %v4024_v8 }
 0x45a   :  { %v13114_v41 = vpop.eup %13113 }
 0x45b   :  { %v16212_v1 = vmul.f32 %v13114_v41, %v4023_v23 }
 0x45d   :  { %v16220_v19 = vmul.f32 %v16212_v1, %v4019_v46 }
 0x45f   :  { %v4029_v52 = vsub.f32 %v16217_v35, %v16220_v19 }
 0x460 LB: > { %s16229_s5 = smov 0   ;;  %s13327_s4 = sphi %s16224_s4, %s4035_s4  }
 0x461 LB: >> { %s9855_s6 = smul.u32 2112, %s13327_s4  ;;  %v18141_v36 = vld [vmem:[#allocation10_spill] sm:$0xff]  ;;  %vm4140_vm8 = vcmask 258048   ;;  %s13331_s5 = sphi %s16229_s5, %s4041_s5  }
 0x462   : >> { %s10628_s29 = smul.u32 96, %s13331_s5  ;;  %v4079_v58 = vrot.slane %v16212_v1, %v18141_v36  ;;  %v4088_v40 = vrot.slane %v4029_v52, %v18141_v36 }
 0x463   : >> { %s9887_s18 = smul.u32 552, %s13327_s4 }
 0x464   : >> { %s9858_s17 = sadd.s32 %s10628_s29, %s9855_s6  ;;  %s9888_s20 = smul.u32 24, %s13331_s5 }
 0x465   : >> { %s16243_s19 = scalar_lea.vmem [#allocation5], %s9858_s17  ;;  %s4041_s5 = sadd.s32 1, %s13331_s5  }
 0x466   : >> { %v10629_v38 = vld [vmem:[%s16243_s19 + $0x31] ss:$2 sm:$0xff]  ;;  %v10634_v42 = vld [vmem:[%s16243_s19 + $0x32] ss:$2 sm:$0xff]  ;;  %v10639_v15 = vld [vmem:[%s16243_s19 + $0x61] ss:$2 sm:$0xff]  ;;  %s9889_s21 = sadd.s32 %s9888_s20, %s9887_s18 }
 0x467   : >> { %v10644_v32 = vld [vmem:[%s16243_s19 + $0x62] ss:$2 sm:$0xff]  ;;  %v4081_v7 = vmul.f32 %v10629_v38, %v4079_v58  ;;  %v4096_v16 = vmul.f32 %v10634_v42, %v4079_v58  ;;  %v4105_v48 = vmul.f32 %v10639_v15, %v4079_v58  ;;  %v10630_v47 = vld [vmem:[%s16243_s19 + $0x41] ss:$2 sm:$0xff]  ;;  %v10640_v0 = vld [vmem:[%s16243_s19 + $0x71] ss:$2 sm:$0xff] }
 0x468   : >> { %v4114_v22 = vmul.f32 %v10644_v32, %v4079_v58  ;;  %v10635_v53 = vld [vmem:[%s16243_s19 + $0x42] ss:$2 sm:$0xff]  ;;  %v10645_v60 = vld [vmem:[%s16243_s19 + $0x72] ss:$2 sm:$0xff]  ;;  %v4082_v4 = vmul.f32 %v10630_v47, %v4079_v58  ;;  %v4106_v61 = vmul.f32 %v10640_v0, %v4079_v58  ;;  %s9890_s22 = scalar_lea.vmem [#allocation3], %s9889_s21  ;;  %p4038_p6 = scmp.ge.s32.totalorder %s4041_s5, 21  }
 0x469   : >> { %v4090_v44 = vadd.f32 %v4088_v40, %v4081_v7  ;;  %v4099_v20 = vadd.f32 %v4096_v16, %v4088_v40  ;;  %v4108_v3 = vadd.f32 %v4105_v48, %v4088_v40  ;;  %v4097_v11 = vmul.f32 %v10635_v53, %v4079_v58  ;;  %v10631_v31 = vld [vmem:[%s16243_s19 + $0x51] ss:$2 sm:$0x1f]  ;;  %v10636_v30 = vld [vmem:[%s16243_s19 + $0x52] ss:$2 sm:$0x1f] }
 0x46a   : >> { %v4117_v13 = vadd.f32 %v4114_v22, %v4088_v40  ;;  %v4091_v39 = vadd.f32 %v4088_v40, %v4082_v4  ;;  %v4115_v18 = vmul.f32 %v10645_v60, %v4079_v58  ;;  %v10641_v45 = vld [vmem:[%s16243_s19 + $0x81] ss:$2 sm:$0x1f]  ;;  %v4109_v56 = vadd.f32 %v4106_v61, %v4088_v40  ;;  %v10646_v34 = vld [vmem:[%s16243_s19 + $0x82] ss:$2 sm:$0x1f] }
 0x46b   : >> { %v4093_v43 = vmax.f32 %v4090_v44, 0.0  ;;  %v4102_v14 = vmax.f32 %v4099_v20, 0.0  ;;  %v4111_v37 = vmax.f32 %v4108_v3, 0.0  ;;  %v4100_v21 = vadd.f32 %v4097_v11, %v4088_v40  ;;  %s4035_s4 = sadd.s32 (%p4038_p6), 1, %s13327_s4  }
 0x46c   : >> { %v4120_v49 = vmax.f32 %v4117_v13, 0.0  ;;  %v4094_v62 = vmax.f32 %v4091_v39, 0.0  ;;  %v4118_v63 = vadd.f32 %v4115_v18, %v4088_v40  ;;  %v4083_v5 = vmul.f32 %v10631_v31, %v4079_v58  ;;  %p4032_p7 = scmp.ge.s32.totalorder (%p4038_p6), %s4035_s4, 2  }
 0x46d   : >> { %v4123_v54 = vmax.f32 %v4093_v43, %v4102_v14  ;;  %v4103_v57 = vmax.f32 %v4100_v21, 0.0  ;;  %v4098_v50 = vmul.f32 %v10636_v30, %v4079_v58  ;;  %v4112_v6 = vmax.f32 %v4109_v56, 0.0 }
 0x46e   : >> { %v4126_v51 = vmax.f32 %v4111_v37, %v4120_v49  ;;  %v4121_v9 = vmax.f32 %v4118_v63, 0.0  ;;  %v4107_v25 = vmul.f32 %v10641_v45, %v4079_v58  ;;  %v4092_v12 = vadd.f32 %v4088_v40, %v4083_v5 }
 0x46f   : >> { %v4124_v33 = vmax.f32 %v4094_v62, %v4103_v57  ;;  %v4101_v17 = vadd.f32 %v4098_v50, %v4088_v40  ;;  %v4116_v2 = vmul.f32 %v10646_v34, %v4079_v58 }
 0x470   : >> { %v4129_v55 = vmax.f32 %v4123_v54, %v4126_v51  ;;  %v4127_v26 = vmax.f32 %v4112_v6, %v4121_v9  ;;  %v4110_v46 = vadd.f32 %v4107_v25, %v4088_v40  ;;  %v4095_v59 = vmax.f32 %v4092_v12, 0.0 }
 0x471   : >> { %v4104_v24 = vmax.f32 %v4101_v17, 0.0  ;;  %v4119_v10 = vadd.f32 %v4116_v2, %v4088_v40 }
 0x472   : >> { %10647 = vst.msk [vmem:[%s9890_s22 + $0x21] sm:$0xff] %vm51_vm0, %v4129_v55  ;;  %v4130_v8 = vmax.f32 %v4124_v33, %v4127_v26  ;;  %v4113_v23 = vmax.f32 %v4110_v46, 0.0 }
 0x473   : >> { %v4122_v41 = vmax.f32 %v4119_v10, 0.0  ;;  %v4125_v36 = vmax.f32 %v4095_v59, %v4104_v24 }
 0x474   : >> { %10648 = vst.msk [vmem:[%s9890_s22 + $0x29] sm:$0xff] %vm51_vm0, %v4130_v8 }
 0x475   : >> { %v4128_v38 = vmax.f32 %v4113_v23, %v4122_v41  ;;  %4040 = sbr.rel (!%p4038_p6) target bundleno = 1121 (0x461), region = 366 }
 0x477   : >> { %v4131_v42 = vmax.f32 %v4125_v36, %v4128_v38 }
 0x479   : >> { %10649 = vst.msk [vmem:[%s9890_s22 + $0x31] sm:$0x1f] %vm4140_vm8, %v4131_v42 }
 0x47a   :  { %4034 = sbr.rel (!%p4032_p7) target bundleno = 1120 (0x460), region = 377  ;;  %v18142_v58 = vld [vmem:[#allocation12_spill] sm:$0xff] (%p4032_p7)  ;;  %v18143_v40 = vld [vmem:[#allocation13_spill] sm:$0xff] (%p4032_p7)  ;;  %v18144_v15 = vld [vmem:[#allocation15_spill] sm:$0xff] (%p4032_p7)  ;;  %v18146_v7 = vmov (%p4032_p7), 1.0   ;;  %v16285_v1 = vmov (%p4032_p7), 0.0  }
 0x47b   :  { %vm4144_vm9 = vcmp.eq.s32.totalorder (%p4032_p7), %v18142_v58, 22  ;;  %vm4163_vm10 = vcmp.eq.s32.totalorder (%p4032_p7), %v18143_v40, 24  ;;  %vm4183_vm11 = vcmp.eq.s32.totalorder (%p4032_p7), %v18144_v15, 46  ;;  %v18145_v32 = vld [vmem:[#allocation17_spill] sm:$0xff] (%p4032_p7)  ;;  %v16287_v35 = vmov (%p4032_p7), 0.0   ;;  %s16289_s0 = smov (%p4032_p7), 0  }
 0x47c   :  { %vm4213_vm12 = vcmp.eq.s32.totalorder (%p4032_p7), %v18145_v32, 70  ;;  %v16274_v16 = vsel (%p4032_p7), %vm4144_vm9, 0.0, %v18146_v7  ;;  %v16277_v48 = vsel (%p4032_p7), %vm4163_vm10, 0.0, %v18146_v7  ;;  %v16280_v47 = vsel (%p4032_p7), %vm4183_vm11, 0.0, %v18146_v7 }
 0x47d   :  { %v16283_v22 = vsel (%p4032_p7), %vm4213_vm12, 0.0, %v18146_v7 }
 0x47f LB: > { %s16300_s2 = smov 0   ;;  %s13343_s0 = sphi %s16289_s0, %s4237_s0   ;;  %v13339_v35 = vphi %v16287_v35, %v18150_v35   ;;  %v13335_v1 = vphi %v16285_v1, %v18149_v1  }
 0x480 LB: >> { %v4282_v19 = vld [vmem:[%s18075_s7 + $0x38] sm:$0xff]  ;;  %s9892_s26 = smul.u32 552, %s13343_s0  ;;  %v13399_v52 = vmov 0.0   ;;  %v4281_v53 = vld [vmem:[%s18075_s7 + $0x30] sm:$0xff]  ;;  %v4280_v0 = vld [vmem:[%s18075_s7 + $0x28] sm:$0xff]  ;;  %vm13400_vm13 = vmmov 0   ;;  %s13355_s2 = sphi %s16300_s2, %s4245_s2   ;;  %v13351_v35 = vphi %v13339_v35, %v18148_v35   ;;  %v13347_v1 = vphi %v13335_v1, %v18147_v1  }
 0x481   : >> { %12020 = vmatprep.subr.mxu0 %v13399_v52  ;;  %12833 = vmatprep.subr.mxu1 %v13399_v52  ;;  %s9893_s24 = smul.u32 72, %s13355_s2  ;;  %v4279_v60 = vld [vmem:[%s18075_s7 + $0x20] sm:$0xff]  ;;  %v4571_v20 = vld [vmem:[%s18075_s7 + $0x58] sm:$0xff]  ;;  %v4570_v39 = vld [vmem:[%s18075_s7 + $0x50] sm:$0xff]  ;;  %s4245_s2 = sadd.s32 1, %s13355_s2  }
 0x482   : >> { %12021 = vmatpush3.msra.mxu0 %v4282_v19  ;;  %12837 = vmatpush3.msra.mxu1 %v4282_v19  ;;  %v4267_v3 = vld [vmem:[%s18075_s7 + $0x18] sm:$0xff]  ;;  %v4266_v61 = vld [vmem:[%s18075_s7 + $0x10] sm:$0xff]  ;;  %v4265_v30 = vld [vmem:[%s18075_s7 + $0x8] sm:$0xff]  ;;  %p4242_p8 = scmp.ge.s32.totalorder %s4245_s2, 7  }
 0x483   : >> { %12022 = vmatprep.subr.mxu0 %v13399_v52  ;;  %12834 = vmatprep.subr.mxu1 %v13399_v52  ;;  %s16326_s30 = sadd.s32 %s9893_s24, %s9892_s26  ;;  %v4569_v43 = vld [vmem:[%s18075_s7 + $0x48] sm:$0xff]  ;;  %v4264_v21 = vld [vmem:[%s18075_s7] sm:$0xff]  ;;  %v4732_v56 = vld [vmem:[%s18075_s7 + $0x78] sm:$0xff]  ;;  %s4237_s0 = sadd.s32 (%p4242_p8), 1, %s13343_s0  }
 0x484   : >> { %12023 = vmatpush3.msra.mxu0 %v4281_v53  ;;  %12838 = vmatpush3.msra.mxu1 %v4281_v53  ;;  %s16336_s5 = scalar_lea.vmem [#allocation3], %s16326_s30  ;;  %v4568_v62 = vld [vmem:[%s18075_s7 + $0x40] sm:$0xff]  ;;  %v4892_v54 = vld [vmem:[%s18075_s7 + $0x98] sm:$0xff]  ;;  %v4731_v57 = vld [vmem:[%s18075_s7 + $0x70] sm:$0xff]  ;;  %p4234_p9 = scmp.ge.s32.totalorder (%p4242_p8), %s4237_s0, 2  }
 0x485   : >> { %12024 = vmatprep.subr.mxu0 %v13399_v52  ;;  %12835 = vmatprep.subr.mxu1 %v13399_v52  ;;  %v10659_v4 = vld [vmem:[%s16336_s5 + $0x8] sm:$0xff]  ;;  %v16340_v44 = vld [vmem:[%s16336_s5 + $0x30] sm:$0xff]  ;;  %v16359_v13 = vld [vmem:[%s16336_s5 + $0x38] sm:$0xff] }
 0x486   : >> { %12025 = vmatpush3.msra.mxu0 %v4280_v0  ;;  %12839 = vmatpush3.msra.mxu1 %v4280_v0  ;;  %v10660_v11 = vld [vmem:[%s16336_s5 + $0x10] sm:$0xff]  ;;  %v10661_v18 = vld [vmem:[%s16336_s5 + $0x18] sm:$0xff]  ;;  %v16378_v31 = vld [vmem:[%s16336_s5 + $0x40] sm:$0xff] }
 0x487   : >> { %12026 = vmatprep.subr.mxu0 %v13399_v52  ;;  %12836 = vmatprep.subr.mxu1 %v13399_v52  ;;  %v16396_v14 = vld [vmem:[%s16336_s5 + $0x20] sm:$0xff]  ;;  %v16399_v37 = vld [vmem:[%s16336_s5 + $0x48] sm:$0xff]  ;;  %v10652_v5 = vld [vmem:[%s16336_s5 + $0x17] sm:$0xff] }
 0x488   : >> { %12027 = vmatpush3.msra.mxu0 %v4279_v60  ;;  %12840 = vmatpush3.msra.mxu1 %v4279_v60  ;;  %v16416_v45 = vld [vmem:[%s16336_s5 + $0x28] sm:$0xff]  ;;  %v10687_v50 = vld [vmem:[%s16336_s5 + $0x11] sm:$0xff]  ;;  %v10653_v9 = vld [vmem:[%s16336_s5 + $0x1f] sm:$0xff] }
 0x489   : >> { %12028 = vmatprep.mubr.msk.f32.mxu0 %vm13400_vm13, %v13399_v52  ;;  %12043 = vmatprep.mubr.msk.f32.mxu1 %vm13400_vm13, %v13399_v52  ;;  %v10650_v49 = vld [vmem:[%s16336_s5 + $0x7] sm:$0xff]  ;;  %v10651_v63 = vld [vmem:[%s16336_s5 + $0xf] sm:$0xff]  ;;  %v10688_v25 = vld [vmem:[%s16336_s5 + $0x19] sm:$0xff] }
 0x48a   : >> { %12029 = vmatmul.mubr.msk.f32.vlgmr.msra.gmra.mxu0 %vm51_vm0, %v10659_v4  ;;  %12044 = vmatmul.mubr.msk.f32.vlgmr.msra.gmra.mxu1 %vm51_vm0, %v16340_v44  ;;  %v10686_v34 = vld [vmem:[%s16336_s5 + $0x9] sm:$0xff]  ;;  %v4729_v12 = vld [vmem:[%s18075_s7 + $0x60] sm:$0xff]  ;;  %v16513_v59 = vld [vmem:[%s16336_s5 + $0x37] sm:$0xff] }
 0x48b   : >> { %12090 = vmatprep.subr.mxu0 %v13399_v52  ;;  %12055 = vmatprep.subr.mxu1 %v13399_v52  ;;  %v4891_v51 = vld [vmem:[%s18075_s7 + $0x90] sm:$0xff]  ;;  %v4730_v6 = vld [vmem:[%s18075_s7 + $0x68] sm:$0xff]  ;;  %v4889_v55 = vld [vmem:[%s18075_s7 + $0x80] sm:$0xff] }
 0x48c   : >> { %12091 = vmatpush3.msra.mxu0 %v4571_v20  ;;  %12031 = vmatprep.mubr.msk.f32.mxu0 %vm13400_vm13, %v13399_v52  ;;  %v4890_v33 = vld [vmem:[%s18075_s7 + $0x88] sm:$0xff]  ;;  %v16516_v24 = vld [vmem:[%s16336_s5 + $0x31] sm:$0xff]  ;;  %v16527_v10 = vld [vmem:[%s16336_s5 + $0x3f] sm:$0xff] }
 0x48d   : >> { %12046 = vmatprep.mubr.msk.f32.mxu1 %vm13400_vm13, %v13399_v52  ;;  %12056 = vmatpush3.msra.mxu1 %v4267_v3  ;;  %v10654_v17 = vld [vmem:[%s16336_s5 + $0x27] sm:$0xff]  ;;  %v10655_v26 = vld [vmem:[%s16336_s5 + $0x2f] sm:$0xff]  ;;  %v16530_v8 = vld [vmem:[%s16336_s5 + $0x39] sm:$0xff] }
 0x48e   : >> { %12032 = vmatmul.mubr.msk.f32.gmra.mxu0 %vm51_vm0, %v10660_v11  ;;  %12047 = vmatmul.mubr.msk.f32.gmra.mxu1 %vm51_vm0, %v16359_v13  ;;  %v16486_v2 = vld [vmem:[%s16336_s5 + $0x21] sm:$0xff]  ;;  %v16502_v46 = vld [vmem:[%s16336_s5 + $0x29] sm:$0xff]  ;;  %v5053_v38 = vld [vmem:[%s18075_s7 + $0xb8] sm:$0xff] }
 0x48f   : >> { %12092 = vmatprep.subr.mxu0 %v13399_v52  ;;  %12057 = vmatprep.subr.mxu1 %v13399_v52  ;;  %v16541_v23 = vld [vmem:[%s16336_s5 + $0x47] sm:$0xff]  ;;  %v5214_v42 = vld [vmem:[%s18075_s7 + $0xd8] sm:$0xff]  ;;  %v5052_v58 = vld [vmem:[%s18075_s7 + $0xb0] sm:$0xff] }
 0x490   : >> { %12093 = vmatpush3.msra.mxu0 %v4570_v39  ;;  %12034 = vmatprep.mubr.msk.f32.mxu0 %vm13400_vm13, %v13399_v52  ;;  %v16544_v41 = vld [vmem:[%s16336_s5 + $0x41] sm:$0xff]  ;;  %v16555_v36 = vld [vmem:[%s16336_s5 + $0x49] sm:$0xff]  ;;  %v10711_v0 = vld [vmem:[%s16336_s5 + $0x57] sm:$0xff] }
 0x491   : >> { %12049 = vmatprep.mubr.msk.f32.mxu1 %vm13400_vm13, %v13399_v52  ;;  %12058 = vmatpush3.msra.mxu1 %v4266_v61  ;;  %v5213_v40 = vld [vmem:[%s18075_s7 + $0xd0] sm:$0xff]  ;;  %v5051_v15 = vld [vmem:[%s18075_s7 + $0xa8] sm:$0xff]  ;;  %v5050_v7 = vld [vmem:[%s18075_s7 + $0xa0] sm:$0xff] }
 0x492   : >> { %12035 = vmatmul.mubr.msk.f32.gmra.mxu0 %vm51_vm0, %v10661_v18  ;;  %12050 = vmatmul.mubr.msk.f32.gmra.mxu1 %vm51_vm0, %v16378_v31  ;;  %v5212_v32 = vld [vmem:[%s18075_s7 + $0xc8] sm:$0xff]  ;;  %v5211_v19 = vld [vmem:[%s18075_s7 + $0xc0] sm:$0xff]  ;;  %v16644_v60 = vld [vmem:[%s16336_s5 + $0x50] sm:$0xff] }
 0x493   : >> { %12059 = vmatprep.subr.mxu1 %v13399_v52  ;;  %12094 = vmatprep.subr.mxu0 %v13399_v52  ;;  %v10710_v53 = vld [vmem:[%s16336_s5 + $0x4f] sm:$0xff]  ;;  %v10712_v4 = vld [vmem:[%s16336_s5 + $0x5f] sm:$0xff] }
 0x494   : >> { %12037 = vmatprep.mubr.msk.f32.mxu0 %vm13400_vm13, %v13399_v52  ;;  %12052 = vmatprep.mubr.msk.f32.mxu1 %vm13400_vm13, %v13399_v52  ;;  %v16665_v20 = vld [vmem:[%s16336_s5 + $0x60] sm:$0xff]  ;;  %v5375_v3 = vld [vmem:[%s18075_s7 + $0xf8] sm:$0xff]  ;;  %v5374_v39 = vld [vmem:[%s18075_s7 + $0xf0] sm:$0xff] }
 0x495   : >> { %12060 = vmatpush3.msra.mxu1 %v4265_v30  ;;  %12095 = vmatpush3.msra.mxu0 %v4569_v43  ;;  %v5536_v11 = vld [vmem:[%s18075_s7 + $0x118] sm:$0xff]  ;;  %v5535_v61 = vld [vmem:[%s18075_s7 + $0x110] sm:$0xff]  ;;  %v5373_v18 = vld [vmem:[%s18075_s7 + $0xe8] sm:$0xff] }
 0x496   : >> { %12038 = vmatmul.mubr.msk.f32.gmra.mxu0 %vm51_vm0, %v16396_v14  ;;  %12053 = vmatmul.mubr.msk.f32.gmra.mxu1 %vm51_vm0, %v16399_v37  ;;  %v5534_v30 = vld [vmem:[%s18075_s7 + $0x108] sm:$0xff]  ;;  %v5372_v43 = vld [vmem:[%s18075_s7 + $0xe0] sm:$0xff] }
 0x497   : >> { %12061 = vmatprep.subr.mxu1 %v13399_v52  ;;  %12040 = vmatprep.mubr.msk.f32.mxu0 %vm13400_vm13, %v13399_v52 }
 0x498   : >> { %12062 = vmatpush3.msra.mxu1 %v4264_v21  ;;  %12063 = vmatprep.mubr.msk.f32.mxu1 %vm13400_vm13, %v13399_v52  ;;  %v10746_v21 = vld [vmem:[%s16336_s5 + $0x51] sm:$0xff] }
 0x499   : >> { %12096 = vmatprep.subr.mxu0 %v13399_v52  ;;  %12125 = vmatprep.subr.mxu1 %v13399_v52 }
 0x49a   : >> { %12041 = vmatmul.mubr.msk.f32.gmra.mxu0 %vm51_vm0, %v16416_v45  ;;  %12064 = vmatmul.mubr.msk.f32.vlgmr.msra.gmra.mxu1 %vm51_vm0, %v10650_v49  ;;  %v10764_v49 = vld [vmem:[%s16336_s5 + $0x67] sm:$0xff] }
 0x49b   : >> { %12097 = vmatpush3.msra.mxu0 %v4568_v62  ;;  %12066 = vmatprep.mubr.msk.f32.mxu1 %vm13400_vm13, %v13399_v52  ;;  %v10748_v62 = vld [vmem:[%s16336_s5 + $0x61] sm:$0xff] }
 0x49c   : >> { %12098 = vmatprep.mubr.msk.f32.mxu0 %vm13400_vm13, %v13399_v52  ;;  %12126 = vmatpush3.msra.mxu1 %v4732_v56  ;;  %v10765_v56 = vld [vmem:[%s16336_s5 + $0x6f] sm:$0xff] }
 0x49d   : >> { %12160 = vmatprep.subr.mxu0 %v13399_v52  ;;  %12127 = vmatprep.subr.mxu1 %v13399_v52 }
 0x49e   : >> { %12067 = vmatmul.mubr.msk.f32.gmra.mxu1 %vm51_vm0, %v10651_v63  ;;  %12099 = vmatmul.mubr.msk.f32.vlgmr.msra.gmra.mxu0 %vm51_vm0, %v10686_v34  ;;  %v10766_v63 = vld [vmem:[%s16336_s5 + $0x77] sm:$0xff] }
 0x49f   : >> { %12161 = vmatpush3.msra.mxu0 %v4892_v54  ;;  %12069 = vmatprep.mubr.msk.f32.mxu1 %vm13400_vm13, %v13399_v52  ;;  %v10784_v34 = vld [vmem:[%s16336_s5 + $0x78] sm:$0xff] }
 0x4a0   : >> { %12101 = vmatprep.mubr.msk.f32.mxu0 %vm13400_vm13, %v13399_v52  ;;  %12128 = vmatpush3.msra.mxu1 %v4731_v57  ;;  %v10801_v54 = vld [vmem:[%s16336_s5 + $0x71] sm:$0xff]  ;;  %v10802_v57 = vld [vmem:[%s16336_s5 + $0x79] sm:$0xff] }
 0x4a1   : >> { %12162 = vmatprep.subr.mxu0 %v13399_v52  ;;  %12129 = vmatprep.subr.mxu1 %v13399_v52 }
 0x4a2   : >> { %12070 = vmatmul.mubr.msk.f32.gmra.mxu1 %vm51_vm0, %v10652_v5  ;;  %12102 = vmatmul.mubr.msk.f32.gmra.mxu0 %vm51_vm0, %v10687_v50 }
 0x4a3   : >> { %12072 = vmatprep.mubr.msk.f32.mxu1 %vm13400_vm13, %v13399_v52  ;;  %12104 = vmatprep.mubr.msk.f32.mxu0 %vm13400_vm13, %v13399_v52 }
 0x4a4   : >> { %12163 = vmatpush3.msra.mxu0 %v4891_v51  ;;  %12130 = vmatpush3.msra.mxu1 %v4730_v6 }
 0x4a5   : >> { %12164 = vmatprep.subr.mxu0 %v13399_v52  ;;  %12131 = vmatprep.subr.mxu1 %v13399_v52 }
 0x4a6   : >> { %12073 = vmatmul.mubr.msk.f32.gmra.mxu1 %vm51_vm0, %v10653_v9  ;;  %12105 = vmatmul.mubr.msk.f32.gmra.mxu0 %vm51_vm0, %v10688_v25 }
 0x4a7   : >> { %12075 = vmatprep.mubr.msk.f32.mxu1 %vm13400_vm13, %v13399_v52  ;;  %12107 = vmatprep.mubr.msk.f32.mxu0 %vm13400_vm13, %v13399_v52 }
 0x4a8   : >> { %12165 = vmatpush3.msra.mxu0 %v4890_v33  ;;  %12132 = vmatpush3.msra.mxu1 %v4729_v12 }
 0x4a9   : >> { %12166 = vmatprep.subr.mxu0 %v13399_v52  ;;  %12195 = vmatprep.subr.mxu1 %v13399_v52 }
 0x4aa   : >> { %12076 = vmatmul.mubr.msk.f32.gmra.mxu1 %vm51_vm0, %v10654_v17  ;;  %12108 = vmatmul.mubr.msk.f32.gmra.mxu0 %vm51_vm0, %v16486_v2 }
 0x4ab   : >> { %12078 = vmatprep.mubr.msk.f32.mxu1 %vm13400_vm13, %v13399_v52  ;;  %12110 = vmatprep.mubr.msk.f32.mxu0 %vm13400_vm13, %v13399_v52 }
 0x4ac   : >> { %12167 = vmatpush3.msra.mxu0 %v4889_v55 }
 0x4ad   : >> { %12230 = vmatprep.subr.mxu0 %v13399_v52 }
 0x4ae   : >> { %12079 = vmatmul.mubr.msk.f32.gmra.mxu1 %vm51_vm0, %v10655_v26  ;;  %12111 = vmatmul.mubr.msk.f32.gmra.mxu0 %vm51_vm0, %v16502_v46 }
 0x4af   : >> { %12081 = vmatprep.mubr.msk.f32.mxu1 %vm13400_vm13, %v13399_v52  ;;  %12113 = vmatprep.mubr.msk.f32.mxu0 %vm13400_vm13, %v13399_v52 }
 0x4b2   : >> { %12082 = vmatmul.mubr.msk.f32.gmra.mxu1 %vm51_vm0, %v16513_v59  ;;  %12114 = vmatmul.mubr.msk.f32.gmra.mxu0 %vm51_vm0, %v16516_v24 }
 0x4b3   : >> { %12084 = vmatprep.mubr.msk.f32.mxu1 %vm13400_vm13, %v13399_v52  ;;  %12116 = vmatprep.mubr.msk.f32.mxu0 %vm13400_vm13, %v13399_v52 }
 0x4b6   : >> { %12085 = vmatmul.mubr.msk.f32.gmra.mxu1 %vm51_vm0, %v16527_v10  ;;  %12117 = vmatmul.mubr.msk.f32.gmra.mxu0 %vm51_vm0, %v16530_v8 }
 0x4b7   : >> { %12087 = vmatprep.mubr.msk.f32.mxu1 %vm13400_vm13, %v13399_v52  ;;  %12119 = vmatprep.mubr.msk.f32.mxu0 %vm13400_vm13, %v13399_v52 }
 0x4ba   : >> { %12088 = vmatmul.mubr.msk.f32.gmra.mxu1 %vm51_vm0, %v16541_v23  ;;  %12120 = vmatmul.mubr.msk.f32.gmra.mxu0 %vm51_vm0, %v16544_v41 }
 0x4bb   : >> { %12122 = vmatprep.mubr.msk.f32.mxu0 %vm13400_vm13, %v13399_v52  ;;  %12133 = vmatprep.mubr.msk.f32.mxu1 %vm13400_vm13, %v13399_v52 }
 0x4be   : >> { %12123 = vmatmul.mubr.msk.f32.gmra.mxu0 %vm51_vm0, %v16555_v36  ;;  %12134 = vmatmul.mubr.msk.f32.vlgmr.msra.gmra.mxu1 %vm51_vm0, %v10653_v9 }
 0x4bf   : >> { %12136 = vmatprep.mubr.msk.f32.mxu1 %vm13400_vm13, %v13399_v52  ;;  %12168 = vmatprep.mubr.msk.f32.mxu0 %vm13400_vm13, %v13399_v52 }
 0x4c0   : >> { %12196 = vmatpush3.msra.mxu1 %v5053_v38 }
 0x4c1   : >> { %12197 = vmatprep.subr.mxu1 %v13399_v52 }
 0x4c2   : >> { %12137 = vmatmul.mubr.msk.f32.gmra.mxu1 %vm51_vm0, %v10654_v17  ;;  %12169 = vmatmul.mubr.msk.f32.vlgmr.msra.gmra.mxu0 %vm51_vm0, %v16396_v14  ;;  %v5533_v14 = vld [vmem:[%s18075_s7 + $0x100] sm:$0xff] }
 0x4c3   : >> { %12231 = vmatpush3.msra.mxu0 %v5214_v42  ;;  %12139 = vmatprep.mubr.msk.f32.mxu1 %vm13400_vm13, %v13399_v52 }
 0x4c4   : >> { %12171 = vmatprep.mubr.msk.f32.mxu0 %vm13400_vm13, %v13399_v52  ;;  %12198 = vmatpush3.msra.mxu1 %v5052_v58 }
 0x4c5   : >> { %12232 = vmatprep.subr.mxu0 %v13399_v52  ;;  %12199 = vmatprep.subr.mxu1 %v13399_v52 }
 0x4c6   : >> { %12140 = vmatmul.mubr.msk.f32.gmra.mxu1 %vm51_vm0, %v10655_v26  ;;  %12172 = vmatmul.mubr.msk.f32.gmra.mxu0 %vm51_vm0, %v16416_v45  ;;  %v10747_v45 = vld [vmem:[%s16336_s5 + $0x59] sm:$0xff] }
 0x4c7   : >> { %12142 = vmatprep.mubr.msk.f32.mxu1 %vm13400_vm13, %v13399_v52  ;;  %12174 = vmatprep.mubr.msk.f32.mxu0 %vm13400_vm13, %v13399_v52 }
 0x4c8   : >> { %12233 = vmatpush3.msra.mxu0 %v5213_v40  ;;  %12200 = vmatpush3.msra.mxu1 %v5051_v15 }
 0x4c9   : >> { %12234 = vmatprep.subr.mxu0 %v13399_v52  ;;  %12201 = vmatprep.subr.mxu1 %v13399_v52 }
 0x4ca   : >> { %12143 = vmatmul.mubr.msk.f32.gmra.mxu1 %vm51_vm0, %v16513_v59  ;;  %12175 = vmatmul.mubr.msk.f32.gmra.mxu0 %vm51_vm0, %v16340_v44  ;;  %v16655_v44 = vld [vmem:[%s16336_s5 + $0x58] sm:$0xff] }
 0x4cb   : >> { %12145 = vmatprep.mubr.msk.f32.mxu1 %vm13400_vm13, %v13399_v52  ;;  %12177 = vmatprep.mubr.msk.f32.mxu0 %vm13400_vm13, %v13399_v52 }
 0x4cc   : >> { %12235 = vmatpush3.msra.mxu0 %v5212_v32  ;;  %12202 = vmatpush3.msra.mxu1 %v5050_v7 }
 0x4cd   : >> { %12236 = vmatprep.subr.mxu0 %v13399_v52  ;;  %12265 = vmatprep.subr.mxu1 %v13399_v52 }
 0x4ce   : >> { %12146 = vmatmul.mubr.msk.f32.gmra.mxu1 %vm51_vm0, %v16527_v10  ;;  %12178 = vmatmul.mubr.msk.f32.gmra.mxu0 %vm51_vm0, %v16359_v13 }
 0x4cf   : >> { %12148 = vmatprep.mubr.msk.f32.mxu1 %vm13400_vm13, %v13399_v52  ;;  %12180 = vmatprep.mubr.msk.f32.mxu0 %vm13400_vm13, %v13399_v52 }
 0x4d0   : >> { %12237 = vmatpush3.msra.mxu0 %v5211_v19 }
 0x4d1   : >> { %12300 = vmatprep.subr.mxu0 %v13399_v52 }
 0x4d2   : >> { %12149 = vmatmul.mubr.msk.f32.gmra.mxu1 %vm51_vm0, %v16541_v23  ;;  %12181 = vmatmul.mubr.msk.f32.gmra.mxu0 %vm51_vm0, %v16378_v31 }
 0x4d3   : >> { %12151 = vmatprep.mubr.msk.f32.mxu1 %vm13400_vm13, %v13399_v52  ;;  %12183 = vmatprep.mubr.msk.f32.mxu0 %vm13400_vm13, %v13399_v52 }
 0x4d6   : >> { %12152 = vmatmul.mubr.msk.f32.gmra.mxu1 %vm51_vm0, %v10710_v53  ;;  %12184 = vmatmul.mubr.msk.f32.gmra.mxu0 %vm51_vm0, %v16399_v37 }
 0x4d7   : >> { %12154 = vmatprep.mubr.msk.f32.mxu1 %vm13400_vm13, %v13399_v52  ;;  %12186 = vmatprep.mubr.msk.f32.mxu0 %vm13400_vm13, %v13399_v52 }
 0x4da   : >> { %12155 = vmatmul.mubr.msk.f32.gmra.mxu1 %vm51_vm0, %v10711_v0  ;;  %12187 = vmatmul.mubr.msk.f32.gmra.mxu0 %vm51_vm0, %v16644_v60 }
 0x4db   : >> { %12157 = vmatprep.mubr.msk.f32.mxu1 %vm13400_vm13, %v13399_v52  ;;  %12189 = vmatprep.mubr.msk.f32.mxu0 %vm13400_vm13, %v13399_v52 }
 0x4de   : >> { %12158 = vmatmul.mubr.msk.f32.gmra.mxu1 %vm51_vm0, %v10712_v4  ;;  %12190 = vmatmul.mubr.msk.f32.gmra.mxu0 %vm51_vm0, %v16655_v44 }
 0x4df   : >> { %12192 = vmatprep.mubr.msk.f32.mxu0 %vm13400_vm13, %v13399_v52  ;;  %12203 = vmatprep.mubr.msk.f32.mxu1 %vm13400_vm13, %v13399_v52 }
 0x4e2   : >> { %12193 = vmatmul.mubr.msk.f32.gmra.mxu0 %vm51_vm0, %v16665_v20  ;;  %12204 = vmatmul.mubr.msk.f32.vlgmr.msra.gmra.mxu1 %vm51_vm0, %v16486_v2 }
 0x4e3   : >> { %12206 = vmatprep.mubr.msk.f32.mxu1 %vm13400_vm13, %v13399_v52  ;;  %12238 = vmatprep.mubr.msk.f32.mxu0 %vm13400_vm13, %v13399_v52 }
 0x4e4   : >> { %12266 = vmatpush3.msra.mxu1 %v5375_v3 }
 0x4e5   : >> { %12267 = vmatprep.subr.mxu1 %v13399_v52 }
 0x4e6   : >> { %12207 = vmatmul.mubr.msk.f32.gmra.mxu1 %vm51_vm0, %v16502_v46  ;;  %12239 = vmatmul.mubr.msk.f32.vlgmr.msra.gmra.mxu0 %vm51_vm0, %v16513_v59 }
 0x4e7   : >> { %12301 = vmatpush3.msra.mxu0 %v5536_v11  ;;  %12209 = vmatprep.mubr.msk.f32.mxu1 %vm13400_vm13, %v13399_v52 }
 0x4e8   : >> { %12241 = vmatprep.mubr.msk.f32.mxu0 %vm13400_vm13, %v13399_v52  ;;  %12268 = vmatpush3.msra.mxu1 %v5374_v39 }
 0x4e9   : >> { %12302 = vmatprep.subr.mxu0 %v13399_v52  ;;  %12269 = vmatprep.subr.mxu1 %v13399_v52 }
 0x4ea   : >> { %12210 = vmatmul.mubr.msk.f32.gmra.mxu1 %vm51_vm0, %v16516_v24  ;;  %12242 = vmatmul.mubr.msk.f32.gmra.mxu0 %vm51_vm0, %v16527_v10 }
 0x4eb   : >> { %12212 = vmatprep.mubr.msk.f32.mxu1 %vm13400_vm13, %v13399_v52  ;;  %12244 = vmatprep.mubr.msk.f32.mxu0 %vm13400_vm13, %v13399_v52 }
 0x4ec   : >> { %12303 = vmatpush3.msra.mxu0 %v5535_v61  ;;  %12270 = vmatpush3.msra.mxu1 %v5373_v18 }
 0x4ed   : >> { %12304 = vmatprep.subr.mxu0 %v13399_v52  ;;  %12271 = vmatprep.subr.mxu1 %v13399_v52 }
 0x4ee   : >> { %12213 = vmatmul.mubr.msk.f32.gmra.mxu1 %vm51_vm0, %v16530_v8  ;;  %12245 = vmatmul.mubr.msk.f32.gmra.mxu0 %vm51_vm0, %v16541_v23 }
 0x4ef   : >> { %12215 = vmatprep.mubr.msk.f32.mxu1 %vm13400_vm13, %v13399_v52  ;;  %12247 = vmatprep.mubr.msk.f32.mxu0 %vm13400_vm13, %v13399_v52 }
 0x4f0   : >> { %12305 = vmatpush3.msra.mxu0 %v5534_v30  ;;  %12272 = vmatpush3.msra.mxu1 %v5372_v43 }
 0x4f1   : >> { %12306 = vmatprep.subr.mxu0 %v13399_v52 }
 0x4f2   : >> { %12216 = vmatmul.mubr.msk.f32.gmra.mxu1 %vm51_vm0, %v16544_v41  ;;  %12248 = vmatmul.mubr.msk.f32.gmra.mxu0 %vm51_vm0, %v10710_v53 }
 0x4f3   : >> { %12218 = vmatprep.mubr.msk.f32.mxu1 %vm13400_vm13, %v13399_v52  ;;  %12250 = vmatprep.mubr.msk.f32.mxu0 %vm13400_vm13, %v13399_v52 }
 0x4f4   : >> { %12307 = vmatpush3.msra.mxu0 %v5533_v14 }
 0x4f6   : >> { %12219 = vmatmul.mubr.msk.f32.gmra.mxu1 %vm51_vm0, %v16555_v36  ;;  %12251 = vmatmul.mubr.msk.f32.gmra.mxu0 %vm51_vm0, %v10711_v0 }
 0x4f7   : >> { %12221 = vmatprep.mubr.msk.f32.mxu1 %vm13400_vm13, %v13399_v52  ;;  %12253 = vmatprep.mubr.msk.f32.mxu0 %vm13400_vm13, %v13399_v52 }
 0x4fa   : >> { %12222 = vmatmul.mubr.msk.f32.gmra.mxu1 %vm51_vm0, %v10746_v21  ;;  %12254 = vmatmul.mubr.msk.f32.gmra.mxu0 %vm51_vm0, %v10712_v4 }
 0x4fb   : >> { %12224 = vmatprep.mubr.msk.f32.mxu1 %vm13400_vm13, %v13399_v52  ;;  %12256 = vmatprep.mubr.msk.f32.mxu0 %vm13400_vm13, %v13399_v52 }
 0x4fe   : >> { %12225 = vmatmul.mubr.msk.f32.gmra.mxu1 %vm51_vm0, %v10747_v45  ;;  %12257 = vmatmul.mubr.msk.f32.gmra.mxu0 %vm51_vm0, %v10764_v49 }
 0x4ff   : >> { %12227 = vmatprep.mubr.msk.f32.mxu1 %vm13400_vm13, %v13399_v52  ;;  %12259 = vmatprep.mubr.msk.f32.mxu0 %vm13400_vm13, %v13399_v52 }
 0x502   : >> { %12228 = vmatmul.mubr.msk.f32.gmra.mxu1 %vm51_vm0, %v10748_v62  ;;  %12260 = vmatmul.mubr.msk.f32.gmra.mxu0 %vm51_vm0, %v10765_v56 }
 0x503   : >> { %12262 = vmatprep.mubr.msk.f32.mxu0 %vm13400_vm13, %v13399_v52  ;;  %12273 = vmatprep.mubr.msk.f32.mxu1 %vm13400_vm13, %v13399_v52 }
 0x506   : >> { %12263 = vmatmul.mubr.msk.f32.gmra.mxu0 %vm51_vm0, %v10766_v63  ;;  %12274 = vmatmul.mubr.msk.f32.vlgmr.msra.gmra.mxu1 %vm51_vm0, %v16359_v13  ;;  %v10782_v13 = vld [vmem:[%s16336_s5 + $0x68] sm:$0xff] }
 0x507   : >> { %12276 = vmatprep.mubr.msk.f32.mxu1 %vm13400_vm13, %v13399_v52  ;;  %12308 = vmatprep.mubr.msk.f32.mxu0 %vm13400_vm13, %v13399_v52 }
 0x50a   : >> { %12277 = vmatmul.mubr.msk.f32.gmra.mxu1 %vm51_vm0, %v16378_v31  ;;  %12309 = vmatmul.mubr.msk.f32.vlgmr.msra.gmra.mxu0 %vm51_vm0, %v16530_v8  ;;  %v10783_v31 = vld [vmem:[%s16336_s5 + $0x70] sm:$0xff] }
 0x50b   : >> { %12279 = vmatprep.mubr.msk.f32.mxu1 %vm13400_vm13, %v13399_v52  ;;  %12311 = vmatprep.mubr.msk.f32.mxu0 %vm13400_vm13, %v13399_v52 }
 0x50e   : >> { %12280 = vmatmul.mubr.msk.f32.gmra.mxu1 %vm51_vm0, %v16399_v37  ;;  %12312 = vmatmul.mubr.msk.f32.gmra.mxu0 %vm51_vm0, %v16544_v41  ;;  %v10800_v37 = vld [vmem:[%s16336_s5 + $0x69] sm:$0xff]  ;;  %s16876_s5 = scalar_lea.vmem [#allocation5], %s16326_s30 }
 0x50f   : >> { %12282 = vmatprep.mubr.msk.f32.mxu1 %vm13400_vm13, %v13399_v52  ;;  %12314 = vmatprep.mubr.msk.f32.mxu0 %vm13400_vm13, %v13399_v52 }
 0x512   : >> { %12283 = vmatmul.mubr.msk.f32.gmra.mxu1 %vm51_vm0, %v16644_v60  ;;  %12315 = vmatmul.mubr.msk.f32.gmra.mxu0 %vm51_vm0, %v16555_v36 }
 0x513   : >> { %12285 = vmatprep.mubr.msk.f32.mxu1 %vm13400_vm13, %v13399_v52  ;;  %12317 = vmatprep.mubr.msk.f32.mxu0 %vm13400_vm13, %v13399_v52 }
 0x516   : >> { %12286 = vmatmul.mubr.msk.f32.gmra.mxu1 %vm51_vm0, %v16655_v44  ;;  %12318 = vmatmul.mubr.msk.f32.gmra.mxu0 %vm51_vm0, %v10746_v21 }
 0x517   : >> { %12288 = vmatprep.mubr.msk.f32.mxu1 %vm13400_vm13, %v13399_v52  ;;  %12320 = vmatprep.mubr.msk.f32.mxu0 %vm13400_vm13, %v13399_v52 }
 0x51a   : >> { %12289 = vmatmul.mubr.msk.f32.gmra.mxu1 %vm51_vm0, %v16665_v20  ;;  %12321 = vmatmul.mubr.msk.f32.gmra.mxu0 %vm51_vm0, %v10747_v45 }
 0x51b   : >> { %12291 = vmatprep.mubr.msk.f32.mxu1 %vm13400_vm13, %v13399_v52  ;;  %12323 = vmatprep.mubr.msk.f32.mxu0 %vm13400_vm13, %v13399_v52 }
 0x51e   : >> { %12292 = vmatmul.mubr.msk.f32.gmra.mxu1 %vm51_vm0, %v10782_v13  ;;  %12324 = vmatmul.mubr.msk.f32.gmra.mxu0 %vm51_vm0, %v10748_v62 }
 0x51f   : >> { %12294 = vmatprep.mubr.msk.f32.mxu1 %vm13400_vm13, %v13399_v52  ;;  %12326 = vmatprep.mubr.msk.f32.mxu0 %vm13400_vm13, %v13399_v52 }
 0x522   : >> { %12295 = vmatmul.mubr.msk.f32.gmra.mxu1 %vm51_vm0, %v10783_v31  ;;  %12327 = vmatmul.mubr.msk.f32.gmra.mxu0 %vm51_vm0, %v10800_v37 }
 0x523   : >> { %12297 = vmatprep.mubr.msk.f32.mxu1 %vm13400_vm13, %v13399_v52  ;;  %12329 = vmatprep.mubr.msk.f32.mxu0 %vm13400_vm13, %v13399_v52 }
 0x526   : >> { %12298 = vmatmul.mubr.msk.f32.gmra.mxu1 %vm51_vm0, %v10784_v34  ;;  %12330 = vmatmul.mubr.msk.f32.gmra.mxu0 %vm51_vm0, %v10801_v54 }
 0x527   : >> { %12332 = vmatprep.mubr.msk.f32.mxu0 %vm13400_vm13, %v13399_v52 }
 0x52a   : >> { %12333 = vmatmul.mubr.msk.f32.gmra.mxu0 %vm51_vm0, %v10802_v57 }
 0x54a   : >> { %v4376_v5 = vpop.f32.mrf.mxu0  ;;  %v4401_v50 = vpop.f32.mrf.mxu1 }
 0x54c   : >> { %v12030_v51 = vpop.f32.mrf.mxu0  ;;  %v12045_v6 = vpop.f32.mrf.mxu1 }
 0x54e   : >> { %v4381_v9 = vpop.f32.mrf.mxu0  ;;  %v4406_v25 = vpop.f32.mrf.mxu1 }
 0x550   : >> { %v12033_v33 = vpop.f32.mrf.mxu0  ;;  %v12048_v12 = vpop.f32.mrf.mxu1 }
 0x552   : >> { %v4386_v17 = vpop.f32.mrf.mxu0  ;;  %v4411_v2 = vpop.f32.mrf.mxu1 }
 0x554   : >> { %v12036_v55 = vpop.f32.mrf.mxu0  ;;  %v12051_v26 = vpop.f32.mrf.mxu1 }
 0x556   : >> { %v4391_v46 = vpop.f32.mrf.mxu0  ;;  %v4416_v59 = vpop.f32.mrf.mxu1 }
 0x558   : >> { %v12039_v24 = vpop.f32.mrf.mxu0  ;;  %v12054_v10 = vpop.f32.mrf.mxu1 }
 0x55a   : >> { %v4396_v52 = vpop.f32.mrf.mxu0  ;;  %v4513_v8 = vpop.f32.mrf.mxu1 }
 0x55b   : >> { %v4514_v23 = vadd.f32 %v4513_v8, %v4376_v5 }
 0x55c   : >> { %v12042_v41 = vpop.f32.mrf.mxu0  ;;  %v12065_v36 = vpop.f32.mrf.mxu1 }
 0x55e   : >> { %v4518_v38 = vpop.f32.mrf.mxu1  ;;  %v4665_v42 = vpop.f32.mrf.mxu0 }
 0x55f   : >> { %v4519_v58 = vadd.f32 %v4518_v38, %v4381_v9  ;;  %v4709_v40 = vadd.f32 %v4665_v42, %v4514_v23 }
 0x560   : >> { %v12068_v15 = vpop.f32.mrf.mxu1  ;;  %v12100_v32 = vpop.f32.mrf.mxu0 }
 0x562   : >> { %v4523_v7 = vpop.f32.mrf.mxu1  ;;  %v4670_v19 = vpop.f32.mrf.mxu0 }
 0x563   : >> { %v4524_v53 = vadd.f32 %v4523_v7, %v4386_v17  ;;  %v4710_v0 = vadd.f32 %v4670_v19, %v4519_v58 }
 0x564   : >> { %v12071_v60 = vpop.f32.mrf.mxu1  ;;  %v12103_v4 = vpop.f32.mrf.mxu0 }
 0x566   : >> { %v4528_v44 = vpop.f32.mrf.mxu1  ;;  %v4675_v20 = vpop.f32.mrf.mxu0 }
 0x567   : >> { %v4529_v3 = vadd.f32 %v4528_v44, %v4391_v46  ;;  %v4711_v11 = vadd.f32 %v4675_v20, %v4524_v53 }
 0x568   : >> { %v12074_v39 = vpop.f32.mrf.mxu1  ;;  %v12106_v61 = vpop.f32.mrf.mxu0 }
 0x56a   : >> { %v4533_v18 = vpop.f32.mrf.mxu1  ;;  %v4680_v30 = vpop.f32.mrf.mxu0 }
 0x56b   : >> { %v4534_v43 = vadd.f32 %v4533_v18, %v4396_v52  ;;  %v4712_v14 = vadd.f32 %v4680_v30, %v4529_v3 }
 0x56c   : >> { %v12077_v21 = vpop.f32.mrf.mxu1  ;;  %v12109_v45 = vpop.f32.mrf.mxu0 }
 0x56e   : >> { %v4538_v49 = vpop.f32.mrf.mxu1  ;;  %v4685_v62 = vpop.f32.mrf.mxu0 }
 0x56f   : >> { %v4539_v56 = vadd.f32 %v4538_v49, %v4401_v50  ;;  %v4713_v63 = vadd.f32 %v4685_v62, %v4534_v43 }
 0x570   : >> { %v12080_v13 = vpop.f32.mrf.mxu1  ;;  %v12112_v31 = vpop.f32.mrf.mxu0 }
 0x572   : >> { %v4543_v37 = vpop.f32.mrf.mxu1  ;;  %v4690_v34 = vpop.f32.mrf.mxu0 }
 0x573   : >> { %v4544_v54 = vadd.f32 %v4543_v37, %v4406_v25  ;;  %v4714_v57 = vadd.f32 %v4690_v34, %v4539_v56 }
 0x574   : >> { %v12083_v5 = vpop.f32.mrf.mxu1  ;;  %v12115_v51 = vpop.f32.mrf.mxu0 }
 0x576   : >> { %v4548_v6 = vpop.f32.mrf.mxu1  ;;  %v4695_v9 = vpop.f32.mrf.mxu0 }
 0x577   : >> { %v4549_v33 = vadd.f32 %v4548_v6, %v4411_v2  ;;  %v4715_v12 = vadd.f32 %v4695_v9, %v4544_v54 }
 0x578   : >> { %v12086_v17 = vpop.f32.mrf.mxu1  ;;  %v12118_v55 = vpop.f32.mrf.mxu0 }
 0x57a   : >> { %v4553_v26 = vpop.f32.mrf.mxu1  ;;  %v4700_v46 = vpop.f32.mrf.mxu0 }
 0x57b   : >> { %v4554_v24 = vadd.f32 %v4553_v26, %v4416_v59  ;;  %v4716_v10 = vadd.f32 %v4700_v46, %v4549_v33 }
 0x57c   : >> { %v12089_v50 = vpop.f32.mrf.mxu1  ;;  %v12121_v52 = vpop.f32.mrf.mxu0 }
 0x57e   : >> { %v4705_v8 = vpop.f32.mrf.mxu0  ;;  %v4826_v23 = vpop.f32.mrf.mxu1 }
 0x57f   : >> { %v4717_v41 = vadd.f32 %v4705_v8, %v4554_v24  ;;  %v4870_v36 = vadd.f32 %v4826_v23, %v4709_v40 }
 0x580   : >> { %v12124_v25 = vpop.f32.mrf.mxu0  ;;  %v12135_v38 = vpop.f32.mrf.mxu1 }
 0x582   : >> { %v4831_v42 = vpop.f32.mrf.mxu1  ;;  %v4986_v58 = vpop.f32.mrf.mxu0 }
 0x583   : >> { %v4871_v15 = vadd.f32 %v4831_v42, %v4710_v0  ;;  %v16835_v32 = vadd.f32 %v4986_v58, %v4870_v36 }
 0x584   : >> { %v12138_v2 = vpop.f32.mrf.mxu1  ;;  %v12170_v7 = vpop.f32.mrf.mxu0 }
 0x586   : >> { %v4836_v19 = vpop.f32.mrf.mxu1  ;;  %v4991_v53 = vpop.f32.mrf.mxu0 }
 0x587   : >> { %v4872_v60 = vadd.f32 %v4836_v19, %v4711_v11  ;;  %v16837_v59 = vadd.f32 %v4991_v53, %v4871_v15 }
 0x588   : >> { %v12141_v4 = vpop.f32.mrf.mxu1  ;;  %v12173_v44 = vpop.f32.mrf.mxu0 }
 0x58a   : >> { %v4841_v20 = vpop.f32.mrf.mxu1  ;;  %v4996_v3 = vpop.f32.mrf.mxu0 }
 0x58b   : >> { %v4873_v39 = vadd.f32 %v4841_v20, %v4712_v14  ;;  %v16839_v40 = vadd.f32 %v4996_v3, %v4872_v60 }
 0x58c   : >> { %v12144_v61 = vpop.f32.mrf.mxu1  ;;  %v12176_v18 = vpop.f32.mrf.mxu0 }
 0x58e   : >> { %v4846_v30 = vpop.f32.mrf.mxu1  ;;  %v5001_v0 = vpop.f32.mrf.mxu0 }
 0x58f   : >> { %v4874_v43 = vadd.f32 %v4846_v30, %v4713_v63  ;;  %v16841_v21 = vadd.f32 %v5001_v0, %v4873_v39 }
 0x590   : >> { %v12147_v45 = vpop.f32.mrf.mxu1  ;;  %v12179_v49 = vpop.f32.mrf.mxu0 }
 0x592   : >> { %v4851_v62 = vpop.f32.mrf.mxu1  ;;  %v5006_v11 = vpop.f32.mrf.mxu0 }
 0x593   : >> { %v4875_v56 = vadd.f32 %v4851_v62, %v4714_v57  ;;  %v16843_v13 = vadd.f32 %v5006_v11, %v4874_v43 }
 0x594   : >> { %v12150_v31 = vpop.f32.mrf.mxu1  ;;  %v12182_v37 = vpop.f32.mrf.mxu0 }
 0x596   : >> { %v4856_v34 = vpop.f32.mrf.mxu1  ;;  %v5011_v14 = vpop.f32.mrf.mxu0 }
 0x597   : >> { %v4876_v54 = vadd.f32 %v4856_v34, %v4715_v12  ;;  %v16845_v5 = vadd.f32 %v5011_v14, %v4875_v56 }
 0x598   : >> { %v12153_v51 = vpop.f32.mrf.mxu1  ;;  %v12185_v6 = vpop.f32.mrf.mxu0 }
 0x59a   : >> { %v4861_v9 = vpop.f32.mrf.mxu1  ;;  %v5016_v63 = vpop.f32.mrf.mxu0 }
 0x59b   : >> { %v4877_v33 = vadd.f32 %v4861_v9, %v4716_v10  ;;  %v16847_v17 = vadd.f32 %v5016_v63, %v4876_v54 }
 0x59c   : >> { %v12156_v55 = vpop.f32.mrf.mxu1  ;;  %v12188_v26 = vpop.f32.mrf.mxu0 }
 0x59e   : >> { %v4866_v46 = vpop.f32.mrf.mxu1  ;;  %v5021_v57 = vpop.f32.mrf.mxu0 }
 0x59f   : >> { %v4878_v24 = vadd.f32 %v4866_v46, %v4717_v41  ;;  %v16849_v50 = vadd.f32 %v5021_v57, %v4877_v33 }
 0x5a0   : >> { %v12159_v52 = vpop.f32.mrf.mxu1  ;;  %v12191_v8 = vpop.f32.mrf.mxu0 }
 0x5a2   : >> { %v5026_v23 = vpop.f32.mrf.mxu0  ;;  %v5147_v12 = vpop.f32.mrf.mxu1 }
 0x5a3   : >> { %v16851_v36 = vadd.f32 %v5026_v23, %v4878_v24  ;;  %v5191_v9 = vadd.f32 %v5147_v12, %v16835_v32 }
 0x5a4   : >> { %v12194_v25 = vpop.f32.mrf.mxu0  ;;  %v12205_v38 = vpop.f32.mrf.mxu1 }
 0x5a6   : >> { %v5152_v42 = vpop.f32.mrf.mxu1  ;;  %v5308_v58 = vpop.f32.mrf.mxu0 }
 0x5a7   : >> { %v5352_v55 = vadd.f32 %v5308_v58, %v5191_v9  ;;  %v5192_v57 = vadd.f32 %v5152_v42, %v16837_v59 }
 0x5a8   : >> { %v12208_v10 = vpop.f32.mrf.mxu1  ;;  %v12240_v15 = vpop.f32.mrf.mxu0 }
 0x5aa   : >> { %v5157_v2 = vpop.f32.mrf.mxu1  ;;  %v5313_v7 = vpop.f32.mrf.mxu0 }
 0x5ab   : >> { %v5353_v23 = vadd.f32 %v5313_v7, %v5192_v57  ;;  %v5193_v15 = vadd.f32 %v5157_v2, %v16839_v40 }
 0x5ac   : >> { %v12211_v19 = vpop.f32.mrf.mxu1  ;;  %v12243_v53 = vpop.f32.mrf.mxu0 }
 0x5ae   : >> { %v5162_v60 = vpop.f32.mrf.mxu1  ;;  %v5318_v41 = vpop.f32.mrf.mxu0 }
 0x5af   : >> { %v5354_v42 = vadd.f32 %v5318_v41, %v5193_v15  ;;  %v5194_v7 = vadd.f32 %v5162_v60, %v16841_v21 }
 0x5b0   : >> { %v12214_v4 = vpop.f32.mrf.mxu1  ;;  %v12246_v44 = vpop.f32.mrf.mxu0 }
 0x5b2   : >> { %v5167_v20 = vpop.f32.mrf.mxu1  ;;  %v5323_v3 = vpop.f32.mrf.mxu0 }
 0x5b4   : >> { %v12217_v39 = vpop.f32.mrf.mxu1  ;;  %v12249_v61 = vpop.f32.mrf.mxu0 }
 0x5b6   : >> { %v16853_v18 = vpop.f32.mrf.mxu1  ;;  %v16855_v30 = vpop.f32.mrf.mxu0 }
 0x5b8   : >> { %v12220_v0 = vpop.f32.mrf.mxu1  ;;  %v12252_v43 = vpop.f32.mrf.mxu0 }
 0x5ba   : >> { %v16857_v45 = vpop.f32.mrf.mxu1  ;;  %v16859_v49 = vpop.f32.mrf.mxu0 }
 0x5bc   : >> { %v12223_v62 = vpop.f32.mrf.mxu1  ;;  %v12255_v11 = vpop.f32.mrf.mxu0 }
 0x5bd   : >> { %v5355_v11 = vadd.f32 %v5323_v3, %v5194_v7 }
 0x5be   : >> { %v16861_v56 = vpop.f32.mrf.mxu1  ;;  %v16863_v31 = vpop.f32.mrf.mxu0 }
 0x5c0   : >> { %v12226_v37 = vpop.f32.mrf.mxu1  ;;  %v12258_v34 = vpop.f32.mrf.mxu0 }
 0x5c2   : >> { %v16865_v14 = vpop.f32.mrf.mxu1  ;;  %v16867_v54 = vpop.f32.mrf.mxu0 }
 0x5c4   : >> { %v12229_v51 = vpop.f32.mrf.mxu1  ;;  %v12261_v6 = vpop.f32.mrf.mxu0 }
 0x5c5   : >> { %v5195_v6 = vadd.f32 %v5167_v20, %v16843_v13  ;;  %v5196_v13 = vadd.f32 %v16853_v18, %v16845_v5  ;;  %v5197_v5 = vadd.f32 %v16857_v45, %v16847_v17 }
 0x5c6   : >> { %v16870_v63 = vpop.f32.mrf.mxu0  ;;  %v5469_v33 = vpop.f32.mrf.mxu1 }
 0x5c7   : >> { %v5513_v24 = vadd.f32 %v5469_v33, %v5352_v55  ;;  %v5356_v3 = vadd.f32 %v16855_v30, %v5195_v6 }
 0x5c8   : >> { %v12264_v26 = vpop.f32.mrf.mxu0  ;;  %v12275_v46 = vpop.f32.mrf.mxu1 }
 0x5ca   : >> { %v5474_v52 = vpop.f32.mrf.mxu1  ;;  %v5630_v8 = vpop.f32.mrf.mxu0 }
 0x5cb   : >> { %v5674_v25 = vadd.f32 %v5630_v8, %v5513_v24  ;;  %v5514_v19 = vadd.f32 %v5474_v52, %v5353_v23 }
 0x5cc   : >> { %v12278_v38 = vpop.f32.mrf.mxu1  ;;  %v12310_v10 = vpop.f32.mrf.mxu0 }
 0x5cd   : >> { %v5683_v32 = vmul.f32 %v5674_v25, %v15371_v27  ;;  %10812 = vst.msk [vmem:[%s16876_s5 + $0x18] sm:$0xff] %vm51_vm0, %v5674_v25 }
 0x5ce   : >> { %v5479_v12 = vpop.f32.mrf.mxu1  ;;  %v5635_v59 = vpop.f32.mrf.mxu0 }
 0x5cf   : >> { %v5716_v58 = vmul.f32 %v5683_v32, %v5674_v25  ;;  %v5675_v53 = vadd.f32 %v5635_v59, %v5514_v19  ;;  %v5515_v39 = vadd.f32 %v5479_v12, %v5354_v42  ;;  %v5692_v40 = vsel %vm51_vm0, %v5683_v32, 0.0 }
 0x5d0   : >> { %v12281_v4 = vpop.f32.mrf.mxu1  ;;  %v12313_v44 = vpop.f32.mrf.mxu0  ;;  %v5357_v19 = vadd.f32 %v16859_v49, %v5196_v13 }
 0x5d1   : >> { %v5693_v2 = vsel %vm51_vm0, %v5675_v53, 0.0  ;;  %v5717_v61 = vmul.f32 %v5675_v53, %v5675_v53  ;;  %10813 = vst.msk [vmem:[%s16876_s5 + $0x20] sm:$0xff] %vm51_vm0, %v5675_v53  ;;  %v5725_v41 = vsel %vm51_vm0, %v5716_v58, 0.0 }
 0x5d2   : >> { %v5694_v0 = vadd.f32 %v5693_v2, %v5692_v40  ;;  %v5484_v43 = vpop.f32.mrf.mxu1  ;;  %v5640_v62 = vpop.f32.mrf.mxu0 }
 0x5d3   : >> { %v5726_v37 = vsel %vm51_vm0, %v5717_v61, 0.0  ;;  %v5676_v21 = vadd.f32 %v5640_v62, %v5515_v39  ;;  %v5516_v9 = vadd.f32 %v5484_v43, %v5355_v11  ;;  %v5358_v61 = vadd.f32 %v16863_v31, %v5197_v5 }
 0x5d4   : >> { %v5727_v60 = vadd.f32 %v5726_v37, %v5725_v41  ;;  %v12284_v34 = vpop.f32.mrf.mxu1  ;;  %v12316_v51 = vpop.f32.mrf.mxu0  ;;  %v5198_v11 = vadd.f32 %v16861_v56, %v16849_v50  ;;  %v5199_v50 = vadd.f32 %v16865_v14, %v16851_v36 }
 0x5d5   : >> { %v5685_v33 = vmul.f32 %v5676_v21, %v16274_v16  ;;  %10814 = vst.msk [vmem:[%s16876_s5 + $0x28] sm:$0xff] %vm51_vm0, %v5676_v21 }
 0x5d6   : >> { %v5489_v55 = vpop.f32.mrf.mxu1  ;;  %v5645_v26 = vpop.f32.mrf.mxu0  ;;  %v5359_v34 = vadd.f32 %v16867_v54, %v5198_v11 }
 0x5d7   : >> { %v5695_v46 = vsel %vm51_vm0, %v5685_v33, 0.0  ;;  %v5718_v57 = vmul.f32 %v5685_v33, %v5676_v21  ;;  %v5677_v24 = vadd.f32 %v5645_v26, %v5516_v9  ;;  %v5517_v25 = vadd.f32 %v5489_v55, %v5356_v3 }
 0x5d8   : >> { %v5696_v52 = vadd.f32 %v5695_v46, %v5694_v0  ;;  %v12287_v8 = vpop.f32.mrf.mxu1  ;;  %v12319_v23 = vpop.f32.mrf.mxu0 }
 0x5d9   : >> { %v5728_v20 = vsel %vm51_vm0, %v5718_v57, 0.0  ;;  %v5686_v38 = vmul.f32 %v5677_v24, %v16277_v48  ;;  %10815 = vst.msk [vmem:[%s16876_s5 + $0x30] sm:$0xff] %vm51_vm0, %v5677_v24 }
 0x5da   : >> { %v5729_v10 = vadd.f32 %v5728_v20, %v5727_v60  ;;  %v5494_v30 = vpop.f32.mrf.mxu1  ;;  %v5650_v15 = vpop.f32.mrf.mxu0 }
 0x5db   : >> { %v5697_v32 = vsel %vm51_vm0, %v5686_v38, 0.0  ;;  %v5719_v12 = vmul.f32 %v5686_v38, %v5677_v24  ;;  %v5678_v59 = vadd.f32 %v5650_v15, %v5517_v25  ;;  %v5518_v7 = vadd.f32 %v5494_v30, %v5357_v19 }
 0x5dc   : >> { %v5698_v18 = vadd.f32 %v5697_v32, %v5696_v52  ;;  %v12290_v42 = vpop.f32.mrf.mxu1  ;;  %v12322_v58 = vpop.f32.mrf.mxu0  ;;  %v5360_v24 = vadd.f32 %v16870_v63, %v5199_v50 }
 0x5dd   : >> { %v5730_v53 = vsel %vm51_vm0, %v5719_v12, 0.0  ;;  %v5699_v4 = vsel %vm51_vm0, %v5678_v59, 0.0  ;;  %v5720_v44 = vmul.f32 %v5678_v59, %v5678_v59  ;;  %10816 = vst.msk [vmem:[%s16876_s5 + $0x38] sm:$0xff] %vm51_vm0, %v5678_v59 }
 0x5de   : >> { %v5731_v49 = vadd.f32 %v5730_v53, %v5729_v10  ;;  %v5700_v39 = vadd.f32 %v5699_v4, %v5698_v18  ;;  %v5499_v40 = vpop.f32.mrf.mxu1  ;;  %v5655_v2 = vpop.f32.mrf.mxu0 }
 0x5df   : >> { %v5732_v17 = vsel %vm51_vm0, %v5720_v44, 0.0  ;;  %v5679_v45 = vadd.f32 %v5655_v2, %v5518_v7  ;;  %v5519_v41 = vadd.f32 %v5499_v40, %v5358_v61 }
 0x5e0   : >> { %v5733_v0 = vadd.f32 %v5732_v17, %v5731_v49  ;;  %v12293_v43 = vpop.f32.mrf.mxu1  ;;  %v12325_v62 = vpop.f32.mrf.mxu0 }
 0x5e1   : >> { %v5688_v37 = vmul.f32 %v5679_v45, %v16280_v47  ;;  %10817 = vst.msk [vmem:[%s16876_s5 + $0x40] sm:$0xff] %vm51_vm0, %v5679_v45 }
 0x5e2   : >> { %v5504_v21 = vpop.f32.mrf.mxu1  ;;  %v5660_v60 = vpop.f32.mrf.mxu0 }
 0x5e3   : >> { %v5701_v31 = vsel %vm51_vm0, %v5688_v37, 0.0  ;;  %v5721_v51 = vmul.f32 %v5688_v37, %v5679_v45  ;;  %v5680_v6 = vadd.f32 %v5660_v60, %v5519_v41  ;;  %v5520_v26 = vadd.f32 %v5504_v21, %v5359_v34 }
 0x5e4   : >> { %v5702_v9 = vadd.f32 %v5701_v31, %v5700_v39  ;;  %v12296_v33 = vpop.f32.mrf.mxu1  ;;  %v12328_v55 = vpop.f32.mrf.mxu0 }
 0x5e5   : >> { %v5734_v56 = vsel %vm51_vm0, %v5721_v51, 0.0  ;;  %v5689_v3 = vmul.f32 %v5680_v6, %v15377_v29  ;;  %10818 = vst.msk [vmem:[%s16876_s5 + $0x48] sm:$0xff] %vm51_vm0, %v5680_v6 }
 0x5e6   : >> { %v5735_v46 = vadd.f32 %v5734_v56, %v5733_v0  ;;  %v5509_v54 = vpop.f32.mrf.mxu1  ;;  %v5665_v57 = vpop.f32.mrf.mxu0 }
 0x5e7   : >> { %v5703_v52 = vsel %vm51_vm0, %v5689_v3, 0.0  ;;  %v5722_v8 = vmul.f32 %v5689_v3, %v5680_v6  ;;  %v5681_v23 = vadd.f32 %v5665_v57, %v5520_v26  ;;  %v5521_v25 = vadd.f32 %v5509_v54, %v5360_v24 }
 0x5e8   : >> { %v5704_v13 = vadd.f32 %v5703_v52, %v5702_v9  ;;  %v12331_v36 = vpop.f32.mrf.mxu0  ;;  %v12299_v14 = vpop.f32.mrf.mxu1 }
 0x5e9   : >> { %v5736_v20 = vsel %vm51_vm0, %v5722_v8, 0.0  ;;  %v5705_v38 = vsel %vm51_vm0, %v5681_v23, 0.0  ;;  %v5723_v10 = vmul.f32 %v5681_v23, %v5681_v23  ;;  %10819 = vst.msk [vmem:[%s16876_s5 + $0x50] sm:$0xff] %vm51_vm0, %v5681_v23 }
 0x5ea   : >> { %v5737_v30 = vadd.f32 %v5736_v20, %v5735_v46  ;;  %v5706_v15 = vadd.f32 %v5705_v38, %v5704_v13  ;;  %v5670_v19 = vpop.f32.mrf.mxu0 }
 0x5eb   : >> { %v5738_v63 = vsel %vm51_vm0, %v5723_v10, 0.0  ;;  %v5682_v32 = vadd.f32 %v5670_v19, %v5521_v25 }
 0x5ec   : >> { %v5739_v12 = vadd.f32 %v5738_v63, %v5737_v30  ;;  %v12334_v59 = vpop.f32.mrf.mxu0 }
 0x5ed   : >> { %v5691_v5 = vmul.f32 %v5682_v32, %v16283_v22  ;;  %10820 = vst.msk [vmem:[%s16876_s5 + $0x58] sm:$0xff] %vm51_vm0, %v5682_v32 }
 0x5ef   : >> { %v5707_v18 = vsel %vm51_vm0, %v5691_v5, 0.0  ;;  %v5724_v42 = vmul.f32 %v5691_v5, %v5682_v32 }
 0x5f0   : >> { %v5708_v58 = vadd.f32 %v5707_v18, %v5706_v15 }
 0x5f1   : >> { %v5740_v53 = vsel %vm51_vm0, %v5724_v42, 0.0 }
 0x5f2   : >> { %v5709_v7 = vrot.slane %v5708_v58, 4  ;;  %v5741_v4 = vadd.f32 %v5740_v53, %v5739_v12 }
 0x5f4   : >> { %v5710_v44 = vadd.f32 %v5709_v7, %v5708_v58  ;;  %v5742_v49 = vrot.slane %v5741_v4, 4 }
 0x5f6   : >> { %v5711_v39 = vrot.slane %v5710_v44, 2  ;;  %v5743_v40 = vadd.f32 %v5742_v49, %v5741_v4 }
 0x5f8   : >> { %v5712_v2 = vadd.f32 %v5711_v39, %v5710_v44  ;;  %v5744_v61 = vrot.slane %v5743_v40, 2 }
 0x5fa   : >> { %v5713_v17 = vrot.slane %v5712_v2, 1  ;;  %v5745_v45 = vadd.f32 %v5744_v61, %v5743_v40 }
 0x5fc   : >> { %v5714_v0 = vadd.f32 %v5713_v17, %v5712_v2  ;;  %v5746_v43 = vrot.slane %v5745_v45, 1 }
 0x5fe   : >> { %v5715_v62 = vadd.f32 %v13351_v35, %v5714_v0   ;;  %v5747_v11 = vadd.f32 %v5746_v43, %v5745_v45  ;;  %4244 = sbr.rel (!%p4242_p8) target bundleno = 1152 (0x480), region = 388 }
 0x600   : >> { %v5748_v41 = vadd.f32 %v13347_v1, %v5747_v11   ;;  %v18148_v35 = vmov %v5715_v62 }
 0x601   : > { %v18150_v35 = vmov (%p4242_p8), %v5715_v62 }
 0x602   : >> { %v18147_v1 = vmov %v5748_v41 }
 0x603   : > { %v18149_v1 = vmov %v5748_v41  ;;  %4236 = sbr.rel (!%p4234_p9) target bundleno = 1151 (0x47f), region = 399  ;;  %v5760_v35 = vmul.f32 (%p4234_p9), 0.0011337869, %v5715_v62  ;;  %v5761_v37 = vmul.f32 (%p4234_p9), 0.0011337869, %v5748_v41  ;;  %s16965_s7 = smov (%p4234_p9), 0  }
 0x604   :  { %v5764_v31 = vld [vmem:[%s18076_s8] sm:$0x1] (%p4234_p9) }
 0x605   :  { %v5762_v21 = vmul.f32 (%p4234_p9), %v5760_v35, %v5760_v35  ;;  %v16958_v9 = vld [vmem:[%s18077_s9] sm:$0x1] (%p4234_p9) }
 0x607   :  { %v5763_v60 = vsub.f32 (%p4234_p9), %v5761_v37, %v5762_v21 }
 0x609   :  { %v5765_v34 = vadd.f32 1e-05, %v5763_v60 }
 0x60b   :  { %13115 = vrsqrt.f32 %v5765_v34 }
 0x618   :  { %v13116_v51 = vpop.eup %13115 }
 0x619   :  { %v16953_v6 = vmul.f32 %v13116_v51, %v5764_v31 }
 0x61b   :  { %v16961_v33 = vmul.f32 %v16953_v6, %v5760_v35 }
 0x61d   :  { %v5770_v16 = vsub.f32 %v16958_v9, %v16961_v33 }
 0x61e LB: > { %s16970_s8 = smov 0   ;;  %s13359_s7 = sphi %s16965_s7, %s5776_s7  }
 0x61f LB: >> { %s9942_s9 = smul.u32 552, %s13359_s7  ;;  %v18151_v48 = vld [vmem:[#allocation10_spill] sm:$0xff]  ;;  %s10837_s28 = sshll.u32 %s13363_s8, 4  ;;  %s13363_s8 = sphi %s16970_s8, %s5782_s8  }
 0x620   : >> { %s10822_s0 = smul.u32 48, %s13363_s8  ;;  %v5812_v47 = vrot.slane %v16953_v6, %v18151_v48  ;;  %v5820_v22 = vrot.slane %v5770_v16, %v18151_v48  ;;  %s5782_s8 = sadd.s32 1, %s13363_s8  }
 0x621   : >> { %s9970_s23 = smul.u32 192, %s13359_s7  ;;  %p5779_p10 = scmp.ge.s32.totalorder %s5782_s8, 10  }
 0x622   : >> { %s9945_s27 = sadd.s32 %s10822_s0, %s9942_s9  ;;  %s5776_s7 = sadd.s32 (%p5779_p10), 1, %s13359_s7  }
 0x623   : >> { %s9946_s24 = scalar_lea.vmem [#allocation5], %s9945_s27  ;;  %s9972_s16 = sadd.s32 %s10837_s28, %s9970_s23 }
 0x624   : >> { %v10823_v1 = vld [vmem:[%s9946_s24 + $0x19] ss:$2 sm:$0xff]  ;;  %v10827_v55 = vld [vmem:[%s9946_s24 + $0x1a] ss:$2 sm:$0xff]  ;;  %s9973_s4 = scalar_lea.vmem [#allocation4], %s9972_s16  ;;  %p5773_p11 = scmp.ge.s32.totalorder (%p5779_p10), %s5776_s7, 2  }
 0x625   : >> { %v10831_v50 = vld [vmem:[%s9946_s24 + $0x31] ss:$2 sm:$0xff]  ;;  %v10835_v56 = vld [vmem:[%s9946_s24 + $0x32] ss:$2 sm:$0xff]  ;;  %v5814_v26 = vmul.f32 %v10823_v1, %v5812_v47  ;;  %v5826_v3 = vmul.f32 %v10827_v55, %v5812_v47 }
 0x626   : >> { %v5832_v46 = vmul.f32 %v10831_v50, %v5812_v47  ;;  %v10824_v54 = vld [vmem:[%s9946_s24 + $0x29] ss:$2 sm:$0x3]  ;;  %v5838_v57 = vmul.f32 %v10835_v56, %v5812_v47  ;;  %v10828_v24 = vld [vmem:[%s9946_s24 + $0x2a] ss:$2 sm:$0x3] }
 0x627   : >> { %v10832_v52 = vld [vmem:[%s9946_s24 + $0x41] ss:$2 sm:$0x3]  ;;  %v5815_v8 = vmul.f32 %v10824_v54, %v5812_v47  ;;  %v5822_v23 = vadd.f32 %v5820_v22, %v5814_v26  ;;  %v5828_v13 = vadd.f32 %v5826_v3, %v5820_v22  ;;  %v10836_v14 = vld [vmem:[%s9946_s24 + $0x42] ss:$2 sm:$0x3]  ;;  %v5827_v20 = vmul.f32 %v10828_v24, %v5812_v47 }
 0x628   : >> { %v5834_v36 = vadd.f32 %v5832_v46, %v5820_v22  ;;  %v5840_v25 = vadd.f32 %v5838_v57, %v5820_v22  ;;  %v5833_v10 = vmul.f32 %v10832_v52, %v5812_v47  ;;  %v5839_v30 = vmul.f32 %v10836_v14, %v5812_v47 }
 0x629   : >> { %v5823_v38 = vadd.f32 %v5820_v22, %v5815_v8  ;;  %v5824_v15 = vmax.f32 %v5822_v23, 0.0  ;;  %v5830_v19 = vmax.f32 %v5828_v13, 0.0  ;;  %v5829_v32 = vadd.f32 %v5827_v20, %v5820_v22 }
 0x62a   : >> { %v5836_v63 = vmax.f32 %v5834_v36, 0.0  ;;  %v5842_v12 = vmax.f32 %v5840_v25, 0.0  ;;  %v5835_v5 = vadd.f32 %v5833_v10, %v5820_v22  ;;  %v5841_v18 = vadd.f32 %v5839_v30, %v5820_v22 }
 0x62b   : >> { %v5825_v59 = vmax.f32 %v5823_v38, 0.0  ;;  %v5844_v42 = vmax.f32 %v5824_v15, %v5830_v19  ;;  %v5831_v58 = vmax.f32 %v5829_v32, 0.0 }
 0x62c   : >> { %v5846_v53 = vmax.f32 %v5836_v63, %v5842_v12  ;;  %v5837_v7 = vmax.f32 %v5835_v5, 0.0  ;;  %v5843_v4 = vmax.f32 %v5841_v18, 0.0 }
 0x62d   : >> { %v5845_v44 = vmax.f32 %v5825_v59, %v5831_v58 }
 0x62e   : >> { %v5848_v49 = vmax.f32 %v5844_v42, %v5846_v53  ;;  %v5847_v39 = vmax.f32 %v5837_v7, %v5843_v4  ;;  %5781 = sbr.rel (!%p5779_p10) target bundleno = 1567 (0x61f), region = 410 }
 0x630   : >> { %10838 = vst.msk [vmem:[%s9973_s4 + $0x19] sm:$0xff] %vm51_vm0, %v5848_v49  ;;  %v5849_v40 = vmax.f32 %v5845_v44, %v5847_v39 }
 0x632   : >> { %10839 = vst.msk [vmem:[%s9973_s4 + $0x21] sm:$0x3] %vm1399_vm1, %v5849_v40 }
 0x633   :  { %5775 = sbr.rel (!%p5773_p11) target bundleno = 1566 (0x61e), region = 421  ;;  %v18152_v2 = vld [vmem:[#allocation11_spill] sm:$0xff] (%p5773_p11)  ;;  %v18153_v61 = vld [vmem:[#allocation12_spill] sm:$0xff] (%p5773_p11)  ;;  %v18154_v17 = vld [vmem:[#allocation13_spill] sm:$0xff] (%p5773_p11)  ;;  %v18159_v11 = vmov (%p5773_p11), 1.0   ;;  %v17021_v51 = vmov (%p5773_p11), 0.0  }
 0x634   :  { %vm5860_vm14 = vcmp.eq.s32.totalorder (%p5773_p11), %v18152_v2, 11  ;;  %vm5881_vm15 = vcmp.eq.s32.totalorder (%p5773_p11), %v18153_v61, 16  ;;  %vm5902_vm2 = vcmp.eq.s32.totalorder (%p5773_p11), %v18154_v17, 27  ;;  %v18155_v45 = vld [vmem:[#allocation14_spill] sm:$0xff] (%p5773_p11)  ;;  %v18156_v0 = vld [vmem:[#allocation16_spill] sm:$0xff] (%p5773_p11)  ;;  %v18157_v43 = vld [vmem:[#allocation17_spill] sm:$0xff] (%p5773_p11) }
 0x635   :  { %vm5923_vm3 = vcmp.eq.s32.totalorder (%p5773_p11), %v18155_v45, 32  ;;  %vm5966_vm4 = vcmp.eq.s32.totalorder (%p5773_p11), %v18156_v0, 59  ;;  %vm5987_vm5 = vcmp.eq.s32.totalorder (%p5773_p11), %v18157_v43, 64  ;;  %v18158_v62 = vld [vmem:[#allocation18_spill] sm:$0xff] (%p5773_p11)  ;;  %v17001_v41 = vsel (%p5773_p11), %vm5860_vm14, 0.0, %v18159_v11  ;;  %s17025_s6 = smov (%p5773_p11), 0  }
 0x636   :  { %vm6008_vm6 = vcmp.eq.s32.totalorder (%p5773_p11), %v18158_v62, 75  ;;  %18160 = vst [vmem:[#allocation22_spill] sm:$0xff] (%p5773_p11), %v17001_v41  ;;  %v17004_v35 = vsel (%p5773_p11), %vm5881_vm15, 0.0, %v18159_v11  ;;  %v17007_v37 = vsel (%p5773_p11), %vm5902_vm2, 0.0, %v18159_v11  ;;  %v17010_v21 = vsel (%p5773_p11), %vm5923_vm3, 0.0, %v18159_v11 }
 0x637   :  { %18161 = vst [vmem:[#allocation23_spill] sm:$0xff] (%p5773_p11), %v17004_v35  ;;  %18162 = vst [vmem:[#allocation24_spill] sm:$0xff] (%p5773_p11), %v17007_v37  ;;  %v17013_v60 = vsel (%p5773_p11), %vm5966_vm4, 0.0, %v18159_v11  ;;  %v17016_v34 = vsel (%p5773_p11), %vm5987_vm5, 0.0, %v18159_v11  ;;  %v17019_v31 = vsel (%p5773_p11), %vm6008_vm6, 0.0, %v18159_v11  ;;  %v17023_v6 = vmov (%p5773_p11), 0.0  }
 0x638   :  { %18163 = vst [vmem:[#allocation15_spill] sm:$0xff] %v17010_v21  ;;  %18164 = vst [vmem:[#allocation11_spill] sm:$0xff] %v17013_v60 }
 0x639   :  { %18165 = vst [vmem:[#allocation12_spill] sm:$0xff] %v17016_v34  ;;  %18166 = vst [vmem:[#allocation13_spill] sm:$0xff] %v17019_v31 }
 0x63a LB: > { %s17036_s29 = smov 0   ;;  %s13375_s6 = sphi %s17025_s6, %s6034_s6   ;;  %v13371_v6 = vphi %v17023_v6, %v18196_v6   ;;  %v13367_v51 = vphi %v17021_v51, %v18195_v51  }
 0x63b LB: >> { %18167 = vst [vmem:[#allocation34_spill] sm:$0xff] %v13379_v51  ;;  %18168 = vst [vmem:[#allocation35_spill] sm:$0xff] %v13383_v6  ;;  %v6081_v9 = vld [vmem:[%s18078_s10 + $0x38] sm:$0xff]  ;;  %v6080_v33 = vld [vmem:[%s18078_s10 + $0x30] sm:$0xff]  ;;  %s9975_s21 = smul.u32 192, %s13375_s6  ;;  %s13387_s29 = sphi %s17036_s29, %s6042_s29   ;;  %v13383_v6 = vphi %v13371_v6, %v18194_v6   ;;  %v13379_v51 = vphi %v13367_v51, %v18193_v51  }
 0x63c   : >> { %12841 = vmatprep.subr.mxu1 %v6081_v9  ;;  %12335 = vmatprep.subr.mxu0 %v6081_v9  ;;  %v6079_v16 = vld [vmem:[%s18078_s10 + $0x28] sm:$0xff]  ;;  %s9976_s25 = smul.u32 80, %s13387_s29  ;;  %v6078_v48 = vld [vmem:[%s18078_s10 + $0x20] sm:$0xff]  ;;  %v6065_v1 = vld [vmem:[%s18078_s10 + $0x18] sm:$0xff]  ;;  %s6042_s29 = sadd.s32 1, %s13387_s29  }
 0x63d   : >> { %12845 = vmatpush3.msra.mxu1 %v6081_v9  ;;  %12336 = vmatpush3.msra.mxu0 %v6081_v9  ;;  %v6064_v50 = vld [vmem:[%s18078_s10 + $0x10] sm:$0xff]  ;;  %v6387_v46 = vld [vmem:[%s18078_s10 + $0x58] sm:$0xff]  ;;  %v6063_v54 = vld [vmem:[%s18078_s10 + $0x8] sm:$0xff]  ;;  %p6039_p12 = scmp.ge.s32.totalorder %s6042_s29, 2  }
 0x63e   : >> { %12842 = vmatprep.subr.mxu1 %v6080_v33  ;;  %12337 = vmatprep.subr.mxu0 %v6080_v33  ;;  %s17061_s26 = sadd.s32 %s9976_s25, %s9975_s21  ;;  %v6386_v24 = vld [vmem:[%s18078_s10 + $0x50] sm:$0xff]  ;;  %v6062_v23 = vld [vmem:[%s18078_s10] sm:$0xff]  ;;  %v6385_v36 = vld [vmem:[%s18078_s10 + $0x48] sm:$0xff]  ;;  %s6034_s6 = sadd.s32 (%p6039_p12), 1, %s13375_s6  }
 0x63f   : >> { %12846 = vmatpush3.msra.mxu1 %v6080_v33  ;;  %12338 = vmatpush3.msra.mxu0 %v6080_v33  ;;  %s17064_s2 = scalar_lea.vmem [#allocation4], %s17061_s26  ;;  %v6384_v20 = vld [vmem:[%s18078_s10 + $0x40] sm:$0xff]  ;;  %v6558_v10 = vld [vmem:[%s18078_s10 + $0x78] sm:$0xff]  ;;  %v6557_v12 = vld [vmem:[%s18078_s10 + $0x70] sm:$0xff]  ;;  %p6031_p13 = scmp.ge.s32.totalorder (%p6039_p12), %s6034_s6, 2  }
 0x640   : >> { %12843 = vmatprep.subr.mxu1 %v6079_v16  ;;  %12339 = vmatprep.subr.mxu0 %v6079_v16  ;;  %v17067_v47 = vld [vmem:[%s17064_s2 + $0x28] sm:$0xff]  ;;  %v17070_v22 = vld [vmem:[%s17064_s2 + $0x30] sm:$0xff]  ;;  %v17078_v55 = vld [vmem:[%s17064_s2 + $0x38] sm:$0xff] }
 0x641   : >> { %12847 = vmatpush3.msra.mxu1 %v6079_v16  ;;  %12340 = vmatpush3.msra.mxu0 %v6079_v16  ;;  %v10850_v56 = vld [vmem:[%s17064_s2 + $0x8] sm:$0xff]  ;;  %v17089_v26 = vld [vmem:[%s17064_s2 + $0x40] sm:$0xff]  ;;  %v10851_v3 = vld [vmem:[%s17064_s2 + $0x10] sm:$0xff] }
 0x642   : >> { %12844 = vmatprep.subr.mxu1 %v6078_v48  ;;  %12349 = vmatprep.mubr.msk.f32.mxu1 %vm51_vm0, %v17067_v47  ;;  %v17100_v57 = vld [vmem:[%s17064_s2 + $0x48] sm:$0xff]  ;;  %v17109_v52 = vld [vmem:[%s17064_s2 + $0x18] sm:$0xff]  ;;  %v17112_v8 = vld [vmem:[%s17064_s2 + $0x50] sm:$0xff] }
 0x643   : >> { %12848 = vmatpush3.msra.mxu1 %v6078_v48  ;;  %12341 = vmatprep.subr.mxu0 %v6078_v48  ;;  %v17120_v13 = vld [vmem:[%s17064_s2 + $0x20] sm:$0xff]  ;;  %v10841_v25 = vld [vmem:[%s17064_s2 + $0xf] sm:$0xff]  ;;  %v6728_v15 = vld [vmem:[%s18078_s10 + $0x98] sm:$0xff] }
 0x644   : >> { %12350 = vmatmul.mubr.msk.f32.vlgmr.msra.gmra.mxu1 %vm51_vm0, %v17070_v22  ;;  %12358 = vmatprep.subr.mxu1 %v6065_v1  ;;  %v10840_v14 = vld [vmem:[%s17064_s2 + $0x7] sm:$0xff]  ;;  %v10881_v30 = vld [vmem:[%s17064_s2 + $0x11] sm:$0xff]  ;;  %v10843_v63 = vld [vmem:[%s17064_s2 + $0x1f] sm:$0xff] }
 0x645   : >> { %12359 = vmatpush3.msra.mxu1 %v6065_v1  ;;  %12352 = vmatprep.mubr.msk.f32.mxu1 %vm51_vm0, %v17078_v55  ;;  %v10880_v38 = vld [vmem:[%s17064_s2 + $0x9] sm:$0xff]  ;;  %v10842_v19 = vld [vmem:[%s17064_s2 + $0x17] sm:$0xff]  ;;  %v17158_v59 = vld [vmem:[%s17064_s2 + $0x21] sm:$0xff] }
 0x646   : >> { %12360 = vmatprep.subr.mxu1 %v6064_v50  ;;  %12342 = vmatpush3.msra.mxu0 %v6078_v48  ;;  %v17151_v32 = vld [vmem:[%s17064_s2 + $0x19] sm:$0xff]  ;;  %v17162_v5 = vld [vmem:[%s17064_s2 + $0x27] sm:$0xff]  ;;  %v6727_v18 = vld [vmem:[%s18078_s10 + $0x90] sm:$0xff] }
 0x647   : >> { %12343 = vmatprep.mubr.msk.f32.mxu0 %vm51_vm0, %v10850_v56  ;;  %12361 = vmatpush3.msra.mxu1 %v6064_v50  ;;  %v17170_v42 = vld [vmem:[%s17064_s2 + $0x2f] sm:$0xff]  ;;  %v17186_v4 = vld [vmem:[%s17064_s2 + $0x37] sm:$0xff]  ;;  %v17196_v49 = vld [vmem:[%s17064_s2 + $0x3f] sm:$0xff] }
 0x648   : >> { %12353 = vmatmul.mubr.msk.f32.gmra.mxu1 %vm51_vm0, %v17089_v26  ;;  %12344 = vmatmul.mubr.msk.f32.vlgmr.msra.gmra.mxu0 %vm51_vm0, %v10851_v3  ;;  %v17173_v58 = vld [vmem:[%s17064_s2 + $0x29] sm:$0xff]  ;;  %v17183_v7 = vld [vmem:[%s17064_s2 + $0x31] sm:$0xff]  ;;  %v17193_v44 = vld [vmem:[%s17064_s2 + $0x39] sm:$0xff] }
 0x649   : >> { %12381 = vmatprep.subr.mxu0 %v6387_v46  ;;  %12362 = vmatprep.subr.mxu1 %v6063_v54  ;;  %v6556_v53 = vld [vmem:[%s18078_s10 + $0x68] sm:$0xff]  ;;  %v6555_v61 = vld [vmem:[%s18078_s10 + $0x60] sm:$0xff]  ;;  %v17234_v43 = vld [vmem:[%s17064_s2 + $0x51] sm:$0xff] }
 0x64a   : >> { %12382 = vmatpush3.msra.mxu0 %v6387_v46  ;;  %12355 = vmatprep.mubr.msk.f32.mxu1 %vm51_vm0, %v17100_v57  ;;  %v6726_v39 = vld [vmem:[%s18078_s10 + $0x88] sm:$0xff]  ;;  %v6725_v0 = vld [vmem:[%s18078_s10 + $0x80] sm:$0xff]  ;;  %v6899_v62 = vld [vmem:[%s18078_s10 + $0xb8] sm:$0xff] }
 0x64b   : >> { %12363 = vmatpush3.msra.mxu1 %v6063_v54  ;;  %12383 = vmatprep.subr.mxu0 %v6386_v24  ;;  %v17206_v40 = vld [vmem:[%s17064_s2 + $0x47] sm:$0xff]  ;;  %v17224_v45 = vld [vmem:[%s17064_s2 + $0x4f] sm:$0xff]  ;;  %v7070_v11 = vld [vmem:[%s18078_s10 + $0xd8] sm:$0xff] }
 0x64c   : >> { %12346 = vmatprep.mubr.msk.f32.mxu0 %vm51_vm0, %v17109_v52  ;;  %12356 = vmatmul.mubr.msk.f32.gmra.mxu1 %vm51_vm0, %v17112_v8  ;;  %v17211_v2 = vld [vmem:[%s17064_s2 + $0x41] sm:$0xff]  ;;  %v17219_v17 = vld [vmem:[%s17064_s2 + $0x49] sm:$0xff]  ;;  %v10908_v56 = vld [vmem:[%s17064_s2 + $0x57] sm:$0xff] }
 0x64d   : >> { %12384 = vmatpush3.msra.mxu0 %v6386_v24  ;;  %12364 = vmatprep.subr.mxu1 %v6062_v23  ;;  %v6898_v9 = vld [vmem:[%s18078_s10 + $0xb0] sm:$0xff]  ;;  %v6897_v16 = vld [vmem:[%s18078_s10 + $0xa8] sm:$0xff]  ;;  %v6896_v1 = vld [vmem:[%s18078_s10 + $0xa0] sm:$0xff] }
 0x64e   : >> { %12347 = vmatmul.mubr.msk.f32.gmra.mxu0 %vm51_vm0, %v17120_v13  ;;  %12385 = vmatprep.subr.mxu0 %v6385_v36  ;;  %v7069_v33 = vld [vmem:[%s18078_s10 + $0xd0] sm:$0xff]  ;;  %v7068_v48 = vld [vmem:[%s18078_s10 + $0xc8] sm:$0xff]  ;;  %v7067_v50 = vld [vmem:[%s18078_s10 + $0xc0] sm:$0xff] }
 0x64f   : >> { %12365 = vmatpush3.msra.mxu1 %v6062_v23  ;;  %12386 = vmatpush3.msra.mxu0 %v6385_v36  ;;  %v7241_v3 = vld [vmem:[%s18078_s10 + $0xf8] sm:$0xff]  ;;  %v7240_v23 = vld [vmem:[%s18078_s10 + $0xf0] sm:$0xff]  ;;  %v7239_v36 = vld [vmem:[%s18078_s10 + $0xe8] sm:$0xff] }
 0x650   : >> { %12366 = vmatprep.mubr.msk.f32.mxu1 %vm51_vm0, %v10840_v14  ;;  %12387 = vmatprep.subr.mxu0 %v6384_v20  ;;  %v17297_v46 = vld [vmem:[%s17064_s2 + $0x58] sm:$0xff]  ;;  %v7410_v14 = vld [vmem:[%s18078_s10 + $0x108] sm:$0xff] }
 0x651   : >> { %12367 = vmatmul.mubr.msk.f32.vlgmr.msra.gmra.mxu1 %vm51_vm0, %v10841_v25  ;;  %12388 = vmatpush3.msra.mxu0 %v6384_v20  ;;  %v10909_v54 = vld [vmem:[%s17064_s2 + $0x5f] sm:$0xff] }
 0x652   : >> { %12389 = vmatprep.mubr.msk.f32.mxu0 %vm51_vm0, %v10880_v38  ;;  %12404 = vmatprep.subr.mxu1 %v6558_v10  ;;  %v7412_v24 = vld [vmem:[%s18078_s10 + $0x118] sm:$0xff]  ;;  %v7238_v20 = vld [vmem:[%s18078_s10 + $0xe0] sm:$0xff] }
 0x653   : >> { %12390 = vmatmul.mubr.msk.f32.vlgmr.msra.gmra.mxu0 %vm51_vm0, %v10881_v30  ;;  %12405 = vmatpush3.msra.mxu1 %v6558_v10  ;;  %v7409_v25 = vld [vmem:[%s18078_s10 + $0x100] sm:$0xff] }
 0x654   : >> { %12427 = vmatprep.subr.mxu0 %v6728_v15  ;;  %12369 = vmatprep.mubr.msk.f32.mxu1 %vm51_vm0, %v10842_v19  ;;  %v10948_v38 = vld [vmem:[%s17064_s2 + $0x59] sm:$0xff]  ;;  %v10968_v10 = vld [vmem:[%s17064_s2 + $0x67] sm:$0xff] }
 0x655   : >> { %12428 = vmatpush3.msra.mxu0 %v6728_v15  ;;  %12370 = vmatmul.mubr.msk.f32.gmra.mxu1 %vm51_vm0, %v10843_v63  ;;  %v10949_v30 = vld [vmem:[%s17064_s2 + $0x61] sm:$0xff]  ;;  %v10969_v15 = vld [vmem:[%s17064_s2 + $0x6f] sm:$0xff] }
 0x656   : >> { %12392 = vmatprep.mubr.msk.f32.mxu0 %vm51_vm0, %v17151_v32  ;;  %12406 = vmatprep.subr.mxu1 %v6557_v12 }
 0x657   : >> { %12393 = vmatmul.mubr.msk.f32.gmra.mxu0 %vm51_vm0, %v17158_v59  ;;  %12407 = vmatpush3.msra.mxu1 %v6557_v12 }
 0x658   : >> { %12372 = vmatprep.mubr.msk.f32.mxu1 %vm51_vm0, %v17162_v5  ;;  %12429 = vmatprep.subr.mxu0 %v6727_v18 }
 0x659   : >> { %12373 = vmatmul.mubr.msk.f32.gmra.mxu1 %vm51_vm0, %v17170_v42  ;;  %12395 = vmatprep.mubr.msk.f32.mxu0 %vm51_vm0, %v17173_v58 }
 0x65a   : >> { %12430 = vmatpush3.msra.mxu0 %v6727_v18  ;;  %12408 = vmatprep.subr.mxu1 %v6556_v53 }
 0x65b   : >> { %12396 = vmatmul.mubr.msk.f32.gmra.mxu0 %vm51_vm0, %v17183_v7  ;;  %12375 = vmatprep.mubr.msk.f32.mxu1 %vm51_vm0, %v17186_v4 }
 0x65c   : >> { %12409 = vmatpush3.msra.mxu1 %v6556_v53  ;;  %12398 = vmatprep.mubr.msk.f32.mxu0 %vm51_vm0, %v17193_v44 }
 0x65d   : >> { %12376 = vmatmul.mubr.msk.f32.gmra.mxu1 %vm51_vm0, %v17196_v49  ;;  %12431 = vmatprep.subr.mxu0 %v6726_v39 }
 0x65e   : >> { %12432 = vmatpush3.msra.mxu0 %v6726_v39  ;;  %12378 = vmatprep.mubr.msk.f32.mxu1 %vm51_vm0, %v17206_v40 }
 0x65f   : >> { %12399 = vmatmul.mubr.msk.f32.gmra.mxu0 %vm51_vm0, %v17211_v2  ;;  %12410 = vmatprep.subr.mxu1 %v6555_v61 }
 0x660   : >> { %12401 = vmatprep.mubr.msk.f32.mxu0 %vm51_vm0, %v17219_v17  ;;  %12411 = vmatpush3.msra.mxu1 %v6555_v61 }
 0x661   : >> { %12379 = vmatmul.mubr.msk.f32.gmra.mxu1 %vm51_vm0, %v17224_v45  ;;  %12433 = vmatprep.subr.mxu0 %v6725_v0 }
 0x662   : >> { %12434 = vmatpush3.msra.mxu0 %v6725_v0  ;;  %12412 = vmatprep.mubr.msk.f32.mxu1 %vm51_vm0, %v10842_v19 }
 0x663   : >> { %12402 = vmatmul.mubr.msk.f32.gmra.mxu0 %vm51_vm0, %v17234_v43  ;;  %12450 = vmatprep.subr.mxu1 %v6899_v62 }
 0x664   : >> { %12435 = vmatprep.mubr.msk.f32.mxu0 %vm51_vm0, %v17109_v52  ;;  %12473 = vmatprep.subr.mxu0 %v7070_v11  ;;  %v17309_v52 = vld [vmem:[%s17064_s2 + $0x60] sm:$0xff] }
 0x665   : >> { %12413 = vmatmul.mubr.msk.f32.vlgmr.msra.gmra.mxu1 %vm51_vm0, %v10843_v63 }
 0x666   : >> { %12451 = vmatpush3.msra.mxu1 %v6899_v62  ;;  %12415 = vmatprep.mubr.msk.f32.mxu1 %vm51_vm0, %v17162_v5 }
 0x667   : >> { %12436 = vmatmul.mubr.msk.f32.vlgmr.msra.gmra.mxu0 %vm51_vm0, %v17120_v13  ;;  %12452 = vmatprep.subr.mxu1 %v6898_v9  ;;  %v7411_v13 = vld [vmem:[%s18078_s10 + $0x110] sm:$0xff] }
 0x668   : >> { %12474 = vmatpush3.msra.mxu0 %v7070_v11  ;;  %12438 = vmatprep.mubr.msk.f32.mxu0 %vm51_vm0, %v17067_v47 }
 0x669   : >> { %12416 = vmatmul.mubr.msk.f32.gmra.mxu1 %vm51_vm0, %v17170_v42  ;;  %12475 = vmatprep.subr.mxu0 %v7069_v33 }
 0x66a   : >> { %12453 = vmatpush3.msra.mxu1 %v6898_v9  ;;  %12418 = vmatprep.mubr.msk.f32.mxu1 %vm51_vm0, %v17186_v4 }
 0x66b   : >> { %12439 = vmatmul.mubr.msk.f32.gmra.mxu0 %vm51_vm0, %v17070_v22  ;;  %12454 = vmatprep.subr.mxu1 %v6897_v16 }
 0x66c   : >> { %12441 = vmatprep.mubr.msk.f32.mxu0 %vm51_vm0, %v17078_v55  ;;  %12476 = vmatpush3.msra.mxu0 %v7069_v33 }
 0x66d   : >> { %12419 = vmatmul.mubr.msk.f32.gmra.mxu1 %vm51_vm0, %v17196_v49  ;;  %12477 = vmatprep.subr.mxu0 %v7068_v48 }
 0x66e   : >> { %12421 = vmatprep.mubr.msk.f32.mxu1 %vm51_vm0, %v17206_v40  ;;  %12455 = vmatpush3.msra.mxu1 %v6897_v16 }
 0x66f   : >> { %12442 = vmatmul.mubr.msk.f32.gmra.mxu0 %vm51_vm0, %v17089_v26  ;;  %12456 = vmatprep.subr.mxu1 %v6896_v1 }
 0x670   : >> { %12444 = vmatprep.mubr.msk.f32.mxu0 %vm51_vm0, %v17100_v57  ;;  %12478 = vmatpush3.msra.mxu0 %v7068_v48 }
 0x671   : >> { %12422 = vmatmul.mubr.msk.f32.gmra.mxu1 %vm51_vm0, %v17224_v45  ;;  %12479 = vmatprep.subr.mxu0 %v7067_v50 }
 0x672   : >> { %12424 = vmatprep.mubr.msk.f32.mxu1 %vm51_vm0, %v10908_v56  ;;  %12457 = vmatpush3.msra.mxu1 %v6896_v1 }
 0x673   : >> { %12445 = vmatmul.mubr.msk.f32.gmra.mxu0 %vm51_vm0, %v17112_v8  ;;  %12496 = vmatprep.subr.mxu1 %v7241_v3 }
 0x674   : >> { %12447 = vmatprep.mubr.msk.f32.mxu0 %vm51_vm0, %v17297_v46  ;;  %12480 = vmatpush3.msra.mxu0 %v7067_v50 }
 0x675   : >> { %12425 = vmatmul.mubr.msk.f32.gmra.mxu1 %vm51_vm0, %v10909_v54  ;;  %12519 = vmatprep.subr.mxu0 %v7412_v24 }
 0x676   : >> { %12458 = vmatprep.mubr.msk.f32.mxu1 %vm51_vm0, %v17151_v32 }
 0x677   : >> { %12448 = vmatmul.mubr.msk.f32.gmra.mxu0 %vm51_vm0, %v17309_v52 }
 0x678   : >> { %12481 = vmatprep.mubr.msk.f32.mxu0 %vm51_vm0, %v17162_v5 }
 0x679   : >> { %12459 = vmatmul.mubr.msk.f32.vlgmr.msra.gmra.mxu1 %vm51_vm0, %v17158_v59 }
 0x67a   : >> { %12497 = vmatpush3.msra.mxu1 %v7241_v3  ;;  %12461 = vmatprep.mubr.msk.f32.mxu1 %vm51_vm0, %v17173_v58 }
 0x67b   : >> { %12482 = vmatmul.mubr.msk.f32.vlgmr.msra.gmra.mxu0 %vm51_vm0, %v17170_v42  ;;  %12498 = vmatprep.subr.mxu1 %v7240_v23 }
 0x67c   : >> { %12520 = vmatpush3.msra.mxu0 %v7412_v24  ;;  %12484 = vmatprep.mubr.msk.f32.mxu0 %vm51_vm0, %v17186_v4 }
 0x67d   : >> { %12462 = vmatmul.mubr.msk.f32.gmra.mxu1 %vm51_vm0, %v17183_v7  ;;  %12521 = vmatprep.subr.mxu0 %v7411_v13 }
 0x67e   : >> { %12499 = vmatpush3.msra.mxu1 %v7240_v23  ;;  %12464 = vmatprep.mubr.msk.f32.mxu1 %vm51_vm0, %v17193_v44 }
 0x67f   : >> { %12485 = vmatmul.mubr.msk.f32.gmra.mxu0 %vm51_vm0, %v17196_v49  ;;  %12500 = vmatprep.subr.mxu1 %v7239_v36 }
 0x680   : >> { %12487 = vmatprep.mubr.msk.f32.mxu0 %vm51_vm0, %v17206_v40  ;;  %12522 = vmatpush3.msra.mxu0 %v7411_v13 }
 0x681   : >> { %12465 = vmatmul.mubr.msk.f32.gmra.mxu1 %vm51_vm0, %v17211_v2  ;;  %12523 = vmatprep.subr.mxu0 %v7410_v14 }
 0x682   : >> { %12467 = vmatprep.mubr.msk.f32.mxu1 %vm51_vm0, %v17219_v17  ;;  %12501 = vmatpush3.msra.mxu1 %v7239_v36 }
 0x683   : >> { %12488 = vmatmul.mubr.msk.f32.gmra.mxu0 %vm51_vm0, %v17224_v45  ;;  %12502 = vmatprep.subr.mxu1 %v7238_v20 }
 0x684   : >> { %12490 = vmatprep.mubr.msk.f32.mxu0 %vm51_vm0, %v10908_v56  ;;  %12524 = vmatpush3.msra.mxu0 %v7410_v14 }
 0x685   : >> { %12468 = vmatmul.mubr.msk.f32.gmra.mxu1 %vm51_vm0, %v17234_v43  ;;  %12525 = vmatprep.subr.mxu0 %v7409_v25 }
 0x686   : >> { %12470 = vmatprep.mubr.msk.f32.mxu1 %vm51_vm0, %v10948_v38  ;;  %12503 = vmatpush3.msra.mxu1 %v7238_v20 }
 0x687   : >> { %12491 = vmatmul.mubr.msk.f32.gmra.mxu0 %vm51_vm0, %v10909_v54 }
 0x688   : >> { %12493 = vmatprep.mubr.msk.f32.mxu0 %vm51_vm0, %v10968_v10  ;;  %12526 = vmatpush3.msra.mxu0 %v7409_v25 }
 0x689   : >> { %12471 = vmatmul.mubr.msk.f32.gmra.mxu1 %vm51_vm0, %v10949_v30 }
 0x68a   : >> { %12504 = vmatprep.mubr.msk.f32.mxu1 %vm51_vm0, %v17067_v47  ;;  %v10988_v47 = vld [vmem:[%s17064_s2 + $0x68] sm:$0xff] }
 0x68b   : >> { %12494 = vmatmul.mubr.msk.f32.gmra.mxu0 %vm51_vm0, %v10969_v15 }
 0x68c   : >> { %12527 = vmatprep.mubr.msk.f32.mxu0 %vm51_vm0, %v17173_v58 }
 0x68d   : >> { %12505 = vmatmul.mubr.msk.f32.vlgmr.msra.gmra.mxu1 %vm51_vm0, %v17070_v22  ;;  %v11008_v22 = vld [vmem:[%s17064_s2 + $0x69] sm:$0xff] }
 0x68e   : >> { %12507 = vmatprep.mubr.msk.f32.mxu1 %vm51_vm0, %v17078_v55  ;;  %v10989_v55 = vld [vmem:[%s17064_s2 + $0x70] sm:$0xff] }
 0x68f   : >> { %12528 = vmatmul.mubr.msk.f32.vlgmr.msra.gmra.mxu0 %vm51_vm0, %v17183_v7 }
 0x690   : >> { %12530 = vmatprep.mubr.msk.f32.mxu0 %vm51_vm0, %v17193_v44 }
 0x691   : >> { %12508 = vmatmul.mubr.msk.f32.gmra.mxu1 %vm51_vm0, %v17089_v26  ;;  %v11009_v26 = vld [vmem:[%s17064_s2 + $0x71] sm:$0xff]  ;;  %s17484_s2 = scalar_lea.vmem [#allocation5], %s17061_s26 }
 0x692   : >> { %12510 = vmatprep.mubr.msk.f32.mxu1 %vm51_vm0, %v17100_v57 }
 0x693   : >> { %12531 = vmatmul.mubr.msk.f32.gmra.mxu0 %vm51_vm0, %v17211_v2 }
 0x694   : >> { %12533 = vmatprep.mubr.msk.f32.mxu0 %vm51_vm0, %v17219_v17 }
 0x695   : >> { %12511 = vmatmul.mubr.msk.f32.gmra.mxu1 %vm51_vm0, %v17112_v8 }
 0x696   : >> { %12513 = vmatprep.mubr.msk.f32.mxu1 %vm51_vm0, %v17297_v46 }
 0x697   : >> { %12534 = vmatmul.mubr.msk.f32.gmra.mxu0 %vm51_vm0, %v17234_v43 }
 0x698   : >> { %12536 = vmatprep.mubr.msk.f32.mxu0 %vm51_vm0, %v10948_v38 }
 0x699   : >> { %12514 = vmatmul.mubr.msk.f32.gmra.mxu1 %vm51_vm0, %v17309_v52 }
 0x69a   : >> { %12516 = vmatprep.mubr.msk.f32.mxu1 %vm51_vm0, %v10988_v47 }
 0x69b   : >> { %12537 = vmatmul.mubr.msk.f32.gmra.mxu0 %vm51_vm0, %v10949_v30 }
 0x69c   : >> { %12539 = vmatprep.mubr.msk.f32.mxu0 %vm51_vm0, %v11008_v22 }
 0x69d   : >> { %12517 = vmatmul.mubr.msk.f32.gmra.mxu1 %vm51_vm0, %v10989_v55 }
 0x69f   : >> { %12540 = vmatmul.mubr.msk.f32.gmra.mxu0 %vm51_vm0, %v11009_v26 }
 0x704   : >> { %v17408_v57 = vpop.f32.mrf.mxu1 }
 0x706   : >> { %v17410_v8 = vpop.f32.mrf.mxu1 }
 0x708   : >> { %v17412_v19 = vpop.f32.mrf.mxu1  ;;  %v12345_v63 = vpop.f32.mrf.mxu0 }
 0x70a   : >> { %v17414_v32 = vpop.f32.mrf.mxu1  ;;  %v6178_v12 = vpop.f32.mrf.mxu0 }
 0x70c   : >> { %v17416_v59 = vpop.f32.mrf.mxu1 }
 0x70e   : >> { %v12348_v5 = vpop.f32.mrf.mxu0  ;;  %v17418_v18 = vpop.f32.mrf.mxu1 }
 0x710   : >> { %v6188_v42 = vpop.f32.mrf.mxu0 }
 0x711   : >> { %v12368_v58 = vpop.f32.mrf.mxu1 }
 0x712   : >> { %v6329_v6 = vadd.f32 %v12368_v58, %v12345_v63 }
 0x713   : >> { %v12391_v53 = vpop.f32.mrf.mxu0  ;;  %v6323_v7 = vpop.f32.mrf.mxu1 }
 0x714   : >> { %v6324_v29 = vadd.f32 %v6323_v7, %v6178_v12  ;;  %v6534_v28 = vadd.f32 %v12391_v53, %v6329_v6 }
 0x715   : >> { %v6484_v4 = vpop.f32.mrf.mxu0  ;;  %v12371_v44 = vpop.f32.mrf.mxu1 }
 0x716   : >> { %v6339_v35 = vadd.f32 %v12371_v44, %v12348_v5  ;;  %v6533_v41 = vadd.f32 %v6484_v4, %v6324_v29 }
 0x717   : >> { %v12394_v49 = vpop.f32.mrf.mxu0  ;;  %v6333_v39 = vpop.f32.mrf.mxu1 }
 0x719   : >> { %v6494_v40 = vpop.f32.mrf.mxu0  ;;  %v12374_v2 = vpop.f32.mrf.mxu1 }
 0x71a   : >> { %v6349_v63 = vadd.f32 %v12374_v2, %v17408_v57 }
 0x71b   : >> { %v17420_v61 = vpop.f32.mrf.mxu0  ;;  %v6343_v17 = vpop.f32.mrf.mxu1 }
 0x71c   : >> { %v6344_v58 = vadd.f32 %v6343_v17, %v17410_v8  ;;  %v6538_v57 = vadd.f32 %v17420_v61, %v6349_v63 }
 0x71d   : >> { %v17422_v45 = vpop.f32.mrf.mxu0  ;;  %v12377_v0 = vpop.f32.mrf.mxu1 }
 0x71e   : >> { %v6359_v12 = vadd.f32 %v12377_v0, %v17412_v19  ;;  %v6537_v8 = vadd.f32 %v17422_v45, %v6344_v58 }
 0x71f   : >> { %v17424_v43 = vpop.f32.mrf.mxu0  ;;  %v6353_v62 = vpop.f32.mrf.mxu1 }
 0x720   : >> { %v6354_v5 = vadd.f32 %v6353_v62, %v17414_v32  ;;  %v6540_v19 = vadd.f32 %v17424_v43, %v6359_v12 }
 0x721   : >> { %v17426_v11 = vpop.f32.mrf.mxu0  ;;  %v12380_v9 = vpop.f32.mrf.mxu1 }
 0x722   : >> { %v6539_v2 = vadd.f32 %v17426_v11, %v6354_v5 }
 0x723   : >> { %v17428_v33 = vpop.f32.mrf.mxu0  ;;  %v17430_v16 = vpop.f32.mrf.mxu1 }
 0x725   : >> { %v17432_v48 = vpop.f32.mrf.mxu0  ;;  %v12414_v1 = vpop.f32.mrf.mxu1 }
 0x727   : >> { %v12437_v50 = vpop.f32.mrf.mxu0  ;;  %v6655_v56 = vpop.f32.mrf.mxu1 }
 0x729   : >> { %v6825_v3 = vpop.f32.mrf.mxu0  ;;  %v12417_v46 = vpop.f32.mrf.mxu1 }
 0x72b   : >> { %v12440_v54 = vpop.f32.mrf.mxu0  ;;  %v6665_v24 = vpop.f32.mrf.mxu1 }
 0x72d   : >> { %v17434_v52 = vpop.f32.mrf.mxu0  ;;  %v12420_v23 = vpop.f32.mrf.mxu1 }
 0x72e   : >> { %v6709_v62 = vadd.f32 %v12420_v23, %v6538_v57 }
 0x72f   : >> { %v17436_v13 = vpop.f32.mrf.mxu0  ;;  %v6675_v36 = vpop.f32.mrf.mxu1 }
 0x731   : >> { %v17438_v14 = vpop.f32.mrf.mxu0  ;;  %v12423_v20 = vpop.f32.mrf.mxu1 }
 0x732   : >> { %18169 = vst [vmem:[#allocation36_spill] sm:$0xff] %v17438_v14  ;;  %v6704_v14 = vadd.f32 %v6655_v56, %v6533_v41  ;;  %v6711_v61 = vadd.f32 %v12423_v20, %v6540_v19 }
 0x733   : >> { %v17440_v25 = vpop.f32.mrf.mxu0  ;;  %v6685_v38 = vpop.f32.mrf.mxu1 }
 0x734   : >> { %18170 = vst [vmem:[#allocation37_spill] sm:$0xff] %v17440_v25  ;;  %v6536_v25 = vadd.f32 %v12394_v49, %v6339_v35  ;;  %v6874_v41 = vadd.f32 %v6825_v3, %v6704_v14 }
 0x735   : >> { %v17442_v10 = vpop.f32.mrf.mxu0  ;;  %v12426_v30 = vpop.f32.mrf.mxu1 }
 0x736   : >> { %18171 = vst [vmem:[#allocation38_spill] sm:$0xff] %v17442_v10  ;;  %v6334_v10 = vadd.f32 %v6333_v39, %v6188_v42  ;;  %v6707_v29 = vadd.f32 %v12417_v46, %v6536_v25  ;;  %v6369_v42 = vadd.f32 %v12380_v9, %v17416_v59  ;;  %v6364_v59 = vadd.f32 %v17430_v16, %v17418_v18 }
 0x737   : >> { %v17444_v15 = vpop.f32.mrf.mxu0  ;;  %v17446_v47 = vpop.f32.mrf.mxu1  ;;  %v6708_v9 = vadd.f32 %v6675_v36, %v6537_v8 }
 0x738   : >> { %18172 = vst [vmem:[#allocation39_spill] sm:$0xff] %v17444_v15  ;;  %18173 = vst [vmem:[#allocation40_spill] sm:$0xff] %v17446_v47  ;;  %v6705_v15 = vadd.f32 %v12414_v1, %v6534_v28  ;;  %v6535_v28 = vadd.f32 %v6494_v40, %v6334_v10  ;;  %v6877_v40 = vadd.f32 %v12440_v54, %v6707_v29 }
 0x739   : >> { %v17448_v22 = vpop.f32.mrf.mxu0  ;;  %v12460_v55 = vpop.f32.mrf.mxu1  ;;  %v6542_v0 = vadd.f32 %v17428_v33, %v6369_v42  ;;  %v6541_v18 = vadd.f32 %v17432_v48, %v6364_v59  ;;  %v6879_v33 = vadd.f32 %v17436_v13, %v6709_v62  ;;  %v18175_v54 = vld [vmem:[#allocation36_spill] sm:$0xff]  ;;  %v18183_v62 = vld [vmem:[#allocation24_spill] sm:$0xff] }
 0x73a   : >> { %18174 = vst [vmem:[#allocation41_spill] sm:$0xff] %v17448_v22  ;;  %v6875_v53 = vadd.f32 %v12437_v50, %v6705_v15  ;;  %v6706_v49 = vadd.f32 %v6665_v24, %v6535_v28  ;;  %v6710_v50 = vadd.f32 %v6685_v38, %v6539_v2  ;;  %v6878_v23 = vadd.f32 %v18175_v54, %v6708_v9 }
 0x73b   : >> { %v12483_v26 = vpop.f32.mrf.mxu0  ;;  %v6996_v51 = vpop.f32.mrf.mxu1  ;;  %v6713_v46 = vadd.f32 %v12426_v30, %v6542_v0  ;;  %v18176_v36 = vld [vmem:[#allocation37_spill] sm:$0xff] }
 0x73c   : >> { %v7046_v44 = vadd.f32 %v12460_v55, %v6875_v53  ;;  %v7045_v17 = vadd.f32 %v6996_v51, %v6874_v41  ;;  %v6876_v3 = vadd.f32 %v17434_v52, %v6706_v49  ;;  %v6881_v14 = vadd.f32 %v18176_v36, %v6711_v61  ;;  %v18180_v53 = vld [vmem:[#allocation22_spill] sm:$0xff] }
 0x73d   : >> { %v7167_v34 = vpop.f32.mrf.mxu0  ;;  %v12463_v31 = vpop.f32.mrf.mxu1  ;;  %v18177_v38 = vld [vmem:[#allocation38_spill] sm:$0xff] }
 0x73e   : >> { %v7217_v43 = vadd.f32 %v12483_v26, %v7046_v44  ;;  %v7048_v56 = vadd.f32 %v12463_v31, %v6877_v40  ;;  %v7216_v16 = vadd.f32 %v7167_v34, %v7045_v17  ;;  %v6880_v52 = vadd.f32 %v18177_v38, %v6710_v50  ;;  %v18181_v44 = vld [vmem:[#allocation19_spill] sm:$0xff] }
 0x73f   : >> { %v12486_v60 = vpop.f32.mrf.mxu0  ;;  %v7006_v21 = vpop.f32.mrf.mxu1  ;;  %v18178_v55 = vld [vmem:[#allocation39_spill] sm:$0xff]  ;;  %v18179_v48 = vld [vmem:[#allocation40_spill] sm:$0xff] }
 0x740   : >> { %v7047_v20 = vadd.f32 %v7006_v21, %v6876_v3  ;;  %v7219_v10 = vadd.f32 %v12486_v60, %v7048_v56  ;;  %v6883_v26 = vadd.f32 %v18178_v55, %v6713_v46  ;;  %v6712_v34 = vadd.f32 %v18179_v48, %v6541_v18 }
 0x741   : >> { %v17450_v37 = vpop.f32.mrf.mxu0  ;;  %v12466_v27 = vpop.f32.mrf.mxu1  ;;  %v18182_v8 = vld [vmem:[#allocation41_spill] sm:$0xff] }
 0x742   : >> { %v7050_v63 = vadd.f32 %v12466_v27, %v6879_v33  ;;  %v7218_v28 = vadd.f32 %v17450_v37, %v7047_v20  ;;  %v6882_v19 = vadd.f32 %v18182_v8, %v6712_v34 }
 0x743   : >> { %v17452_v47 = vpop.f32.mrf.mxu0  ;;  %v7016_v22 = vpop.f32.mrf.mxu1 }
 0x744   : >> { %v7049_v58 = vadd.f32 %v7016_v22, %v6878_v23  ;;  %v7221_v49 = vadd.f32 %v17452_v47, %v7050_v63 }
 0x745   : >> { %v17457_v7 = vpop.f32.mrf.mxu0  ;;  %v12469_v6 = vpop.f32.mrf.mxu1 }
 0x746   : >> { %v7052_v5 = vadd.f32 %v12469_v6, %v6881_v14  ;;  %v7220_v37 = vadd.f32 %v17457_v7, %v7049_v58 }
 0x747   : >> { %v17461_v4 = vpop.f32.mrf.mxu0  ;;  %v7026_v35 = vpop.f32.mrf.mxu1 }
 0x748   : >> { %v7051_v42 = vadd.f32 %v7026_v35, %v6880_v52  ;;  %v7223_v35 = vadd.f32 %v17461_v4, %v7052_v5 }
 0x749   : >> { %v17466_v39 = vpop.f32.mrf.mxu0  ;;  %v12472_v32 = vpop.f32.mrf.mxu1 }
 0x74a   : >> { %v7054_v22 = vadd.f32 %v12472_v32, %v6883_v26  ;;  %v7222_v9 = vadd.f32 %v17466_v39, %v7051_v42  ;;  %v18187_v42 = vld [vmem:[#allocation11_spill] sm:$0xff] }
 0x74b   : >> { %v12495_v1 = vpop.f32.mrf.mxu0  ;;  %v7036_v45 = vpop.f32.mrf.mxu1 }
 0x74c   : >> { %v7225_v3 = vadd.f32 %v12495_v1, %v7054_v22  ;;  %v7053_v46 = vadd.f32 %v7036_v45, %v6882_v19 }
 0x74d   : >> { %v17473_v24 = vpop.f32.mrf.mxu0  ;;  %v12506_v11 = vpop.f32.mrf.mxu1 }
 0x74e   : >> { %v7388_v51 = vadd.f32 %v12506_v11, %v7217_v43  ;;  %v7224_v34 = vadd.f32 %v17473_v24, %v7053_v46 }
 0x74f   : >> { %v12529_v25 = vpop.f32.mrf.mxu0  ;;  %v7338_v31 = vpop.f32.mrf.mxu1 }
 0x750   : >> { %v7559_v30 = vadd.f32 %v12529_v25, %v7388_v51  ;;  %v7387_v15 = vadd.f32 %v7338_v31, %v7216_v16  ;;  %v18184_v16 = vld [vmem:[#allocation23_spill] sm:$0xff]  ;;  %v18185_v31 = vld [vmem:[#allocation20_spill] sm:$0xff] }
 0x751   : >> { %v7509_v13 = vpop.f32.mrf.mxu0  ;;  %v12509_v12 = vpop.f32.mrf.mxu1 }
 0x752   : >> { %v7569_v29 = vmul.f32 %v7559_v30, %v18180_v53  ;;  %11021 = vst.msk [vmem:[%s17484_s2 + $0x18] sm:$0xff] %vm51_vm0, %v7559_v30  ;;  %v7558_v21 = vadd.f32 %v7509_v13, %v7387_v15  ;;  %v7390_v60 = vadd.f32 %v12509_v12, %v7219_v10  ;;  %v18186_v15 = vld [vmem:[#allocation15_spill] sm:$0xff] }
 0x753   : >> { %v12532_v41 = vpop.f32.mrf.mxu0  ;;  %v7348_v27 = vpop.f32.mrf.mxu1 }
 0x754   : >> { %v7568_v57 = vmul.f32 %v7558_v21, %v18181_v44  ;;  %11020 = vst.msk [vmem:[%s17484_s2 + $0x10] sm:$0xff] %vm51_vm0, %v7558_v21  ;;  %v7561_v6 = vadd.f32 %v12532_v41, %v7390_v60  ;;  %v7605_v2 = vmul.f32 %v7569_v29, %v7559_v30  ;;  %v7389_v59 = vadd.f32 %v7348_v27, %v7218_v28 }
 0x755   : >> { %v7519_v40 = vpop.f32.mrf.mxu0  ;;  %v12512_v17 = vpop.f32.mrf.mxu1  ;;  %v7579_v4 = vsel %vm51_vm0, %v7569_v29, 0.0 }
 0x756   : >> { %v7604_v0 = vmul.f32 %v7568_v57, %v7558_v21  ;;  %v7571_v32 = vmul.f32 %v7561_v6, %v18183_v62  ;;  %11023 = vst.msk [vmem:[%s17484_s2 + $0x28] sm:$0xff] %vm51_vm0, %v7561_v6  ;;  %v7578_v61 = vsel %vm51_vm0, %v7568_v57, 0.0  ;;  %v7560_v50 = vadd.f32 %v7519_v40, %v7389_v59 }
 0x757   : >> { %v7392_v47 = vadd.f32 %v12512_v17, %v7221_v49  ;;  %v12535_v43 = vpop.f32.mrf.mxu0  ;;  %v7358_v56 = vpop.f32.mrf.mxu1  ;;  %v7615_v18 = vsel %vm51_vm0, %v7605_v2, 0.0  ;;  %v7580_v23 = vadd.f32 %v7579_v4, %v7578_v61  ;;  %v18188_v2 = vld [vmem:[#allocation21_spill] sm:$0xff] }
 0x758   : >> { %v7614_v7 = vsel %vm51_vm0, %v7604_v0, 0.0  ;;  %v7391_v11 = vadd.f32 %v7358_v56, %v7220_v37  ;;  %v7570_v51 = vmul.f32 %v7560_v50, %v18184_v16  ;;  %11022 = vst.msk [vmem:[%s17484_s2 + $0x20] sm:$0xff] %vm51_vm0, %v7560_v50  ;;  %v7607_v36 = vmul.f32 %v7571_v32, %v7561_v6 }
 0x759   : >> { %v7563_v39 = vadd.f32 %v12535_v43, %v7392_v47  ;;  %v7529_v33 = vpop.f32.mrf.mxu0  ;;  %v12515_v54 = vpop.f32.mrf.mxu1  ;;  %v7616_v14 = vadd.f32 %v7615_v18, %v7614_v7  ;;  %v7583_v63 = vsel %vm51_vm0, %v7571_v32, 0.0 }
 0x75a   : >> { %v7562_v1 = vadd.f32 %v7529_v33, %v7391_v11  ;;  %v7394_v45 = vadd.f32 %v12515_v54, %v7223_v35  ;;  %v7581_v20 = vsel %vm51_vm0, %v7570_v51, 0.0  ;;  %v7606_v25 = vmul.f32 %v7570_v51, %v7560_v50  ;;  %v18189_v50 = vld [vmem:[#allocation13_spill] sm:$0xff] }
 0x75b   : >> { %v7573_v38 = vmul.f32 %v7563_v39, %v18185_v31  ;;  %11025 = vst.msk [vmem:[%s17484_s2 + $0x38] sm:$0xff] %vm51_vm0, %v7563_v39  ;;  %v12538_v52 = vpop.f32.mrf.mxu0  ;;  %v7368_v10 = vpop.f32.mrf.mxu1  ;;  %v7582_v30 = vadd.f32 %v7581_v20, %v7580_v23  ;;  %v7619_v28 = vsel %vm51_vm0, %v7607_v36, 0.0 }
 0x75c   : >> { %v7572_v55 = vmul.f32 %v7562_v1, %v18186_v15  ;;  %11024 = vst.msk [vmem:[%s17484_s2 + $0x30] sm:$0xff] %vm51_vm0, %v7562_v1  ;;  %v7565_v26 = vadd.f32 %v12538_v52, %v7394_v45  ;;  %v7393_v48 = vadd.f32 %v7368_v10, %v7222_v9  ;;  %v7617_v58 = vsel %vm51_vm0, %v7606_v25, 0.0 }
 0x75d   : >> { %v7609_v13 = vmul.f32 %v7573_v38, %v7563_v39  ;;  %v7539_v12 = vpop.f32.mrf.mxu0  ;;  %v12518_v5 = vpop.f32.mrf.mxu1  ;;  %v7618_v53 = vadd.f32 %v7617_v58, %v7616_v14  ;;  %v7584_v29 = vadd.f32 %v7583_v63, %v7582_v30  ;;  %v7587_v49 = vsel %vm51_vm0, %v7573_v38, 0.0  ;;  %v18191_v58 = vld [vmem:[#allocation35_spill] sm:$0xff] }
 0x75e   : >> { %v7585_v21 = vsel %vm51_vm0, %v7572_v55, 0.0  ;;  %v7608_v60 = vmul.f32 %v7572_v55, %v7562_v1  ;;  %11027 = vst.msk [vmem:[%s17484_s2 + $0x48] sm:$0xff] %vm51_vm0, %v7565_v26  ;;  %v7575_v41 = vmul.f32 %v7565_v26, %v18187_v42  ;;  %v7564_v24 = vadd.f32 %v7539_v12, %v7393_v48 }
 0x75f   : >> { %v7396_v27 = vadd.f32 %v12518_v5, %v7225_v3  ;;  %v12541_v22 = vpop.f32.mrf.mxu0  ;;  %v7378_v44 = vpop.f32.mrf.mxu1  ;;  %v7586_v57 = vadd.f32 %v7585_v21, %v7584_v29  ;;  %v7620_v6 = vadd.f32 %v7619_v28, %v7618_v53  ;;  %v7623_v37 = vsel %vm51_vm0, %v7609_v13, 0.0  ;;  %v18190_v3 = vld [vmem:[#allocation12_spill] sm:$0xff]  ;;  %v18192_v5 = vld [vmem:[#allocation34_spill] sm:$0xff] }
 0x760   : >> { %v7621_v8 = vsel %vm51_vm0, %v7608_v60, 0.0  ;;  %v7395_v19 = vadd.f32 %v7378_v44, %v7224_v34  ;;  %v7574_v59 = vmul.f32 %v7564_v24, %v18188_v2  ;;  %11026 = vst.msk [vmem:[%s17484_s2 + $0x40] sm:$0xff] %vm51_vm0, %v7564_v24  ;;  %v7611_v32 = vmul.f32 %v7575_v41, %v7565_v26 }
 0x761   : >> { %v7567_v40 = vadd.f32 %v12541_v22, %v7396_v27  ;;  %v7549_v17 = vpop.f32.mrf.mxu0  ;;  %v7622_v35 = vadd.f32 %v7621_v8, %v7620_v6  ;;  %v7588_v0 = vadd.f32 %v7587_v49, %v7586_v57  ;;  %v7591_v7 = vsel %vm51_vm0, %v7575_v41, 0.0 }
 0x762   : >> { %v7566_v62 = vadd.f32 %v7549_v17, %v7395_v19  ;;  %v7589_v9 = vsel %vm51_vm0, %v7574_v59, 0.0  ;;  %v7610_v61 = vmul.f32 %v7574_v59, %v7564_v24  ;;  %v7627_v39 = vsel %vm51_vm0, %v7611_v32, 0.0 }
 0x763   : >> { %v7577_v47 = vmul.f32 %v7567_v40, %v18189_v50  ;;  %11029 = vst.msk [vmem:[%s17484_s2 + $0x58] sm:$0xff] %vm51_vm0, %v7567_v40  ;;  %v7590_v43 = vadd.f32 %v7589_v9, %v7588_v0  ;;  %v7624_v56 = vadd.f32 %v7623_v37, %v7622_v35 }
 0x764   : >> { %v7576_v46 = vmul.f32 %v7566_v62, %v18190_v3  ;;  %11028 = vst.msk [vmem:[%s17484_s2 + $0x50] sm:$0xff] %vm51_vm0, %v7566_v62  ;;  %v7625_v11 = vsel %vm51_vm0, %v7610_v61, 0.0 }
 0x765   : >> { %v7626_v4 = vadd.f32 %v7625_v11, %v7624_v56  ;;  %v7592_v18 = vadd.f32 %v7591_v7, %v7590_v43  ;;  %v7613_v33 = vmul.f32 %v7577_v47, %v7567_v40  ;;  %v7595_v1 = vsel %vm51_vm0, %v7577_v47, 0.0 }
 0x766   : >> { %v7593_v16 = vsel %vm51_vm0, %v7576_v46, 0.0  ;;  %v7612_v51 = vmul.f32 %v7576_v46, %v7566_v62 }
 0x767   : >> { %v7594_v54 = vadd.f32 %v7593_v16, %v7592_v18  ;;  %v7628_v23 = vadd.f32 %v7627_v39, %v7626_v4  ;;  %v7631_v20 = vsel %vm51_vm0, %v7613_v33, 0.0 }
 0x768   : >> { %v7629_v36 = vsel %vm51_vm0, %v7612_v51, 0.0 }
 0x769   : >> { %v7596_v45 = vadd.f32 %v7595_v1, %v7594_v54  ;;  %v7630_v14 = vadd.f32 %v7629_v36, %v7628_v23 }
 0x76b   : >> { %v7597_v25 = vrot.slane %v7596_v45, 4  ;;  %v7632_v31 = vadd.f32 %v7631_v20, %v7630_v14 }
 0x76d   : >> { %v7598_v38 = vadd.f32 %v7597_v25, %v7596_v45  ;;  %v7633_v52 = vrot.slane %v7632_v31, 4 }
 0x76f   : >> { %v7599_v10 = vrot.slane %v7598_v38, 2  ;;  %v7634_v30 = vadd.f32 %v7633_v52, %v7632_v31 }
 0x771   : >> { %v7600_v15 = vadd.f32 %v7599_v10, %v7598_v38  ;;  %v7635_v55 = vrot.slane %v7634_v30, 2 }
 0x773   : >> { %v7601_v26 = vrot.slane %v7600_v15, 1  ;;  %v7636_v48 = vadd.f32 %v7635_v55, %v7634_v30 }
 0x775   : >> { %v7602_v34 = vadd.f32 %v7601_v26, %v7600_v15  ;;  %v7637_v63 = vrot.slane %v7636_v48, 1 }
 0x777   : >> { %v7603_v13 = vadd.f32 %v18191_v58, %v7602_v34   ;;  %v7638_v12 = vadd.f32 %v7637_v63, %v7636_v48  ;;  %6041 = sbr.rel (!%p6039_p12) target bundleno = 1595 (0x63b), region = 432 }
 0x779   : >> { %v7639_v53 = vadd.f32 %v18192_v5, %v7638_v12   ;;  %v18194_v6 = vmov %v7603_v13 }
 0x77a   : > { %v18196_v6 = vmov (%p6039_p12), %v7603_v13 }
 0x77b   : >> { %v18193_v51 = vmov %v7639_v53 }
 0x77c   : > { %v18195_v51 = vmov %v7639_v53  ;;  %6033 = sbr.rel (!%p6031_p13) target bundleno = 1594 (0x63a), region = 443  ;;  %v7652_v29 = vmul.f32 (%p6031_p13), 0.005, %v7603_v13  ;;  %v7653_v21 = vmul.f32 (%p6031_p13), 0.005, %v7639_v53  ;;  %s17564_s6 = smov (%p6031_p13), 0  }
 0x77d   :  { %v7656_v41 = vld [vmem:[%s18079_s11] sm:$0x1] (%p6031_p13) }
 0x77e   :  { %v7654_v60 = vmul.f32 (%p6031_p13), %v7652_v29, %v7652_v29  ;;  %v7660_v22 = vld [vmem:[%s18080_s12] sm:$0x1] (%p6031_p13) }
 0x780   :  { %v7655_v28 = vsub.f32 (%p6031_p13), %v7653_v21, %v7654_v60 }
 0x782   :  { %v7657_v42 = vadd.f32 1e-05, %v7655_v28 }
 0x784   :  { %13117 = vrsqrt.f32 %v7657_v42 }
 0x791   :  { %v13118_v24 = vpop.eup %13117 }
 0x792   :  { %v7659_v27 = vmul.f32 %v13118_v24, %v7656_v41 }
 0x794   :  { %v7661_v44 = vmul.f32 %v7659_v27, %v7652_v29 }
 0x796   :  { %v7662_v57 = vsub.f32 %v7660_v22, %v7661_v44 }
 0x797 LB: > { %s17569_s10 = smov 0   ;;  %s13391_s6 = sphi %s17564_s6, %s7668_s6  }
 0x798 LB: >> { %s10025_s11 = smul.u32 192, %s13391_s6  ;;  %s11068_s12 = sshll.u32 %s13395_s10, 5  ;;  %v18197_v6 = vld [vmem:[#allocation10_spill] sm:$0xff]  ;;  %s13395_s10 = sphi %s17569_s10, %s7674_s10  }
 0x799   : >> { %v7696_v8 = vrot.slane %v7659_v27, %v18197_v6  ;;  %v7703_v19 = vrot.slane %v7662_v57, %v18197_v6  ;;  %s7719_s0 = smul.u32 25, %s13391_s6 }
 0x79a   : >> { %s10028_s9 = sadd.s32 %s11068_s12, %s10025_s11  ;;  %s7720_s24 = smul.u32 5, %s13395_s10 }
 0x79b   : >> { %s10029_s27 = scalar_lea.vmem [#allocation5], %s10028_s9  ;;  %s7674_s10 = sadd.s32 1, %s13395_s10  }
 0x79c   : >> { %v11032_v49 = vld [vmem:[%s10029_s27 + $0x11] ss:$2 sm:$0x1f]  ;;  %v11035_v2 = vld [vmem:[%s10029_s27 + $0x12] ss:$2 sm:$0x1f]  ;;  %s7721_s23 = sadd.s32 %s7720_s24, %s7719_s0 }
 0x79d   : >> { %v11038_v59 = vld [vmem:[%s10029_s27 + $0x21] ss:$2 sm:$0x1f]  ;;  %v11041_v40 = vld [vmem:[%s10029_s27 + $0x22] ss:$2 sm:$0x1f]  ;;  %v7698_v17 = vmul.f32 %v11032_v49, %v7696_v8  ;;  %v7707_v37 = vmul.f32 %v11035_v2, %v7696_v8 }
 0x79e   : >> { %v7710_v35 = vmul.f32 %v11038_v59, %v7696_v8  ;;  %v7713_v0 = vmul.f32 %v11041_v40, %v7696_v8  ;;  %s7722_s28 = scalar_lea.vmem [#allocation6], %s7721_s23  ;;  %p7671_p0 = scmp.ge.s32.totalorder %s7674_s10, 5  }
 0x79f   : >> { %v7705_v62 = vadd.f32 %v7703_v19, %v7698_v17  ;;  %v7708_v32 = vadd.f32 %v7707_v37, %v7703_v19  ;;  %s7668_s6 = sadd.s32 (%p7671_p0), 1, %s13391_s6  }
 0x7a0   : >> { %v7711_v9 = vadd.f32 %v7710_v35, %v7703_v19  ;;  %v7714_v61 = vadd.f32 %v7713_v0, %v7703_v19  ;;  %p7665_p1 = scmp.ge.s32.totalorder (%p7671_p0), %s7668_s6, 2  }
 0x7a1   : >> { %v7706_v50 = vmax.f32 %v7705_v62, 0.0  ;;  %v7709_v47 = vmax.f32 %v7708_v32, 0.0 }
 0x7a2   : >> { %v7712_v43 = vmax.f32 %v7711_v9, 0.0  ;;  %v7715_v56 = vmax.f32 %v7714_v61, 0.0 }
 0x7a3   : >> { %v7716_v3 = vmax.f32 %v7706_v50, %v7709_v47 }
 0x7a4   : >> { %v7717_v46 = vmax.f32 %v7712_v43, %v7715_v56  ;;  %7673 = sbr.rel (!%p7671_p0) target bundleno = 1944 (0x798), region = 454 }
 0x7a6   : >> { %v7718_v7 = vmax.f32 %v7716_v3, %v7717_v46 }
 0x7a8   : >> { %7724 = vst.msk [vmem:[%s7722_s28] sm:$0x1f] %vm4140_vm8, %v7718_v7 }
 0x7a9   :  { %7667 = sbr.rel (!%p7665_p1) target bundleno = 1943 (0x797), region = 465  ;;  %v18198_v11 = vmov (%p7665_p1), 0.0   ;;  %v7735_v4 = vld [vmem:[%s18081_s13 + $0x38] sm:$0xff] (%p7665_p1)  ;;  %v7734_v16 = vld [vmem:[%s18081_s13 + $0x30] sm:$0xff] (%p7665_p1)  ;;  %v7733_v39 = vld [vmem:[%s18081_s13 + $0x28] sm:$0xff] (%p7665_p1)  ;;  %vm13401_vm1 = vmmov (%p7665_p1), 0  }
 0x7aa   :  { %12542 = vmatprep.subr.mxu0 (%p7665_p1), %v18198_v11  ;;  %12553 = vmatprep.subr.mxu1 (%p7665_p1), %v18198_v11  ;;  %v7729_v18 = vld [vmem:[%s18081_s13 + $0x18] sm:$0xff] (%p7665_p1)  ;;  %v7728_v51 = vld [vmem:[%s18081_s13 + $0x10] sm:$0xff] (%p7665_p1)  ;;  %v7727_v33 = vld [vmem:[%s18081_s13 + $0x8] sm:$0xff] (%p7665_p1)  ;;  %s13402_s20 = smov (%p7665_p1), [#allocation7]  }
 0x7ab   :  { %12543 = vmatpush3.msra.mxu0 (%p7665_p1), %v7735_v4  ;;  %12554 = vmatpush3.msra.mxu1 (%p7665_p1), %v7729_v18  ;;  %v7732_v54 = vld [vmem:[%s18081_s13 + $0x20] sm:$0xff] (%p7665_p1)  ;;  %v7887_v45 = vld [vmem:[%s18081_s13 + $0x58] sm:$0xff] (%p7665_p1)  ;;  %v7886_v14 = vld [vmem:[%s18081_s13 + $0x50] sm:$0xff] (%p7665_p1)  ;;  %s9738_s21 = sshll.u32 (%p7665_p1), %s13402_s20, 4  ;;  %s9739_s21 = int_to_ptr.vmem [resolvable:$true] %s9738_s21 }
 0x7ac   :  { %12544 = vmatprep.subr.mxu0 (%p7665_p1), %v18198_v11  ;;  %12555 = vmatprep.subr.mxu1 (%p7665_p1), %v18198_v11  ;;  %v7726_v36 = vld [vmem:[%s18081_s13] sm:$0xff] (%p7665_p1)  ;;  %v7967_v20 = vld [vmem:[%s18081_s13 + $0x78] sm:$0xff] (%p7665_p1)  ;;  %v7885_v25 = vld [vmem:[%s18081_s13 + $0x48] sm:$0xff] (%p7665_p1)  ;;  %s13119_s22 = scalar_lea.vmem (%p7665_p1), %s9739_s21, 32  ;;  %p13124_p3 = scmp.lt.s32.totalorder (%p7665_p1), %s9739_s21, %s9739_s21 }
 0x7ad   :  { %12545 = vmatpush3.msra.mxu0 (%p7665_p1), %v7734_v16  ;;  %12556 = vmatpush3.msra.mxu1 (%p7665_p1), %v7728_v51  ;;  %v7966_v31 = vld [vmem:[%s18081_s13 + $0x70] sm:$0xff] (%p7665_p1)  ;;  %v7884_v38 = vld [vmem:[%s18081_s13 + $0x40] sm:$0xff] (%p7665_p1)  ;;  %v7965_v52 = vld [vmem:[%s18081_s13 + $0x68] sm:$0xff] (%p7665_p1)  ;;  %p13120_p2 = scmp.ne.s32.totalorder (%p7665_p1), %s9739_s21, %s13119_s22  ;;  %p13125_p4 = scmp.lt.s32.totalorder (%p7665_p1), %s13119_s22, %s13119_s22 }
 0x7ae   :  { %12546 = vmatprep.subr.mxu0 %v18198_v11  ;;  %12557 = vmatprep.subr.mxu1 %v18198_v11  ;;  %v7964_v30 = vld [vmem:[%s18081_s13 + $0x60] sm:$0xff]  ;;  %v8047_v15 = vld [vmem:[%s18081_s13 + $0x98] sm:$0xff]  ;;  %v8046_v26 = vld [vmem:[%s18081_s13 + $0x90] sm:$0xff] }
 0x7af   :  { %12547 = vmatpush3.msra.mxu0 %v7733_v39  ;;  %12558 = vmatpush3.msra.mxu1 %v7727_v33  ;;  %v7731_v23 = vld [vmem:[#allocation6 + $0x1] ss:$25 sm:$0x3]  ;;  %v7725_v1 = vld [vmem:[#allocation6] ss:$25 sm:$0x3]  ;;  %p13126_p5 = por %p13125_p4, %p13124_p3 }
 0x7b0   :  { %12548 = vmatprep.subr.mxu0 %v18198_v11  ;;  %12550 = vmatprep.mubr.msk.f32.mxu0 %vm13401_vm1, %v18198_v11  ;;  %v7883_v10 = vld [vmem:[#allocation6 + $0x2] ss:$25 sm:$0x3]  ;;  %v7963_v55 = vld [vmem:[#allocation6 + $0x3] ss:$25 sm:$0x3] }
 0x7b1   :  { %12549 = vmatpush3.msra.mxu0 %v7732_v54  ;;  %12559 = vmatprep.subr.mxu1 %v18198_v11  ;;  %v8127_v48 = vld [vmem:[%s18081_s13 + $0xb8] sm:$0xff]  ;;  %v8045_v34 = vld [vmem:[%s18081_s13 + $0x88] sm:$0xff]  ;;  %v8126_v63 = vld [vmem:[%s18081_s13 + $0xb0] sm:$0xff]  ;;  %p13127_p6 = pnand %p13126_p5, %p13120_p2 }
 0x7b2   :  { %12551 = vmatmul.mubr.msk.f32.vlgmr.msra.gmra.mxu0 %vm51_vm0, %v7731_v23  ;;  %12560 = vmatpush3.msra.mxu1 %v7726_v36  ;;  %v8044_v58 = vld [vmem:[%s18081_s13 + $0x80] sm:$0xff]  ;;  %v8125_v13 = vld [vmem:[%s18081_s13 + $0xa8] sm:$0xff]  ;;  %v8207_v53 = vld [vmem:[%s18081_s13 + $0xd8] sm:$0xff] }
 0x7b3   :  { %12561 = vmatprep.mubr.msk.f32.mxu1 %vm13401_vm1, %v18198_v11  ;;  %12564 = vmatprep.subr.mxu0 %v18198_v11  ;;  %v8043_v12 = vld [vmem:[#allocation6 + $0x4] ss:$25 sm:$0x3]  ;;  %v8123_v29 = vld [vmem:[#allocation6 + $0x5] ss:$25 sm:$0x3] }
 0x7b4   :  { %12562 = vmatmul.mubr.msk.f32.vlgmr.msra.gmra.mxu1 %vm51_vm0, %v7725_v1  ;;  %12565 = vmatpush3.msra.mxu0 %v7887_v45  ;;  %v8124_v5 = vld [vmem:[%s18081_s13 + $0xa0] sm:$0xff]  ;;  %v8206_v21 = vld [vmem:[%s18081_s13 + $0xd0] sm:$0xff]  ;;  %v8287_v60 = vld [vmem:[%s18081_s13 + $0xf8] sm:$0xff] }
 0x7b5   :  { %12566 = vmatprep.subr.mxu0 %v18198_v11  ;;  %12575 = vmatprep.subr.mxu1 %v18198_v11  ;;  %v8205_v28 = vld [vmem:[%s18081_s13 + $0xc8] sm:$0xff]  ;;  %v8286_v42 = vld [vmem:[%s18081_s13 + $0xf0] sm:$0xff]  ;;  %v8204_v41 = vld [vmem:[%s18081_s13 + $0xc0] sm:$0xff] }
 0x7b6   :  { %12567 = vmatpush3.msra.mxu0 %v7886_v14  ;;  %12576 = vmatpush3.msra.mxu1 %v7967_v20  ;;  %v8285_v24 = vld [vmem:[%s18081_s13 + $0xe8] sm:$0xff]  ;;  %v8203_v27 = vld [vmem:[#allocation6 + $0x6] ss:$25 sm:$0x3]  ;;  %v8366_v6 = vld [vmem:[%s18081_s13 + $0x110] sm:$0xff] }
 0x7b7   :  { %12568 = vmatprep.subr.mxu0 %v18198_v11  ;;  %12577 = vmatprep.subr.mxu1 %v18198_v11  ;;  %v8284_v22 = vld [vmem:[%s18081_s13 + $0xe0] sm:$0xff]  ;;  %v8367_v44 = vld [vmem:[%s18081_s13 + $0x118] sm:$0xff]  ;;  %v8365_v19 = vld [vmem:[%s18081_s13 + $0x108] sm:$0xff] }
 0x7b8   :  { %12569 = vmatpush3.msra.mxu0 %v7885_v25  ;;  %12578 = vmatpush3.msra.mxu1 %v7966_v31  ;;  %v8283_v57 = vld [vmem:[#allocation6 + $0x7] ss:$25 sm:$0x3]  ;;  %v8447_v8 = vld [vmem:[%s18081_s13 + $0x138] sm:$0xff]  ;;  %v8446_v49 = vld [vmem:[%s18081_s13 + $0x130] sm:$0xff] }
 0x7b9   :  { %12570 = vmatprep.subr.mxu0 %v18198_v11  ;;  %12579 = vmatprep.subr.mxu1 %v18198_v11  ;;  %v8364_v2 = vld [vmem:[%s18081_s13 + $0x100] sm:$0xff]  ;;  %v8445_v59 = vld [vmem:[%s18081_s13 + $0x128] sm:$0xff]  ;;  %v8527_v37 = vld [vmem:[%s18081_s13 + $0x158] sm:$0xff] }
 0x7ba   :  { %12571 = vmatpush3.msra.mxu0 %v7884_v38  ;;  %12572 = vmatprep.mubr.msk.f32.mxu0 %vm13401_vm1, %v18198_v11  ;;  %v8363_v40 = vld [vmem:[#allocation6 + $0x8] ss:$25 sm:$0x3]  ;;  %v8443_v35 = vld [vmem:[#allocation6 + $0x9] ss:$25 sm:$0x3] }
 0x7bb   :  { %12580 = vmatpush3.msra.mxu1 %v7965_v52  ;;  %12573 = vmatmul.mubr.msk.f32.vlgmr.msra.gmra.mxu0 %vm51_vm0, %v7883_v10  ;;  %v8444_v17 = vld [vmem:[%s18081_s13 + $0x120] sm:$0xff]  ;;  %v8526_v0 = vld [vmem:[%s18081_s13 + $0x150] sm:$0xff]  ;;  %v8607_v62 = vld [vmem:[%s18081_s13 + $0x178] sm:$0xff] }
 0x7bc   :  { %12581 = vmatprep.subr.mxu1 %v18198_v11  ;;  %12586 = vmatprep.subr.mxu0 %v18198_v11  ;;  %v8525_v32 = vld [vmem:[%s18081_s13 + $0x148] sm:$0xff]  ;;  %v8606_v9 = vld [vmem:[%s18081_s13 + $0x170] sm:$0xff]  ;;  %v8524_v61 = vld [vmem:[%s18081_s13 + $0x140] sm:$0xff] }
 0x7bd   :  { %12582 = vmatpush3.msra.mxu1 %v7964_v30  ;;  %12583 = vmatprep.mubr.msk.f32.mxu1 %vm13401_vm1, %v18198_v11  ;;  %v8605_v50 = vld [vmem:[%s18081_s13 + $0x168] sm:$0xff]  ;;  %v8604_v43 = vld [vmem:[%s18081_s13 + $0x160] sm:$0xff]  ;;  %v8687_v56 = vld [vmem:[%s18081_s13 + $0x198] sm:$0xff] }
 0x7be   :  { %12587 = vmatpush3.msra.mxu0 %v8047_v15  ;;  %12584 = vmatmul.mubr.msk.f32.vlgmr.msra.gmra.mxu1 %vm51_vm0, %v7963_v55  ;;  %v8523_v47 = vld [vmem:[#allocation6 + $0xa] ss:$25 sm:$0x3]  ;;  %v8603_v3 = vld [vmem:[#allocation6 + $0xb] ss:$25 sm:$0x3] }
 0x7bf   :  { %12588 = vmatprep.subr.mxu0 %v18198_v11  ;;  %12597 = vmatprep.subr.mxu1 %v18198_v11  ;;  %v8686_v46 = vld [vmem:[%s18081_s13 + $0x190] sm:$0xff]  ;;  %v8767_v7 = vld [vmem:[%s18081_s13 + $0x1b8] sm:$0xff]  ;;  %v8685_v4 = vld [vmem:[%s18081_s13 + $0x188] sm:$0xff] }
 0x7c0   :  { %12589 = vmatpush3.msra.mxu0 %v8046_v26  ;;  %12598 = vmatpush3.msra.mxu1 %v8127_v48  ;;  %v8766_v18 = vld [vmem:[%s18081_s13 + $0x1b0] sm:$0xff]  ;;  %v8684_v16 = vld [vmem:[%s18081_s13 + $0x180] sm:$0xff]  ;;  %v8765_v51 = vld [vmem:[%s18081_s13 + $0x1a8] sm:$0xff] }
 0x7c1   :  { %12590 = vmatprep.subr.mxu0 %v18198_v11  ;;  %12599 = vmatprep.subr.mxu1 %v18198_v11  ;;  %v8683_v39 = vld [vmem:[#allocation6 + $0xc] ss:$25 sm:$0x3]  ;;  %v8847_v54 = vld [vmem:[%s18081_s13 + $0x1d8] sm:$0xff]  ;;  %v8846_v36 = vld [vmem:[%s18081_s13 + $0x1d0] sm:$0xff] }
 0x7c2   :  { %12591 = vmatpush3.msra.mxu0 %v8045_v34  ;;  %12600 = vmatpush3.msra.mxu1 %v8126_v63  ;;  %v8764_v33 = vld [vmem:[%s18081_s13 + $0x1a0] sm:$0xff]  ;;  %v8927_v1 = vld [vmem:[%s18081_s13 + $0x1f8] sm:$0xff]  ;;  %v8845_v45 = vld [vmem:[%s18081_s13 + $0x1c8] sm:$0xff] }
 0x7c3   :  { %12592 = vmatprep.subr.mxu0 %v18198_v11  ;;  %12601 = vmatprep.subr.mxu1 %v18198_v11  ;;  %v8763_v23 = vld [vmem:[#allocation6 + $0xd] ss:$25 sm:$0x3]  ;;  %v8926_v14 = vld [vmem:[%s18081_s13 + $0x1f0] sm:$0xff]  ;;  %v9007_v52 = vld [vmem:[%s18081_s13 + $0x218] sm:$0xff] }
 0x7c4   :  { %12593 = vmatpush3.msra.mxu0 %v8044_v58  ;;  %12594 = vmatprep.mubr.msk.f32.mxu0 %vm13401_vm1, %v18198_v11  ;;  %v8844_v20 = vld [vmem:[%s18081_s13 + $0x1c0] sm:$0xff]  ;;  %v8925_v25 = vld [vmem:[%s18081_s13 + $0x1e8] sm:$0xff]  ;;  %v9006_v30 = vld [vmem:[%s18081_s13 + $0x210] sm:$0xff] }
 0x7c5   :  { %12602 = vmatpush3.msra.mxu1 %v8125_v13  ;;  %12595 = vmatmul.mubr.msk.f32.vlgmr.msra.gmra.mxu0 %vm51_vm0, %v8043_v12  ;;  %v8843_v31 = vld [vmem:[#allocation6 + $0xe] ss:$25 sm:$0x3]  ;;  %v8923_v10 = vld [vmem:[#allocation6 + $0xf] ss:$25 sm:$0x3] }
 0x7c6   :  { %12603 = vmatprep.subr.mxu1 %v18198_v11  ;;  %12608 = vmatprep.subr.mxu0 %v18198_v11  ;;  %v8924_v38 = vld [vmem:[%s18081_s13 + $0x1e0] sm:$0xff]  ;;  %v9087_v15 = vld [vmem:[%s18081_s13 + $0x238] sm:$0xff]  ;;  %v9005_v55 = vld [vmem:[%s18081_s13 + $0x208] sm:$0xff] }
 0x7c7   :  { %12604 = vmatpush3.msra.mxu1 %v8124_v5  ;;  %12605 = vmatprep.mubr.msk.f32.mxu1 %vm13401_vm1, %v18198_v11  ;;  %v9086_v26 = vld [vmem:[%s18081_s13 + $0x230] sm:$0xff]  ;;  %v9004_v48 = vld [vmem:[%s18081_s13 + $0x200] sm:$0xff]  ;;  %v9085_v34 = vld [vmem:[%s18081_s13 + $0x228] sm:$0xff] }
 0x7c8   :  { %12609 = vmatpush3.msra.mxu0 %v8207_v53  ;;  %12606 = vmatmul.mubr.msk.f32.vlgmr.msra.gmra.mxu1 %vm51_vm0, %v8123_v29  ;;  %v9003_v63 = vld [vmem:[#allocation6 + $0x10] ss:$25 sm:$0x3]  ;;  %v9084_v58 = vld [vmem:[%s18081_s13 + $0x220] sm:$0xff]  ;;  %v9167_v13 = vld [vmem:[%s18081_s13 + $0x258] sm:$0xff] }
 0x7c9   :  { %12610 = vmatprep.subr.mxu0 %v18198_v11  ;;  %12619 = vmatprep.subr.mxu1 %v18198_v11  ;;  %v9083_v12 = vld [vmem:[#allocation6 + $0x11] ss:$25 sm:$0x3]  ;;  %v9247_v53 = vld [vmem:[%s18081_s13 + $0x278] sm:$0xff] }
 0x7ca   :  { %12611 = vmatpush3.msra.mxu0 %v8206_v21  ;;  %12620 = vmatpush3.msra.mxu1 %v8287_v60  ;;  %v9166_v5 = vld [vmem:[%s18081_s13 + $0x250] sm:$0xff]  ;;  %v9165_v29 = vld [vmem:[%s18081_s13 + $0x248] sm:$0xff]  ;;  %v9164_v60 = vld [vmem:[%s18081_s13 + $0x240] sm:$0xff] }
 0x7cb   :  { %12612 = vmatprep.subr.mxu0 %v18198_v11  ;;  %12621 = vmatprep.subr.mxu1 %v18198_v11  ;;  %v9246_v21 = vld [vmem:[%s18081_s13 + $0x270] sm:$0xff] }
 0x7cc   :  { %12613 = vmatpush3.msra.mxu0 %v8205_v28  ;;  %12622 = vmatpush3.msra.mxu1 %v8286_v42  ;;  %v9245_v28 = vld [vmem:[%s18081_s13 + $0x268] sm:$0xff] }
 0x7cd   :  { %12614 = vmatprep.subr.mxu0 %v18198_v11  ;;  %12623 = vmatprep.subr.mxu1 %v18198_v11  ;;  %v9163_v42 = vld [vmem:[#allocation6 + $0x12] ss:$25 sm:$0x3] }
 0x7ce   :  { %12615 = vmatpush3.msra.mxu0 %v8204_v41  ;;  %12616 = vmatprep.mubr.msk.f32.mxu0 %vm13401_vm1, %v18198_v11  ;;  %v9244_v41 = vld [vmem:[%s18081_s13 + $0x260] sm:$0xff] }
 0x7cf   :  { %12624 = vmatpush3.msra.mxu1 %v8285_v24  ;;  %12617 = vmatmul.mubr.msk.f32.vlgmr.msra.gmra.mxu0 %vm51_vm0, %v8203_v27  ;;  %v9327_v24 = vld [vmem:[%s18081_s13 + $0x298] sm:$0xff]  ;;  %v9243_v27 = vld [vmem:[#allocation6 + $0x13] ss:$25 sm:$0x3] }
 0x7d0   :  { %12625 = vmatprep.subr.mxu1 %v18198_v11  ;;  %12630 = vmatprep.subr.mxu0 %v18198_v11 }
 0x7d1   :  { %12626 = vmatpush3.msra.mxu1 %v8284_v22  ;;  %12627 = vmatprep.mubr.msk.f32.mxu1 %vm13401_vm1, %v18198_v11  ;;  %v9326_v22 = vld [vmem:[%s18081_s13 + $0x290] sm:$0xff] }
 0x7d2   :  { %12631 = vmatpush3.msra.mxu0 %v8367_v44  ;;  %12628 = vmatmul.mubr.msk.f32.vlgmr.msra.gmra.mxu1 %vm51_vm0, %v8283_v57  ;;  %v9407_v44 = vld [vmem:[%s18081_s13 + $0x2b8] sm:$0xff]  ;;  %v9325_v57 = vld [vmem:[%s18081_s13 + $0x288] sm:$0xff] }
 0x7d3   :  { %12632 = vmatprep.subr.mxu0 %v18198_v11  ;;  %12641 = vmatprep.subr.mxu1 %v18198_v11 }
 0x7d4   :  { %12633 = vmatpush3.msra.mxu0 %v8366_v6  ;;  %12642 = vmatpush3.msra.mxu1 %v8447_v8  ;;  %v9406_v6 = vld [vmem:[%s18081_s13 + $0x2b0] sm:$0xff]  ;;  %v9324_v8 = vld [vmem:[%s18081_s13 + $0x280] sm:$0xff] }
 0x7d5   :  { %12634 = vmatprep.subr.mxu0 %v18198_v11  ;;  %12643 = vmatprep.subr.mxu1 %v18198_v11 }
 0x7d6   :  { %12635 = vmatpush3.msra.mxu0 %v8365_v19  ;;  %12644 = vmatpush3.msra.mxu1 %v8446_v49  ;;  %v9405_v19 = vld [vmem:[%s18081_s13 + $0x2a8] sm:$0xff] }
 0x7d7   :  { %12636 = vmatprep.subr.mxu0 %v18198_v11  ;;  %12645 = vmatprep.subr.mxu1 %v18198_v11  ;;  %v9323_v49 = vld [vmem:[#allocation6 + $0x14] ss:$25 sm:$0x3] }
 0x7d8   :  { %12637 = vmatpush3.msra.mxu0 %v8364_v2  ;;  %12638 = vmatprep.mubr.msk.f32.mxu0 %vm13401_vm1, %v18198_v11  ;;  %v9404_v2 = vld [vmem:[%s18081_s13 + $0x2a0] sm:$0xff] }
 0x7d9   :  { %12646 = vmatpush3.msra.mxu1 %v8445_v59  ;;  %12639 = vmatmul.mubr.msk.f32.vlgmr.msra.gmra.mxu0 %vm51_vm0, %v8363_v40  ;;  %v9487_v59 = vld [vmem:[%s18081_s13 + $0x2d8] sm:$0xff]  ;;  %v9403_v40 = vld [vmem:[#allocation6 + $0x15] ss:$25 sm:$0x3] }
 0x7da   :  { %12647 = vmatprep.subr.mxu1 %v18198_v11  ;;  %12652 = vmatprep.subr.mxu0 %v18198_v11 }
 0x7db   :  { %12648 = vmatpush3.msra.mxu1 %v8444_v17  ;;  %12649 = vmatprep.mubr.msk.f32.mxu1 %vm13401_vm1, %v18198_v11  ;;  %v9486_v17 = vld [vmem:[%s18081_s13 + $0x2d0] sm:$0xff] }
 0x7dc   :  { %12653 = vmatpush3.msra.mxu0 %v8527_v37  ;;  %12650 = vmatmul.mubr.msk.f32.vlgmr.msra.gmra.mxu1 %vm51_vm0, %v8443_v35  ;;  %v9567_v37 = vld [vmem:[%s18081_s13 + $0x2f8] sm:$0xff]  ;;  %v9485_v35 = vld [vmem:[%s18081_s13 + $0x2c8] sm:$0xff] }
 0x7dd   :  { %12654 = vmatprep.subr.mxu0 %v18198_v11  ;;  %12663 = vmatprep.subr.mxu1 %v18198_v11 }
 0x7de   :  { %12655 = vmatpush3.msra.mxu0 %v8526_v0  ;;  %12664 = vmatpush3.msra.mxu1 %v8607_v62  ;;  %v9566_v0 = vld [vmem:[%s18081_s13 + $0x2f0] sm:$0xff]  ;;  %v9484_v62 = vld [vmem:[%s18081_s13 + $0x2c0] sm:$0xff] }
 0x7df   :  { %12656 = vmatprep.subr.mxu0 %v18198_v11  ;;  %12665 = vmatprep.subr.mxu1 %v18198_v11 }
 0x7e0   :  { %12657 = vmatpush3.msra.mxu0 %v8525_v32  ;;  %12666 = vmatpush3.msra.mxu1 %v8606_v9  ;;  %v9565_v32 = vld [vmem:[%s18081_s13 + $0x2e8] sm:$0xff] }
 0x7e1   :  { %12658 = vmatprep.subr.mxu0 %v18198_v11  ;;  %12667 = vmatprep.subr.mxu1 %v18198_v11  ;;  %v9483_v9 = vld [vmem:[#allocation6 + $0x16] ss:$25 sm:$0x3] }
 0x7e2   :  { %12659 = vmatpush3.msra.mxu0 %v8524_v61  ;;  %12660 = vmatprep.mubr.msk.f32.mxu0 %vm13401_vm1, %v18198_v11  ;;  %v9564_v61 = vld [vmem:[%s18081_s13 + $0x2e0] sm:$0xff] }
 0x7e3   :  { %12668 = vmatpush3.msra.mxu1 %v8605_v50  ;;  %12661 = vmatmul.mubr.msk.f32.vlgmr.msra.gmra.mxu0 %vm51_vm0, %v8523_v47  ;;  %v9647_v50 = vld [vmem:[%s18081_s13 + $0x318] sm:$0xff]  ;;  %v9563_v47 = vld [vmem:[#allocation6 + $0x17] ss:$25 sm:$0x3] }
 0x7e4   :  { %12669 = vmatprep.subr.mxu1 %v18198_v11  ;;  %12674 = vmatprep.subr.mxu0 %v18198_v11 }
 0x7e5   :  { %12670 = vmatpush3.msra.mxu1 %v8604_v43  ;;  %12671 = vmatprep.mubr.msk.f32.mxu1 %vm13401_vm1, %v18198_v11  ;;  %v9646_v43 = vld [vmem:[%s18081_s13 + $0x310] sm:$0xff] }
 0x7e6   :  { %12675 = vmatpush3.msra.mxu0 %v8687_v56  ;;  %12672 = vmatmul.mubr.msk.f32.vlgmr.msra.gmra.mxu1 %vm51_vm0, %v8603_v3  ;;  %v9645_v56 = vld [vmem:[%s18081_s13 + $0x308] sm:$0xff]  ;;  %v9644_v3 = vld [vmem:[%s18081_s13 + $0x300] sm:$0xff] }
 0x7e7   :  { %12676 = vmatprep.subr.mxu0 %v18198_v11  ;;  %12685 = vmatprep.subr.mxu1 %v18198_v11 }
 0x7e8   :  { %12677 = vmatpush3.msra.mxu0 %v8686_v46  ;;  %12686 = vmatpush3.msra.mxu1 %v8767_v7  ;;  %v9643_v46 = vld [vmem:[#allocation6 + $0x18] ss:$25 sm:$0x3] }
 0x7e9   :  { %12678 = vmatprep.subr.mxu0 %v18198_v11  ;;  %12687 = vmatprep.subr.mxu1 %v18198_v11 }
 0x7ea   :  { %12679 = vmatpush3.msra.mxu0 %v8685_v4  ;;  %12688 = vmatpush3.msra.mxu1 %v8766_v18 }
 0x7eb   :  { %12680 = vmatprep.subr.mxu0 %v18198_v11  ;;  %12689 = vmatprep.subr.mxu1 %v18198_v11 }
 0x7ec   :  { %12681 = vmatpush3.msra.mxu0 %v8684_v16  ;;  %12682 = vmatprep.mubr.msk.f32.mxu0 %vm13401_vm1, %v18198_v11 }
 0x7ed   :  { %12690 = vmatpush3.msra.mxu1 %v8765_v51  ;;  %12683 = vmatmul.mubr.msk.f32.vlgmr.msra.gmra.mxu0 %vm51_vm0, %v8683_v39 }
 0x7ee   :  { %12691 = vmatprep.subr.mxu1 %v18198_v11  ;;  %12696 = vmatprep.subr.mxu0 %v18198_v11 }
 0x7ef   :  { %12692 = vmatpush3.msra.mxu1 %v8764_v33  ;;  %12693 = vmatprep.mubr.msk.f32.mxu1 %vm13401_vm1, %v18198_v11 }
 0x7f0   :  { %12697 = vmatpush3.msra.mxu0 %v8847_v54  ;;  %12694 = vmatmul.mubr.msk.f32.vlgmr.msra.gmra.mxu1 %vm51_vm0, %v8763_v23 }
 0x7f1   :  { %12698 = vmatprep.subr.mxu0 %v18198_v11  ;;  %12707 = vmatprep.subr.mxu1 %v18198_v11 }
 0x7f2   :  { %12699 = vmatpush3.msra.mxu0 %v8846_v36  ;;  %12708 = vmatpush3.msra.mxu1 %v8927_v1 }
 0x7f3   :  { %12700 = vmatprep.subr.mxu0 %v18198_v11  ;;  %12709 = vmatprep.subr.mxu1 %v18198_v11 }
 0x7f4   :  { %12701 = vmatpush3.msra.mxu0 %v8845_v45  ;;  %12710 = vmatpush3.msra.mxu1 %v8926_v14 }
 0x7f5   :  { %12702 = vmatprep.subr.mxu0 %v18198_v11  ;;  %12711 = vmatprep.subr.mxu1 %v18198_v11 }
 0x7f6   :  { %12703 = vmatpush3.msra.mxu0 %v8844_v20  ;;  %12704 = vmatprep.mubr.msk.f32.mxu0 %vm13401_vm1, %v18198_v11 }
 0x7f7   :  { %12712 = vmatpush3.msra.mxu1 %v8925_v25  ;;  %12705 = vmatmul.mubr.msk.f32.vlgmr.msra.gmra.mxu0 %vm51_vm0, %v8843_v31 }
 0x7f8   :  { %12713 = vmatprep.subr.mxu1 %v18198_v11  ;;  %12718 = vmatprep.subr.mxu0 %v18198_v11 }
 0x7f9   :  { %12714 = vmatpush3.msra.mxu1 %v8924_v38  ;;  %12715 = vmatprep.mubr.msk.f32.mxu1 %vm13401_vm1, %v18198_v11 }
 0x7fa   :  { %12719 = vmatpush3.msra.mxu0 %v9007_v52  ;;  %12716 = vmatmul.mubr.msk.f32.vlgmr.msra.gmra.mxu1 %vm51_vm0, %v8923_v10 }
 0x7fb   :  { %12720 = vmatprep.subr.mxu0 %v18198_v11  ;;  %12729 = vmatprep.subr.mxu1 %v18198_v11 }
 0x7fc   :  { %12721 = vmatpush3.msra.mxu0 %v9006_v30  ;;  %12730 = vmatpush3.msra.mxu1 %v9087_v15 }
 0x7fd   :  { %12722 = vmatprep.subr.mxu0 %v18198_v11  ;;  %12731 = vmatprep.subr.mxu1 %v18198_v11 }
 0x7fe   :  { %12723 = vmatpush3.msra.mxu0 %v9005_v55  ;;  %12732 = vmatpush3.msra.mxu1 %v9086_v26 }
 0x7ff   :  { %12724 = vmatprep.subr.mxu0 %v18198_v11  ;;  %12733 = vmatprep.subr.mxu1 %v18198_v11 }
 0x800   :  { %12725 = vmatpush3.msra.mxu0 %v9004_v48  ;;  %12726 = vmatprep.mubr.msk.f32.mxu0 %vm13401_vm1, %v18198_v11 }
 0x801   :  { %12734 = vmatpush3.msra.mxu1 %v9085_v34  ;;  %12727 = vmatmul.mubr.msk.f32.vlgmr.msra.gmra.mxu0 %vm51_vm0, %v9003_v63 }
 0x802   :  { %12735 = vmatprep.subr.mxu1 %v18198_v11  ;;  %12740 = vmatprep.subr.mxu0 %v18198_v11 }
 0x803   :  { %12736 = vmatpush3.msra.mxu1 %v9084_v58  ;;  %12737 = vmatprep.mubr.msk.f32.mxu1 %vm13401_vm1, %v18198_v11 }
 0x804   :  { %12741 = vmatpush3.msra.mxu0 %v9167_v13  ;;  %12738 = vmatmul.mubr.msk.f32.vlgmr.msra.gmra.mxu1 %vm51_vm0, %v9083_v12 }
 0x805   :  { %12742 = vmatprep.subr.mxu0 %v18198_v11  ;;  %12751 = vmatprep.subr.mxu1 %v18198_v11 }
 0x806   :  { %12743 = vmatpush3.msra.mxu0 %v9166_v5  ;;  %12752 = vmatpush3.msra.mxu1 %v9247_v53 }
 0x807   :  { %12744 = vmatprep.subr.mxu0 %v18198_v11  ;;  %12753 = vmatprep.subr.mxu1 %v18198_v11 }
 0x808   :  { %12745 = vmatpush3.msra.mxu0 %v9165_v29  ;;  %12754 = vmatpush3.msra.mxu1 %v9246_v21 }
 0x809   :  { %12746 = vmatprep.subr.mxu0 %v18198_v11  ;;  %12755 = vmatprep.subr.mxu1 %v18198_v11 }
 0x80a   :  { %12747 = vmatpush3.msra.mxu0 %v9164_v60  ;;  %12748 = vmatprep.mubr.msk.f32.mxu0 %vm13401_vm1, %v18198_v11 }
 0x80b   :  { %12756 = vmatpush3.msra.mxu1 %v9245_v28  ;;  %12749 = vmatmul.mubr.msk.f32.vlgmr.msra.gmra.mxu0 %vm51_vm0, %v9163_v42 }
 0x80c   :  { %12757 = vmatprep.subr.mxu1 %v18198_v11  ;;  %12762 = vmatprep.subr.mxu0 %v18198_v11 }
 0x80d   :  { %12758 = vmatpush3.msra.mxu1 %v9244_v41  ;;  %12759 = vmatprep.mubr.msk.f32.mxu1 %vm13401_vm1, %v18198_v11 }
 0x80e   :  { %12763 = vmatpush3.msra.mxu0 %v9327_v24  ;;  %12760 = vmatmul.mubr.msk.f32.vlgmr.msra.gmra.mxu1 %vm51_vm0, %v9243_v27 }
 0x80f   :  { %12764 = vmatprep.subr.mxu0 %v18198_v11  ;;  %12773 = vmatprep.subr.mxu1 %v18198_v11 }
 0x810   :  { %12765 = vmatpush3.msra.mxu0 %v9326_v22  ;;  %12774 = vmatpush3.msra.mxu1 %v9407_v44 }
 0x811   :  { %12766 = vmatprep.subr.mxu0 %v18198_v11  ;;  %12775 = vmatprep.subr.mxu1 %v18198_v11 }
 0x812   :  { %12767 = vmatpush3.msra.mxu0 %v9325_v57  ;;  %12776 = vmatpush3.msra.mxu1 %v9406_v6 }
 0x813   :  { %12768 = vmatprep.subr.mxu0 %v18198_v11  ;;  %12777 = vmatprep.subr.mxu1 %v18198_v11 }
 0x814   :  { %12769 = vmatpush3.msra.mxu0 %v9324_v8  ;;  %12770 = vmatprep.mubr.msk.f32.mxu0 %vm13401_vm1, %v18198_v11 }
 0x815   :  { %12778 = vmatpush3.msra.mxu1 %v9405_v19  ;;  %12771 = vmatmul.mubr.msk.f32.vlgmr.msra.gmra.mxu0 %vm51_vm0, %v9323_v49 }
 0x816   :  { %12779 = vmatprep.subr.mxu1 %v18198_v11  ;;  %12784 = vmatprep.subr.mxu0 %v18198_v11 }
 0x817   :  { %12780 = vmatpush3.msra.mxu1 %v9404_v2  ;;  %12781 = vmatprep.mubr.msk.f32.mxu1 %vm13401_vm1, %v18198_v11 }
 0x818   :  { %12785 = vmatpush3.msra.mxu0 %v9487_v59  ;;  %12782 = vmatmul.mubr.msk.f32.vlgmr.msra.gmra.mxu1 %vm51_vm0, %v9403_v40 }
 0x819   :  { %12786 = vmatprep.subr.mxu0 %v18198_v11  ;;  %12795 = vmatprep.subr.mxu1 %v18198_v11 }
 0x81a   :  { %12787 = vmatpush3.msra.mxu0 %v9486_v17  ;;  %12796 = vmatpush3.msra.mxu1 %v9567_v37 }
 0x81b   :  { %12788 = vmatprep.subr.mxu0 %v18198_v11  ;;  %12797 = vmatprep.subr.mxu1 %v18198_v11 }
 0x81c   :  { %12789 = vmatpush3.msra.mxu0 %v9485_v35  ;;  %12798 = vmatpush3.msra.mxu1 %v9566_v0 }
 0x81d   :  { %12790 = vmatprep.subr.mxu0 %v18198_v11  ;;  %12799 = vmatprep.subr.mxu1 %v18198_v11 }
 0x81e   :  { %12791 = vmatpush3.msra.mxu0 %v9484_v62  ;;  %12792 = vmatprep.mubr.msk.f32.mxu0 %vm13401_vm1, %v18198_v11 }
 0x81f   :  { %12800 = vmatpush3.msra.mxu1 %v9565_v32  ;;  %12793 = vmatmul.mubr.msk.f32.vlgmr.msra.gmra.mxu0 %vm51_vm0, %v9483_v9 }
 0x820   :  { %12801 = vmatprep.subr.mxu1 %v18198_v11  ;;  %12806 = vmatprep.subr.mxu0 %v18198_v11 }
 0x821   :  { %12802 = vmatpush3.msra.mxu1 %v9564_v61  ;;  %12803 = vmatprep.mubr.msk.f32.mxu1 %vm13401_vm1, %v18198_v11 }
 0x822   :  { %12807 = vmatpush3.msra.mxu0 %v9647_v50  ;;  %12804 = vmatmul.mubr.msk.f32.vlgmr.msra.gmra.mxu1 %vm51_vm0, %v9563_v47 }
 0x823   :  { %12808 = vmatprep.subr.mxu0 %v18198_v11  ;;  %12814 = vmatprep.mubr.msk.f32.mxu0 %vm13401_vm1, %v18198_v11 }
 0x824   :  { %12809 = vmatpush3.msra.mxu0 %v9646_v43 }
 0x825   :  { %12810 = vmatprep.subr.mxu0 %v18198_v11 }
 0x826   :  { %12811 = vmatpush3.msra.mxu0 %v9645_v56 }
 0x827   :  { %12812 = vmatprep.subr.mxu0 %v18198_v11 }
 0x828   :  { %12813 = vmatpush3.msra.mxu0 %v9644_v3 }
 0x829   :  { %12815 = vmatmul.mubr.msk.f32.vlgmr.msra.gmra.mxu0 %vm51_vm0, %v9643_v46  ;;  %vm9730_vm0 = vcmask 33792  }
 0x872   :  { %v7805_v7 = vpop.f32.mrf.mxu0 }
 0x874   :  { %v7878_v4 = vpop.f32.mrf.mxu1  ;;  %v12552_v18 = vpop.f32.mrf.mxu0 }
 0x875   :  { %v7879_v16 = vadd.f32 %v7878_v4, %v7805_v7 }
 0x876   :  { %v12563_v51 = vpop.f32.mrf.mxu1 }
 0x87b   :  { %v7957_v39 = vpop.f32.mrf.mxu0 }
 0x87c   :  { %v7961_v33 = vadd.f32 %v7957_v39, %v7879_v16 }
 0x87d   :  { %v12574_v54 = vpop.f32.mrf.mxu0 }
 0x87e   :  { %v8037_v23 = vpop.f32.mrf.mxu1 }
 0x87f   :  { %v8041_v36 = vadd.f32 %v8037_v23, %v7961_v33  ;;  %v11067_v23 = vld [vmem:[%s18082_s14] ss:$0 sm:$0xff] }
 0x880   :  { %v12585_v1 = vpop.f32.mrf.mxu1 }
 0x885   :  { %v8117_v45 = vpop.f32.mrf.mxu0 }
 0x886   :  { %v8121_v13 = vadd.f32 %v8117_v45, %v8041_v36 }
 0x887   :  { %v12596_v14 = vpop.f32.mrf.mxu0 }
 0x888   :  { %v8197_v20 = vpop.f32.mrf.mxu1 }
 0x889   :  { %v8201_v53 = vadd.f32 %v8197_v20, %v8121_v13 }
 0x88a   :  { %v12607_v25 = vpop.f32.mrf.mxu1 }
 0x88f   :  { %v8277_v31 = vpop.f32.mrf.mxu0 }
 0x890   :  { %v8281_v21 = vadd.f32 %v8277_v31, %v8201_v53 }
 0x891   :  { %v12618_v11 = vpop.f32.mrf.mxu0 }
 0x892   :  { %v8357_v38 = vpop.f32.mrf.mxu1 }
 0x893   :  { %v8361_v28 = vadd.f32 %v8357_v38, %v8281_v21 }
 0x894   :  { %v12629_v52 = vpop.f32.mrf.mxu1 }
 0x899   :  { %v8437_v10 = vpop.f32.mrf.mxu0 }
 0x89a   :  { %v8441_v41 = vadd.f32 %v8437_v10, %v8361_v28 }
 0x89b   :  { %v12640_v30 = vpop.f32.mrf.mxu0 }
 0x89c   :  { %v8517_v15 = vpop.f32.mrf.mxu1 }
 0x89d   :  { %v8521_v22 = vadd.f32 %v8517_v15, %v8441_v41 }
 0x89e   :  { %v12651_v55 = vpop.f32.mrf.mxu1 }
 0x8a3   :  { %v8597_v26 = vpop.f32.mrf.mxu0 }
 0x8a4   :  { %v8601_v44 = vadd.f32 %v8597_v26, %v8521_v22 }
 0x8a5   :  { %v12662_v48 = vpop.f32.mrf.mxu0 }
 0x8a6   :  { %v8677_v34 = vpop.f32.mrf.mxu1 }
 0x8a7   :  { %v8681_v8 = vadd.f32 %v8677_v34, %v8601_v44 }
 0x8a8   :  { %v12673_v63 = vpop.f32.mrf.mxu1 }
 0x8ad   :  { %v8757_v58 = vpop.f32.mrf.mxu0 }
 0x8ae   :  { %v8761_v49 = vadd.f32 %v8757_v58, %v8681_v8 }
 0x8af   :  { %v12684_v12 = vpop.f32.mrf.mxu0 }
 0x8b0   :  { %v8837_v5 = vpop.f32.mrf.mxu1 }
 0x8b1   :  { %v8841_v59 = vadd.f32 %v8837_v5, %v8761_v49 }
 0x8b2   :  { %v12695_v29 = vpop.f32.mrf.mxu1 }
 0x8b7   :  { %v8917_v60 = vpop.f32.mrf.mxu0 }
 0x8b8   :  { %v8921_v17 = vadd.f32 %v8917_v60, %v8841_v59 }
 0x8b9   :  { %v12706_v42 = vpop.f32.mrf.mxu0 }
 0x8ba   :  { %v8997_v24 = vpop.f32.mrf.mxu1 }
 0x8bb   :  { %v9001_v0 = vadd.f32 %v8997_v24, %v8921_v17 }
 0x8bc   :  { %v12717_v27 = vpop.f32.mrf.mxu1 }
 0x8c1   :  { %v9077_v57 = vpop.f32.mrf.mxu0 }
 0x8c2   :  { %v9081_v32 = vadd.f32 %v9077_v57, %v9001_v0 }
 0x8c3   :  { %v12728_v6 = vpop.f32.mrf.mxu0 }
 0x8c4   :  { %v9157_v19 = vpop.f32.mrf.mxu1 }
 0x8c5   :  { %v9161_v61 = vadd.f32 %v9157_v19, %v9081_v32 }
 0x8c6   :  { %v12739_v2 = vpop.f32.mrf.mxu1 }
 0x8cb   :  { %v9237_v40 = vpop.f32.mrf.mxu0 }
 0x8cc   :  { %v9241_v47 = vadd.f32 %v9237_v40, %v9161_v61 }
 0x8cd   :  { %v12750_v37 = vpop.f32.mrf.mxu0 }
 0x8ce   :  { %v9317_v35 = vpop.f32.mrf.mxu1 }
 0x8cf   :  { %v9321_v3 = vadd.f32 %v9317_v35, %v9241_v47 }
 0x8d0   :  { %v12761_v62 = vpop.f32.mrf.mxu1 }
 0x8d5   :  { %v9397_v9 = vpop.f32.mrf.mxu0 }
 0x8d6   :  { %v9401_v46 = vadd.f32 %v9397_v9, %v9321_v3 }
 0x8d7   :  { %v12772_v50 = vpop.f32.mrf.mxu0 }
 0x8d8   :  { %v9477_v43 = vpop.f32.mrf.mxu1 }
 0x8d9   :  { %v9481_v18 = vadd.f32 %v9477_v43, %v9401_v46 }
 0x8da   :  { %v12783_v56 = vpop.f32.mrf.mxu1 }
 0x8df   :  { %v9557_v7 = vpop.f32.mrf.mxu0 }
 0x8e0   :  { %v9561_v51 = vadd.f32 %v9557_v7, %v9481_v18 }
 0x8e1   :  { %v12794_v4 = vpop.f32.mrf.mxu0 }
 0x8e2   :  { %v9637_v16 = vpop.f32.mrf.mxu1 }
 0x8e3   :  { %v9641_v33 = vadd.f32 %v9637_v16, %v9561_v51 }
 0x8e4   :  { %v12805_v39 = vpop.f32.mrf.mxu1 }
 0x8e9   :  { %v9717_v54 = vpop.f32.mrf.mxu0 }
 0x8ea   :  { %v9721_v36 = vadd.f32 %v9717_v54, %v9641_v33 }
 0x8eb   :  { %v12816_v1 = vpop.f32.mrf.mxu0 }
 0x8ec   :  { %v9729_v45 = vadd.f32 %v11067_v23, %v9721_v36 }
 0x8ee   :  { %9731 = vst.msk [vmem:[#allocation7] sm:$0x3] %vm9730_vm0, %v9729_v45 }
 0x8ef   :  { %13130 = shalt.err (!%p13127_p6)
}
 0x8f0   :  { %9741 = dma.vmem_to_hbm [thread:$0]  %s9739_s21, 32, %s18083_s15, [#allocation8]  }
 0x8f1   :  { %13267 = dma.done.wait [#allocation8], 32  }
 0x8f2   :  { %13268 = vsyncadd [#allocation8], 4294967264 }
 0x8f3   :  { %9745 = vsyncpa [#allocation8], 1 }

</bundles_post_ra>
